<compile_context>
chip_gen: v5e
topology: v5e:2x2
jax: 0.10.0
libtpu: 0.0.40
codegen_flags: <defaults>
</compile_context>

<pallas_src>
import numpy as np
import jax
import jax.numpy as jnp
from jax.experimental import pallas as pl
from jax.experimental.pallas import tpu as pltpu

EPS = 1e-5


# --------------------------------------------------------------------------- #
# Pallas kernel (one block of B images per grid step, everything in VMEM).
# --------------------------------------------------------------------------- #
def make_kernel(downsample):
    def kernel(x_ref, w1s_ref, s1_ref, b1_ref, w2_ref, s2_ref, b2_ref,
               w3_ref, s3_ref, b3_ref, *rest):
        if downsample:
            (ss_ref, bs_ref, gap_ref, fc1w_ref, fc1b_ref,
             fc2w_ref, fc2b_ref, o_ref) = rest
        else:
            (gap_ref, fc1w_ref, fc1b_ref, fc2w_ref, fc2b_ref, o_ref) = rest

        B, H, W, Cin = x_ref.shape
        HW = H * W
        P = s1_ref.shape[1]
        Cout = s3_ref.shape[1]
        f32, bf16 = jnp.float32, jnp.bfloat16

        # sum(gap): used by the pooled-before-conv3 SE refactor.  Once per grid step.
        gsum = jnp.sum(gap_ref[...].astype(f32))

        for b in range(B):          # static unroll over the images of this block
            x2d = x_ref[b].reshape(HW, Cin)                           # bf16 (HW, Cin)

            # ---- conv1 (1x1) [+ fused shortcut 1x1 when downsample] ----------- #
            y = jnp.dot(x2d, w1s_ref[...], preferred_element_type=f32)
            y1 = jnp.maximum(y[:, :P] * s1_ref[...] + b1_ref[...], 0.0)   # f32 (HW,P)
            if downsample:
                # shortcut held in bf16 until the epilogue (halves its live footprint)
                sc_bf = (y[:, P:] * ss_ref[...] + bs_ref[...]).astype(bf16)

            # ---- conv2 (3x3, pad=1, stride=1): 2-shift im2col, 3 dots --------- #
            # Column (kw) halo: two in-row +/-1 shifted copies built on the (H, W, P)
            # view, so the shift never bleeds across rows (no masks needed).
            y1b = y1.astype(bf16).reshape(H, W, P)
            zc = jnp.zeros((H, 1, P), bf16)
            left = jnp.concatenate([zc, y1b[:, :W - 1, :]], axis=1)   # (h,w)=y1[h,w-1]
            right = jnp.concatenate([y1b[:, 1:, :], zc], axis=1)      # (h,w)=y1[h,w+1]
            mid = jnp.concatenate([left, y1b, right],
                                  axis=-1).reshape(HW, 3 * P)         # bf16 (HW, 3P)
            # Row (kh) halo: W-row zero pad (W % 8 == 0 -> sublane aligned); three
            # aligned slices feed three K=3P MXU dots accumulated in f32.
            zr = jnp.zeros((W, 3 * P), bf16)
            midp = jnp.concatenate([zr, mid, zr], axis=0)             # (HW + 2W, 3P)
            y2 = (jnp.dot(midp[0:HW], w2_ref[0], preferred_element_type=f32)
                  + jnp.dot(midp[W:W + HW], w2_ref[1], preferred_element_type=f32)
                  + jnp.dot(midp[2 * W:2 * W + HW], w2_ref[2],
                            preferred_element_type=f32))
            y2b = jnp.maximum(y2 * s2_ref[...] + b2_ref[...], 0.0).astype(bf16)

            # ---- SE: pool before conv3 (exact refactor of gap @ x_res) --------- #
            pooled = jnp.dot(gap_ref[...], y2b, preferred_element_type=f32)   # (1, P)
            x_se = (jnp.dot(pooled.astype(bf16), w3_ref[...],
                            preferred_element_type=f32)
                    * s3_ref[...] + gsum * b3_ref[...])                       # (1, Cout)
            h = jnp.maximum(jnp.dot(x_se.astype(bf16), fc1w_ref[...],
                                    preferred_element_type=f32) + fc1b_ref[...], 0.0)
            g = jnp.dot(h.astype(bf16), fc2w_ref[...],
                        preferred_element_type=f32) + fc2b_ref[...]
            gate = 1.0 / (1.0 + jnp.exp(-g))                                  # (1, Cout)

            # ---- conv3 (1x1) + BN3*gate + shortcut + ReLU (Dropout eval = id) -- #
            y3 = jnp.dot(y2b, w3_ref[...], preferred_element_type=f32)  # f32 (HW,Cout)
            if downsample:
                sc = sc_bf.astype(f32)
            else:
                # identity shortcut: re-read the VMEM input block in the epilogue
                sc = x_ref[b].reshape(HW, Cin).astype(f32)        # Cin == Cout
            out = jnp.maximum(y3 * (s3_ref[...] * gate) + b3_ref[...] * gate + sc, 0.0)
            o_ref[b] = out.reshape(H, W, Cout).astype(o_ref.dtype)

    return kernel


# --------------------------------------------------------------------------- #
# Wrapper: NCHW -> NHWC, weight re-layout, BN folding, pallas_call.
# --------------------------------------------------------------------------- #
def wse_bottleneck_pallas(x_nchw, p, downsample, *, out_dtype=jnp.bfloat16,
                          img_block=None):
    N, Cin, H, W = x_nchw.shape
    P = p['w1_oihw'].shape[0]
    Cout = p['w3_oihw'].shape[0]
    HW = H * W

    assert p['gap'].shape == (1, HW), "weighted_gap size must equal H*W"
    # lane-dense channel dims (128-lane vregs / MXU fully used, unmasked vst)
    assert Cin % 128 == 0 and P % 128 == 0 and Cout % 128 == 0
    assert W % 8 == 0, "row-halo zero pad / kh slices assume sublane-aligned W"
    if not downsample:
        assert Cin == Cout, "identity shortcut requires inplanes == expansion*planes"

    # Images per grid step: amortize per-step overhead while always keeping >= 2 grid
    # steps so both v7x TensorCores get work under dimension_semantics=("parallel",).
    if img_block is None:
        img_block = 1
        for cand in (4, 2):
            if N % cand == 0 and N // cand >= 2:
                img_block = cand
                break
    assert N % img_block == 0
    B = img_block

    f32, bf16 = jnp.float32, jnp.bfloat16

    x = jnp.transpose(x_nchw, (0, 2, 3, 1)).astype(bf16)              # NHWC bf16

    w1 = p['w1_oihw'][:, :, 0, 0].T.astype(bf16)                      # (Cin, P)
    # (O,I,3,3) -> (kh, kw*I, O): per-kh K=3P weight blocks matching [left|center|right]
    w2 = jnp.transpose(p['w2_oihw'], (2, 3, 1, 0)).reshape(3, 3 * P, P).astype(bf16)
    w3 = p['w3_oihw'][:, :, 0, 0].T.astype(bf16)                      # (P, Cout)
    if downsample:
        ws = p['ws_oihw'][:, :, 0, 0].T.astype(bf16)                  # (Cin, Cout)
        w1s = jnp.concatenate([w1, ws], axis=1)                       # fused (Cin, P+Cout)
    else:
        w1s = w1

    def row(v):
        return v.reshape(1, -1).astype(f32)

    args = [x, w1s, row(p['s1']), row(p['b1']),
            w2, row(p['s2']), row(p['b2']),
            w3, row(p['s3']), row(p['b3'])]
    if downsample:
        args += [row(p['ss']), row(p['bs'])]
    args += [p['gap'].astype(bf16),
             p['fc1_w'].T.astype(bf16), row(p['fc1_b']),
             p['fc2_w'].T.astype(bf16), row(p['fc2_b'])]

    def const_spec(a):
        nd = a.ndim
        return pl.BlockSpec(a.shape, lambda n, _k=nd: (0,) * _k)

    in_specs = [pl.BlockSpec((B, H, W, Cin), lambda n: (n, 0, 0, 0))]
    in_specs += [const_spec(a) for a in args[1:]]

    grid_spec = pltpu.PrefetchScalarGridSpec(
        num_scalar_prefetch=0,
        grid=(N // B,),
        in_specs=in_specs,
        out_specs=pl.BlockSpec((B, H, W, Cout), lambda n: (n, 0, 0, 0)),
    )

    out_nhwc = pl.pallas_call(
        make_kernel(downsample),
        out_shape=jax.ShapeDtypeStruct((N, H, W, Cout), out_dtype),
        grid_spec=grid_spec,
        compiler_params=pltpu.CompilerParams(
            dimension_semantics=("parallel",),
            vmem_limit_bytes=32 * 1024 * 1024),
    )(*args)

    return jnp.transpose(out_nhwc, (0, 3, 1, 2))                      # back to NCHW


# --------------------------------------------------------------------------- #
# Deterministic parameter init (BatchNorm folded into per-channel scale/shift).
# Conv/FC/gap weights are bf16-representable so the bf16 MXU path is lossless
# on weights (activation rounding remains).
# --------------------------------------------------------------------------- #
def init_params(key, inplanes, planes, expansion, downsample, H, W, r=8):
    cout = expansion * planes
    chid = cout // r
    hw = H * W
    ks = jax.random.split(key, 16)

    def q(w):  # round-trip through bf16
        return w.astype(jnp.bfloat16).astype(jnp.float32)

    def bn_fold(k, c):
        kg, kb, km, kv = jax.random.split(k, 4)
        gamma = jax.random.uniform(kg, (c,), minval=0.8, maxval=1.25, dtype=jnp.float32)
        beta = 0.1 * jax.random.normal(kb, (c,), dtype=jnp.float32)
        mean = 0.1 * jax.random.normal(km, (c,), dtype=jnp.float32)
        var = jax.random.uniform(kv, (c,), minval=0.8, maxval=1.25, dtype=jnp.float32)
        scale = gamma / jnp.sqrt(var + EPS)
        return scale, beta - mean * scale

    p = {}
    p['w1_oihw'] = q(jax.random.normal(ks[0], (planes, inplanes, 1, 1), jnp.float32)
                     / np.sqrt(inplanes))
    p['w2_oihw'] = q(jax.random.normal(ks[1], (planes, planes, 3, 3), jnp.float32)
                     / np.sqrt(9 * planes))
    p['w3_oihw'] = q(jax.random.normal(ks[2], (cout, planes, 1, 1), jnp.float32)
                     / np.sqrt(planes))
    p['s1'], p['b1'] = bn_fold(ks[3], planes)
    p['s2'], p['b2'] = bn_fold(ks[4], planes)
    p['s3'], p['b3'] = bn_fold(ks[5], cout)
    if downsample:
        p['ws_oihw'] = q(jax.random.normal(ks[6], (cout, inplanes, 1, 1), jnp.float32)
                         / np.sqrt(inplanes))
        p['ss'], p['bs'] = bn_fold(ks[7], cout)
    # WSE extras (torch init for weighted_gap is ones; perturbed here to exercise it)
    p['gap'] = q((1.0 + 0.1 * jax.random.normal(ks[8], (1, hw), jnp.float32)) / hw)
    p['fc1_w'] = q(jax.random.normal(ks[9], (chid, cout), jnp.float32) / np.sqrt(cout))
    p['fc1_b'] = 0.1 * jax.random.normal(ks[10], (chid,), jnp.float32)
    p['fc2_w'] = q(jax.random.normal(ks[11], (cout, chid), jnp.float32) / np.sqrt(chid))
    p['fc2_b'] = 0.1 * jax.random.normal(ks[12], (cout,), jnp.float32)
    return p


# --------------------------------------------------------------------------- #
# Pure-JAX reference (mirrors the PyTorch WSEBottleNeck forward, eval mode, f32).
# --------------------------------------------------------------------------- #
def ref_forward(x, p, downsample):
    def conv(x, w, padding):
        return jax.lax.conv_general_dilated(
            x, w, window_strides=(1, 1), padding=padding,
            dimension_numbers=('NCHW', 'OIHW', 'NCHW'))

    def bn(x, scale, shift):
        return x * scale[None, :, None, None] + shift[None, :, None, None]

    y = jax.nn.relu(bn(conv(x, p['w1_oihw'], 'VALID'), p['s1'], p['b1']))
    y = jax.nn.relu(bn(conv(y, p['w2_oihw'], ((1, 1), (1, 1))), p['s2'], p['b2']))
    x_res = bn(conv(y, p['w3_oihw'], 'VALID'), p['s3'], p['b3'])   # Dropout eval = id

    N, C, H, W = x_res.shape
    x_se = jnp.einsum('nck,k->nc', x_res.reshape(N, C, H * W), p['gap'][0])
    h = jax.nn.relu(x_se @ p['fc1_w'].T + p['fc1_b'])
    g = jax.nn.sigmoid(h @ p['fc2_w'].T + p['fc2_b'])

    if downsample:
        sc = bn(conv(x, p['ws_oihw'], 'VALID'), p['ss'], p['bs'])
    else:
        sc = x
    return jax.nn.relu(x_res * g[:, :, None, None] + sc)


if __name__ == "__main__":
    # WSEBottleNeck requires H*W == (2048 // planes) ** 2 (weighted_gap size), so a
    # small 16x16 spatial size implies planes = 128 (conveniently lane-dense).
    planes, expansion, r = 128, 4, 8
    side = 2048 // planes            # 16
    H = W = side
    cout = expansion * planes        # 512

    key = jax.random.PRNGKey(0)
    k1, k2, k3, k4 = jax.random.split(key, 4)

    # --- case 1: conv+BN shortcut (downsample=True), N=2 -> 1 image/step ------ #
    N1, inplanes = 2, 128
    x = jax.random.normal(k1, (N1, inplanes, H, W), jnp.float32)
    x = x.astype(jnp.bfloat16).astype(jnp.float32)       # bf16-representable input
    params = init_params(k2, inplanes, planes, expansion, True, H, W, r)

    out = jax.block_until_ready(wse_bottleneck_pallas(x, params, True))
    ref = jax.block_until_ready(ref_forward(x, params, True))
    assert out.shape == ref.shape == (N1, cout, H, W)
    out_f = np.asarray(out.astype(jnp.float32))
    ref_f = np.asarray(ref)
    # bf16 activations / weights / output -> bf16-level tolerance vs f32 reference
    if not np.allclose(out_f, ref_f, rtol=5e-2, atol=1e-1):
        err = float(np.max(np.abs(out_f - ref_f)))
        raise SystemExit("MISMATCH (downsample) max_abs_err=%e" % err)

    # --- case 2: identity shortcut, N=4 -> 2 images/step (batched grid path) --- #
    N2, inplanes2 = 4, cout
    x2 = jax.random.normal(k3, (N2, inplanes2, H, W), jnp.float32)
    x2 = x2.astype(jnp.bfloat16).astype(jnp.float32)
    params2 = init_params(k4, inplanes2, planes, expansion, False, H, W, r)

    out2 = jax.block_until_ready(wse_bottleneck_pallas(x2, params2, False))
    ref2 = jax.block_until_ready(ref_forward(x2, params2, False))
    out2_f = np.asarray(out2.astype(jnp.float32))
    ref2_f = np.asarray(ref2)
    if not np.allclose(out2_f, ref2_f, rtol=5e-2, atol=1e-1):
        err2 = float(np.max(np.abs(out2_f - ref2_f)))
        raise SystemExit("MISMATCH (identity) max_abs_err=%e" % err2)

    print("KERNEL_OK")
</pallas_src>

<mosaic_0001>
module attributes {stable_mosaic.version = 11 : i64} {
  func.func @kernel(%arg0: i32, %arg1: memref<1x16x16x128xbf16, #tpu.memory_space<vmem>>, %arg2: memref<128x640xbf16, #tpu.memory_space<vmem>>, %arg3: memref<1x128xf32, #tpu.memory_space<vmem>>, %arg4: memref<1x128xf32, #tpu.memory_space<vmem>>, %arg5: memref<3x384x128xbf16, #tpu.memory_space<vmem>>, %arg6: memref<1x128xf32, #tpu.memory_space<vmem>>, %arg7: memref<1x128xf32, #tpu.memory_space<vmem>>, %arg8: memref<128x512xbf16, #tpu.memory_space<vmem>>, %arg9: memref<1x512xf32, #tpu.memory_space<vmem>>, %arg10: memref<1x512xf32, #tpu.memory_space<vmem>>, %arg11: memref<1x512xf32, #tpu.memory_space<vmem>>, %arg12: memref<1x512xf32, #tpu.memory_space<vmem>>, %arg13: memref<1x256xbf16, #tpu.memory_space<vmem>>, %arg14: memref<512x64xbf16, #tpu.memory_space<vmem>>, %arg15: memref<1x64xf32, #tpu.memory_space<vmem>>, %arg16: memref<64x512xbf16, #tpu.memory_space<vmem>>, %arg17: memref<1x512xf32, #tpu.memory_space<vmem>>, %arg18: memref<1x16x16x512xbf16, #tpu.memory_space<vmem>>) attributes {dimension_semantics = [#tpu.dimension_semantics<parallel>], iteration_bounds = array<i64: 2>, scalar_prefetch = 0 : i64, scratch_operands = 0 : i64, tpu.core_type = #tpu.core_type<tc>, window_params = [{transform_indices = @transform_0, window_bounds = array<i64: 1, 16, 16, 128>}, {pipeline_mode = #tpu.pipeline_mode<synchronous>, transform_indices = @transform_1, window_bounds = array<i64: 128, 640>}, {pipeline_mode = #tpu.pipeline_mode<synchronous>, transform_indices = @transform_2, window_bounds = array<i64: 1, 128>}, {pipeline_mode = #tpu.pipeline_mode<synchronous>, transform_indices = @transform_3, window_bounds = array<i64: 1, 128>}, {pipeline_mode = #tpu.pipeline_mode<synchronous>, transform_indices = @transform_4, window_bounds = array<i64: 3, 384, 128>}, {pipeline_mode = #tpu.pipeline_mode<synchronous>, transform_indices = @transform_5, window_bounds = array<i64: 1, 128>}, {pipeline_mode = #tpu.pipeline_mode<synchronous>, transform_indices = @transform_6, window_bounds = array<i64: 1, 128>}, {pipeline_mode = #tpu.pipeline_mode<synchronous>, transform_indices = @transform_7, window_bounds = array<i64: 128, 512>}, {pipeline_mode = #tpu.pipeline_mode<synchronous>, transform_indices = @transform_8, window_bounds = array<i64: 1, 512>}, {pipeline_mode = #tpu.pipeline_mode<synchronous>, transform_indices = @transform_9, window_bounds = array<i64: 1, 512>}, {pipeline_mode = #tpu.pipeline_mode<synchronous>, transform_indices = @transform_10, window_bounds = array<i64: 1, 512>}, {pipeline_mode = #tpu.pipeline_mode<synchronous>, transform_indices = @transform_11, window_bounds = array<i64: 1, 512>}, {pipeline_mode = #tpu.pipeline_mode<synchronous>, transform_indices = @transform_12, window_bounds = array<i64: 1, 256>}, {pipeline_mode = #tpu.pipeline_mode<synchronous>, transform_indices = @transform_13, window_bounds = array<i64: 512, 64>}, {pipeline_mode = #tpu.pipeline_mode<synchronous>, transform_indices = @transform_14, window_bounds = array<i64: 1, 64>}, {pipeline_mode = #tpu.pipeline_mode<synchronous>, transform_indices = @transform_15, window_bounds = array<i64: 64, 512>}, {pipeline_mode = #tpu.pipeline_mode<synchronous>, transform_indices = @transform_16, window_bounds = array<i64: 1, 512>}, {transform_indices = @transform_17, window_bounds = array<i64: 1, 16, 16, 512>}]} {
    %c0 = arith.constant 0 : index
    %c0_0 = arith.constant 0 : index
    %0 = vector.load %arg13[%c0, %c0_0] : memref<1x256xbf16, #tpu.memory_space<vmem>>, vector<1x256xbf16>
    %1 = arith.extf %0 : vector<1x256xbf16> to vector<1x256xf32>
    %2 = vector.shape_cast %1 : vector<1x256xf32> to vector<1x1x256xf32>
    %cst = arith.constant dense<0.000000e+00> : vector<1xf32>
    %3 = vector.multi_reduction <add>, %2, %cst [1, 2] : vector<1x1x256xf32> to vector<1xf32>
    %4 = vector.shape_cast %3 : vector<1xf32> to vector<1x1x1xf32>
    %5 = vector.extract %4[0, 0, 0] : f32 from vector<1x1x1xf32>
    %c0_1 = arith.constant 0 : index
    %c0_2 = arith.constant 0 : index
    %c0_3 = arith.constant 0 : index
    %c0_4 = arith.constant 0 : index
    %6 = vector.load %arg1[%c0_1, %c0_2, %c0_3, %c0_4] : memref<1x16x16x128xbf16, #tpu.memory_space<vmem>>, vector<1x16x16x128xbf16>
    %7 = vector.shape_cast %6 : vector<1x16x16x128xbf16> to vector<16x16x128xbf16>
    %8 = vector.shape_cast %7 : vector<16x16x128xbf16> to vector<256x128xbf16>
    %c0_5 = arith.constant 0 : index
    %c0_6 = arith.constant 0 : index
    %9 = vector.load %arg2[%c0_5, %c0_6] : memref<128x640xbf16, #tpu.memory_space<vmem>>, vector<128x640xbf16>
    %cst_7 = arith.constant dense<0.000000e+00> : vector<256x640xf32>
    %10 = tpu.matmul %8, %9, %cst_7 {dimension_numbers = #tpu.dot_dimension_numbers<[1], [0], [0], [1], [0, 0, 1, 1], [], []>} : vector<256x128xbf16>, vector<128x640xbf16>, vector<256x640xf32> -> vector<256x640xf32>
    %11 = vector.extract_strided_slice %10 {offsets = [0, 0], sizes = [256, 128], strides = [1, 1]} : vector<256x640xf32> to vector<256x128xf32>
    %c0_8 = arith.constant 0 : index
    %c0_9 = arith.constant 0 : index
    %12 = vector.load %arg3[%c0_8, %c0_9] : memref<1x128xf32, #tpu.memory_space<vmem>>, vector<1x128xf32>
    %13 = vector.broadcast %12 : vector<1x128xf32> to vector<256x128xf32>
    %14 = arith.mulf %11, %13 : vector<256x128xf32>
    %c0_10 = arith.constant 0 : index
    %c0_11 = arith.constant 0 : index
    %15 = vector.load %arg4[%c0_10, %c0_11] : memref<1x128xf32, #tpu.memory_space<vmem>>, vector<1x128xf32>
    %16 = vector.broadcast %15 : vector<1x128xf32> to vector<256x128xf32>
    %17 = arith.addf %14, %16 : vector<256x128xf32>
    %cst_12 = arith.constant 0.000000e+00 : f32
    %18 = vector.broadcast %cst_12 : f32 to vector<256x128xf32>
    %19 = arith.maximumf %17, %18 : vector<256x128xf32>
    %20 = vector.extract_strided_slice %10 {offsets = [0, 128], sizes = [256, 512], strides = [1, 1]} : vector<256x640xf32> to vector<256x512xf32>
    %c0_13 = arith.constant 0 : index
    %c0_14 = arith.constant 0 : index
    %21 = vector.load %arg11[%c0_13, %c0_14] : memref<1x512xf32, #tpu.memory_space<vmem>>, vector<1x512xf32>
    %22 = vector.broadcast %21 : vector<1x512xf32> to vector<256x512xf32>
    %23 = arith.mulf %20, %22 : vector<256x512xf32>
    %c0_15 = arith.constant 0 : index
    %c0_16 = arith.constant 0 : index
    %24 = vector.load %arg12[%c0_15, %c0_16] : memref<1x512xf32, #tpu.memory_space<vmem>>, vector<1x512xf32>
    %25 = vector.broadcast %24 : vector<1x512xf32> to vector<256x512xf32>
    %26 = arith.addf %23, %25 : vector<256x512xf32>
    %27 = arith.truncf %26 : vector<256x512xf32> to vector<256x512xbf16>
    %28 = arith.truncf %19 : vector<256x128xf32> to vector<256x128xbf16>
    %29 = vector.shape_cast %28 : vector<256x128xbf16> to vector<16x16x128xbf16>
    %cst_17 = arith.constant 0.000000e+00 : bf16
    %30 = vector.broadcast %cst_17 : bf16 to vector<16x1x128xbf16>
    %31 = vector.extract_strided_slice %29 {offsets = [0, 0, 0], sizes = [16, 15, 128], strides = [1, 1, 1]} : vector<16x16x128xbf16> to vector<16x15x128xbf16>
    %32 = tpu.concatenate %30, %31 in 1 : vector<16x1x128xbf16>, vector<16x15x128xbf16> -> vector<16x16x128xbf16>
    %33 = vector.extract_strided_slice %29 {offsets = [0, 1, 0], sizes = [16, 15, 128], strides = [1, 1, 1]} : vector<16x16x128xbf16> to vector<16x15x128xbf16>
    %34 = tpu.concatenate %33, %30 in 1 : vector<16x15x128xbf16>, vector<16x1x128xbf16> -> vector<16x16x128xbf16>
    %35 = tpu.concatenate %32, %29, %34 in 2 : vector<16x16x128xbf16>, vector<16x16x128xbf16>, vector<16x16x128xbf16> -> vector<16x16x384xbf16>
    %36 = vector.shape_cast %35 : vector<16x16x384xbf16> to vector<256x384xbf16>
    %cst_18 = arith.constant 0.000000e+00 : bf16
    %37 = vector.broadcast %cst_18 : bf16 to vector<16x384xbf16>
    %38 = tpu.concatenate %37, %36, %37 in 0 : vector<16x384xbf16>, vector<256x384xbf16>, vector<16x384xbf16> -> vector<288x384xbf16>
    %39 = vector.extract_strided_slice %38 {offsets = [0, 0], sizes = [256, 384], strides = [1, 1]} : vector<288x384xbf16> to vector<256x384xbf16>
    %c0_19 = arith.constant 0 : index
    %c0_20 = arith.constant 0 : index
    %c0_21 = arith.constant 0 : index
    %40 = vector.load %arg5[%c0_19, %c0_20, %c0_21] : memref<3x384x128xbf16, #tpu.memory_space<vmem>>, vector<1x384x128xbf16>
    %41 = vector.shape_cast %40 : vector<1x384x128xbf16> to vector<384x128xbf16>
    %cst_22 = arith.constant dense<0.000000e+00> : vector<256x128xf32>
    %42 = tpu.matmul %39, %41, %cst_22 {dimension_numbers = #tpu.dot_dimension_numbers<[1], [0], [0], [1], [0, 0, 1, 1], [], []>} : vector<256x384xbf16>, vector<384x128xbf16>, vector<256x128xf32> -> vector<256x128xf32>
    %43 = vector.extract_strided_slice %38 {offsets = [16, 0], sizes = [256, 384], strides = [1, 1]} : vector<288x384xbf16> to vector<256x384xbf16>
    %c1 = arith.constant 1 : index
    %c0_23 = arith.constant 0 : index
    %c0_24 = arith.constant 0 : index
    %44 = vector.load %arg5[%c1, %c0_23, %c0_24] : memref<3x384x128xbf16, #tpu.memory_space<vmem>>, vector<1x384x128xbf16>
    %45 = vector.shape_cast %44 : vector<1x384x128xbf16> to vector<384x128xbf16>
    %cst_25 = arith.constant dense<0.000000e+00> : vector<256x128xf32>
    %46 = tpu.matmul %43, %45, %cst_25 {dimension_numbers = #tpu.dot_dimension_numbers<[1], [0], [0], [1], [0, 0, 1, 1], [], []>} : vector<256x384xbf16>, vector<384x128xbf16>, vector<256x128xf32> -> vector<256x128xf32>
    %47 = arith.addf %42, %46 : vector<256x128xf32>
    %48 = vector.extract_strided_slice %38 {offsets = [32, 0], sizes = [256, 384], strides = [1, 1]} : vector<288x384xbf16> to vector<256x384xbf16>
    %c2 = arith.constant 2 : index
    %c0_26 = arith.constant 0 : index
    %c0_27 = arith.constant 0 : index
    %49 = vector.load %arg5[%c2, %c0_26, %c0_27] : memref<3x384x128xbf16, #tpu.memory_space<vmem>>, vector<1x384x128xbf16>
    %50 = vector.shape_cast %49 : vector<1x384x128xbf16> to vector<384x128xbf16>
    %cst_28 = arith.constant dense<0.000000e+00> : vector<256x128xf32>
    %51 = tpu.matmul %48, %50, %cst_28 {dimension_numbers = #tpu.dot_dimension_numbers<[1], [0], [0], [1], [0, 0, 1, 1], [], []>} : vector<256x384xbf16>, vector<384x128xbf16>, vector<256x128xf32> -> vector<256x128xf32>
    %52 = arith.addf %47, %51 : vector<256x128xf32>
    %c0_29 = arith.constant 0 : index
    %c0_30 = arith.constant 0 : index
    %53 = vector.load %arg6[%c0_29, %c0_30] : memref<1x128xf32, #tpu.memory_space<vmem>>, vector<1x128xf32>
    %54 = vector.broadcast %53 : vector<1x128xf32> to vector<256x128xf32>
    %55 = arith.mulf %52, %54 : vector<256x128xf32>
    %c0_31 = arith.constant 0 : index
    %c0_32 = arith.constant 0 : index
    %56 = vector.load %arg7[%c0_31, %c0_32] : memref<1x128xf32, #tpu.memory_space<vmem>>, vector<1x128xf32>
    %57 = vector.broadcast %56 : vector<1x128xf32> to vector<256x128xf32>
    %58 = arith.addf %55, %57 : vector<256x128xf32>
    %cst_33 = arith.constant 0.000000e+00 : f32
    %59 = vector.broadcast %cst_33 : f32 to vector<256x128xf32>
    %60 = arith.maximumf %58, %59 : vector<256x128xf32>
    %61 = arith.truncf %60 : vector<256x128xf32> to vector<256x128xbf16>
    %c0_34 = arith.constant 0 : index
    %c0_35 = arith.constant 0 : index
    %62 = vector.load %arg13[%c0_34, %c0_35] : memref<1x256xbf16, #tpu.memory_space<vmem>>, vector<1x256xbf16>
    %cst_36 = arith.constant dense<0.000000e+00> : vector<1x128xf32>
    %63 = tpu.matmul %62, %61, %cst_36 {dimension_numbers = #tpu.dot_dimension_numbers<[1], [0], [0], [1], [0, 0, 1, 1], [], []>} : vector<1x256xbf16>, vector<256x128xbf16>, vector<1x128xf32> -> vector<1x128xf32>
    %64 = arith.truncf %63 : vector<1x128xf32> to vector<1x128xbf16>
    %c0_37 = arith.constant 0 : index
    %c0_38 = arith.constant 0 : index
    %65 = vector.load %arg8[%c0_37, %c0_38] : memref<128x512xbf16, #tpu.memory_space<vmem>>, vector<128x512xbf16>
    %cst_39 = arith.constant dense<0.000000e+00> : vector<1x512xf32>
    %66 = tpu.matmul %64, %65, %cst_39 {dimension_numbers = #tpu.dot_dimension_numbers<[1], [0], [0], [1], [0, 0, 1, 1], [], []>} : vector<1x128xbf16>, vector<128x512xbf16>, vector<1x512xf32> -> vector<1x512xf32>
    %c0_40 = arith.constant 0 : index
    %c0_41 = arith.constant 0 : index
    %67 = vector.load %arg9[%c0_40, %c0_41] : memref<1x512xf32, #tpu.memory_space<vmem>>, vector<1x512xf32>
    %68 = arith.mulf %66, %67 : vector<1x512xf32>
    %c0_42 = arith.constant 0 : index
    %c0_43 = arith.constant 0 : index
    %69 = vector.load %arg10[%c0_42, %c0_43] : memref<1x512xf32, #tpu.memory_space<vmem>>, vector<1x512xf32>
    %70 = vector.broadcast %5 : f32 to vector<1x512xf32>
    %71 = arith.mulf %70, %69 : vector<1x512xf32>
    %72 = arith.addf %68, %71 : vector<1x512xf32>
    %73 = arith.truncf %72 : vector<1x512xf32> to vector<1x512xbf16>
    %c0_44 = arith.constant 0 : index
    %c0_45 = arith.constant 0 : index
    %74 = vector.load %arg14[%c0_44, %c0_45] : memref<512x64xbf16, #tpu.memory_space<vmem>>, vector<512x64xbf16>
    %cst_46 = arith.constant dense<0.000000e+00> : vector<1x64xf32>
    %75 = tpu.matmul %73, %74, %cst_46 {dimension_numbers = #tpu.dot_dimension_numbers<[1], [0], [0], [1], [0, 0, 1, 1], [], []>} : vector<1x512xbf16>, vector<512x64xbf16>, vector<1x64xf32> -> vector<1x64xf32>
    %c0_47 = arith.constant 0 : index
    %c0_48 = arith.constant 0 : index
    %76 = vector.load %arg15[%c0_47, %c0_48] : memref<1x64xf32, #tpu.memory_space<vmem>>, vector<1x64xf32>
    %77 = arith.addf %75, %76 : vector<1x64xf32>
    %cst_49 = arith.constant 0.000000e+00 : f32
    %78 = vector.broadcast %cst_49 : f32 to vector<1x64xf32>
    %79 = arith.maximumf %77, %78 : vector<1x64xf32>
    %80 = arith.truncf %79 : vector<1x64xf32> to vector<1x64xbf16>
    %c0_50 = arith.constant 0 : index
    %c0_51 = arith.constant 0 : index
    %81 = vector.load %arg16[%c0_50, %c0_51] : memref<64x512xbf16, #tpu.memory_space<vmem>>, vector<64x512xbf16>
    %cst_52 = arith.constant dense<0.000000e+00> : vector<1x512xf32>
    %82 = tpu.matmul %80, %81, %cst_52 {dimension_numbers = #tpu.dot_dimension_numbers<[1], [0], [0], [1], [0, 0, 1, 1], [], []>} : vector<1x64xbf16>, vector<64x512xbf16>, vector<1x512xf32> -> vector<1x512xf32>
    %c0_53 = arith.constant 0 : index
    %c0_54 = arith.constant 0 : index
    %83 = vector.load %arg17[%c0_53, %c0_54] : memref<1x512xf32, #tpu.memory_space<vmem>>, vector<1x512xf32>
    %84 = arith.addf %82, %83 : vector<1x512xf32>
    %cst_55 = arith.constant 0.000000e+00 : f32
    %85 = vector.broadcast %cst_55 : f32 to vector<1x512xf32>
    %86 = arith.subf %85, %84 : vector<1x512xf32>
    %87 = math.exp %86 : vector<1x512xf32>
    %cst_56 = arith.constant 1.000000e+00 : f32
    %88 = vector.broadcast %cst_56 : f32 to vector<1x512xf32>
    %89 = arith.addf %88, %87 : vector<1x512xf32>
    %cst_57 = arith.constant 1.000000e+00 : f32
    %90 = vector.broadcast %cst_57 : f32 to vector<1x512xf32>
    %91 = arith.divf %90, %89 : vector<1x512xf32>
    %c0_58 = arith.constant 0 : index
    %c0_59 = arith.constant 0 : index
    %92 = vector.load %arg8[%c0_58, %c0_59] : memref<128x512xbf16, #tpu.memory_space<vmem>>, vector<128x512xbf16>
    %cst_60 = arith.constant dense<0.000000e+00> : vector<256x512xf32>
    %93 = tpu.matmul %61, %92, %cst_60 {dimension_numbers = #tpu.dot_dimension_numbers<[1], [0], [0], [1], [0, 0, 1, 1], [], []>} : vector<256x128xbf16>, vector<128x512xbf16>, vector<256x512xf32> -> vector<256x512xf32>
    %94 = arith.extf %27 : vector<256x512xbf16> to vector<256x512xf32>
    %c0_61 = arith.constant 0 : index
    %c0_62 = arith.constant 0 : index
    %95 = vector.load %arg9[%c0_61, %c0_62] : memref<1x512xf32, #tpu.memory_space<vmem>>, vector<1x512xf32>
    %96 = arith.mulf %95, %91 : vector<1x512xf32>
    %97 = vector.broadcast %96 : vector<1x512xf32> to vector<256x512xf32>
    %98 = arith.mulf %93, %97 : vector<256x512xf32>
    %c0_63 = arith.constant 0 : index
    %c0_64 = arith.constant 0 : index
    %99 = vector.load %arg10[%c0_63, %c0_64] : memref<1x512xf32, #tpu.memory_space<vmem>>, vector<1x512xf32>
    %100 = arith.mulf %99, %91 : vector<1x512xf32>
    %101 = vector.broadcast %100 : vector<1x512xf32> to vector<256x512xf32>
    %102 = arith.addf %98, %101 : vector<256x512xf32>
    %103 = arith.addf %102, %94 : vector<256x512xf32>
    %cst_65 = arith.constant 0.000000e+00 : f32
    %104 = vector.broadcast %cst_65 : f32 to vector<256x512xf32>
    %105 = arith.maximumf %103, %104 : vector<256x512xf32>
    %106 = vector.shape_cast %105 : vector<256x512xf32> to vector<16x16x512xf32>
    %107 = arith.truncf %106 : vector<16x16x512xf32> to vector<16x16x512xbf16>
    %c0_66 = arith.constant 0 : index
    %c0_67 = arith.constant 0 : index
    %c0_68 = arith.constant 0 : index
    %c0_69 = arith.constant 0 : index
    %108 = vector.load %arg18[%c0_66, %c0_67, %c0_68, %c0_69] : memref<1x16x16x512xbf16, #tpu.memory_space<vmem>>, vector<1x16x16x512xbf16>
    %109 = vector.shape_cast %108 : vector<1x16x16x512xbf16> to vector<16x16x512xbf16>
    %110 = vector.shape_cast %107 : vector<16x16x512xbf16> to vector<1x16x16x512xbf16>
    tpu.vector_store %arg18[%c0_66, %c0_67, %c0_68, %c0_69], %110 {strides = array<i32>} : memref<1x16x16x512xbf16, #tpu.memory_space<vmem>>, vector<1x16x16x512xbf16>,
    return
  }
  func.func @transform_0(%arg0: i32) -> (i32, i32, i32, i32) {
    %c0_i32 = arith.constant 0 : i32
    %c0_i32_0 = arith.constant 0 : i32
    %c0_i32_1 = arith.constant 0 : i32
    %c0_i32_2 = arith.constant 0 : i32
    return %arg0, %c0_i32, %c0_i32_0, %c0_i32_1 : i32, i32, i32, i32
  }
  func.func @transform_1(%arg0: i32) -> (i32, i32) {
    %c0_i32 = arith.constant 0 : i32
    %c0_i32_0 = arith.constant 0 : i32
    %c0_i32_1 = arith.constant 0 : i32
    return %c0_i32, %c0_i32_0 : i32, i32
  }
  func.func @transform_2(%arg0: i32) -> (i32, i32) {
    %c0_i32 = arith.constant 0 : i32
    %c0_i32_0 = arith.constant 0 : i32
    %c0_i32_1 = arith.constant 0 : i32
    return %c0_i32, %c0_i32_0 : i32, i32
  }
  func.func @transform_3(%arg0: i32) -> (i32, i32) {
    %c0_i32 = arith.constant 0 : i32
    %c0_i32_0 = arith.constant 0 : i32
    %c0_i32_1 = arith.constant 0 : i32
    return %c0_i32, %c0_i32_0 : i32, i32
  }
  func.func @transform_4(%arg0: i32) -> (i32, i32, i32) {
    %c0_i32 = arith.constant 0 : i32
    %c0_i32_0 = arith.constant 0 : i32
    %c0_i32_1 = arith.constant 0 : i32
    %c0_i32_2 = arith.constant 0 : i32
    return %c0_i32, %c0_i32_0, %c0_i32_1 : i32, i32, i32
  }
  func.func @transform_5(%arg0: i32) -> (i32, i32) {
    %c0_i32 = arith.constant 0 : i32
    %c0_i32_0 = arith.constant 0 : i32
    %c0_i32_1 = arith.constant 0 : i32
    return %c0_i32, %c0_i32_0 : i32, i32
  }
  func.func @transform_6(%arg0: i32) -> (i32, i32) {
    %c0_i32 = arith.constant 0 : i32
    %c0_i32_0 = arith.constant 0 : i32
    %c0_i32_1 = arith.constant 0 : i32
    return %c0_i32, %c0_i32_0 : i32, i32
  }
  func.func @transform_7(%arg0: i32) -> (i32, i32) {
    %c0_i32 = arith.constant 0 : i32
    %c0_i32_0 = arith.constant 0 : i32
    %c0_i32_1 = arith.constant 0 : i32
    return %c0_i32, %c0_i32_0 : i32, i32
  }
  func.func @transform_8(%arg0: i32) -> (i32, i32) {
    %c0_i32 = arith.constant 0 : i32
    %c0_i32_0 = arith.constant 0 : i32
    %c0_i32_1 = arith.constant 0 : i32
    return %c0_i32, %c0_i32_0 : i32, i32
  }
  func.func @transform_9(%arg0: i32) -> (i32, i32) {
    %c0_i32 = arith.constant 0 : i32
    %c0_i32_0 = arith.constant 0 : i32
    %c0_i32_1 = arith.constant 0 : i32
    return %c0_i32, %c0_i32_0 : i32, i32
  }
  func.func @transform_10(%arg0: i32) -> (i32, i32) {
    %c0_i32 = arith.constant 0 : i32
    %c0_i32_0 = arith.constant 0 : i32
    %c0_i32_1 = arith.constant 0 : i32
    return %c0_i32, %c0_i32_0 : i32, i32
  }
  func.func @transform_11(%arg0: i32) -> (i32, i32) {
    %c0_i32 = arith.constant 0 : i32
    %c0_i32_0 = arith.constant 0 : i32
    %c0_i32_1 = arith.constant 0 : i32
    return %c0_i32, %c0_i32_0 : i32, i32
  }
  func.func @transform_12(%arg0: i32) -> (i32, i32) {
    %c0_i32 = arith.constant 0 : i32
    %c0_i32_0 = arith.constant 0 : i32
    %c0_i32_1 = arith.constant 0 : i32
    return %c0_i32, %c0_i32_0 : i32, i32
  }
  func.func @transform_13(%arg0: i32) -> (i32, i32) {
    %c0_i32 = arith.constant 0 : i32
    %c0_i32_0 = arith.constant 0 : i32
    %c0_i32_1 = arith.constant 0 : i32
    return %c0_i32, %c0_i32_0 : i32, i32
  }
  func.func @transform_14(%arg0: i32) -> (i32, i32) {
    %c0_i32 = arith.constant 0 : i32
    %c0_i32_0 = arith.constant 0 : i32
    %c0_i32_1 = arith.constant 0 : i32
    return %c0_i32, %c0_i32_0 : i32, i32
  }
  func.func @transform_15(%arg0: i32) -> (i32, i32) {
    %c0_i32 = arith.constant 0 : i32
    %c0_i32_0 = arith.constant 0 : i32
    %c0_i32_1 = arith.constant 0 : i32
    return %c0_i32, %c0_i32_0 : i32, i32
  }
  func.func @transform_16(%arg0: i32) -> (i32, i32) {
    %c0_i32 = arith.constant 0 : i32
    %c0_i32_0 = arith.constant 0 : i32
    %c0_i32_1 = arith.constant 0 : i32
    return %c0_i32, %c0_i32_0 : i32, i32
  }
  func.func @transform_17(%arg0: i32) -> (i32, i32, i32, i32) {
    %c0_i32 = arith.constant 0 : i32
    %c0_i32_0 = arith.constant 0 : i32
    %c0_i32_1 = arith.constant 0 : i32
    %c0_i32_2 = arith.constant 0 : i32
    return %arg0, %c0_i32, %c0_i32_0, %c0_i32_1 : i32, i32, i32, i32
  }
}

</mosaic_0001>

<bundles_post_ra>
// kernel: tpu_custom_call.1
= control target key start
LH: loop header
LB: loop body
LE: loop exit
PB: predicated region body
PF: predicated region fallthrough
CT: control target
= control target key end

     0   :  { %s11426_s0 = inlined_call_operand.hbm [shape: bf16[2,16,16,128], index: 0, kind: input, shape index: {}]   ;;  %s11427_s1 = inlined_call_operand.vmem [shape: bf16[128,640], index: 1, kind: input, shape index: {}]   ;;  %s11428_s2 = inlined_call_operand.vmem [shape: f32[1,128], index: 2, kind: input, shape index: {}]   ;;  %s11429_s3 = inlined_call_operand.vmem [shape: f32[1,128], index: 3, kind: input, shape index: {}]   ;;  %s11430_s4 = inlined_call_operand.hbm [shape: bf16[3,384,128], index: 4, kind: input, shape index: {}]   ;;  %s11431_s5 = inlined_call_operand.vmem [shape: f32[1,128], index: 5, kind: input, shape index: {}]   ;;  %s11432_s6 = inlined_call_operand.vmem [shape: f32[1,128], index: 6, kind: input, shape index: {}]   ;;  %s11433_s7 = inlined_call_operand.hbm [shape: bf16[128,512], index: 7, kind: input, shape index: {}]   ;;  %s11434_s8 = inlined_call_operand.vmem [shape: f32[1,512], index: 8, kind: input, shape index: {}]   ;;  %s11435_s9 = inlined_call_operand.vmem [shape: f32[1,512], index: 9, kind: input, shape index: {}]   ;;  %s11436_s10 = inlined_call_operand.vmem [shape: f32[1,512], index: 10, kind: input, shape index: {}]   ;;  %s11437_s11 = inlined_call_operand.vmem [shape: f32[1,512], index: 11, kind: input, shape index: {}]   ;;  %s11438_s12 = inlined_call_operand.vmem [shape: bf16[1,256], index: 12, kind: input, shape index: {}]   ;;  %s11439_s13 = inlined_call_operand.vmem [shape: bf16[512,64], index: 13, kind: input, shape index: {}]   ;;  %s11440_s14 = inlined_call_operand.vmem [shape: f32[1,64], index: 14, kind: input, shape index: {}]   ;;  %s11441_s15 = inlined_call_operand.hbm [shape: bf16[64,512], index: 15, kind: input, shape index: {}]   ;;  %s11442_s16 = inlined_call_operand.vmem [shape: f32[1,512], index: 16, kind: input, shape index: {}]   ;;  %s11443_s17 = inlined_call_operand.hbm [shape: bf16[2,16,16,512], index: 17, kind: output, shape index: {}]  }
   0x1   :  { %11681 = sst [smem:[#allocation113_spill]] %s11426_s0 }
   0x2   :  { %11682 = sst [smem:[#allocation114_spill]] %s11427_s1 }
   0x3   :  { %11683 = sst [smem:[#allocation115_spill]] %s11428_s2 }
   0x4   :  { %11684 = sst [smem:[#allocation116_spill]] %s11430_s4 }
   0x5   :  { %11685 = sst [smem:[#allocation117_spill]] %s11433_s7 }
   0x6   :  { %11686 = sst [smem:[#allocation118_spill]] %s11441_s15 }
   0x7   :  { %11687 = sst [smem:[#allocation119_spill]] %s11442_s16 }
   0x8   :  { %11688 = sst [smem:[#allocation120_spill]] %s11443_s17 }
   0x9   :  { %22 = vsyncpa [#allocation3], 0 }
   0xa   :  { %24 = vsyncpa [#allocation3 + $0x1], 0 }
   0xb   :  { %25 = vsyncpa [#allocation6], 0 }
   0xc   :  { %26 = vsyncpa [#allocation9], 0 }
   0xd   :  { %27 = vsyncpa [#allocation4], 0 }
   0xe   :  { %29 = vsyncpa [#allocation4 + $0x1], 0  ;;  %s7420_s24 = smov 0   ;;  %s7422_s25 = smov 0  }
   0xf   :  { %s7424_s26 = smov 0   ;;  %s7426_s27 = smov 0  }
  0x10 LB: > { %11689 = sst [smem:[#allocation15_spill]] %s7306_s24  ;;  %s7441_s28 = sadd.s32 4294967295, %s7318_s27   ;;  %s7318_s27 = sphi %s7426_s27, %s12276_s27   ;;  %s7314_s26 = sphi %s7424_s26, %s12278_s26   ;;  %s7310_s25 = sphi %s7422_s25, %s12280_s25   ;;  %s7306_s24 = sphi %s7420_s24, %s12279_s24  }
  0x11   : > { %11690 = sst [smem:[#allocation16_spill]] %s7314_s26  ;;  %s5921_s29 = sadd.s32 4294967294, %s7318_s27  }
  0x12   : > { %p55_p0 = scmp.ne.s32.totalorder %s7310_s25, %s7306_s24  ;;  %p56_p1 = scmp.eq.s32.totalorder %s7441_s28, 0 }
  0x13   : > { %p415_p2 = scmp.eq.s32.totalorder %s7441_s28, 1  ;;  %p421_p3 = scmp.eq.s32.totalorder %s5921_s29, 1 }
  0x14   : > { %p7450_p4 = por %p56_p1, %p55_p0  ;;  %p5922_p5 = scmp.ge.s32.totalorder %s7318_s27, 1 }
  0x15   : > { %p7455_p6 = por %p421_p3, %p55_p0  ;;  %p428_p7 = scmp.lt.s32.totalorder %s7318_s27, 3 }
  0x16   : > { %s11694_s4 = sld [smem:[#allocation116_spill]]  ;;  %s7320_s21 = smov [#allocation5]  }
  0x17   : > { %s11692_s30 = scalar_select %p7455_p6, 1, 0 }
  0x18   : > { %p7463_p8 = pnand %p5922_p5, %p428_p7  ;;  %s450_s22 = sshll.u32 %s7320_s21, 4  ;;  %s451_s22 = int_to_ptr.vmem [resolvable:$true] %s450_s22 }
  0x19   : > { %11693 = sst [smem:[#allocation17_spill]] %s11692_s30  ;;  %s11450_s30 = smov 4  }
  0x1a   : > { %p7021_p9 = pneg %p7463_p8  ;;  %s11697_s7 = sld [smem:[#allocation117_spill]] }
  0x1b   : > { %s7323_s21 = smov [#allocation7]   ;;  %s7324_s29 = smov 256  }
  0x1c   : > { %s448_s1 = sshll.u32 %s11694_s4, 4  ;;  %p7471_p10 = pnand %p7021_p9, %p56_p1  ;;  %s449_s1 = int_to_ptr.hbm [resolvable:$true] %s448_s1 }
  0x1d   : > { %s11449_s4 = smov 64   ;;  %s470_s24 = sshll.u32 %s7323_s21, 4  ;;  %s471_s24 = int_to_ptr.vmem [resolvable:$true] %s470_s24 }
  0x1e   : > { %7024 = dma.hbm_to_vmem [thread:$0]  (!%p7471_p10), %s449_s1, 9216, %s451_s22, [#allocation6], %s11449_s4, %s11449_s4, %s11450_s30  }
  0x1f   : > { %s7325_s18 = smov 16   ;;  %s11698_s15 = sld [smem:[#allocation118_spill]] }
  0x20   : > { %s468_s19 = sshll.u32 %s11697_s7, 4  ;;  %s7326_s1 = smov [#allocation8]   ;;  %s469_s19 = int_to_ptr.hbm [resolvable:$true] %s468_s19 }
  0x21   : > { %7027 = dma.hbm_to_vmem [thread:$0]  (!%p7471_p10), %s469_s19, 4096, %s471_s24, [#allocation6], %s7324_s29, %s7324_s29, %s7325_s18  }
  0x22   : > { %s505_s22 = sshll.u32 %s7326_s1, 4  ;;  %s7492_s21 = sadd.s32 1, %s7318_s27   ;;  %s506_s22 = int_to_ptr.vmem [resolvable:$true] %s505_s22 }
  0x23   : > { %11699 = sst [smem:[#allocation18_spill]] %s7492_s21  ;;  %s39_s4 = ssub.s32 %s7318_s27, %s7492_s21 }
  0x24   : > { %s42_s30 = sadd.s32 1, %s7314_s26  ;;  %p40_p12 = scmp.eq.s32.totalorder %s39_s4, 0 }
  0x25   : > { %s503_s16 = sshll.u32 %s11698_s15, 4  ;;  %p49_p13 = scmp.ne.s32.totalorder %s7314_s26, %s7310_s25  ;;  %s504_s16 = int_to_ptr.hbm [resolvable:$true] %s503_s16 }
  0x26   : > { %7030 = dma.hbm_to_vmem [thread:$0]  (!%p7471_p10), %s504_s16, 2048, %s506_s22, [#allocation9], %s7324_s29, %s7324_s29, %s7325_s18  }
  0x27   : > { %p50_p0 = scmp.eq.s32.totalorder %s7318_s27, 0  ;;  %p7505_p3 = por %p415_p2, %p49_p13 }
  0x28   : > { %s7501_s24 = scalar_select %p40_p12, %s7314_s26, %s42_s30  }
  0x29   : > { %p7042_p5 = scmp.lt.s32.totalorder %s7318_s27, 2  ;;  %s522_s17 = sand.u32 1, %s7314_s26  }
  0x2a   : > { %11700 = sst [smem:[#allocation19_spill]] %s7501_s24  ;;  %s6777_s19 = sshll.u32 %s7318_s27, 7 }
  0x2b   : > { %p51_p7 = por %p50_p0, %p49_p13  ;;  %s5927_s16 = sshll.u32 %s522_s17, 7 }
  0x2c   : > { %s11702_s18 = sld [smem:[#allocation113_spill]]  ;;  %s526_s4 = scalar_lea.vmem [#allocation2], %s5927_s16 }
  0x2d   : > { %s534_s15 = sshll.u32 %s526_s4, 4  ;;  %p7515_p9 = pnand %p7042_p5, %p51_p7  ;;  %s535_s15 = int_to_ptr.vmem [resolvable:$true] %s534_s15 }
  0x2e   : > { %s523_s24 = scalar_lea.sflag [#allocation3], %s522_s17 }
  0x2f   : > { %p7218_p10 = pneg %p7515_p9 }
  0x32   : > { %s531_s1 = scalar_lea.hbm %s11702_s18, %s6777_s19  ;;  %s7221_s16 = scalar_lea.hbm %s11702_s18, 256 }
  0x33   : > { %s532_s22 = sshll.u32 %s531_s1, 4  ;;  %s533_s22 = int_to_ptr.hbm [resolvable:$true] %s532_s22 }
  0x34   : > { %s7214_s21 = sshra.s32 %s533_s22, 4  ;;  %s7215_s21 = int_to_ptr.hbm [resolvable:$true] %s7214_s21 }
  0x35   : > { %s7216_s26 = scalar_lea.hbm %s7215_s21, 128  ;;  %p7222_p0 = scmp.lt.s32.totalorder %s7215_s21, %s11702_s18 }
  0x36   : > { %p7217_p2 = scmp.ne.s32.totalorder %s7215_s21, %s7216_s26  ;;  %p7223_p5 = scmp.lt.s32.totalorder %s7221_s16, %s7216_s26 }
  0x38   : > { %p7219_p12 = pnand %p7218_p10, %p7217_p2  ;;  %p7224_p7 = por %p7223_p5, %p7222_p0 }
  0x3a   : > { %p7220_p13 = pneg %p7219_p12 }
  0x3c   : > { %p7225_p11 = pnand %p7224_p7, %p7220_p13 }
  0x3e   : > { %7228 = shalt.err (!%p7225_p11)
}
  0x3f   : > { %s11704_s17 = smov 4   ;;  %s11705_s4 = smov 64  }
  0x40   : > { %7034 = dma.hbm_to_vmem [thread:$0]  (!%p7515_p9), %s533_s22, 2048, %s535_s15, %s523_s24, %s11705_s4, %s11705_s4, %s11704_s17  }
  0x41   : > { %546 = sbr.rel (%p7463_p8) target bundleno = 2225 (0x8b1), region = 88 }
  0x46   : > { %s7535_s19 = sand.u32 1, %s7310_s25  }
  0x47   : > { %s5931_s21 = sshll.u32 %s7535_s19, 7  ;;  %s549_s26 = scalar_lea.sflag [#allocation3], %s7535_s19 }
  0x48   : > { %s7539_s23 = scalar_lea.vmem [#allocation2], %s5931_s21 }
  0x49   : > { %7289 = dma.done.wait (%p7450_p4), %s549_s26, 2048  }
  0x4a   : > { %7291 = vsyncadd (%p7450_p4), %s549_s26, 4294965248 }
  0x4b   : > { %7293 = dma.done.wait (%p56_p1), [#allocation6], 13312  }
  0x4c   : > { %7295 = vsyncadd (%p56_p1), [#allocation6], 4294953984 }
  0x4d   : > { %7297 = dma.done.wait (%p56_p1), [#allocation9], 2048  }
  0x4e   : > { %7299 = vsyncadd (%p56_p1), [#allocation9], 4294965248  ;;  %s11706_s24 = sld [smem:[#allocation114_spill]]  ;;  %v7662_v52 = vld [vmem:[%s7539_s23] sm:$0xff]  ;;  %v7665_v53 = vld [vmem:[%s7539_s23 + $0x70] sm:$0xff]  ;;  %vm627_vm0 = vcmask 1040384  }
  0x4f   : > { %s11708_s2 = sld [smem:[#allocation115_spill]]  ;;  %vm2154_vm1 = vsmask.f32 256  ;;  %vm2220_vm3 = vcmask 1047552   ;;  %vm2221_vm4 = vsmask.f32 7424 }
  0x50   : > { %vm8057_vm2 = vmand %vm627_vm0, %vm2154_vm1  ;;  %vm4514_vm6 = vcmask 523264   ;;  %s11952_s4 = sld [smem:[#allocation119_spill]]  ;;  %s5935_s21 = sshll.u32 %s7535_s19, 9 }
  0x51   : > { %vm8233_vm5 = vmand %vm2220_vm3, %vm2221_vm4  ;;  %s11059_s26 = scalar_lea.vmem [#allocation10], %s5935_s21  ;;  %s6986_s15 = sshll.u32 %s7441_s28, 9 }
  0x52   : > { %s12271_s30 = sld [smem:[#allocation120_spill]]  ;;  %s5816_s28 = sshll.u32 %s11059_s26, 4  ;;  %s5817_s28 = int_to_ptr.vmem [resolvable:$true] %s5816_s28 }
  0x53   : > { %s5804_s29 = scalar_lea.sflag [#allocation4], %s7535_s19 }
  0x54   : > { %s11707_s22 = smov %s11706_s24  ;;  %v6142_v0 = vld [vmem:[%s11706_s24 + $0x118] sm:$0xf] }
  0x55   : > { %v6831_v1 = vld [vmem:[%s11707_s22 + $0x128] sm:$0xf0]  ;;  %v6829_v2 = vld [vmem:[%s11707_s22 + $0x11c] sm:$0xf]  ;;  %v6144_v4 = vld [vmem:[%s11707_s22 + $0x12c] sm:$0xf0] }
  0x56   : > { %v6143_v3 = vor.u32 %v6831_v1, %v6142_v0  ;;  %v6122_v5 = vld [vmem:[%s11707_s22 + $0xf0] sm:$0xf]  ;;  %v6826_v6 = vld [vmem:[%s11707_s22 + $0x100] sm:$0xf0]  ;;  %v6147_v7 = vor.u32 %v6829_v2, %v6144_v4  ;;  %v6824_v8 = vld [vmem:[%s11707_s22 + $0xf4] sm:$0xf] }
  0x57   : > { %v6124_v9 = vld [vmem:[%s11707_s22 + $0x104] sm:$0xf0]  ;;  %v6123_v10 = vor.u32 %v6826_v6, %v6122_v5  ;;  %v6821_v13 = vld [vmem:[%s11707_s22 + $0xd8] sm:$0xf0]  ;;  %v6819_v14 = vld [vmem:[%s11707_s22 + $0xcc] sm:$0xf] }
  0x58   : > { %1024 = vmatpush.bf16.msra.mxu0 %v6143_v3  ;;  %6987 = vmatpush.bf16.msra.mxu2 %v6143_v3  ;;  %v6127_v11 = vor.u32 %v6824_v8, %v6124_v9  ;;  %v6102_v12 = vld [vmem:[%s11707_s22 + $0xc8] sm:$0xf]  ;;  %v6104_v15 = vld [vmem:[%s11707_s22 + $0xdc] sm:$0xf0]  ;;  %v6816_v19 = vld [vmem:[%s11707_s22 + $0xb0] sm:$0xf0]  ;;  %s5815_s16 = scalar_lea.hbm %s12271_s30, %s6986_s15 }
  0x59   : > { %1113 = vmatpush.bf16.msra.mxu1 %v6147_v7  ;;  %6995 = vmatpush.bf16.msra.mxu3 %v6147_v7  ;;  %v6103_v16 = vor.u32 %v6821_v13, %v6102_v12  ;;  %v6107_v17 = vor.u32 %v6819_v14, %v6104_v15  ;;  %v6082_v18 = vld [vmem:[%s11707_s22 + $0xa0] sm:$0xf]  ;;  %v6814_v20 = vld [vmem:[%s11707_s22 + $0xa4] sm:$0xf]  ;;  %v6084_v21 = vld [vmem:[%s11707_s22 + $0xb4] sm:$0xf0] }
  0x5a   : > { %v6083_v22 = vor.u32 %v6816_v19, %v6082_v18  ;;  %v6087_v23 = vor.u32 %v6814_v20, %v6084_v21  ;;  %v6062_v24 = vld [vmem:[%s11707_s22 + $0x78] sm:$0xf]  ;;  %v6811_v25 = vld [vmem:[%s11707_s22 + $0x88] sm:$0xf0]  ;;  %v6809_v26 = vld [vmem:[%s11707_s22 + $0x7c] sm:$0xf] }
  0x5b   : > { %v6064_v27 = vld [vmem:[%s11707_s22 + $0x8c] sm:$0xf0]  ;;  %v6063_v28 = vor.u32 %v6811_v25, %v6062_v24  ;;  %v6806_v31 = vld [vmem:[%s11707_s22 + $0x60] sm:$0xf0]  ;;  %v6804_v32 = vld [vmem:[%s11707_s22 + $0x54] sm:$0xf] }
  0x5c   : > { %1025 = vmatpush.bf16.msra.mxu0 %v6123_v10  ;;  %6988 = vmatpush.bf16.msra.mxu2 %v6123_v10  ;;  %v6067_v29 = vor.u32 %v6809_v26, %v6064_v27  ;;  %v6042_v30 = vld [vmem:[%s11707_s22 + $0x50] sm:$0xf]  ;;  %v6044_v33 = vld [vmem:[%s11707_s22 + $0x64] sm:$0xf0]  ;;  %v6801_v37 = vld [vmem:[%s11707_s22 + $0x38] sm:$0xf0] }
  0x5d   : > { %1114 = vmatpush.bf16.msra.mxu1 %v6127_v11  ;;  %6996 = vmatpush.bf16.msra.mxu3 %v6127_v11  ;;  %v6043_v34 = vor.u32 %v6806_v31, %v6042_v30  ;;  %v6022_v35 = vld [vmem:[%s11707_s22 + $0x28] sm:$0xf]  ;;  %v6047_v36 = vor.u32 %v6804_v32, %v6044_v33  ;;  %v6799_v38 = vld [vmem:[%s11707_s22 + $0x2c] sm:$0xf]  ;;  %v6024_v39 = vld [vmem:[%s11707_s22 + $0x3c] sm:$0xf0] }
  0x5e   : > { %v6023_v40 = vor.u32 %v6801_v37, %v6022_v35  ;;  %v6027_v41 = vor.u32 %v6799_v38, %v6024_v39  ;;  %v6002_v42 = vld [vmem:[%s11707_s22] sm:$0xf]  ;;  %v6796_v43 = vld [vmem:[%s11707_s22 + $0x10] sm:$0xf0]  ;;  %v6794_v44 = vld [vmem:[%s11707_s22 + $0x4] sm:$0xf] }
  0x5f   : > { %v6004_v45 = vld [vmem:[%s11707_s22 + $0x14] sm:$0xf0]  ;;  %v6150_v46 = vld [vmem:[%s11707_s22 + $0x120] sm:$0xf]  ;;  %v6832_v47 = vld [vmem:[%s11707_s22 + $0x130] sm:$0xf0]  ;;  %v6003_v50 = vor.u32 %v6796_v43, %v6002_v42 }
  0x60   : > { %1026 = vmatpush.bf16.msra.mxu0 %v6103_v16  ;;  %6989 = vmatpush.bf16.msra.mxu2 %v6103_v16  ;;  %v6830_v48 = vld [vmem:[%s11707_s22 + $0x124] sm:$0xf]  ;;  %v6152_v49 = vld [vmem:[%s11707_s22 + $0x134] sm:$0xf0]  ;;  %v6007_v51 = vor.u32 %v6794_v44, %v6004_v45  ;;  %v6151_v54 = vor.u32 %v6832_v47, %v6150_v46  ;;  %v6827_v57 = vld [vmem:[%s11707_s22 + $0x108] sm:$0xf0] }
  0x61   : > { %1115 = vmatpush.bf16.msra.mxu1 %v6107_v17  ;;  %6997 = vmatpush.bf16.msra.mxu3 %v6107_v17  ;;  %v6155_v55 = vor.u32 %v6830_v48, %v6152_v49  ;;  %v6130_v56 = vld [vmem:[%s11707_s22 + $0xf8] sm:$0xf]  ;;  %v6825_v58 = vld [vmem:[%s11707_s22 + $0xfc] sm:$0xf]  ;;  %v6132_v59 = vld [vmem:[%s11707_s22 + $0x10c] sm:$0xf0] }
  0x62   : > { %v6131_v60 = vor.u32 %v6827_v57, %v6130_v56  ;;  %v6135_v61 = vor.u32 %v6825_v58, %v6132_v59  ;;  %v6110_v62 = vld [vmem:[%s11707_s22 + $0xd0] sm:$0xf]  ;;  %v6822_v63 = vld [vmem:[%s11707_s22 + $0xe0] sm:$0xf0]  ;;  %v6820_v0 = vld [vmem:[%s11707_s22 + $0xd4] sm:$0xf] }
  0x63   : > { %v6112_v1 = vld [vmem:[%s11707_s22 + $0xe4] sm:$0xf0]  ;;  %v6111_v2 = vor.u32 %v6822_v63, %v6110_v62  ;;  %v6817_v5 = vld [vmem:[%s11707_s22 + $0xb8] sm:$0xf0]  ;;  %v6815_v6 = vld [vmem:[%s11707_s22 + $0xac] sm:$0xf] }
  0x64   : > { %1027 = vmatpush.bf16.msra.mxu0 %v6083_v22  ;;  %6990 = vmatpush.bf16.msra.mxu2 %v6083_v22  ;;  %v6115_v3 = vor.u32 %v6820_v0, %v6112_v1  ;;  %v6090_v4 = vld [vmem:[%s11707_s22 + $0xa8] sm:$0xf]  ;;  %v6092_v7 = vld [vmem:[%s11707_s22 + $0xbc] sm:$0xf0]  ;;  %v6812_v11 = vld [vmem:[%s11707_s22 + $0x90] sm:$0xf0] }
  0x65   : > { %1116 = vmatpush.bf16.msra.mxu1 %v6087_v23  ;;  %6998 = vmatpush.bf16.msra.mxu3 %v6087_v23  ;;  %v6091_v8 = vor.u32 %v6817_v5, %v6090_v4  ;;  %v6095_v9 = vor.u32 %v6815_v6, %v6092_v7  ;;  %v6070_v10 = vld [vmem:[%s11707_s22 + $0x80] sm:$0xf]  ;;  %v6810_v12 = vld [vmem:[%s11707_s22 + $0x84] sm:$0xf]  ;;  %v6072_v13 = vld [vmem:[%s11707_s22 + $0x94] sm:$0xf0] }
  0x66   : > { %v7720_v14 = vld [vmem:[%s7539_s23 + $0x8] sm:$0xff]  ;;  %v7723_v15 = vld [vmem:[%s7539_s23 + $0x78] sm:$0xff]  ;;  %v6071_v16 = vor.u32 %v6812_v11, %v6070_v10  ;;  %v6075_v17 = vor.u32 %v6810_v12, %v6072_v13  ;;  %v6050_v18 = vld [vmem:[%s11707_s22 + $0x58] sm:$0xf]  ;;  %s5818_s0 = sshll.u32 %s5815_s16, 4  ;;  %s7264_s21 = scalar_lea.hbm %s12271_s30, 1024  ;;  %s5819_s0 = int_to_ptr.hbm [resolvable:$true] %s5818_s0 }
  0x67   : > { %v6807_v19 = vld [vmem:[%s11707_s22 + $0x68] sm:$0xf0]  ;;  %v6805_v20 = vld [vmem:[%s11707_s22 + $0x5c] sm:$0xf]  ;;  %v6052_v21 = vld [vmem:[%s11707_s22 + $0x6c] sm:$0xf0] }
  0x68   : > { %1028 = vmatpush.bf16.msra.mxu0 %v6063_v28  ;;  %6991 = vmatpush.bf16.msra.mxu2 %v6063_v28  ;;  %v6051_v22 = vor.u32 %v6807_v19, %v6050_v18  ;;  %v6055_v23 = vor.u32 %v6805_v20, %v6052_v21  ;;  %v6030_v24 = vld [vmem:[%s11707_s22 + $0x30] sm:$0xf]  ;;  %v6802_v25 = vld [vmem:[%s11707_s22 + $0x40] sm:$0xf0]  ;;  %v6800_v26 = vld [vmem:[%s11707_s22 + $0x34] sm:$0xf] }
  0x69   : > { %1117 = vmatpush.bf16.msra.mxu1 %v6067_v29  ;;  %6999 = vmatpush.bf16.msra.mxu3 %v6067_v29  ;;  %v6032_v27 = vld [vmem:[%s11707_s22 + $0x44] sm:$0xf0]  ;;  %v6031_v28 = vor.u32 %v6802_v25, %v6030_v24  ;;  %v6797_v31 = vld [vmem:[%s11707_s22 + $0x18] sm:$0xf0]  ;;  %v6795_v32 = vld [vmem:[%s11707_s22 + $0xc] sm:$0xf] }
  0x6a   : > { %v6035_v29 = vor.u32 %v6800_v26, %v6032_v27  ;;  %v6010_v30 = vld [vmem:[%s11707_s22 + $0x8] sm:$0xf]  ;;  %v6012_v33 = vld [vmem:[%s11707_s22 + $0x1c] sm:$0xf0]  ;;  %v6783_v39 = vld [vmem:[%s7539_s23 + $0x28] sm:$0xff]  ;;  %s7258_s1 = sshra.s32 %s5819_s0, 4  ;;  %s7259_s1 = int_to_ptr.hbm [resolvable:$true] %s7258_s1 }
  0x6b   : > { %v6015_v35 = vor.u32 %v6795_v32, %v6012_v33  ;;  %v7773_v37 = vld [vmem:[%s7539_s23 + $0x18] sm:$0xff]  ;;  %v7780_v38 = vld [vmem:[%s7539_s23 + $0x20] sm:$0xff]  ;;  %s7260_s17 = scalar_lea.hbm %s7259_s1, 512  ;;  %p7265_p11 = scmp.lt.s32.totalorder %s7259_s1, %s12271_s30 }
  0x6c   : > { %1029 = vmatpush.bf16.msra.mxu0 %v6043_v34  ;;  %6992 = vmatpush.bf16.msra.mxu2 %v6043_v34  ;;  %v6011_v34 = vor.u32 %v6797_v31, %v6010_v30  ;;  %v7796_v42 = vld [vmem:[%s11708_s2] ss:$0 sm:$0xff]  ;;  %v7799_v43 = vld [vmem:[%s7539_s23 + $0x40] sm:$0xff]  ;;  %p7261_p1 = scmp.ne.s32.totalorder %s7259_s1, %s7260_s17  ;;  %p7266_p9 = scmp.lt.s32.totalorder %s7264_s21, %s7260_s17 }
  0x6d   : > { %1118 = vmatpush.bf16.msra.mxu1 %v6047_v36  ;;  %7000 = vmatpush.bf16.msra.mxu3 %v6047_v36  ;;  %v7766_v36 = vld [vmem:[%s7539_s23 + $0x10] sm:$0xff]  ;;  %v7804_v45 = vld [vmem:[%s11429_s3] ss:$0 sm:$0xff] }
  0x6e   : > { %v1573_v30 = vld [vmem:[%s11436_s10] sm:$0xf]  ;;  %p7262_p4 = pnand %p7261_p1, %p7505_p3  ;;  %p7267_p2 = por %p7266_p9, %p7265_p11 }
  0x70   : > { %1030 = vmatpush.bf16.msra.mxu0 %v6023_v40  ;;  %6993 = vmatpush.bf16.msra.mxu2 %v6023_v40  ;;  %v6784_v40 = vld [vmem:[%s7539_s23 + $0x30] sm:$0xff]  ;;  %p7263_p8 = pneg %p7262_p4 }
  0x71   : > { %1119 = vmatpush.bf16.msra.mxu1 %v6027_v41  ;;  %7001 = vmatpush.bf16.msra.mxu3 %v6027_v41  ;;  %v6785_v41 = vld [vmem:[%s7539_s23 + $0x38] sm:$0xff] }
  0x72   : > { %p7268_p10 = pnand %p7267_p2, %p7263_p8 }
  0x74   : > { %1031 = vmatpush.bf16.msra.mxu0 %v6003_v50  ;;  %6994 = vmatpush.bf16.msra.mxu2 %v6003_v50 }
  0x75   : > { %1120 = vmatpush.bf16.msra.mxu1 %v6007_v51  ;;  %7002 = vmatpush.bf16.msra.mxu3 %v6007_v51 }
  0x77   : > { %1032 = vmatmul.bf16.vlgmr.msra.gmra.mxu0 %v7662_v52  ;;  %1102 = vmatmul.bf16.vlgmr.msra.gmra.mxu2 %v7665_v53 }
  0x78   : > { %1202 = vmatpush.bf16.msrb.mxu2 %v6151_v54  ;;  %1121 = vmatmul.bf16.vlgmr.msra.gmra.mxu1 %v7662_v52 }
  0x79   : > { %1291 = vmatpush.bf16.msrb.mxu3 %v6155_v55 }
  0x7a   : > { %1191 = vmatmul.bf16.vlgmr.msra.gmra.mxu3 %v7665_v53 }
  0x7c   : > { %1203 = vmatpush.bf16.msrb.mxu2 %v6131_v60 }
  0x7d   : > { %1292 = vmatpush.bf16.msrb.mxu3 %v6135_v61 }
  0x80   : > { %1204 = vmatpush.bf16.msrb.mxu2 %v6111_v2 }
  0x81   : > { %1293 = vmatpush.bf16.msrb.mxu3 %v6115_v3  ;;  %v7824_v3 = vld [vmem:[%s7539_s23 + $0x48] sm:$0xff] }
  0x84   : > { %1205 = vmatpush.bf16.msrb.mxu2 %v6091_v8 }
  0x85   : > { %1294 = vmatpush.bf16.msrb.mxu3 %v6095_v9 }
  0x87   : > { %1037 = vmatmul.bf16.gmra.mxu0 %v7720_v14  ;;  %1107 = vmatmul.bf16.gmra.mxu2 %v7723_v15 }
  0x88   : > { %1206 = vmatpush.bf16.msrb.mxu2 %v6071_v16  ;;  %1126 = vmatmul.bf16.gmra.mxu1 %v7720_v14 }
  0x89   : > { %1295 = vmatpush.bf16.msrb.mxu3 %v6075_v17 }
  0x8a   : > { %1196 = vmatmul.bf16.gmra.mxu3 %v7723_v15 }
  0x8c   : > { %1207 = vmatpush.bf16.msrb.mxu2 %v6051_v22 }
  0x8d   : > { %1296 = vmatpush.bf16.msrb.mxu3 %v6055_v23 }
  0x90   : > { %1208 = vmatpush.bf16.msrb.mxu2 %v6031_v28 }
  0x91   : > { %1297 = vmatpush.bf16.msrb.mxu3 %v6035_v29 }
  0x94   : > { %1209 = vmatpush.bf16.msrb.mxu2 %v6011_v34 }
  0x95   : > { %1298 = vmatpush.bf16.msrb.mxu3 %v6015_v35 }
  0x97   : > { %1042 = vmatmul.bf16.gmra.mxu0 %v7766_v36  ;;  %1210 = vmatmul.bf16.vlgmr.msrb.gmra.mxu2 %v7662_v52 }
  0x98   : > { %1131 = vmatmul.bf16.gmra.mxu1 %v7766_v36 }
  0x9a   : > { %1299 = vmatmul.bf16.vlgmr.msrb.gmra.mxu3 %v7662_v52 }
  0xa7   : > { %1047 = vmatmul.bf16.gmra.mxu0 %v7773_v37  ;;  %1215 = vmatmul.bf16.gmra.mxu2 %v7720_v14 }
  0xa8   : > { %1136 = vmatmul.bf16.gmra.mxu1 %v7773_v37 }
  0xaa   : > { %1304 = vmatmul.bf16.gmra.mxu3 %v7720_v14 }
  0xb7   : > { %1052 = vmatmul.bf16.gmra.mxu0 %v7780_v38  ;;  %1220 = vmatmul.bf16.gmra.mxu2 %v7766_v36 }
  0xb8   : > { %1141 = vmatmul.bf16.gmra.mxu1 %v7780_v38 }
  0xba   : > { %1309 = vmatmul.bf16.gmra.mxu3 %v7766_v36 }
  0xc7   : > { %1057 = vmatmul.bf16.gmra.mxu0 %v6783_v39  ;;  %1225 = vmatmul.bf16.gmra.mxu2 %v7773_v37 }
  0xc8   : > { %1146 = vmatmul.bf16.gmra.mxu1 %v6783_v39 }
  0xca   : > { %1314 = vmatmul.bf16.gmra.mxu3 %v7773_v37 }
  0xd7   : > { %1062 = vmatmul.bf16.gmra.mxu0 %v6784_v40  ;;  %1230 = vmatmul.bf16.gmra.mxu2 %v7780_v38 }
  0xd8   : > { %1151 = vmatmul.bf16.gmra.mxu1 %v6784_v40 }
  0xda   : > { %1319 = vmatmul.bf16.gmra.mxu3 %v7780_v38 }
  0xe7   : > { %1067 = vmatmul.bf16.gmra.mxu0 %v6785_v41  ;;  %1235 = vmatmul.bf16.gmra.mxu2 %v6783_v39 }
  0xe8   : > { %1156 = vmatmul.bf16.gmra.mxu1 %v6785_v41 }
  0xea   : > { %1324 = vmatmul.bf16.gmra.mxu3 %v6783_v39 }
  0xf4   : > { %v1033_v44 = vpop.f32.mrf.mxu0 }
  0xf5   : > { %v1473_v46 = vmul.f32 %v7796_v42, %v1033_v44  ;;  %v7807_v47 = vpop.f32.mrf.mxu1 }
  0xf7   : > { %1072 = vmatmul.bf16.gmra.mxu0 %v7799_v43  ;;  %1240 = vmatmul.bf16.gmra.mxu2 %v6784_v40  ;;  %v1509_v48 = vadd.f32 %v7804_v45, %v1473_v46 }
  0xf8   : > { %1161 = vmatmul.bf16.gmra.mxu1 %v7799_v43 }
  0xf9   : > { %v1541_v54 = vmax.f32 %v1509_v48, 0.0  ;;  %v1711_v48 = vld [vmem:[%s11437_s11] sm:$0xf] }
  0xfa   : > { %1329 = vmatmul.bf16.gmra.mxu3 %v6784_v40  ;;  %v1103_v49 = vpop.f32.mrf.mxu2  ;;  %v7852_v40 = vld [vmem:[%s7539_s23 + $0x50] sm:$0xff] }
  0xfb   : > { %v1501_v50 = vmul.f32 %v7796_v42, %v1103_v49  ;;  %v1913_v60 = vpack.c.bf16 %v1541_v54, %v1541_v54 }
  0xfc   : > { %v1035_v55 = vpop.f32.mrf.mxu0 }
  0xfd   : > { %v7813_v51 = vpop.f32.mrf.mxu3  ;;  %v1537_v56 = vadd.f32 %v7804_v45, %v1501_v50  ;;  %v1474_v57 = vmul.f32 %v7796_v42, %v1035_v55  ;;  %v7817_v58 = vpop.f32.mrf.mxu1  ;;  %v1977_v4 = vunpack.c.l.b16 %v1913_v60 }
  0xff   : > { %v1510_v59 = vadd.f32 %v7804_v45, %v1474_v57  ;;  %v1569_v61 = vmax.f32 %v1537_v56, 0.0  ;;  %v6158_v57 = vld [vmem:[%s11707_s22 + $0x128] sm:$0xf] }
 0x101   : > { %v1542_v62 = vmax.f32 %v1510_v59, 0.0  ;;  %v1941_v6 = vpack.c.bf16 %v1569_v61, %v1569_v61  ;;  %v6833_v59 = vld [vmem:[%s11707_s22 + $0x138] sm:$0xf0] }
 0x102   : > { %v1105_v63 = vpop.f32.mrf.mxu2 }
 0x103   : > { %v1914_v0 = vpack.c.bf16 %v1542_v62, %v1542_v62  ;;  %v1502_v1 = vmul.f32 %v7796_v42, %v1105_v63  ;;  %v2005_v16 = vunpack.c.l.b16 %v1941_v6  ;;  %v7873_v62 = vperm.slane %v1573_v30, 1 }
 0x104   : > { %v1038_v5 = vpop.f32.mrf.mxu0  ;;  %v6159_v63 = vor.u32 %v6833_v59, %v6158_v57  ;;  %v7921_v59 = vld [vmem:[%s7539_s23 + $0x58] sm:$0xff] }
 0x105   : > { %v7821_v2 = vpop.f32.mrf.mxu3  ;;  %v1978_v7 = vunpack.c.l.b16 %v1914_v0  ;;  %v1538_v8 = vadd.f32 %v7804_v45, %v1502_v1  ;;  %v1475_v9 = vmul.f32 %v7796_v42, %v1038_v5  ;;  %v7828_v10 = vpop.f32.mrf.mxu1  ;;  %v6865_v0 = vld [vmem:[#allocation5 + $0xf8] sm:$0xff] }
 0x106   : > { %1380 = vmatpush.bf16.msrb.mxu0 %v6159_v63  ;;  %2496 = vmatpush.bf16.msrb.mxu1 %v6865_v0 }
 0x107   : > { %v7830_v11 = vpack.c.b16 %v1978_v7, %v1977_v4  ;;  %v1570_v12 = vmax.f32 %v1538_v8, 0.0  ;;  %1077 = vmatmul.bf16.gmra.mxu0 %v7824_v3  ;;  %1245 = vmatmul.bf16.gmra.mxu2 %v6785_v41  ;;  %v1511_v13 = vadd.f32 %v7804_v45, %v1475_v9  ;;  %v7877_v4 = vperm.slane %v1711_v48, 0 }
 0x108   : > { %1166 = vmatmul.bf16.gmra.mxu1 %v7824_v3  ;;  %v7882_v8 = vperm.slane %v1711_v48, 1 }
 0x109   : > { %11709 = vst [vmem:[#allocation20_spill] sm:$0xff] %v7830_v11  ;;  %v1942_v17 = vpack.c.bf16 %v1570_v12, %v1570_v12  ;;  %v1543_v22 = vmax.f32 %v1511_v13, 0.0  ;;  %v6138_v12 = vld [vmem:[%s11707_s22 + $0x100] sm:$0xf] }
 0x10a   : > { %1334 = vmatmul.bf16.gmra.mxu3 %v6785_v41  ;;  %v1108_v18 = vpop.f32.mrf.mxu2  ;;  %v7854_v41 = vperm.slane %v1573_v30, 0  ;;  %v6823_v30 = vld [vmem:[%s11707_s22 + $0xe8] sm:$0xf0] }
 0x10b   : > { %v2006_v19 = vunpack.c.l.b16 %v1942_v17  ;;  %v1503_v20 = vmul.f32 %v7796_v42, %v1108_v18  ;;  %v1915_v29 = vpack.c.bf16 %v1543_v22, %v1543_v22  ;;  %v6864_v18 = vld [vmem:[#allocation5 + $0xf0] sm:$0xff] }
 0x10c   : > { %v1040_v23 = vpop.f32.mrf.mxu0  ;;  %v1583_v1 = vmul.f32 %v7854_v41, %v7807_v47  ;;  %v6828_v47 = vld [vmem:[%s11707_s22 + $0x110] sm:$0xf0]  ;;  %2497 = vmatpush.bf16.msrb.mxu1 %v6864_v18 }
 0x10d   : > { %v7836_v21 = vpop.f32.mrf.mxu3  ;;  %v7838_v24 = vpack.c.b16 %v2006_v19, %v2005_v16  ;;  %v1539_v25 = vadd.f32 %v7804_v45, %v1503_v20  ;;  %v1476_v26 = vmul.f32 %v7796_v42, %v1040_v23  ;;  %v7842_v27 = vpop.f32.mrf.mxu1  ;;  %v1979_v44 = vunpack.c.l.b16 %v1915_v29  ;;  %v6118_v29 = vld [vmem:[%s11707_s22 + $0xd8] sm:$0xf] }
 0x10e   : > { %v6139_v17 = vor.u32 %v6828_v47, %v6138_v12  ;;  %v1721_v19 = vadd.f32 %v7877_v4, %v1583_v1  ;;  %v6078_v12 = vld [vmem:[%s11707_s22 + $0x88] sm:$0xf]  ;;  %v6813_v47 = vld [vmem:[%s11707_s22 + $0x98] sm:$0xf0] }
 0x10f   : > { %11710 = vst [vmem:[#allocation21_spill] sm:$0xff] %v7838_v24  ;;  %v1512_v28 = vadd.f32 %v7804_v45, %v1476_v26  ;;  %v1571_v31 = vmax.f32 %v1539_v25, 0.0  ;;  %v6079_v18 = vor.u32 %v6813_v47, %v6078_v12 }
 0x110   : > { %1381 = vmatpush.bf16.msrb.mxu0 %v6139_v17  ;;  %v6861_v17 = vld [vmem:[#allocation5 + $0xd8] sm:$0xff] }
 0x111   : > { %v1544_v32 = vmax.f32 %v1512_v28, 0.0  ;;  %v1943_v49 = vpack.c.bf16 %v1571_v31, %v1571_v31 }
 0x112   : > { %v1110_v33 = vpop.f32.mrf.mxu2 }
 0x113   : > { %v1916_v34 = vpack.c.bf16 %v1544_v32, %v1544_v32  ;;  %v1504_v35 = vmul.f32 %v7796_v42, %v1110_v33  ;;  %v2007_v5 = vunpack.c.l.b16 %v1943_v49  ;;  %v6119_v33 = vor.u32 %v6823_v30, %v6118_v29  ;;  %v6098_v49 = vld [vmem:[%s11707_s22 + $0xb0] sm:$0xf] }
 0x114   : > { %v1043_v46 = vpop.f32.mrf.mxu0 }
 0x115   : > { %v7849_v39 = vpop.f32.mrf.mxu3  ;;  %v1980_v50 = vunpack.c.l.b16 %v1916_v34  ;;  %v1540_v54 = vadd.f32 %v7804_v45, %v1504_v35  ;;  %v1477_v55 = vmul.f32 %v7796_v42, %v1043_v46  ;;  %v7861_v56 = vpop.f32.mrf.mxu1  ;;  %v6863_v34 = vld [vmem:[#allocation5 + $0xe8] sm:$0xff]  ;;  %v1587_v35 = vmul.f32 %v7854_v41, %v7817_v58  ;;  %1382 = vmatpush.bf16.msrb.mxu0 %v6119_v33 }
 0x116   : > { %2498 = vmatpush.bf16.msrb.mxu1 %v6863_v34 }
 0x117   : > { %v7869_v60 = vpack.c.b16 %v1980_v50, %v1979_v44  ;;  %v1572_v61 = vmax.f32 %v1540_v54, 0.0  ;;  %1082 = vmatmul.bf16.gmra.mxu0 %v7852_v40  ;;  %1250 = vmatmul.bf16.gmra.mxu2 %v7799_v43  ;;  %v1513_v7 = vadd.f32 %v7804_v45, %v1477_v55  ;;  %v6818_v50 = vld [vmem:[%s11707_s22 + $0xc0] sm:$0xf0]  ;;  %v1725_v63 = vadd.f32 %v7877_v4, %v1587_v35 }
 0x118   : > { %1171 = vmatmul.bf16.gmra.mxu1 %v7852_v40  ;;  %v6099_v58 = vor.u32 %v6818_v50, %v6098_v49  ;;  %v6803_v49 = vld [vmem:[%s11707_s22 + $0x48] sm:$0xf0] }
 0x119   : > { %11711 = vst [vmem:[#allocation22_spill] sm:$0xff] %v7869_v60  ;;  %v1944_v6 = vpack.c.bf16 %v1572_v61, %v1572_v61  ;;  %v1545_v23 = vmax.f32 %v1513_v7, 0.0  ;;  %v6862_v61 = vld [vmem:[#allocation5 + $0xe0] sm:$0xff] }
 0x11a   : > { %1339 = vmatmul.bf16.gmra.mxu3 %v7799_v43  ;;  %v1211_v9 = vpop.f32.mrf.mxu2  ;;  %1383 = vmatpush.bf16.msrb.mxu0 %v6099_v58  ;;  %v6859_v58 = vld [vmem:[#allocation5 + $0xc8] sm:$0xff] }
 0x11b   : > { %v2008_v13 = vunpack.c.l.b16 %v1944_v6  ;;  %v1584_v43 = vmul.f32 %v7873_v62, %v1211_v9  ;;  %v1917_v44 = vpack.c.bf16 %v1545_v23, %v1545_v23  ;;  %2499 = vmatpush.bf16.msrb.mxu1 %v6862_v61  ;;  %v1595_v61 = vmul.f32 %v7854_v41, %v7842_v27 }
 0x11c   : > { %v1045_v20 = vpop.f32.mrf.mxu0 }
 0x11d   : > { %v7891_v16 = vpop.f32.mrf.mxu3  ;;  %v7894_v22 = vpack.c.b16 %v2008_v13, %v2007_v5  ;;  %v1722_v25 = vadd.f32 %v7882_v8, %v1584_v43  ;;  %v1478_v26 = vmul.f32 %v7796_v42, %v1045_v20  ;;  %v7898_v28 = vpop.f32.mrf.mxu1  ;;  %v1981_v1 = vunpack.c.l.b16 %v1917_v44 }
 0x11e   : > { %1384 = vmatpush.bf16.msrb.mxu0 %v6079_v18  ;;  %v6858_v18 = vld [vmem:[#allocation5 + $0xc0] sm:$0xff] }
 0x11f   : > { %11712 = vst [vmem:[#allocation23_spill] sm:$0xff] %v7894_v22  ;;  %v7906_v31 = vpack.c.bf16 %v1722_v25, %v1721_v19  ;;  %v1514_v32 = vadd.f32 %v7804_v45, %v1478_v26  ;;  %v1591_v19 = vmul.f32 %v7854_v41, %v7828_v10  ;;  %2500 = vmatpush.bf16.msrb.mxu1 %v6861_v17  ;;  %v6058_v25 = vld [vmem:[%s11707_s22 + $0x60] sm:$0xf]  ;;  %v6808_v26 = vld [vmem:[%s11707_s22 + $0x70] sm:$0xf0]  ;;  %v7980_v17 = vld [vmem:[%s7539_s23 + $0x60] sm:$0xff] }
 0x120   : > { %v6059_v30 = vor.u32 %v6808_v26, %v6058_v25 }
 0x121   : > { %11713 = vst [vmem:[#allocation24_spill] sm:$0xff] %v7906_v31  ;;  %v1546_v46 = vmax.f32 %v1514_v32, 0.0  ;;  %v6860_v32 = vld [vmem:[#allocation5 + $0xd0] sm:$0xff]  ;;  %v1729_v33 = vadd.f32 %v7877_v4, %v1591_v19  ;;  %v1733_v19 = vadd.f32 %v7877_v4, %v1595_v61 }
 0x122   : > { %v1213_v48 = vpop.f32.mrf.mxu2  ;;  %1385 = vmatpush.bf16.msrb.mxu0 %v6059_v30 }
 0x123   : > { %v1918_v54 = vpack.c.bf16 %v1546_v46, %v1546_v46  ;;  %v1588_v55 = vmul.f32 %v7873_v62, %v1213_v48  ;;  %2501 = vmatpush.bf16.msrb.mxu1 %v6860_v32  ;;  %v6038_v48 = vld [vmem:[%s11707_s22 + $0x38] sm:$0xf] }
 0x124   : > { %v1048_v0 = vpop.f32.mrf.mxu0 }
 0x125   : > { %v7918_v57 = vpop.f32.mrf.mxu3  ;;  %v1982_v5 = vunpack.c.l.b16 %v1918_v54  ;;  %v1726_v6 = vadd.f32 %v7882_v8, %v1588_v55  ;;  %v1479_v7 = vmul.f32 %v7796_v42, %v1048_v0  ;;  %v7926_v9 = vpop.f32.mrf.mxu1  ;;  %v6039_v55 = vor.u32 %v6803_v49, %v6038_v48 }
 0x127   : > { %v7934_v13 = vpack.c.b16 %v1982_v5, %v1981_v1  ;;  %v7936_v43 = vpack.c.bf16 %v1726_v6, %v1725_v63  ;;  %1087 = vmatmul.bf16.gmra.mxu0 %v7921_v59  ;;  %1255 = vmatmul.bf16.gmra.mxu2 %v7824_v3  ;;  %v1515_v20 = vadd.f32 %v7804_v45, %v1479_v7  ;;  %v6018_v5 = vld [vmem:[%s11707_s22 + $0x10] sm:$0xf]  ;;  %v6798_v6 = vld [vmem:[%s11707_s22 + $0x20] sm:$0xf0] }
 0x128   : > { %1176 = vmatmul.bf16.gmra.mxu1 %v7921_v59  ;;  %1386 = vmatpush.bf16.msrb.mxu0 %v6039_v55  ;;  %v6019_v27 = vor.u32 %v6798_v6, %v6018_v5 }
 0x129   : > { %11714 = vst [vmem:[#allocation25_spill] sm:$0xff] %v7934_v13  ;;  %v1547_v34 = vmax.f32 %v1515_v20, 0.0  ;;  %2502 = vmatpush.bf16.msrb.mxu1 %v6859_v58 }
 0x12a   : > { %11715 = vst [vmem:[#allocation26_spill] sm:$0xff] %v7936_v43  ;;  %1344 = vmatmul.bf16.gmra.mxu3 %v7824_v3  ;;  %v1216_v23 = vpop.f32.mrf.mxu2 }
 0x12b   : > { %v1592_v29 = vmul.f32 %v7873_v62, %v1216_v23  ;;  %v1919_v63 = vpack.c.bf16 %v1547_v34, %v1547_v34 }
 0x12c   : > { %v1050_v10 = vpop.f32.mrf.mxu0  ;;  %1387 = vmatpush.bf16.msrb.mxu0 %v6019_v27 }
 0x12d   : > { %v7952_v3 = vpop.f32.mrf.mxu3  ;;  %v1730_v35 = vadd.f32 %v7882_v8, %v1592_v29  ;;  %v1480_v44 = vmul.f32 %v7796_v42, %v1050_v10  ;;  %v7957_v46 = vpop.f32.mrf.mxu1  ;;  %v1983_v23 = vunpack.c.l.b16 %v1919_v63  ;;  %2503 = vmatpush.bf16.msrb.mxu1 %v6858_v18  ;;  %v8015_v18 = vld [vmem:[%s7539_s23 + $0x68] sm:$0xff] }
 0x12f   : > { %v7965_v50 = vpack.c.bf16 %v1730_v35, %v1729_v33  ;;  %v1516_v54 = vadd.f32 %v7804_v45, %v1480_v44  ;;  %v1599_v33 = vmul.f32 %v7854_v41, %v7861_v56 }
 0x131   : > { %11716 = vst [vmem:[#allocation27_spill] sm:$0xff] %v7965_v50  ;;  %v1548_v0 = vmax.f32 %v1516_v54, 0.0  ;;  %v1737_v54 = vadd.f32 %v7877_v4, %v1599_v33 }
 0x132   : > { %v1218_v1 = vpop.f32.mrf.mxu2 }
 0x133   : > { %v1920_v7 = vpack.c.bf16 %v1548_v0, %v1548_v0  ;;  %v1596_v12 = vmul.f32 %v7873_v62, %v1218_v1  ;;  %v1603_v0 = vmul.f32 %v7854_v41, %v7898_v28 }
 0x134   : > { %v1053_v20 = vpop.f32.mrf.mxu0 }
 0x135   : > { %v7977_v47 = vpop.f32.mrf.mxu3  ;;  %v1984_v25 = vunpack.c.l.b16 %v1920_v7  ;;  %v1734_v26 = vadd.f32 %v7882_v8, %v1596_v12  ;;  %v1481_v29 = vmul.f32 %v7796_v42, %v1053_v20  ;;  %v7985_v30 = vpop.f32.mrf.mxu1 }
 0x137   : > { %v7987_v32 = vpack.c.b16 %v1984_v25, %v1983_v23  ;;  %v7989_v10 = vpack.c.bf16 %v1734_v26, %v1733_v19  ;;  %1092 = vmatmul.bf16.gmra.mxu0 %v7980_v17  ;;  %1260 = vmatmul.bf16.gmra.mxu2 %v7852_v40  ;;  %v1517_v34 = vadd.f32 %v7804_v45, %v1481_v29 }
 0x138   : > { %1181 = vmatmul.bf16.gmra.mxu1 %v7980_v17  ;;  %v1741_v19 = vadd.f32 %v7877_v4, %v1603_v0 }
 0x139   : > { %11717 = vst [vmem:[#allocation28_spill] sm:$0xff] %v7987_v32  ;;  %v1549_v55 = vmax.f32 %v1517_v34, 0.0 }
 0x13a   : > { %11718 = vst [vmem:[#allocation29_spill] sm:$0xff] %v7989_v10  ;;  %1349 = vmatmul.bf16.gmra.mxu3 %v7852_v40  ;;  %v1221_v35 = vpop.f32.mrf.mxu2 }
 0x13b   : > { %v1600_v44 = vmul.f32 %v7873_v62, %v1221_v35  ;;  %v1921_v1 = vpack.c.bf16 %v1549_v55, %v1549_v55  ;;  %v1607_v35 = vmul.f32 %v7854_v41, %v7926_v9 }
 0x13c   : > { %v1055_v49 = vpop.f32.mrf.mxu0 }
 0x13d   : > { %v7999_v48 = vpop.f32.mrf.mxu3  ;;  %v1738_v58 = vadd.f32 %v7882_v8, %v1600_v44  ;;  %v1482_v61 = vmul.f32 %v7796_v42, %v1055_v49  ;;  %v8004_v40 = vpop.f32.mrf.mxu1  ;;  %v1985_v23 = vunpack.c.l.b16 %v1921_v1 }
 0x13f   : > { %v8006_v63 = vpack.c.bf16 %v1738_v58, %v1737_v54  ;;  %v1518_v56 = vadd.f32 %v7804_v45, %v1482_v61  ;;  %v11454_v58 = vshrl.u32 %v7830_v11, 16 }
 0x141   : > { %11719 = vst [vmem:[#allocation30_spill] sm:$0xff] %v8006_v63  ;;  %v1550_v5 = vmax.f32 %v1518_v56, 0.0  ;;  %v1745_v56 = vadd.f32 %v7877_v4, %v1607_v35 }
 0x142   : > { %v1223_v6 = vpop.f32.mrf.mxu2 }
 0x143   : > { %v1922_v7 = vpack.c.bf16 %v1550_v5, %v1550_v5  ;;  %v1604_v12 = vmul.f32 %v7873_v62, %v1223_v6 }
 0x144   : > { %v1058_v20 = vpop.f32.mrf.mxu0 }
 0x145   : > { %v8012_v27 = vpop.f32.mrf.mxu3  ;;  %v1986_v25 = vunpack.c.l.b16 %v1922_v7  ;;  %v1742_v26 = vadd.f32 %v7882_v8, %v1604_v12  ;;  %v1483_v29 = vmul.f32 %v7796_v42, %v1058_v20  ;;  %v8020_v28 = vpop.f32.mrf.mxu1  ;;  %v2028_v7 = vrot.slane %v11454_v58, 7 }
 0x146   : > { %v1611_v12 = vmul.f32 %v7854_v41, %v7957_v46 }
 0x147   : > { %v8022_v33 = vpack.c.b16 %v1986_v25, %v1985_v23  ;;  %v8024_v34 = vpack.c.bf16 %v1742_v26, %v1741_v19  ;;  %1097 = vmatmul.bf16.gmra.mxu0 %v8015_v18  ;;  %1265 = vmatmul.bf16.gmra.mxu2 %v7921_v59  ;;  %v1519_v44 = vadd.f32 %v7804_v45, %v1483_v29  ;;  %v11455_v23 = vshll.u32 %v7830_v11, 16 }
 0x148   : > { %1186 = vmatmul.bf16.gmra.mxu1 %v8015_v18 }
 0x149   : > { %11720 = vst [vmem:[#allocation31_spill] sm:$0xff] %v8024_v34  ;;  %v1551_v0 = vmax.f32 %v1519_v44, 0.0  ;;  %v2031_v44 = vor.u32 %v11455_v23, %v2028_v7  ;;  %v6871_v23 = vld [vmem:[#allocation5 + $0x128] sm:$0xff] }
 0x14a   : > { %1354 = vmatmul.bf16.gmra.mxu3 %v7921_v59  ;;  %v1226_v49 = vpop.f32.mrf.mxu2 }
 0x14b   : > { %v1608_v54 = vmul.f32 %v7873_v62, %v1226_v49  ;;  %v1923_v19 = vpack.c.bf16 %v1551_v0, %v1551_v0  ;;  %v1749_v49 = vadd.f32 %v7877_v4, %v1611_v12  ;;  %v8073_v7 = vsel %vm8057_vm2, 0, %v2031_v44  ;;  %v6873_v12 = vld [vmem:[#allocation5 + $0x138] sm:$0xff] }
 0x14c   : > { %v1060_v61 = vpop.f32.mrf.mxu0  ;;  %11726 = vst [vmem:[#allocation35_spill] sm:$0xff] %v8073_v7  ;;  %2585 = vmatpush.bf16.msra.mxu2 %v6873_v12  ;;  %v11457_v44 = vshrl.u32 %v7869_v60, 16 }
 0x14d   : > { %v8034_v55 = vpop.f32.mrf.mxu3  ;;  %v1746_v1 = vadd.f32 %v7882_v8, %v1608_v54  ;;  %v1484_v59 = vmul.f32 %v7796_v42, %v1060_v61  ;;  %v8040_v5 = vpop.f32.mrf.mxu1  ;;  %v1987_v61 = vunpack.c.l.b16 %v1923_v19  ;;  %v6881_v19 = vld [vmem:[#allocation5 + $0x178] sm:$0xff] }
 0x14e   : > { %2674 = vmatpush.bf16.msra.mxu3 %v6881_v19 }
 0x14f   : > { %v8042_v9 = vpack.c.bf16 %v1746_v1, %v1745_v56  ;;  %v1520_v6 = vadd.f32 %v7804_v45, %v1484_v59 }
 0x151   : > { %11721 = vst [vmem:[#allocation32_spill] sm:$0xff] %v8042_v9  ;;  %v1552_v20 = vmax.f32 %v1520_v6, 0.0 }
 0x152   : > { %v1228_v25 = vpop.f32.mrf.mxu2 }
 0x153   : > { %v1924_v26 = vpack.c.bf16 %v1552_v20, %v1552_v20  ;;  %v1612_v29 = vmul.f32 %v7873_v62, %v1228_v25  ;;  %v1615_v25 = vmul.f32 %v7854_v41, %v7985_v30 }
 0x154   : > { %v1063_v54 = vpop.f32.mrf.mxu0 }
 0x155   : > { %v8051_v35 = vpop.f32.mrf.mxu3  ;;  %v1988_v56 = vunpack.c.l.b16 %v1924_v26  ;;  %v1750_v0 = vadd.f32 %v7882_v8, %v1612_v29  ;;  %v1485_v1 = vmul.f32 %v7796_v42, %v1063_v54  ;;  %v8063_v59 = vpop.f32.mrf.mxu1  ;;  %v6872_v54 = vld [vmem:[#allocation5 + $0x130] sm:$0xff] }
 0x156   : > { %2586 = vmatpush.bf16.msra.mxu2 %v6872_v54 }
 0x157   : > { %v8065_v6 = vpack.c.b16 %v1988_v56, %v1987_v61  ;;  %v8067_v20 = vpack.c.bf16 %v1750_v0, %v1749_v49  ;;  %1270 = vmatmul.bf16.gmra.mxu2 %v7980_v17  ;;  %1388 = vmatmul.bf16.vlgmr.msrb.gmra.mxu0 %v7662_v52  ;;  %v1521_v26 = vadd.f32 %v7804_v45, %v1485_v1  ;;  %v6880_v61 = vld [vmem:[#allocation5 + $0x170] sm:$0xff] }
 0x158   : > { %2504 = vmatmul.bf16.vlgmr.msrb.gmra.mxu1 %v8073_v7  ;;  %2675 = vmatpush.bf16.msra.mxu3 %v6880_v61 }
 0x159   : > { %11724 = vst [vmem:[#allocation33_spill] sm:$0xff] %v8065_v6  ;;  %v1553_v0 = vmax.f32 %v1521_v26, 0.0 }
 0x15a   : > { %11725 = vst [vmem:[#allocation34_spill] sm:$0xff] %v8067_v20  ;;  %1359 = vmatmul.bf16.gmra.mxu3 %v7980_v17  ;;  %v1231_v29 = vpop.f32.mrf.mxu2  ;;  %v1753_v17 = vadd.f32 %v7877_v4, %v1615_v25  ;;  %v6879_v20 = vld [vmem:[#allocation5 + $0x168] sm:$0xff]  ;;  %v1619_v25 = vmul.f32 %v7854_v41, %v8004_v40  ;;  %2587 = vmatpush.bf16.msra.mxu2 %v6871_v23 }
 0x15b   : > { %v1616_v52 = vmul.f32 %v7873_v62, %v1231_v29  ;;  %v2035_v29 = vrot.slane %v11457_v44, 7  ;;  %v1925_v26 = vpack.c.bf16 %v1553_v0, %v1553_v0  ;;  %v6870_v44 = vld [vmem:[#allocation5 + $0x120] sm:$0xff] }
 0x15c   : > { %v1065_v56 = vpop.f32.mrf.mxu0  ;;  %2676 = vmatpush.bf16.msra.mxu3 %v6879_v20  ;;  %v1757_v9 = vadd.f32 %v7877_v4, %v1619_v25  ;;  %v6869_v25 = vld [vmem:[#allocation5 + $0x118] sm:$0xff] }
 0x15d   : > { %v8081_v49 = vpop.f32.mrf.mxu3  ;;  %v1754_v58 = vadd.f32 %v7882_v8, %v1616_v52  ;;  %v1486_v30 = vmul.f32 %v7796_v42, %v1065_v56  ;;  %v8087_v1 = vpop.f32.mrf.mxu1  ;;  %v11461_v56 = vshll.u32 %v7869_v60, 16  ;;  %v1989_v0 = vunpack.c.l.b16 %v1925_v26  ;;  %v6877_v26 = vld [vmem:[#allocation5 + $0x158] sm:$0xff] }
 0x15e   : > { %2588 = vmatpush.bf16.msra.mxu2 %v6870_v44  ;;  %v1623_v44 = vmul.f32 %v7854_v41, %v8020_v28 }
 0x15f   : > { %v8089_v12 = vpack.c.bf16 %v1754_v58, %v1753_v17  ;;  %v1522_v19 = vadd.f32 %v7804_v45, %v1486_v30  ;;  %v2038_v30 = vor.u32 %v11461_v56, %v2035_v29  ;;  %v6867_v56 = vld [vmem:[#allocation5 + $0x108] sm:$0xff] }
 0x161   : > { %11727 = vst [vmem:[#allocation36_spill] sm:$0xff] %v8089_v12  ;;  %v1554_v52 = vmax.f32 %v1522_v19, 0.0  ;;  %v6878_v12 = vld [vmem:[#allocation5 + $0x160] sm:$0xff]  ;;  %v8115_v29 = vsel %vm8057_vm2, 0, %v2038_v30  ;;  %v6876_v30 = vld [vmem:[#allocation5 + $0x150] sm:$0xff] }
 0x162   : > { %v1233_v54 = vpop.f32.mrf.mxu2  ;;  %2677 = vmatpush.bf16.msra.mxu3 %v6878_v12  ;;  %11729 = vst [vmem:[#allocation38_spill] sm:$0xff] %v8115_v29  ;;  %2589 = vmatpush.bf16.msra.mxu2 %v6869_v25 }
 0x163   : > { %v1926_v61 = vpack.c.bf16 %v1554_v52, %v1554_v52  ;;  %v1620_v58 = vmul.f32 %v7873_v62, %v1233_v54 }
 0x164   : > { %v1068_v40 = vpop.f32.mrf.mxu0 }
 0x165   : > { %v8098_v17 = vpop.f32.mrf.mxu3  ;;  %v1990_v19 = vunpack.c.l.b16 %v1926_v61  ;;  %v1758_v34 = vadd.f32 %v7882_v8, %v1620_v58  ;;  %v1487_v23 = vmul.f32 %v7796_v42, %v1068_v40  ;;  %v8105_v20 = vpop.f32.mrf.mxu1  ;;  %v11463_v61 = vshrl.u32 %v7934_v13, 16  ;;  %v6868_v58 = vld [vmem:[#allocation5 + $0x110] sm:$0xff] }
 0x166   : > { %2678 = vmatpush.bf16.msra.mxu3 %v6877_v26  ;;  %2590 = vmatpush.bf16.msra.mxu2 %v6868_v58 }
 0x167   : > { %v8107_v52 = vpack.c.b16 %v1990_v19, %v1989_v0  ;;  %v8109_v54 = vpack.c.bf16 %v1758_v34, %v1757_v9  ;;  %1275 = vmatmul.bf16.gmra.mxu2 %v8015_v18  ;;  %1393 = vmatmul.bf16.gmra.mxu0 %v7720_v14  ;;  %v1523_v34 = vadd.f32 %v7804_v45, %v1487_v23 }
 0x168   : > { %2509 = vmatmul.bf16.gmra.mxu1 %v8115_v29 }
 0x169   : > { %11728 = vst [vmem:[#allocation37_spill] sm:$0xff] %v8109_v54  ;;  %v1555_v0 = vmax.f32 %v1523_v34, 0.0  ;;  %v6875_v54 = vld [vmem:[#allocation5 + $0x148] sm:$0xff] }
 0x16a   : > { %1364 = vmatmul.bf16.gmra.mxu3 %v8015_v18  ;;  %v1236_v9 = vpop.f32.mrf.mxu2  ;;  %v1761_v18 = vadd.f32 %v7877_v4, %v1623_v44  ;;  %v1627_v44 = vmul.f32 %v7854_v41, %v8040_v5  ;;  %2591 = vmatpush.bf16.msra.mxu2 %v6867_v56 }
 0x16b   : > { %v1624_v14 = vmul.f32 %v7873_v62, %v1236_v9  ;;  %2679 = vmatpush.bf16.msra.mxu3 %v6876_v30  ;;  %v2042_v9 = vrot.slane %v11463_v61, 7  ;;  %v1927_v34 = vpack.c.bf16 %v1555_v0, %v1555_v0  ;;  %v6866_v61 = vld [vmem:[#allocation5 + $0x100] sm:$0xff] }
 0x16c   : > { %v1070_v40 = vpop.f32.mrf.mxu0  ;;  %v1765_v63 = vadd.f32 %v7877_v4, %v1627_v44 }
 0x16d   : > { %v8123_v12 = vpop.f32.mrf.mxu3  ;;  %v1762_v19 = vadd.f32 %v7882_v8, %v1624_v14  ;;  %v1488_v28 = vmul.f32 %v7796_v42, %v1070_v40  ;;  %v8129_v23 = vpop.f32.mrf.mxu1  ;;  %v11467_v40 = vshll.u32 %v7934_v13, 16  ;;  %v1991_v0 = vunpack.c.l.b16 %v1927_v34 }
 0x16e   : > { %2592 = vmatpush.bf16.msra.mxu2 %v6866_v61  ;;  %v1631_v61 = vmul.f32 %v7854_v41, %v8063_v59 }
 0x16f   : > { %v8131_v25 = vpack.c.bf16 %v1762_v19, %v1761_v18  ;;  %v1524_v26 = vadd.f32 %v7804_v45, %v1488_v28  ;;  %2680 = vmatpush.bf16.msra.mxu3 %v6875_v54  ;;  %v2045_v28 = vor.u32 %v11467_v40, %v2042_v9 }
 0x171   : > { %11730 = vst [vmem:[#allocation39_spill] sm:$0xff] %v8131_v25  ;;  %v1556_v14 = vmax.f32 %v1524_v26, 0.0  ;;  %v6874_v25 = vld [vmem:[#allocation5 + $0x140] sm:$0xff]  ;;  %v8157_v9 = vsel %vm8057_vm2, 0, %v2045_v28 }
 0x172   : > { %v1238_v58 = vpop.f32.mrf.mxu2  ;;  %11732 = vst [vmem:[#allocation41_spill] sm:$0xff] %v8157_v9 }
 0x173   : > { %v1928_v30 = vpack.c.bf16 %v1556_v14, %v1556_v14  ;;  %v1628_v18 = vmul.f32 %v7873_v62, %v1238_v58  ;;  %2681 = vmatpush.bf16.msra.mxu3 %v6874_v25 }
 0x174   : > { %v1073_v5 = vpop.f32.mrf.mxu0 }
 0x175   : > { %v8140_v19 = vpop.f32.mrf.mxu3  ;;  %v1992_v26 = vunpack.c.l.b16 %v1928_v30  ;;  %v1766_v10 = vadd.f32 %v7882_v8, %v1628_v18  ;;  %v1489_v56 = vmul.f32 %v7796_v42, %v1073_v5  ;;  %v8147_v54 = vpop.f32.mrf.mxu1  ;;  %v1769_v30 = vadd.f32 %v7877_v4, %v1631_v61 }
 0x176   : > { %v11472_v61 = vshll.u32 %v7987_v32, 16 }
 0x177   : > { %v8149_v14 = vpack.c.b16 %v1992_v26, %v1991_v0  ;;  %v8151_v58 = vpack.c.bf16 %v1766_v10, %v1765_v63  ;;  %1280 = vmatmul.bf16.gmra.mxu2 %v7665_v53  ;;  %1398 = vmatmul.bf16.gmra.mxu0 %v7766_v36  ;;  %v1525_v25 = vadd.f32 %v7804_v45, %v1489_v56  ;;  %v11469_v36 = vshrl.u32 %v7987_v32, 16 }
 0x178   : > { %2514 = vmatmul.bf16.gmra.mxu1 %v8157_v9  ;;  %v1635_v56 = vmul.f32 %v7854_v41, %v8087_v1 }
 0x179   : > { %11731 = vst [vmem:[#allocation40_spill] sm:$0xff] %v8151_v58  ;;  %v1557_v18 = vmax.f32 %v1525_v25, 0.0  ;;  %v2049_v26 = vrot.slane %v11469_v36, 7 }
 0x17a   : > { %1369 = vmatmul.bf16.gmra.mxu3 %v7665_v53  ;;  %v1241_v44 = vpop.f32.mrf.mxu2 }
 0x17b   : > { %v1632_v10 = vmul.f32 %v7873_v62, %v1241_v44  ;;  %v1929_v44 = vpack.c.bf16 %v1557_v18, %v1557_v18 }
 0x17c   : > { %v1075_v34 = vpop.f32.mrf.mxu0 }
 0x17d   : > { %v8165_v63 = vpop.f32.mrf.mxu3  ;;  %v1770_v53 = vadd.f32 %v7882_v8, %v1632_v10  ;;  %v1490_v28 = vmul.f32 %v7796_v42, %v1075_v34  ;;  %v8171_v5 = vpop.f32.mrf.mxu1  ;;  %v1993_v36 = vunpack.c.l.b16 %v1929_v44 }
 0x17f   : > { %v8173_v59 = vpack.c.bf16 %v1770_v53, %v1769_v30  ;;  %v1526_v0 = vadd.f32 %v7804_v45, %v1490_v28  ;;  %v2052_v30 = vor.u32 %v11472_v61, %v2049_v26  ;;  %v1773_v53 = vadd.f32 %v7877_v4, %v1635_v56 }
 0x180   : > { %v1639_v56 = vmul.f32 %v7854_v41, %v8105_v20  ;;  %v11736_v20 = vshll.u32 %v7830_v11, 16 }
 0x181   : > { %11733 = vst [vmem:[#allocation42_spill] sm:$0xff] %v8173_v59  ;;  %v1558_v40 = vmax.f32 %v1526_v0, 0.0  ;;  %v8199_v26 = vsel %vm8057_vm2, 0, %v2052_v30 }
 0x182   : > { %v1243_v25 = vpop.f32.mrf.mxu2  ;;  %11735 = vst [vmem:[#allocation44_spill] sm:$0xff] %v8199_v26 }
 0x183   : > { %v1930_v10 = vpack.c.bf16 %v1558_v40, %v1558_v40  ;;  %v1636_v34 = vmul.f32 %v7873_v62, %v1243_v25 }
 0x184   : > { %v1078_v28 = vpop.f32.mrf.mxu0 }
 0x185   : > { %v8182_v58 = vpop.f32.mrf.mxu3  ;;  %v1994_v59 = vunpack.c.l.b16 %v1930_v10  ;;  %v1774_v1 = vadd.f32 %v7882_v8, %v1636_v34  ;;  %v1491_v18 = vmul.f32 %v7796_v42, %v1078_v28  ;;  %v8189_v0 = vpop.f32.mrf.mxu1  ;;  %v1777_v34 = vadd.f32 %v7877_v4, %v1639_v56 }
 0x186   : > { %v1643_v56 = vmul.f32 %v7854_v41, %v8129_v23 }
 0x187   : > { %v8191_v50 = vpack.c.b16 %v1994_v59, %v1993_v36  ;;  %v8193_v40 = vpack.c.bf16 %v1774_v1, %v1773_v53  ;;  %1285 = vmatmul.bf16.gmra.mxu2 %v7723_v15  ;;  %1403 = vmatmul.bf16.gmra.mxu0 %v7773_v37  ;;  %v1527_v36 = vadd.f32 %v7804_v45, %v1491_v18  ;;  %v11475_v37 = vshrl.u32 %v8022_v33, 16 }
 0x188   : > { %2519 = vmatmul.bf16.gmra.mxu1 %v8199_v26  ;;  %v2172_v1 = vrot.slane %v11736_v20, 1  ;;  %v1781_v23 = vadd.f32 %v7877_v4, %v1643_v56 }
 0x189   : > { %11734 = vst [vmem:[#allocation43_spill] sm:$0xff] %v8193_v40  ;;  %v1559_v30 = vmax.f32 %v1527_v36, 0.0  ;;  %v2056_v61 = vrot.slane %v11475_v37, 7 }
 0x18a   : > { %1374 = vmatmul.bf16.gmra.mxu3 %v7723_v15  ;;  %v1246_v59 = vpop.f32.mrf.mxu2 }
 0x18b   : > { %v1640_v44 = vmul.f32 %v7873_v62, %v1246_v59  ;;  %v1931_v36 = vpack.c.bf16 %v1559_v30, %v1559_v30 }
 0x18c   : > { %v1080_v10 = vpop.f32.mrf.mxu0 }
 0x18d   : > { %v8207_v25 = vpop.f32.mrf.mxu3  ;;  %v1778_v15 = vadd.f32 %v7882_v8, %v1640_v44  ;;  %v1492_v53 = vmul.f32 %v7796_v42, %v1080_v10  ;;  %v8213_v28 = vpop.f32.mrf.mxu1  ;;  %v11482_v10 = vshll.u32 %v8022_v33, 16 }
 0x18f   : > { %v8217_v18 = vpack.c.bf16 %v1778_v15, %v1777_v34  ;;  %v1528_v59 = vadd.f32 %v7804_v45, %v1492_v53  ;;  %v2059_v15 = vor.u32 %v11482_v10, %v2056_v61  ;;  %v11738_v53 = vshrl.u32 %v7830_v11, 16 }
 0x190   : > { %v11747_v10 = vshll.u32 %v7869_v60, 16 }
 0x191   : > { %11737 = vst [vmem:[#allocation45_spill] sm:$0xff] %v8217_v18  ;;  %v1560_v44 = vmax.f32 %v1528_v59, 0.0  ;;  %v2173_v37 = vor.u32 %v2172_v1, %v11738_v53  ;;  %v1995_v59 = vunpack.c.l.b16 %v1931_v36  ;;  %v8248_v1 = vsel %vm8057_vm2, 0, %v2059_v15 }
 0x192   : > { %v1248_v40 = vpop.f32.mrf.mxu2  ;;  %11743 = vst [vmem:[#allocation48_spill] sm:$0xff] %v8248_v1 }
 0x193   : > { %v1932_v43 = vpack.c.bf16 %v1560_v44, %v1560_v44  ;;  %v1644_v20 = vmul.f32 %v7873_v62, %v1248_v40 }
 0x194   : > { %v1083_v18 = vpop.f32.mrf.mxu0 }
 0x195   : > { %v8226_v34 = vpop.f32.mrf.mxu3  ;;  %v1996_v31 = vunpack.c.l.b16 %v1932_v43  ;;  %v1782_v44 = vadd.f32 %v7882_v8, %v1644_v20  ;;  %v1493_v40 = vmul.f32 %v7796_v42, %v1083_v18  ;;  %v8239_v26 = vpop.f32.mrf.mxu1  ;;  %v8253_v43 = vsel %vm8233_vm5, %v2173_v37, 0 }
 0x196   : > { %11744 = vst [vmem:[#allocation49_spill] sm:$0xff] %v8253_v43  ;;  %v11487_v20 = vshrl.u32 %v8065_v6, 16 }
 0x197   : > { %v8241_v9 = vpack.c.b16 %v1996_v31, %v1995_v59  ;;  %v8243_v61 = vpack.c.bf16 %v1782_v44, %v1781_v23  ;;  %1408 = vmatmul.bf16.gmra.mxu0 %v7780_v38  ;;  %2593 = vmatmul.bf16.vlgmr.msra.gmra.mxu2 %v7830_v11  ;;  %v1647_v31 = vmul.f32 %v7854_v41, %v8147_v54 }
 0x198   : > { %2524 = vmatmul.bf16.gmra.mxu1 %v8248_v1  ;;  %v1529_v18 = vadd.f32 %v7804_v45, %v1493_v40 }
 0x199   : > { %11741 = vst [vmem:[#allocation46_spill] sm:$0xff] %v8241_v9  ;;  %v1785_v37 = vadd.f32 %v7877_v4, %v1647_v31  ;;  %v1651_v31 = vmul.f32 %v7854_v41, %v8171_v5 }
 0x19a   : > { %11742 = vst [vmem:[#allocation47_spill] sm:$0xff] %v8243_v61  ;;  %2682 = vmatmul.bf16.vlgmr.msra.gmra.mxu3 %v8253_v43  ;;  %v1251_v38 = vpop.f32.mrf.mxu2  ;;  %v1561_v53 = vmax.f32 %v1529_v18, 0.0  ;;  %v2174_v61 = vrot.slane %v11747_v10, 1 }
 0x19b   : > { %v1648_v56 = vmul.f32 %v7873_v62, %v1251_v38  ;;  %v2063_v38 = vrot.slane %v11487_v20, 7  ;;  %v11749_v20 = vshrl.u32 %v7869_v60, 16 }
 0x19c   : > { %v1085_v15 = vpop.f32.mrf.mxu0  ;;  %v1933_v18 = vpack.c.bf16 %v1561_v53, %v1561_v53 }
 0x19d   : > { %v8261_v36 = vpop.f32.mrf.mxu3  ;;  %v1786_v23 = vadd.f32 %v7882_v8, %v1648_v56  ;;  %v1494_v59 = vmul.f32 %v7796_v42, %v1085_v15  ;;  %v8267_v44 = vpop.f32.mrf.mxu1  ;;  %v11493_v56 = vshll.u32 %v8065_v6, 16  ;;  %v2175_v10 = vor.u32 %v2174_v61, %v11749_v20 }
 0x19e   : > { %11745 = vst [vmem:[#allocation50_spill] sm:$0xff] %v8261_v36  ;;  %v1997_v53 = vunpack.c.l.b16 %v1933_v18 }
 0x19f   : > { %v8269_v54 = vpack.c.bf16 %v1786_v23, %v1785_v37  ;;  %v1530_v40 = vadd.f32 %v7804_v45, %v1494_v59  ;;  %v2066_v59 = vor.u32 %v11493_v56, %v2063_v38 }
 0x1a1   : > { %11746 = vst [vmem:[#allocation51_spill] sm:$0xff] %v8269_v54  ;;  %v1562_v43 = vmax.f32 %v1530_v40, 0.0  ;;  %v1789_v54 = vadd.f32 %v7877_v4, %v1651_v31  ;;  %v8298_v61 = vsel %vm8057_vm2, 0, %v2066_v59  ;;  %v11496_v31 = vshrl.u32 %v8107_v52, 16 }
 0x1a2   : > { %v1253_v15 = vpop.f32.mrf.mxu2  ;;  %11752 = vst [vmem:[#allocation55_spill] sm:$0xff] %v8298_v61 }
 0x1a3   : > { %v1934_v1 = vpack.c.bf16 %v1562_v43, %v1562_v43  ;;  %v1652_v37 = vmul.f32 %v7873_v62, %v1253_v15 }
 0x1a4   : > { %v1088_v5 = vpop.f32.mrf.mxu0 }
 0x1a5   : > { %v8280_v23 = vpop.f32.mrf.mxu3  ;;  %v1998_v40 = vunpack.c.l.b16 %v1934_v1  ;;  %v1790_v29 = vadd.f32 %v7882_v8, %v1652_v37  ;;  %v1495_v11 = vmul.f32 %v7796_v42, %v1088_v5  ;;  %v8289_v43 = vpop.f32.mrf.mxu1  ;;  %v8303_v1 = vsel %vm8233_vm5, %v2175_v10, 0  ;;  %v8319_v10 = vld [vmem:[%s11708_s2] ss:$0 sm:$0xff] }
 0x1a6   : > { %11748 = vst [vmem:[#allocation52_spill] sm:$0xff] %v8280_v23  ;;  %v7109_v23 = vld [vmem:[%s7539_s23 + $0x28] sm:$0xff]  ;;  %v1655_v42 = vmul.f32 %v7854_v41, %v8189_v0  ;;  %v8329_v5 = vld [vmem:[%s11429_s3] ss:$0 sm:$0xff] }
 0x1a7   : > { %v8291_v15 = vpack.c.b16 %v1998_v40, %v1997_v53  ;;  %v8293_v7 = vpack.c.bf16 %v1790_v29, %v1789_v54  ;;  %1413 = vmatmul.bf16.gmra.mxu0 %v7109_v23  ;;  %2598 = vmatmul.bf16.gmra.mxu2 %v7869_v60  ;;  %11753 = vst [vmem:[#allocation56_spill] sm:$0xff] %v8303_v1  ;;  %v2070_v40 = vrot.slane %v11496_v31, 7  ;;  %v11758_v31 = vshrl.u32 %v7934_v13, 16 }
 0x1a8   : > { %2529 = vmatmul.bf16.gmra.mxu1 %v8298_v61  ;;  %v1531_v29 = vadd.f32 %v7804_v45, %v1495_v11  ;;  %v1793_v37 = vadd.f32 %v7877_v4, %v1655_v42  ;;  %v11756_v42 = vshll.u32 %v7934_v13, 16 }
 0x1a9   : > { %11750 = vst [vmem:[#allocation53_spill] sm:$0xff] %v8291_v15 }
 0x1aa   : > { %11751 = vst [vmem:[#allocation54_spill] sm:$0xff] %v8293_v7  ;;  %2687 = vmatmul.bf16.gmra.mxu3 %v8303_v1  ;;  %v1256_v20 = vpop.f32.mrf.mxu2  ;;  %v1563_v23 = vmax.f32 %v1531_v29, 0.0  ;;  %v2176_v29 = vrot.slane %v11756_v42, 1 }
 0x1ab   : > { %v1656_v54 = vmul.f32 %v7873_v62, %v1256_v20  ;;  %v1659_v20 = vmul.f32 %v7854_v41, %v8213_v28 }
 0x1ac   : > { %v1090_v18 = vpop.f32.mrf.mxu0  ;;  %v2177_v42 = vor.u32 %v2176_v29, %v11758_v31  ;;  %v11507_v29 = vshrl.u32 %v8149_v14, 16 }
 0x1ad   : > { %v8311_v38 = vpop.f32.mrf.mxu3  ;;  %v1794_v59 = vadd.f32 %v7882_v8, %v1656_v54  ;;  %v1496_v45 = vmul.f32 %v8319_v10, %v1090_v18  ;;  %v8322_v11 = vpop.f32.mrf.mxu1  ;;  %v1935_v54 = vpack.c.bf16 %v1563_v23, %v1563_v23  ;;  %v1797_v1 = vadd.f32 %v7877_v4, %v1659_v20 }
 0x1ae   : > { %11754 = vst [vmem:[#allocation57_spill] sm:$0xff] %v8311_v38  ;;  %v7112_v38 = vld [vmem:[%s7539_s23 + $0x30] sm:$0xff] }
 0x1af   : > { %v8324_v0 = vpack.c.bf16 %v1794_v59, %v1793_v37  ;;  %v1532_v53 = vadd.f32 %v8329_v5, %v1496_v45  ;;  %v11503_v37 = vshll.u32 %v8107_v52, 16  ;;  %v1999_v23 = vunpack.c.l.b16 %v1935_v54 }
 0x1b1   : > { %11755 = vst [vmem:[#allocation58_spill] sm:$0xff] %v8324_v0  ;;  %v1564_v18 = vmax.f32 %v1532_v53, 0.0  ;;  %v2073_v45 = vor.u32 %v11503_v37, %v2070_v40 }
 0x1b2   : > { %v1258_v59 = vpop.f32.mrf.mxu2 }
 0x1b3   : > { %v1936_v56 = vpack.c.bf16 %v1564_v18, %v1564_v18  ;;  %v1660_v0 = vmul.f32 %v7873_v62, %v1258_v59  ;;  %v8358_v31 = vsel %vm8057_vm2, 0, %v2073_v45 }
 0x1b4   : > { %v1093_v28 = vpop.f32.mrf.mxu0  ;;  %11760 = vst [vmem:[#allocation61_spill] sm:$0xff] %v8358_v31 }
 0x1b5   : > { %v8340_v7 = vpop.f32.mrf.mxu3  ;;  %v2000_v53 = vunpack.c.l.b16 %v1936_v56  ;;  %v1798_v61 = vadd.f32 %v7882_v8, %v1660_v0  ;;  %v1497_v60 = vmul.f32 %v8319_v10, %v1093_v28  ;;  %v8349_v18 = vpop.f32.mrf.mxu1  ;;  %v8363_v56 = vsel %vm8233_vm5, %v2177_v42, 0 }
 0x1b6   : > { %11757 = vst [vmem:[#allocation59_spill] sm:$0xff] %v8340_v7 }
 0x1b7   : > { %v8351_v59 = vpack.c.b16 %v2000_v53, %v1999_v23  ;;  %v8353_v7 = vpack.c.bf16 %v1798_v61, %v1797_v1  ;;  %1418 = vmatmul.bf16.gmra.mxu0 %v7112_v38  ;;  %2603 = vmatmul.bf16.gmra.mxu2 %v7934_v13  ;;  %11761 = vst [vmem:[#allocation62_spill] sm:$0xff] %v8363_v56  ;;  %v2077_v53 = vrot.slane %v11507_v29, 7  ;;  %v11766_v29 = vshrl.u32 %v7987_v32, 16 }
 0x1b8   : > { %2534 = vmatmul.bf16.gmra.mxu1 %v8358_v31  ;;  %v1663_v61 = vmul.f32 %v7854_v41, %v8239_v26  ;;  %v1533_v1 = vadd.f32 %v8329_v5, %v1497_v60 }
 0x1b9   : > { %11759 = vst [vmem:[#allocation60_spill] sm:$0xff] %v8353_v7 }
 0x1ba   : > { %2692 = vmatmul.bf16.gmra.mxu3 %v8363_v56  ;;  %v1261_v38 = vpop.f32.mrf.mxu2  ;;  %v1801_v54 = vadd.f32 %v7877_v4, %v1663_v61  ;;  %v1565_v45 = vmax.f32 %v1533_v1, 0.0  ;;  %v1667_v61 = vmul.f32 %v7854_v41, %v8267_v44 }
 0x1bb   : > { %v1664_v0 = vmul.f32 %v7873_v62, %v1261_v38  ;;  %v11764_v38 = vshll.u32 %v7987_v32, 16 }
 0x1bc   : > { %v1095_v20 = vpop.f32.mrf.mxu0  ;;  %v1937_v1 = vpack.c.bf16 %v1565_v45, %v1565_v45 }
 0x1bd   : > { %v8371_v40 = vpop.f32.mrf.mxu3  ;;  %v1802_v42 = vadd.f32 %v7882_v8, %v1664_v0  ;;  %v1498_v28 = vmul.f32 %v8319_v10, %v1095_v20  ;;  %v8377_v23 = vpop.f32.mrf.mxu1  ;;  %v2178_v37 = vrot.slane %v11764_v38, 1  ;;  %v11513_v0 = vshll.u32 %v8149_v14, 16 }
 0x1be   : > { %11762 = vst [vmem:[#allocation63_spill] sm:$0xff] %v8371_v40  ;;  %v2001_v45 = vunpack.c.l.b16 %v1937_v1  ;;  %v7113_v40 = vld [vmem:[%s7539_s23 + $0x38] sm:$0xff] }
 0x1bf   : > { %v8379_v26 = vpack.c.bf16 %v1802_v42, %v1801_v54  ;;  %v1534_v60 = vadd.f32 %v8329_v5, %v1498_v28  ;;  %v2080_v28 = vor.u32 %v11513_v0, %v2077_v53  ;;  %v2179_v38 = vor.u32 %v2178_v37, %v11766_v29  ;;  %v7114_v1 = vld [vmem:[%s11436_s10] sm:$0xf] }
 0x1c1   : > { %11763 = vst [vmem:[#allocation64_spill] sm:$0xff] %v8379_v26  ;;  %v1566_v7 = vmax.f32 %v1534_v60, 0.0  ;;  %v1805_v26 = vadd.f32 %v7877_v4, %v1667_v61  ;;  %v8408_v37 = vsel %vm8057_vm2, 0, %v2080_v28 }
 0x1c2   : > { %v1263_v20 = vpop.f32.mrf.mxu2  ;;  %11769 = vst [vmem:[#allocation68_spill] sm:$0xff] %v8408_v37 }
 0x1c3   : > { %v1938_v56 = vpack.c.bf16 %v1566_v7, %v1566_v7  ;;  %v1668_v54 = vmul.f32 %v7873_v62, %v1263_v20 }
 0x1c4   : > { %v1098_v44 = vpop.f32.mrf.mxu0 }
 0x1c5   : > { %v8390_v42 = vpop.f32.mrf.mxu3  ;;  %v2002_v60 = vunpack.c.l.b16 %v1938_v56  ;;  %v1806_v31 = vadd.f32 %v7882_v8, %v1668_v54  ;;  %v1499_v13 = vmul.f32 %v8319_v10, %v1098_v44  ;;  %v8399_v7 = vpop.f32.mrf.mxu1  ;;  %v8413_v56 = vsel %vm8233_vm5, %v2179_v38, 0 }
 0x1c6   : > { %11765 = vst [vmem:[#allocation65_spill] sm:$0xff] %v8390_v42  ;;  %v8427_v54 = vperm.slane %v7114_v1, 2 }
 0x1c7   : > { %v8401_v20 = vpack.c.b16 %v2002_v60, %v2001_v45  ;;  %v8403_v42 = vpack.c.bf16 %v1806_v31, %v1805_v26  ;;  %1423 = vmatmul.bf16.gmra.mxu0 %v7113_v40  ;;  %2608 = vmatmul.bf16.gmra.mxu2 %v7987_v32  ;;  %11770 = vst [vmem:[#allocation69_spill] sm:$0xff] %v8413_v56  ;;  %v11772_v60 = vshll.u32 %v8022_v33, 16 }
 0x1c8   : > { %2539 = vmatmul.bf16.gmra.mxu1 %v8408_v37  ;;  %v1671_v31 = vmul.f32 %v7854_v41, %v8289_v43  ;;  %v1535_v29 = vadd.f32 %v8329_v5, %v1499_v13 }
 0x1c9   : > { %11767 = vst [vmem:[#allocation66_spill] sm:$0xff] %v8401_v20 }
 0x1ca   : > { %11768 = vst [vmem:[#allocation67_spill] sm:$0xff] %v8403_v42  ;;  %2697 = vmatmul.bf16.gmra.mxu3 %v8413_v56  ;;  %v1266_v40 = vpop.f32.mrf.mxu2  ;;  %v1809_v38 = vadd.f32 %v7877_v4, %v1671_v31  ;;  %v1567_v44 = vmax.f32 %v1535_v29, 0.0  ;;  %v11774_v42 = vshrl.u32 %v8191_v50, 16  ;;  %v1585_v31 = vmul.f32 %v8427_v54, %v7891_v16  ;;  %v7115_v29 = vld [vmem:[%s11437_s11] sm:$0xf] }
 0x1cb   : > { %v1672_v26 = vmul.f32 %v7873_v62, %v1266_v40  ;;  %v2180_v40 = vrot.slane %v11772_v60, 1  ;;  %v8458_v32 = vperm.slane %v7115_v29, 3 }
 0x1cc   : > { %v1100_v28 = vpop.f32.mrf.mxu0  ;;  %v2084_v56 = vrot.slane %v11774_v42, 7  ;;  %v11775_v42 = vshrl.u32 %v8022_v33, 16 }
 0x1cd   : > { %v8421_v53 = vpop.f32.mrf.mxu3  ;;  %v1810_v43 = vadd.f32 %v7882_v8, %v1672_v26  ;;  %v1500_v13 = vmul.f32 %v8319_v10, %v1100_v28  ;;  %v8432_v45 = vpop.f32.mrf.mxu1  ;;  %v8446_v10 = vperm.slane %v7115_v29, 2  ;;  %v1675_v26 = vmul.f32 %v7854_v41, %v8322_v11 }
 0x1ce   : > { %11771 = vst [vmem:[#allocation70_spill] sm:$0xff] %v8421_v53  ;;  %v1939_v28 = vpack.c.bf16 %v1567_v44, %v1567_v44  ;;  %v2181_v60 = vor.u32 %v2180_v40, %v11775_v42 }
 0x1cf   : > { %v8436_v0 = vpack.c.bf16 %v1810_v43, %v1809_v38  ;;  %v1536_v61 = vadd.f32 %v8329_v5, %v1500_v13  ;;  %v8450_v43 = vperm.slane %v7114_v1, 3  ;;  %v11522_v5 = vshll.u32 %v8191_v50, 16 }
 0x1d0   : > { %v1813_v1 = vadd.f32 %v7877_v4, %v1675_v26  ;;  %v2003_v53 = vunpack.c.l.b16 %v1939_v28  ;;  %v8470_v29 = vsel %vm8233_vm5, %v2181_v60, 0  ;;  %v7116_v26 = vld [vmem:[%s7539_s23 + $0x40] sm:$0xff] }
 0x1d1   : > { %11773 = vst [vmem:[#allocation71_spill] sm:$0xff] %v8436_v0  ;;  %v1568_v38 = vmax.f32 %v1536_v61, 0.0  ;;  %v2087_v11 = vor.u32 %v11522_v5, %v2084_v56  ;;  %v1723_v61 = vadd.f32 %v8446_v10, %v1585_v31  ;;  %v11782_v5 = vshll.u32 %v8065_v6, 16 }
 0x1d2   : > { %v1268_v13 = vpop.f32.mrf.mxu2  ;;  %11776 = vst [vmem:[#allocation72_spill] sm:$0xff] %v8470_v29 }
 0x1d3   : > { %v1940_v16 = vpack.c.bf16 %v1568_v38, %v1568_v38  ;;  %v1676_v0 = vmul.f32 %v7873_v62, %v1268_v13  ;;  %v8480_v28 = vsel %vm8057_vm2, 0, %v2087_v11  ;;  %v11524_v11 = vshrl.u32 %v8241_v9, 16 }
 0x1d4   : > { %v1389_v44 = vpop.f32.mrf.mxu0  ;;  %11779 = vst [vmem:[#allocation75_spill] sm:$0xff] %v8480_v28 }
 0x1d5   : > { %v8456_v37 = vpop.f32.mrf.mxu3  ;;  %v2004_v36 = vunpack.c.l.b16 %v1940_v16  ;;  %v1814_v40 = vadd.f32 %v7882_v8, %v1676_v0  ;;  %v1586_v38 = vmul.f32 %v8450_v43, %v1389_v44  ;;  %v8466_v13 = vpop.f32.mrf.mxu1 }
 0x1d7   : > { %v8472_v42 = vpack.c.b16 %v2004_v36, %v2003_v53  ;;  %v8474_v56 = vpack.c.bf16 %v1814_v40, %v1813_v1  ;;  %v1724_v31 = vadd.f32 %v8458_v32, %v1586_v38  ;;  %1428 = vmatmul.bf16.gmra.mxu0 %v7116_v26  ;;  %2613 = vmatmul.bf16.gmra.mxu2 %v8022_v33 }
 0x1d8   : > { %2544 = vmatmul.bf16.gmra.mxu1 %v8480_v28  ;;  %v1679_v36 = vmul.f32 %v7854_v41, %v8349_v18  ;;  %v1589_v53 = vmul.f32 %v8427_v54, %v7918_v57  ;;  %v7117_v28 = vld [vmem:[%s7539_s23 + $0x48] sm:$0xff] }
 0x1d9   : > { %11777 = vst [vmem:[#allocation73_spill] sm:$0xff] %v8472_v42  ;;  %v8487_v0 = vpack.c.bf16 %v1724_v31, %v1723_v61 }
 0x1da   : > { %11778 = vst [vmem:[#allocation74_spill] sm:$0xff] %v8474_v56  ;;  %2702 = vmatmul.bf16.gmra.mxu3 %v8470_v29  ;;  %v1271_v60 = vpop.f32.mrf.mxu2  ;;  %v1817_v40 = vadd.f32 %v7877_v4, %v1679_v36  ;;  %v1727_v61 = vadd.f32 %v8446_v10, %v1589_v53  ;;  %v2182_v56 = vrot.slane %v11782_v5, 1  ;;  %v1593_v36 = vmul.f32 %v8427_v54, %v7952_v3 }
 0x1db   : > { %11780 = vst [vmem:[#allocation76_spill] sm:$0xff] %v8487_v0  ;;  %v1680_v16 = vmul.f32 %v7873_v62, %v1271_v60  ;;  %v2091_v60 = vrot.slane %v11524_v11, 7  ;;  %v11532_v53 = vshll.u32 %v8241_v9, 16  ;;  %v11784_v5 = vshrl.u32 %v8065_v6, 16 }
 0x1dc   : > { %v1391_v44 = vpop.f32.mrf.mxu0  ;;  %v1731_v0 = vadd.f32 %v8446_v10, %v1593_v36  ;;  %v1687_v36 = vmul.f32 %v7854_v41, %v8399_v7 }
 0x1dd   : > { %v8492_v1 = vpop.f32.mrf.mxu3  ;;  %v1818_v38 = vadd.f32 %v7882_v8, %v1680_v16  ;;  %v1590_v26 = vmul.f32 %v8450_v43, %v1391_v44  ;;  %v8498_v18 = vpop.f32.mrf.mxu1  ;;  %v1683_v16 = vmul.f32 %v7854_v41, %v8377_v23  ;;  %v2094_v11 = vor.u32 %v11532_v53, %v2091_v60 }
 0x1de   : > { %v11790_v53 = vshll.u32 %v8107_v52, 16 }
 0x1df   : > { %v8501_v31 = vpack.c.bf16 %v1818_v38, %v1817_v40  ;;  %v1728_v57 = vadd.f32 %v8458_v32, %v1590_v26  ;;  %v1821_v23 = vadd.f32 %v7877_v4, %v1683_v16 }
 0x1e1   : > { %11781 = vst [vmem:[#allocation77_spill] sm:$0xff] %v8501_v31  ;;  %v8512_v44 = vpack.c.bf16 %v1728_v57, %v1727_v61  ;;  %v2183_v31 = vor.u32 %v2182_v56, %v11784_v5  ;;  %v8534_v56 = vsel %vm8057_vm2, 0, %v2094_v11 }
 0x1e2   : > { %v1273_v40 = vpop.f32.mrf.mxu2  ;;  %11786 = vst [vmem:[#allocation80_spill] sm:$0xff] %v8534_v56 }
 0x1e3   : > { %11783 = vst [vmem:[#allocation78_spill] sm:$0xff] %v8512_v44  ;;  %v1684_v38 = vmul.f32 %v7873_v62, %v1273_v40  ;;  %v8539_v60 = vsel %vm8233_vm5, %v2183_v31, 0  ;;  %v11534_v31 = vshrl.u32 %v8291_v15, 16 }
 0x1e4   : > { %v1394_v3 = vpop.f32.mrf.mxu0  ;;  %11787 = vst [vmem:[#allocation81_spill] sm:$0xff] %v8539_v60 }
 0x1e5   : > { %v8516_v26 = vpop.f32.mrf.mxu3  ;;  %v1822_v61 = vadd.f32 %v7882_v8, %v1684_v38  ;;  %v1594_v57 = vmul.f32 %v8450_v43, %v1394_v3  ;;  %v8526_v44 = vpop.f32.mrf.mxu1 }
 0x1e7   : > { %v8528_v40 = vpack.c.bf16 %v1822_v61, %v1821_v23  ;;  %v1732_v29 = vadd.f32 %v8458_v32, %v1594_v57  ;;  %1433 = vmatmul.bf16.gmra.mxu0 %v7117_v28  ;;  %2618 = vmatmul.bf16.gmra.mxu2 %v8065_v6  ;;  %v1597_v28 = vmul.f32 %v8427_v54, %v7977_v47 }
 0x1e8   : > { %2549 = vmatmul.bf16.gmra.mxu1 %v8534_v56  ;;  %v1825_v23 = vadd.f32 %v7877_v4, %v1687_v36  ;;  %v1601_v36 = vmul.f32 %v8427_v54, %v7999_v48  ;;  %v7118_v56 = vld [vmem:[%s7539_s23 + $0x50] sm:$0xff] }
 0x1e9   : > { %11785 = vst [vmem:[#allocation79_spill] sm:$0xff] %v8528_v40  ;;  %v8545_v16 = vpack.c.bf16 %v1732_v29, %v1731_v0  ;;  %v1735_v29 = vadd.f32 %v8446_v10, %v1597_v28  ;;  %v2184_v40 = vrot.slane %v11790_v53, 1  ;;  %v11542_v28 = vshll.u32 %v8291_v15, 16 }
 0x1ea   : > { %2707 = vmatmul.bf16.gmra.mxu3 %v8539_v60  ;;  %v1276_v11 = vpop.f32.mrf.mxu2  ;;  %v11792_v53 = vshrl.u32 %v8107_v52, 16 }
 0x1eb   : > { %11788 = vst [vmem:[#allocation82_spill] sm:$0xff] %v8545_v16  ;;  %v1688_v38 = vmul.f32 %v7873_v62, %v1276_v11  ;;  %v2098_v11 = vrot.slane %v11534_v31, 7  ;;  %v1739_v16 = vadd.f32 %v8446_v10, %v1601_v36  ;;  %v1695_v36 = vmul.f32 %v7854_v41, %v7813_v51 }
 0x1ec   : > { %v1396_v3 = vpop.f32.mrf.mxu0 }
 0x1ed   : > { %v8550_v5 = vpop.f32.mrf.mxu3  ;;  %v1826_v61 = vadd.f32 %v7882_v8, %v1688_v38  ;;  %v1598_v57 = vmul.f32 %v8450_v43, %v1396_v3  ;;  %v8556_v7 = vpop.f32.mrf.mxu1  ;;  %v1691_v38 = vmul.f32 %v7854_v41, %v8432_v45  ;;  %v2101_v31 = vor.u32 %v11542_v28, %v2098_v11 }
 0x1ee   : > { %v11798_v28 = vshll.u32 %v8149_v14, 16 }
 0x1ef   : > { %v8559_v0 = vpack.c.bf16 %v1826_v61, %v1825_v23  ;;  %v1736_v47 = vadd.f32 %v8458_v32, %v1598_v57  ;;  %v1829_v45 = vadd.f32 %v7877_v4, %v1691_v38 }
 0x1f1   : > { %11789 = vst [vmem:[#allocation83_spill] sm:$0xff] %v8559_v0  ;;  %v8570_v3 = vpack.c.bf16 %v1736_v47, %v1735_v29  ;;  %v2185_v0 = vor.u32 %v2184_v40, %v11792_v53  ;;  %v8592_v40 = vsel %vm8057_vm2, 0, %v2101_v31 }
 0x1f2   : > { %v1278_v23 = vpop.f32.mrf.mxu2  ;;  %11794 = vst [vmem:[#allocation86_spill] sm:$0xff] %v8592_v40 }
 0x1f3   : > { %11791 = vst [vmem:[#allocation84_spill] sm:$0xff] %v8570_v3  ;;  %v1692_v61 = vmul.f32 %v7873_v62, %v1278_v23  ;;  %v8597_v11 = vsel %vm8233_vm5, %v2185_v0, 0  ;;  %v11544_v0 = vshrl.u32 %v8351_v59, 16 }
 0x1f4   : > { %v1399_v48 = vpop.f32.mrf.mxu0  ;;  %11795 = vst [vmem:[#allocation87_spill] sm:$0xff] %v8597_v11 }
 0x1f5   : > { %v8574_v57 = vpop.f32.mrf.mxu3  ;;  %v1830_v29 = vadd.f32 %v7882_v8, %v1692_v61  ;;  %v1602_v47 = vmul.f32 %v8450_v43, %v1399_v48  ;;  %v8584_v3 = vpop.f32.mrf.mxu1 }
 0x1f7   : > { %v8586_v23 = vpack.c.bf16 %v1830_v29, %v1829_v45  ;;  %v1740_v60 = vadd.f32 %v8458_v32, %v1602_v47  ;;  %1438 = vmatmul.bf16.gmra.mxu0 %v7118_v56  ;;  %2623 = vmatmul.bf16.gmra.mxu2 %v8107_v52  ;;  %v1605_v56 = vmul.f32 %v8427_v54, %v8012_v27 }
 0x1f8   : > { %2554 = vmatmul.bf16.gmra.mxu1 %v8592_v40  ;;  %v1833_v45 = vadd.f32 %v7877_v4, %v1695_v36  ;;  %v1699_v36 = vmul.f32 %v7854_v41, %v7821_v2  ;;  %v7119_v40 = vld [vmem:[%s7539_s23 + $0x58] sm:$0xff] }
 0x1f9   : > { %11793 = vst [vmem:[#allocation85_spill] sm:$0xff] %v8586_v23  ;;  %v8603_v38 = vpack.c.bf16 %v1740_v60, %v1739_v16  ;;  %v1743_v60 = vadd.f32 %v8446_v10, %v1605_v56  ;;  %v2186_v23 = vrot.slane %v11798_v28, 1  ;;  %v11552_v56 = vshll.u32 %v8351_v59, 16 }
 0x1fa   : > { %2712 = vmatmul.bf16.gmra.mxu3 %v8597_v11  ;;  %v1281_v31 = vpop.f32.mrf.mxu2  ;;  %v11800_v28 = vshrl.u32 %v8149_v14, 16 }
 0x1fb   : > { %11796 = vst [vmem:[#allocation88_spill] sm:$0xff] %v8603_v38  ;;  %v1696_v61 = vmul.f32 %v7873_v62, %v1281_v31  ;;  %v2105_v31 = vrot.slane %v11544_v0, 7  ;;  %v1837_v38 = vadd.f32 %v7877_v4, %v1699_v36 }
 0x1fc   : > { %v1401_v48 = vpop.f32.mrf.mxu0 }
 0x1fd   : > { %v8608_v53 = vpop.f32.mrf.mxu3  ;;  %v1834_v29 = vadd.f32 %v7882_v8, %v1696_v61  ;;  %v1606_v47 = vmul.f32 %v8450_v43, %v1401_v48  ;;  %v8614_v51 = vpop.f32.mrf.mxu1  ;;  %v1609_v61 = vmul.f32 %v8427_v54, %v8034_v55  ;;  %v2108_v0 = vor.u32 %v11552_v56, %v2105_v31 }
 0x1fe   : > { %v11804_v56 = vshll.u32 %v8191_v50, 16 }
 0x1ff   : > { %v8617_v16 = vpack.c.bf16 %v1834_v29, %v1833_v45  ;;  %v1744_v27 = vadd.f32 %v8458_v32, %v1606_v47  ;;  %v1747_v55 = vadd.f32 %v8446_v10, %v1609_v61 }
 0x201   : > { %11797 = vst [vmem:[#allocation89_spill] sm:$0xff] %v8617_v16  ;;  %v8628_v48 = vpack.c.bf16 %v1744_v27, %v1743_v60  ;;  %v2187_v16 = vor.u32 %v2186_v23, %v11800_v28  ;;  %v8650_v23 = vsel %vm8057_vm2, 0, %v2108_v0 }
 0x202   : > { %v1283_v45 = vpop.f32.mrf.mxu2 }
 0x203   : > { %11799 = vst [vmem:[#allocation90_spill] sm:$0xff] %v8628_v48  ;;  %v1700_v29 = vmul.f32 %v7873_v62, %v1283_v45  ;;  %v8655_v31 = vsel %vm8233_vm5, %v2187_v16, 0  ;;  %v11554_v16 = vshrl.u32 %v8401_v20, 16 }
 0x204   : > { %v1404_v2 = vpop.f32.mrf.mxu0 }
 0x205   : > { %v8632_v47 = vpop.f32.mrf.mxu3  ;;  %v1838_v60 = vadd.f32 %v7882_v8, %v1700_v29  ;;  %v1610_v27 = vmul.f32 %v8450_v43, %v1404_v2  ;;  %v8642_v48 = vpop.f32.mrf.mxu1 }
 0x207   : > { %v8644_v45 = vpack.c.bf16 %v1838_v60, %v1837_v38  ;;  %v1748_v11 = vadd.f32 %v8458_v32, %v1610_v27  ;;  %1443 = vmatmul.bf16.gmra.mxu0 %v7119_v40  ;;  %2628 = vmatmul.bf16.gmra.mxu2 %v8149_v14  ;;  %v1703_v38 = vmul.f32 %v7854_v41, %v7836_v21 }
 0x208   : > { %2559 = vmatmul.bf16.gmra.mxu1 %v8650_v23  ;;  %v1613_v40 = vmul.f32 %v8427_v54, %v8051_v35 }
 0x209   : > { %11801 = vst [vmem:[#allocation91_spill] sm:$0xff] %v8644_v45  ;;  %v8661_v36 = vpack.c.bf16 %v1748_v11, %v1747_v55  ;;  %v1841_v2 = vadd.f32 %v7877_v4, %v1703_v38  ;;  %v2188_v45 = vrot.slane %v11804_v56, 1  ;;  %v1707_v38 = vmul.f32 %v7854_v41, %v7849_v39 }
 0x20a   : > { %2717 = vmatmul.bf16.gmra.mxu3 %v8655_v31  ;;  %v1286_v0 = vpop.f32.mrf.mxu2  ;;  %v1751_v11 = vadd.f32 %v8446_v10, %v1613_v40  ;;  %v11558_v40 = vshll.u32 %v8401_v20, 16  ;;  %v11806_v56 = vshrl.u32 %v8191_v50, 16 }
 0x20b   : > { %11802 = vst [vmem:[#allocation92_spill] sm:$0xff] %v8661_v36  ;;  %v1704_v61 = vmul.f32 %v7873_v62, %v1286_v0  ;;  %v2112_v0 = vrot.slane %v11554_v16, 7  ;;  %v1845_v41 = vadd.f32 %v7877_v4, %v1707_v38  ;;  %v7120_v36 = vld [vmem:[%s7539_s23 + $0x60] sm:$0xff] }
 0x20c   : > { %v1406_v28 = vpop.f32.mrf.mxu0 }
 0x20d   : > { %v8666_v29 = vpop.f32.mrf.mxu3  ;;  %v1842_v60 = vadd.f32 %v7882_v8, %v1704_v61  ;;  %v1614_v27 = vmul.f32 %v8450_v43, %v1406_v28  ;;  %v8672_v21 = vpop.f32.mrf.mxu1  ;;  %v1617_v61 = vmul.f32 %v8427_v54, %v8081_v49  ;;  %v2115_v16 = vor.u32 %v11558_v40, %v2112_v0  ;;  %v6849_v0 = vld [vmem:[#allocation5 + $0x78] sm:$0xff]  ;;  %v6847_v40 = vld [vmem:[#allocation5 + $0x68] sm:$0xff] }
 0x20e   : > { %2996 = vmatpush.bf16.msra.mxu1 %v6849_v0 }
 0x20f   : > { %v8675_v55 = vpack.c.bf16 %v1842_v60, %v1841_v2  ;;  %v1752_v35 = vadd.f32 %v8458_v32, %v1614_v27  ;;  %v1755_v49 = vadd.f32 %v8446_v10, %v1617_v61 }
 0x211   : > { %11803 = vst [vmem:[#allocation93_spill] sm:$0xff] %v8675_v55  ;;  %v8686_v28 = vpack.c.bf16 %v1752_v35, %v1751_v11  ;;  %v2189_v55 = vor.u32 %v2188_v45, %v11806_v56  ;;  %v8708_v45 = vsel %vm8057_vm2, 0, %v2115_v16  ;;  %v1621_v16 = vmul.f32 %v8427_v54, %v8098_v17  ;;  %v6840_v56 = vld [vmem:[#allocation5 + $0x30] sm:$0xff] }
 0x212   : > { %v1288_v2 = vpop.f32.mrf.mxu2  ;;  %11808 = vst [vmem:[#allocation96_spill] sm:$0xff] %v8708_v45 }
 0x213   : > { %11805 = vst [vmem:[#allocation94_spill] sm:$0xff] %v8686_v28  ;;  %v1708_v60 = vmul.f32 %v7873_v62, %v1288_v2  ;;  %v8713_v4 = vsel %vm8233_vm5, %v2189_v55, 0  ;;  %v11559_v55 = vshrl.u32 %v8472_v42, 16 }
 0x214   : > { %v1409_v39 = vpop.f32.mrf.mxu0  ;;  %11809 = vst [vmem:[#allocation97_spill] sm:$0xff] %v8713_v4 }
 0x215   : > { %v8690_v27 = vpop.f32.mrf.mxu3  ;;  %v1846_v11 = vadd.f32 %v7882_v8, %v1708_v60  ;;  %v1618_v35 = vmul.f32 %v8450_v43, %v1409_v39  ;;  %v8700_v28 = vpop.f32.mrf.mxu1  ;;  %v6841_v8 = vld [vmem:[#allocation5 + $0x38] sm:$0xff]  ;;  %v6848_v39 = vld [vmem:[#allocation5 + $0x70] sm:$0xff] }
 0x216   : > { %2907 = vmatpush.bf16.msra.mxu0 %v6841_v8  ;;  %2997 = vmatpush.bf16.msra.mxu1 %v6848_v39  ;;  %v11811_v8 = vshll.u32 %v8241_v9, 16 }
 0x217   : > { %v8702_v62 = vpack.c.bf16 %v1846_v11, %v1845_v41  ;;  %v1756_v2 = vadd.f32 %v8458_v32, %v1618_v35  ;;  %1448 = vmatmul.bf16.gmra.mxu0 %v7120_v36  ;;  %2633 = vmatmul.bf16.gmra.mxu2 %v8191_v50 }
 0x218   : > { %2564 = vmatmul.bf16.gmra.mxu1 %v8708_v45  ;;  %v2190_v0 = vrot.slane %v11811_v8, 1  ;;  %v11813_v8 = vshrl.u32 %v8241_v9, 16 }
 0x219   : > { %11807 = vst [vmem:[#allocation95_spill] sm:$0xff] %v8702_v62  ;;  %v8717_v38 = vpack.c.bf16 %v1756_v2, %v1755_v49  ;;  %v1759_v2 = vadd.f32 %v8446_v10, %v1621_v16  ;;  %v6838_v62 = vld [vmem:[#allocation5 + $0x20] sm:$0xff] }
 0x21a   : > { %2722 = vmatmul.bf16.gmra.mxu3 %v8713_v4  ;;  %v2594_v36 = vpop.f32.mrf.mxu2  ;;  %2908 = vmatpush.bf16.msra.mxu0 %v6840_v56  ;;  %v11562_v56 = vshll.u32 %v8472_v42, 16 }
 0x21b   : > { %11810 = vst [vmem:[#allocation98_spill] sm:$0xff] %v8717_v38  ;;  %v2595_v61 = vadd.f32 %v2594_v36, %v8466_v13  ;;  %v2119_v13 = vrot.slane %v11559_v55, 7  ;;  %v6839_v36 = vld [vmem:[#allocation5 + $0x28] sm:$0xff]  ;;  %2998 = vmatpush.bf16.msra.mxu1 %v6847_v40  ;;  %v2191_v55 = vor.u32 %v2190_v0, %v11813_v8  ;;  %v6846_v38 = vld [vmem:[#allocation5 + $0x60] sm:$0xff] }
 0x21c   : > { %v1411_v41 = vpop.f32.mrf.mxu0 }
 0x21d   : > { %v2683_v60 = vpop.f32.mrf.mxu3  ;;  %v1622_v35 = vmul.f32 %v8450_v43, %v1411_v41  ;;  %v8726_v49 = vpop.f32.mrf.mxu1  ;;  %v8759_v0 = vsel %vm8233_vm5, %v2191_v55, 0  ;;  %v11565_v55 = vshrl.u32 %v7838_v24, 16 }
 0x21e   : > { %v8723_v11 = vadd.f32 %v2683_v60, %v2595_v61  ;;  %v1625_v61 = vmul.f32 %v8427_v54, %v8123_v12  ;;  %2909 = vmatpush.bf16.msra.mxu0 %v6839_v36  ;;  %11815 = vst [vmem:[#allocation101_spill] sm:$0xff] %v8759_v0 }
 0x21f   : > { %v1760_v17 = vadd.f32 %v8458_v32, %v1622_v35  ;;  %v2122_v35 = vor.u32 %v11562_v56, %v2119_v13  ;;  %2999 = vmatpush.bf16.msra.mxu1 %v6846_v38 }
 0x221   : > { %v8736_v60 = vpack.c.bf16 %v1760_v17, %v1759_v2  ;;  %v1763_v2 = vadd.f32 %v8446_v10, %v1625_v61  ;;  %v8754_v13 = vsel %vm8057_vm2, 0, %v2122_v35  ;;  %v6837_v61 = vld [vmem:[#allocation5 + $0x18] sm:$0xff] }
 0x222   : > { %v2596_v16 = vpop.f32.mrf.mxu2  ;;  %2910 = vmatpush.bf16.msra.mxu0 %v6838_v62  ;;  %11814 = vst [vmem:[#allocation100_spill] sm:$0xff] %v8754_v13 }
 0x223   : > { %11812 = vst [vmem:[#allocation99_spill] sm:$0xff] %v8736_v60  ;;  %v2597_v39 = vadd.f32 %v2596_v16, %v8498_v18  ;;  %v7121_v16 = vld [vmem:[%s7539_s23 + $0x68] sm:$0xff] }
 0x224   : > { %v1414_v12 = vpop.f32.mrf.mxu0 }
 0x225   : > { %v2685_v41 = vpop.f32.mrf.mxu3  ;;  %v1626_v40 = vmul.f32 %v8450_v43, %v1414_v12  ;;  %v8748_v36 = vpop.f32.mrf.mxu1  ;;  %v6836_v12 = vld [vmem:[#allocation5 + $0x10] sm:$0xff] }
 0x226   : > { %v8745_v17 = vadd.f32 %v2685_v41, %v2597_v39  ;;  %v6845_v39 = vld [vmem:[#allocation5 + $0x58] sm:$0xff]  ;;  %2911 = vmatpush.bf16.msra.mxu0 %v6837_v61  ;;  %v1629_v41 = vmul.f32 %v8427_v54, %v8140_v19  ;;  %v11817_v61 = vshll.u32 %v8291_v15, 16 }
 0x227   : > { %v1764_v18 = vadd.f32 %v8458_v32, %v1626_v40  ;;  %1453 = vmatmul.bf16.gmra.mxu0 %v7121_v16  ;;  %2638 = vmatmul.bf16.gmra.mxu2 %v8241_v9  ;;  %v6844_v40 = vld [vmem:[#allocation5 + $0x50] sm:$0xff] }
 0x228   : > { %2569 = vmatmul.bf16.gmra.mxu1 %v8754_v13  ;;  %v6842_v13 = vld [vmem:[#allocation5 + $0x40] sm:$0xff] }
 0x229   : > { %v8763_v62 = vpack.c.bf16 %v1764_v18, %v1763_v2  ;;  %3000 = vmatpush.bf16.msra.mxu1 %v6845_v39  ;;  %v1767_v18 = vadd.f32 %v8446_v10, %v1629_v41  ;;  %v2192_v39 = vrot.slane %v11817_v61, 1  ;;  %v11819_v61 = vshrl.u32 %v8291_v15, 16 }
 0x22a   : > { %2727 = vmatmul.bf16.gmra.mxu3 %v8759_v0  ;;  %v2599_v38 = vpop.f32.mrf.mxu2  ;;  %2912 = vmatpush.bf16.msra.mxu0 %v6836_v12  ;;  %v11570_v12 = vshll.u32 %v7838_v24, 16  ;;  %v6834_v0 = vld [vmem:[#allocation5] sm:$0xff] }
 0x22b   : > { %11816 = vst [vmem:[#allocation102_spill] sm:$0xff] %v8763_v62  ;;  %v2600_v35 = vadd.f32 %v2599_v38, %v8526_v44  ;;  %v2126_v44 = vrot.slane %v11565_v55, 7  ;;  %v6835_v38 = vld [vmem:[#allocation5 + $0x8] sm:$0xff]  ;;  %v2193_v55 = vor.u32 %v2192_v39, %v11819_v61 }
 0x22c   : > { %v1416_v16 = vpop.f32.mrf.mxu0  ;;  %v6843_v62 = vld [vmem:[#allocation5 + $0x48] sm:$0xff] }
 0x22d   : > { %v2688_v8 = vpop.f32.mrf.mxu3  ;;  %v1630_v60 = vmul.f32 %v8450_v43, %v1416_v16  ;;  %v8772_v2 = vpop.f32.mrf.mxu1  ;;  %3001 = vmatpush.bf16.msra.mxu1 %v6844_v40  ;;  %v2129_v16 = vor.u32 %v11570_v12, %v2126_v44  ;;  %v8805_v39 = vsel %vm8233_vm5, %v2193_v55, 0 }
 0x22e   : > { %v8769_v56 = vadd.f32 %v2688_v8, %v2600_v35  ;;  %v1633_v35 = vmul.f32 %v8427_v54, %v8165_v63  ;;  %2913 = vmatpush.bf16.msra.mxu0 %v6835_v38  ;;  %11821 = vst [vmem:[#allocation105_spill] sm:$0xff] %v8805_v39 }
 0x22f   : > { %v1768_v19 = vadd.f32 %v8458_v32, %v1630_v60  ;;  %v8800_v44 = vsel %vm8057_vm2, 0, %v2129_v16  ;;  %v11571_v16 = vshrl.u32 %v7894_v22, 16 }
 0x230   : > { %11820 = vst [vmem:[#allocation104_spill] sm:$0xff] %v8800_v44 }
 0x231   : > { %v8782_v8 = vpack.c.bf16 %v1768_v19, %v1767_v18  ;;  %3002 = vmatpush.bf16.msra.mxu1 %v6843_v62  ;;  %v1771_v18 = vadd.f32 %v8446_v10, %v1633_v35  ;;  %v1637_v35 = vmul.f32 %v8427_v54, %v8182_v58  ;;  %v11823_v58 = vshll.u32 %v8351_v59, 16 }
 0x232   : > { %v2601_v41 = vpop.f32.mrf.mxu2  ;;  %2914 = vmatpush.bf16.msra.mxu0 %v6834_v0 }
 0x233   : > { %11818 = vst [vmem:[#allocation103_spill] sm:$0xff] %v8782_v8  ;;  %v2602_v60 = vadd.f32 %v2601_v41, %v8556_v7  ;;  %v7122_v41 = vld [vmem:[%s7539_s23 + $0x70] sm:$0xff] }
 0x234   : > { %v1419_v63 = vpop.f32.mrf.mxu0 }
 0x235   : > { %v2690_v40 = vpop.f32.mrf.mxu3  ;;  %v1634_v62 = vmul.f32 %v8450_v43, %v1419_v63  ;;  %v8794_v38 = vpop.f32.mrf.mxu1  ;;  %3003 = vmatpush.bf16.msra.mxu1 %v6842_v13 }
 0x236   : > { %v8791_v19 = vadd.f32 %v2690_v40, %v2602_v60 }
 0x237   : > { %v1772_v7 = vadd.f32 %v8458_v32, %v1634_v62  ;;  %1458 = vmatmul.bf16.gmra.mxu0 %v7122_v41  ;;  %2643 = vmatmul.bf16.gmra.mxu2 %v8291_v15  ;;  %v1775_v41 = vadd.f32 %v8446_v10, %v1637_v35 }
 0x238   : > { %2574 = vmatmul.bf16.gmra.mxu1 %v8800_v44 }
 0x239   : > { %v8809_v0 = vpack.c.bf16 %v1772_v7, %v1771_v18  ;;  %v2133_v7 = vrot.slane %v11571_v16, 7  ;;  %v11825_v16 = vshrl.u32 %v8351_v59, 16 }
 0x23a   : > { %2732 = vmatmul.bf16.gmra.mxu3 %v8805_v39  ;;  %v2604_v13 = vpop.f32.mrf.mxu2 }
 0x23b   : > { %11822 = vst [vmem:[#allocation106_spill] sm:$0xff] %v8809_v0  ;;  %v2605_v60 = vadd.f32 %v2604_v13, %v8584_v3  ;;  %v2194_v3 = vrot.slane %v11823_v58, 1  ;;  %v1641_v13 = vmul.f32 %v8427_v54, %v8207_v25 }
 0x23c   : > { %v1421_v61 = vpop.f32.mrf.mxu0 }
 0x23d   : > { %v2693_v40 = vpop.f32.mrf.mxu3  ;;  %v1638_v55 = vmul.f32 %v8450_v43, %v1421_v61  ;;  %v8818_v62 = vpop.f32.mrf.mxu1  ;;  %v2195_v0 = vor.u32 %v2194_v3, %v11825_v16  ;;  %v1779_v58 = vadd.f32 %v8446_v10, %v1641_v13 }
 0x23e   : > { %v8815_v63 = vadd.f32 %v2693_v40, %v2605_v60  ;;  %v11577_v40 = vshll.u32 %v7894_v22, 16 }
 0x23f   : > { %v1776_v18 = vadd.f32 %v8458_v32, %v1638_v55  ;;  %v8851_v16 = vsel %vm8233_vm5, %v2195_v0, 0 }
 0x240   : > { %v2136_v55 = vor.u32 %v11577_v40, %v2133_v7  ;;  %11827 = vst [vmem:[#allocation109_spill] sm:$0xff] %v8851_v16  ;;  %v1645_v7 = vmul.f32 %v8427_v54, %v8226_v34 }
 0x241   : > { %v8828_v60 = vpack.c.bf16 %v1776_v18, %v1775_v41 }
 0x242   : > { %v2606_v61 = vpop.f32.mrf.mxu2 }
 0x243   : > { %11824 = vst [vmem:[#allocation107_spill] sm:$0xff] %v8828_v60  ;;  %v2607_v12 = vadd.f32 %v2606_v61, %v8614_v51  ;;  %v7123_v60 = vld [vmem:[%s7539_s23 + $0x78] sm:$0xff]  ;;  %v8846_v51 = vsel %vm8057_vm2, 0, %v2136_v55 }
 0x244   : > { %v1424_v8 = vpop.f32.mrf.mxu0  ;;  %11826 = vst [vmem:[#allocation108_spill] sm:$0xff] %v8846_v51 }
 0x245   : > { %v2695_v35 = vpop.f32.mrf.mxu3  ;;  %v1642_v25 = vmul.f32 %v8450_v43, %v1424_v8  ;;  %v8840_v41 = vpop.f32.mrf.mxu1 }
 0x246   : > { %v8837_v39 = vadd.f32 %v2695_v35, %v2607_v12  ;;  %v1783_v35 = vadd.f32 %v8446_v10, %v1645_v7 }
 0x247   : > { %v1780_v18 = vadd.f32 %v8458_v32, %v1642_v25  ;;  %1463 = vmatmul.bf16.gmra.mxu0 %v7123_v60  ;;  %2648 = vmatmul.bf16.gmra.mxu2 %v8351_v59 }
 0x248   : > { %2579 = vmatmul.bf16.gmra.mxu1 %v8846_v51 }
 0x249   : > { %v8855_v8 = vpack.c.bf16 %v1780_v18, %v1779_v58  ;;  %v11829_v58 = vshll.u32 %v8401_v20, 16  ;;  %v11830_v18 = vld [vmem:[#allocation50_spill] sm:$0xff] }
 0x24a   : > { %2737 = vmatmul.bf16.gmra.mxu3 %v8851_v16  ;;  %v2609_v12 = vpop.f32.mrf.mxu2  ;;  %v1649_v34 = vmul.f32 %v8427_v54, %v11830_v18 }
 0x24b   : > { %11828 = vst [vmem:[#allocation110_spill] sm:$0xff] %v8855_v8  ;;  %v2610_v46 = vadd.f32 %v2609_v12, %v8642_v48  ;;  %v2196_v25 = vrot.slane %v11829_v58, 1 }
 0x24c   : > { %v1426_v13 = vpop.f32.mrf.mxu0  ;;  %v1787_v7 = vadd.f32 %v8446_v10, %v1649_v34 }
 0x24d   : > { %v2698_v3 = vpop.f32.mrf.mxu3  ;;  %v1646_v61 = vmul.f32 %v8450_v43, %v1426_v13  ;;  %v8863_v0 = vpop.f32.mrf.mxu1 }
 0x24e   : > { %v8860_v60 = vadd.f32 %v2698_v3, %v2610_v46  ;;  %v11832_v3 = vshrl.u32 %v8401_v20, 16 }
 0x24f   : > { %v1784_v55 = vadd.f32 %v8458_v32, %v1646_v61 }
 0x250   : > { %v2197_v13 = vor.u32 %v2196_v25, %v11832_v3  ;;  %v6889_v25 = vld [vmem:[#allocation5 + $0x1b8] sm:$0xff] }
 0x251   : > { %v8871_v40 = vpack.c.bf16 %v1784_v55, %v1783_v35  ;;  %v11587_v35 = vmov 0   ;;  %v6857_v55 = vld [vmem:[#allocation5 + $0xb8] sm:$0xff]  ;;  %3367 = vmatpush.bf16.msrb.mxu3 %v6889_v25 }
 0x252   : > { %v2611_v48 = vpop.f32.mrf.mxu2  ;;  %3085 = vmatpush.bf16.msrb.mxu2 %v6857_v55  ;;  %v11836_v55 = vshll.u32 %v8472_v42, 16 }
 0x253   : > { %11831 = vst [vmem:[#allocation50_spill] sm:$0xff] %v8871_v40  ;;  %v2612_v12 = vadd.f32 %v2611_v48, %v8672_v21  ;;  %v8886_v21 = vsel %vm8233_vm5, %v2197_v13, 0  ;;  %v11835_v48 = vld [vmem:[#allocation52_spill] sm:$0xff]  ;;  %v6856_v13 = vld [vmem:[#allocation5 + $0xb0] sm:$0xff] }
 0x254   : > { %v1429_v8 = vpop.f32.mrf.mxu0  ;;  %11833 = vst [vmem:[#allocation111_spill] sm:$0xff] %v8886_v21  ;;  %v2198_v25 = vrot.slane %v11836_v55, 1 }
 0x255   : > { %v2700_v46 = vpop.f32.mrf.mxu3  ;;  %v1650_v61 = vmul.f32 %v8450_v43, %v1429_v8  ;;  %v8880_v58 = vpop.f32.mrf.mxu1 }
 0x256   : > { %v8877_v51 = vadd.f32 %v2700_v46, %v2612_v12  ;;  %v1653_v12 = vmul.f32 %v8427_v54, %v11835_v48  ;;  %3086 = vmatpush.bf16.msrb.mxu2 %v6856_v13  ;;  %v11837_v48 = vld [vmem:[#allocation57_spill] sm:$0xff] }
 0x257   : > { %v1788_v18 = vadd.f32 %v8458_v32, %v1650_v61  ;;  %2653 = vmatmul.bf16.gmra.mxu2 %v8401_v20  ;;  %2915 = vmatmul.bf16.vlgmr.msra.gmra.mxu0 %v11587_v35  ;;  %v6888_v61 = vld [vmem:[#allocation5 + $0x1b0] sm:$0xff] }
 0x258   : > { %3004 = vmatmul.bf16.vlgmr.msra.gmra.mxu1 %v11587_v35  ;;  %3368 = vmatpush.bf16.msrb.mxu3 %v6888_v61  ;;  %v1657_v35 = vmul.f32 %v8427_v54, %v11837_v48 }
 0x259   : > { %v8891_v8 = vpack.c.bf16 %v1788_v18, %v1787_v7  ;;  %v1791_v7 = vadd.f32 %v8446_v10, %v1653_v12  ;;  %v11839_v12 = vshrl.u32 %v8472_v42, 16 }
 0x25a   : > { %2742 = vmatmul.bf16.gmra.mxu3 %v8886_v21  ;;  %v2614_v34 = vpop.f32.mrf.mxu2  ;;  %v1795_v55 = vadd.f32 %v8446_v10, %v1657_v35  ;;  %v6885_v35 = vld [vmem:[#allocation5 + $0x198] sm:$0xff] }
 0x25b   : > { %11834 = vst [vmem:[#allocation112_spill] sm:$0xff] %v8891_v8  ;;  %v2615_v46 = vadd.f32 %v2614_v34, %v8700_v28  ;;  %v6855_v28 = vld [vmem:[#allocation5 + $0xa8] sm:$0xff]  ;;  %v2199_v61 = vor.u32 %v2198_v25, %v11839_v12  ;;  %v6886_v8 = vld [vmem:[#allocation5 + $0x1a0] sm:$0xff]  ;;  %v11841_v25 = vld [vmem:[#allocation35_spill] sm:$0xff] }
 0x25c   : > { %v1431_v40 = vpop.f32.mrf.mxu0  ;;  %v6887_v34 = vld [vmem:[#allocation5 + $0x1a8] sm:$0xff]  ;;  %3087 = vmatpush.bf16.msrb.mxu2 %v6855_v28  ;;  %v6853_v28 = vld [vmem:[#allocation5 + $0x98] sm:$0xff] }
 0x25d   : > { %v2703_v3 = vpop.f32.mrf.mxu3  ;;  %v1654_v21 = vmul.f32 %v8450_v43, %v1431_v40  ;;  %v8899_v44 = vpop.f32.mrf.mxu1  ;;  %3369 = vmatpush.bf16.msrb.mxu3 %v6887_v34  ;;  %v11842_v34 = vld [vmem:[#allocation20_spill] sm:$0xff] }
 0x25e   : > { %v8896_v16 = vadd.f32 %v2703_v3, %v2615_v46 }
 0x25f   : > { %v1792_v18 = vadd.f32 %v8458_v32, %v1654_v21  ;;  %v6854_v21 = vld [vmem:[#allocation5 + $0xa0] sm:$0xff] }
 0x260   : > { %3088 = vmatpush.bf16.msrb.mxu2 %v6854_v21  ;;  %v6884_v21 = vld [vmem:[#allocation5 + $0x190] sm:$0xff] }
 0x261   : > { %v8907_v46 = vpack.c.bf16 %v1792_v18, %v1791_v7  ;;  %3370 = vmatpush.bf16.msrb.mxu3 %v6886_v8 }
 0x262   : > { %v2616_v40 = vpop.f32.mrf.mxu2 }
 0x263   : > { %11838 = vst [vmem:[#allocation52_spill] sm:$0xff] %v8907_v46  ;;  %v2617_v3 = vadd.f32 %v2616_v40, %v8726_v49  ;;  %v8922_v49 = vsel %vm8233_vm5, %v2199_v61, 0  ;;  %v11844_v40 = vld [vmem:[#allocation59_spill] sm:$0xff]  ;;  %v6852_v61 = vld [vmem:[#allocation5 + $0x90] sm:$0xff] }
 0x264   : > { %v1434_v20 = vpop.f32.mrf.mxu0  ;;  %11840 = vst [vmem:[#allocation57_spill] sm:$0xff] %v8922_v49  ;;  %3089 = vmatpush.bf16.msrb.mxu2 %v6853_v28  ;;  %v11845_v28 = vshll.u32 %v7838_v24, 16 }
 0x265   : > { %v2705_v13 = vpop.f32.mrf.mxu3  ;;  %v1658_v48 = vmul.f32 %v8450_v43, %v1434_v20  ;;  %v8916_v7 = vpop.f32.mrf.mxu1  ;;  %3371 = vmatpush.bf16.msrb.mxu3 %v6885_v35 }
 0x266   : > { %v8913_v4 = vadd.f32 %v2705_v13, %v2617_v3  ;;  %v1661_v3 = vmul.f32 %v8427_v54, %v11844_v40  ;;  %v2200_v35 = vrot.slane %v11845_v28, 1 }
 0x267   : > { %v1796_v18 = vadd.f32 %v8458_v32, %v1658_v48  ;;  %2658 = vmatmul.bf16.gmra.mxu2 %v8472_v42  ;;  %2920 = vmatmul.bf16.gmra.mxu0 %v11841_v25 }
 0x268   : > { %3009 = vmatmul.bf16.gmra.mxu1 %v11842_v34  ;;  %3090 = vmatpush.bf16.msrb.mxu2 %v6852_v61  ;;  %v6883_v34 = vld [vmem:[#allocation5 + $0x188] sm:$0xff] }
 0x269   : > { %v8927_v20 = vpack.c.bf16 %v1796_v18, %v1795_v55  ;;  %3372 = vmatpush.bf16.msrb.mxu3 %v6884_v21  ;;  %v1799_v55 = vadd.f32 %v8446_v10, %v1661_v3  ;;  %v11848_v3 = vshrl.u32 %v7838_v24, 16 }
 0x26a   : > { %2747 = vmatmul.bf16.gmra.mxu3 %v8922_v49  ;;  %v2619_v8 = vpop.f32.mrf.mxu2 }
 0x26b   : > { %11843 = vst [vmem:[#allocation35_spill] sm:$0xff] %v8927_v20  ;;  %v2620_v13 = vadd.f32 %v2619_v8, %v8748_v36  ;;  %v6851_v36 = vld [vmem:[#allocation5 + $0x88] sm:$0xff]  ;;  %v11846_v8 = vld [vmem:[#allocation63_spill] sm:$0xff]  ;;  %v6882_v20 = vld [vmem:[#allocation5 + $0x180] sm:$0xff] }
 0x26c   : > { %v1436_v48 = vpop.f32.mrf.mxu0  ;;  %v1665_v40 = vmul.f32 %v8427_v54, %v11846_v8  ;;  %3091 = vmatpush.bf16.msrb.mxu2 %v6851_v36  ;;  %v11851_v36 = vld [vmem:[#allocation22_spill] sm:$0xff] }
 0x26d   : > { %v2708_v12 = vpop.f32.mrf.mxu3  ;;  %v1662_v46 = vmul.f32 %v8450_v43, %v1436_v48  ;;  %v8935_v49 = vpop.f32.mrf.mxu1  ;;  %3373 = vmatpush.bf16.msrb.mxu3 %v6883_v34  ;;  %v2201_v48 = vor.u32 %v2200_v35, %v11848_v3  ;;  %v11850_v35 = vld [vmem:[#allocation38_spill] sm:$0xff] }
 0x26e   : > { %v8932_v25 = vadd.f32 %v2708_v12, %v2620_v13  ;;  %v1803_v28 = vadd.f32 %v8446_v10, %v1665_v40  ;;  %v11853_v40 = vld [vmem:[#allocation65_spill] sm:$0xff] }
 0x26f   : > { %v1800_v18 = vadd.f32 %v8458_v32, %v1662_v46  ;;  %v6850_v46 = vld [vmem:[#allocation5 + $0x80] sm:$0xff] }
 0x270   : > { %3092 = vmatpush.bf16.msrb.mxu2 %v6850_v46 }
 0x271   : > { %v8943_v13 = vpack.c.bf16 %v1800_v18, %v1799_v55  ;;  %3374 = vmatpush.bf16.msrb.mxu3 %v6882_v20  ;;  %v1669_v20 = vmul.f32 %v8427_v54, %v11853_v40 }
 0x272   : > { %v2621_v12 = vpop.f32.mrf.mxu2 }
 0x273   : > { %11847 = vst [vmem:[#allocation20_spill] sm:$0xff] %v8943_v13  ;;  %v2622_v61 = vadd.f32 %v2621_v12, %v8772_v2  ;;  %v8958_v2 = vsel %vm8233_vm5, %v2201_v48, 0 }
 0x274   : > { %v1439_v42 = vpop.f32.mrf.mxu0  ;;  %11849 = vst [vmem:[#allocation59_spill] sm:$0xff] %v8958_v2 }
 0x275   : > { %v2710_v21 = vpop.f32.mrf.mxu3  ;;  %v1666_v8 = vmul.f32 %v8450_v43, %v1439_v42  ;;  %v8952_v55 = vpop.f32.mrf.mxu1 }
 0x276   : > { %v8949_v45 = vadd.f32 %v2710_v21, %v2622_v61 }
 0x277   : > { %v1804_v18 = vadd.f32 %v8458_v32, %v1666_v8  ;;  %2663 = vmatmul.bf16.gmra.mxu2 %v7838_v24  ;;  %2925 = vmatmul.bf16.gmra.mxu0 %v11850_v35  ;;  %v1807_v8 = vadd.f32 %v8446_v10, %v1669_v20 }
 0x278   : > { %3014 = vmatmul.bf16.gmra.mxu1 %v11851_v36 }
 0x279   : > { %v8963_v34 = vpack.c.bf16 %v1804_v18, %v1803_v28  ;;  %v11854_v28 = vshll.u32 %v7894_v22, 16 }
 0x27a   : > { %2752 = vmatmul.bf16.gmra.mxu3 %v8958_v2  ;;  %v2624_v42 = vpop.f32.mrf.mxu2 }
 0x27b   : > { %11852 = vst [vmem:[#allocation63_spill] sm:$0xff] %v8963_v34  ;;  %v2625_v12 = vadd.f32 %v2624_v42, %v8794_v38  ;;  %v2202_v18 = vrot.slane %v11854_v28, 1  ;;  %v11855_v34 = vld [vmem:[#allocation70_spill] sm:$0xff] }
 0x27c   : > { %v1441_v21 = vpop.f32.mrf.mxu0  ;;  %v1673_v40 = vmul.f32 %v8427_v54, %v11855_v34 }
 0x27d   : > { %v2713_v61 = vpop.f32.mrf.mxu3  ;;  %v1670_v48 = vmul.f32 %v8450_v43, %v1441_v21  ;;  %v8971_v46 = vpop.f32.mrf.mxu1 }
 0x27e   : > { %v8968_v3 = vadd.f32 %v2713_v61, %v2625_v12  ;;  %v11857_v61 = vshrl.u32 %v7894_v22, 16  ;;  %v1811_v20 = vadd.f32 %v8446_v10, %v1673_v40 }
 0x27f   : > { %v1808_v13 = vadd.f32 %v8458_v32, %v1670_v48 }
 0x280   : > { %v2203_v21 = vor.u32 %v2202_v18, %v11857_v61 }
 0x281   : > { %v8979_v2 = vpack.c.bf16 %v1808_v13, %v1807_v8  ;;  %v11859_v13 = vld [vmem:[#allocation41_spill] sm:$0xff] }
 0x282   : > { %v2626_v38 = vpop.f32.mrf.mxu2  ;;  %v11860_v8 = vld [vmem:[#allocation25_spill] sm:$0xff] }
 0x283   : > { %11856 = vst [vmem:[#allocation38_spill] sm:$0xff] %v8979_v2  ;;  %v2627_v42 = vadd.f32 %v2626_v38, %v8818_v62  ;;  %v8994_v62 = vsel %vm8233_vm5, %v2203_v21, 0 }
 0x284   : > { %v1444_v36 = vpop.f32.mrf.mxu0  ;;  %11858 = vst [vmem:[#allocation65_spill] sm:$0xff] %v8994_v62 }
 0x285   : > { %v2715_v12 = vpop.f32.mrf.mxu3  ;;  %v1674_v48 = vmul.f32 %v8450_v43, %v1444_v36  ;;  %v8988_v28 = vpop.f32.mrf.mxu1  ;;  %v1677_v36 = vmul.f32 %v8427_v54, %v8456_v37 }
 0x286   : > { %v8985_v24 = vadd.f32 %v2715_v12, %v2627_v42 }
 0x287   : > { %v1812_v34 = vadd.f32 %v8458_v32, %v1674_v48  ;;  %2668 = vmatmul.bf16.gmra.mxu2 %v7894_v22  ;;  %2930 = vmatmul.bf16.gmra.mxu0 %v11859_v13  ;;  %v1815_v48 = vadd.f32 %v8446_v10, %v1677_v36 }
 0x288   : > { %3019 = vmatmul.bf16.gmra.mxu1 %v11860_v8 }
 0x289   : > { %v8999_v18 = vpack.c.bf16 %v1812_v34, %v1811_v20  ;;  %v1681_v20 = vmul.f32 %v8427_v54, %v8492_v1  ;;  %v11864_v1 = vmov 0  }
 0x28a   : > { %2757 = vmatmul.bf16.gmra.mxu3 %v8994_v62  ;;  %v2629_v40 = vpop.f32.mrf.mxu2 }
 0x28b   : > { %11861 = vst [vmem:[#allocation70_spill] sm:$0xff] %v8999_v18  ;;  %v2630_v38 = vadd.f32 %v2629_v40, %v8840_v41 }
 0x28c   : > { %v1446_v12 = vpop.f32.mrf.mxu0 }
 0x28d   : > { %v2718_v42 = vpop.f32.mrf.mxu3  ;;  %v1678_v30 = vmul.f32 %v8450_v43, %v1446_v12  ;;  %v9007_v21 = vpop.f32.mrf.mxu1 }
 0x28e   : > { %v9004_v61 = vadd.f32 %v2718_v42, %v2630_v38  ;;  %v1819_v38 = vadd.f32 %v8446_v10, %v1681_v20  ;;  %v1685_v20 = vmul.f32 %v8427_v54, %v8516_v26 }
 0x28f   : > { %v1816_v2 = vadd.f32 %v8458_v32, %v1678_v30  ;;  %v11863_v30 = vld [vmem:[#allocation44_spill] sm:$0xff] }
 0x290   : > { %v1823_v22 = vadd.f32 %v8446_v10, %v1685_v20 }
 0x291   : > { %v9013_v34 = vpack.c.bf16 %v1816_v2, %v1815_v48  ;;  %v11865_v2 = vld [vmem:[#allocation28_spill] sm:$0xff] }
 0x292   : > { %v2631_v37 = vpop.f32.mrf.mxu2 }
 0x293   : > { %11862 = vst [vmem:[#allocation41_spill] sm:$0xff] %v9013_v34  ;;  %v2632_v41 = vadd.f32 %v2631_v37, %v8863_v0 }
 0x294   : > { %v1449_v18 = vpop.f32.mrf.mxu0 }
 0x295   : > { %v2720_v40 = vpop.f32.mrf.mxu3  ;;  %v1682_v12 = vmul.f32 %v8450_v43, %v1449_v18  ;;  %v9020_v62 = vpop.f32.mrf.mxu1 }
 0x296   : > { %v9017_v42 = vadd.f32 %v2720_v40, %v2632_v41 }
 0x297   : > { %v1820_v36 = vadd.f32 %v8458_v32, %v1682_v12  ;;  %2935 = vmatmul.bf16.gmra.mxu0 %v11863_v30  ;;  %3093 = vmatmul.bf16.vlgmr.msrb.gmra.mxu2 %v11864_v1 }
 0x298   : > { %3024 = vmatmul.bf16.gmra.mxu1 %v11865_v2 }
 0x299   : > { %v9027_v0 = vpack.c.bf16 %v1820_v36, %v1819_v38  ;;  %v1689_v38 = vmul.f32 %v8427_v54, %v8550_v5  ;;  %v11869_v5 = vld [vmem:[#allocation49_spill] sm:$0xff] }
 0x29a   : > { %3375 = vmatmul.bf16.vlgmr.msrb.gmra.mxu3 %v11850_v35  ;;  %v2634_v48 = vpop.f32.mrf.mxu2 }
 0x29b   : > { %11866 = vst [vmem:[#allocation25_spill] sm:$0xff] %v9027_v0  ;;  %v2635_v18 = vadd.f32 %v2634_v48, %v8880_v58 }
 0x29c   : > { %v1451_v41 = vpop.f32.mrf.mxu0 }
 0x29d   : > { %v2723_v37 = vpop.f32.mrf.mxu3  ;;  %v1686_v12 = vmul.f32 %v8450_v43, %v1451_v41  ;;  %v9035_v34 = vpop.f32.mrf.mxu1 }
 0x29e   : > { %v9032_v40 = vadd.f32 %v2723_v37, %v2635_v18  ;;  %v1827_v18 = vadd.f32 %v8446_v10, %v1689_v38 }
 0x29f   : > { %v1824_v35 = vadd.f32 %v8458_v32, %v1686_v12  ;;  %v11868_v12 = vld [vmem:[#allocation48_spill] sm:$0xff] }
 0x2a1   : > { %v9041_v36 = vpack.c.bf16 %v1824_v35, %v1823_v22  ;;  %v1693_v35 = vmul.f32 %v8427_v54, %v8574_v57 }
 0x2a2   : > { %v2636_v26 = vpop.f32.mrf.mxu2 }
 0x2a3   : > { %11867 = vst [vmem:[#allocation44_spill] sm:$0xff] %v9041_v36  ;;  %v2637_v58 = vadd.f32 %v2636_v26, %v8899_v44 }
 0x2a4   : > { %v1454_v0 = vpop.f32.mrf.mxu0 }
 0x2a5   : > { %v2725_v48 = vpop.f32.mrf.mxu3  ;;  %v1690_v41 = vmul.f32 %v8450_v43, %v1454_v0  ;;  %v9048_v1 = vpop.f32.mrf.mxu1 }
 0x2a6   : > { %v9045_v37 = vadd.f32 %v2725_v48, %v2637_v58 }
 0x2a7   : > { %v1828_v20 = vadd.f32 %v8458_v32, %v1690_v41  ;;  %2940 = vmatmul.bf16.gmra.mxu0 %v11868_v12  ;;  %3098 = vmatmul.bf16.gmra.mxu2 %v11869_v5  ;;  %v1831_v5 = vadd.f32 %v8446_v10, %v1693_v35 }
 0x2a8   : > { %3029 = vmatmul.bf16.gmra.mxu1 %v8022_v33 }
 0x2a9   : > { %v9055_v22 = vpack.c.bf16 %v1828_v20, %v1827_v18  ;;  %v1697_v18 = vmul.f32 %v8427_v54, %v8608_v53  ;;  %v11873_v53 = vld [vmem:[#allocation56_spill] sm:$0xff] }
 0x2aa   : > { %3380 = vmatmul.bf16.gmra.mxu3 %v11859_v13  ;;  %v2639_v44 = vpop.f32.mrf.mxu2 }
 0x2ab   : > { %11870 = vst [vmem:[#allocation28_spill] sm:$0xff] %v9055_v22  ;;  %v2640_v0 = vadd.f32 %v2639_v44, %v8916_v7 }
 0x2ac   : > { %v1456_v26 = vpop.f32.mrf.mxu0 }
 0x2ad   : > { %v2728_v38 = vpop.f32.mrf.mxu3  ;;  %v1694_v48 = vmul.f32 %v8450_v43, %v1456_v26  ;;  %v9063_v41 = vpop.f32.mrf.mxu1 }
 0x2ae   : > { %v9060_v58 = vadd.f32 %v2728_v38, %v2640_v0  ;;  %v1835_v0 = vadd.f32 %v8446_v10, %v1697_v18 }
 0x2af   : > { %v1832_v13 = vadd.f32 %v8458_v32, %v1694_v48  ;;  %v11872_v48 = vld [vmem:[#allocation55_spill] sm:$0xff] }
 0x2b1   : > { %v9069_v20 = vpack.c.bf16 %v1832_v13, %v1831_v5  ;;  %v1701_v13 = vmul.f32 %v8427_v54, %v8632_v47 }
 0x2b2   : > { %v2641_v57 = vpop.f32.mrf.mxu2 }
 0x2b3   : > { %11871 = vst [vmem:[#allocation48_spill] sm:$0xff] %v9069_v20  ;;  %v2642_v7 = vadd.f32 %v2641_v57, %v8935_v49  ;;  %v1839_v20 = vadd.f32 %v8446_v10, %v1701_v13 }
 0x2b4   : > { %v1459_v22 = vpop.f32.mrf.mxu0 }
 0x2b5   : > { %v2730_v44 = vpop.f32.mrf.mxu3  ;;  %v1698_v26 = vmul.f32 %v8450_v43, %v1459_v22  ;;  %v9076_v36 = vpop.f32.mrf.mxu1 }
 0x2b6   : > { %v9073_v38 = vadd.f32 %v2730_v44, %v2642_v7 }
 0x2b7   : > { %v1836_v35 = vadd.f32 %v8458_v32, %v1698_v26  ;;  %2945 = vmatmul.bf16.gmra.mxu0 %v11872_v48  ;;  %3103 = vmatmul.bf16.gmra.mxu2 %v11873_v53 }
 0x2b8   : > { %3034 = vmatmul.bf16.gmra.mxu1 %v8065_v6 }
 0x2b9   : > { %v9083_v49 = vpack.c.bf16 %v1836_v35, %v1835_v0  ;;  %v1705_v0 = vmul.f32 %v8427_v54, %v8666_v29  ;;  %v11877_v29 = vld [vmem:[#allocation62_spill] sm:$0xff] }
 0x2ba   : > { %3385 = vmatmul.bf16.gmra.mxu3 %v11863_v30  ;;  %v2644_v5 = vpop.f32.mrf.mxu2 }
 0x2bb   : > { %11874 = vst [vmem:[#allocation49_spill] sm:$0xff] %v9083_v49  ;;  %v2645_v22 = vadd.f32 %v2644_v5, %v8952_v55 }
 0x2bc   : > { %v1461_v57 = vpop.f32.mrf.mxu0 }
 0x2bd   : > { %v2733_v18 = vpop.f32.mrf.mxu3  ;;  %v1702_v44 = vmul.f32 %v8450_v43, %v1461_v57  ;;  %v9091_v26 = vpop.f32.mrf.mxu1 }
 0x2be   : > { %v9088_v7 = vadd.f32 %v2733_v18, %v2645_v22  ;;  %v1843_v22 = vadd.f32 %v8446_v10, %v1705_v0 }
 0x2bf   : > { %v1840_v30 = vadd.f32 %v8458_v32, %v1702_v44  ;;  %v11876_v44 = vld [vmem:[#allocation61_spill] sm:$0xff] }
 0x2c1   : > { %v9097_v35 = vpack.c.bf16 %v1840_v30, %v1839_v20  ;;  %v1709_v30 = vmul.f32 %v8427_v54, %v8690_v27 }
 0x2c2   : > { %v2646_v47 = vpop.f32.mrf.mxu2 }
 0x2c3   : > { %11875 = vst [vmem:[#allocation55_spill] sm:$0xff] %v9097_v35  ;;  %v2647_v55 = vadd.f32 %v2646_v47, %v8971_v46  ;;  %v1847_v35 = vadd.f32 %v8446_v10, %v1709_v30 }
 0x2c4   : > { %v1464_v49 = vpop.f32.mrf.mxu0 }
 0x2c5   : > { %v2735_v5 = vpop.f32.mrf.mxu3  ;;  %v1706_v57 = vmul.f32 %v8450_v43, %v1464_v49  ;;  %v9104_v6 = vpop.f32.mrf.mxu1 }
 0x2c6   : > { %v9101_v18 = vadd.f32 %v2735_v5, %v2647_v55 }
 0x2c7   : > { %v1844_v13 = vadd.f32 %v8458_v32, %v1706_v57  ;;  %2950 = vmatmul.bf16.gmra.mxu0 %v11876_v44  ;;  %3108 = vmatmul.bf16.gmra.mxu2 %v11877_v29 }
 0x2c8   : > { %3039 = vmatmul.bf16.gmra.mxu1 %v8107_v52 }
 0x2c9   : > { %v9111_v46 = vpack.c.bf16 %v1844_v13, %v1843_v22 }
 0x2ca   : > { %3390 = vmatmul.bf16.gmra.mxu3 %v11868_v12  ;;  %v2649_v20 = vpop.f32.mrf.mxu2 }
 0x2cb   : > { %11878 = vst [vmem:[#allocation56_spill] sm:$0xff] %v9111_v46  ;;  %v2650_v49 = vadd.f32 %v2649_v20, %v8988_v28 }
 0x2cc   : > { %v1466_v47 = vpop.f32.mrf.mxu0 }
 0x2cd   : > { %v2738_v0 = vpop.f32.mrf.mxu3  ;;  %v1710_v5 = vmul.f32 %v8450_v43, %v1466_v47  ;;  %v9119_v57 = vpop.f32.mrf.mxu1  ;;  %v11880_v43 = vld [vmem:[#allocation68_spill] sm:$0xff]  ;;  %v11881_v47 = vld [vmem:[#allocation69_spill] sm:$0xff] }
 0x2ce   : > { %v9116_v55 = vadd.f32 %v2738_v0, %v2650_v49 }
 0x2cf   : > { %v1848_v12 = vadd.f32 %v8458_v32, %v1710_v5 }
 0x2d1   : > { %v9123_v22 = vpack.c.bf16 %v1848_v12, %v1847_v35 }
 0x2d2   : > { %v2651_v13 = vpop.f32.mrf.mxu2 }
 0x2d3   : > { %11879 = vst [vmem:[#allocation61_spill] sm:$0xff] %v9123_v22  ;;  %v2652_v46 = vadd.f32 %v2651_v13, %v9007_v21 }
 0x2d4   : > { %v2916_v27 = vpop.f32.mrf.mxu0 }
 0x2d5   : > { %v2740_v54 = vpop.f32.mrf.mxu3  ;;  %v2917_v20 = vadd.f32 %v2916_v27, %v8723_v11  ;;  %v3005_v49 = vpop.f32.mrf.mxu1 }
 0x2d6   : > { %v9126_v28 = vadd.f32 %v2740_v54, %v2652_v46 }
 0x2d7   : > { %v9129_v0 = vadd.f32 %v3005_v49, %v2917_v20  ;;  %2955 = vmatmul.bf16.gmra.mxu0 %v11880_v43  ;;  %3113 = vmatmul.bf16.gmra.mxu2 %v11881_v47 }
 0x2d8   : > { %3044 = vmatmul.bf16.gmra.mxu1 %v8149_v14 }
 0x2da   : > { %3395 = vmatmul.bf16.gmra.mxu3 %v11872_v48  ;;  %v2654_v32 = vpop.f32.mrf.mxu2 }
 0x2db   : > { %v2655_v10 = vadd.f32 %v2654_v32, %v9020_v62  ;;  %v11882_v32 = vld [vmem:[#allocation75_spill] sm:$0xff] }
 0x2dc   : > { %v2918_v35 = vpop.f32.mrf.mxu0 }
 0x2dd   : > { %v2743_v21 = vpop.f32.mrf.mxu3  ;;  %v2919_v11 = vadd.f32 %v2918_v35, %v8745_v17  ;;  %v3007_v30 = vpop.f32.mrf.mxu1 }
 0x2de   : > { %v9136_v46 = vadd.f32 %v2743_v21, %v2655_v10  ;;  %v11883_v10 = vld [vmem:[#allocation72_spill] sm:$0xff] }
 0x2df   : > { %v9139_v5 = vadd.f32 %v3007_v30, %v2919_v11 }
 0x2e2   : > { %v2656_v12 = vpop.f32.mrf.mxu2 }
 0x2e3   : > { %v2657_v13 = vadd.f32 %v2656_v12, %v9035_v34 }
 0x2e4   : > { %v2921_v27 = vpop.f32.mrf.mxu0 }
 0x2e5   : > { %v2745_v54 = vpop.f32.mrf.mxu3  ;;  %v2922_v48 = vadd.f32 %v2921_v27, %v8769_v56  ;;  %v3010_v49 = vpop.f32.mrf.mxu1 }
 0x2e6   : > { %v9142_v20 = vadd.f32 %v2745_v54, %v2657_v13 }
 0x2e7   : > { %v9145_v62 = vadd.f32 %v3010_v49, %v2922_v48  ;;  %2960 = vmatmul.bf16.gmra.mxu0 %v11882_v32  ;;  %3118 = vmatmul.bf16.gmra.mxu2 %v11883_v10 }
 0x2e8   : > { %3049 = vmatmul.bf16.gmra.mxu1 %v8191_v50 }
 0x2ea   : > { %3400 = vmatmul.bf16.gmra.mxu3 %v11876_v44  ;;  %v2659_v17 = vpop.f32.mrf.mxu2 }
 0x2eb   : > { %v2660_v34 = vadd.f32 %v2659_v17, %v9048_v1  ;;  %v11884_v17 = vld [vmem:[#allocation80_spill] sm:$0xff] }
 0x2ec   : > { %v2923_v35 = vpop.f32.mrf.mxu0 }
 0x2ed   : > { %v2748_v21 = vpop.f32.mrf.mxu3  ;;  %v2924_v56 = vadd.f32 %v2923_v35, %v8791_v19  ;;  %v3012_v30 = vpop.f32.mrf.mxu1 }
 0x2ee   : > { %v9152_v11 = vadd.f32 %v2748_v21, %v2660_v34  ;;  %v11885_v34 = vld [vmem:[#allocation81_spill] sm:$0xff] }
 0x2ef   : > { %v9155_v12 = vadd.f32 %v3012_v30, %v2924_v56 }
 0x2f2   : > { %v2661_v13 = vpop.f32.mrf.mxu2 }
 0x2f3   : > { %v2662_v54 = vadd.f32 %v2661_v13, %v9063_v41 }
 0x2f4   : > { %v2926_v48 = vpop.f32.mrf.mxu0 }
 0x2f5   : > { %v2750_v27 = vpop.f32.mrf.mxu3  ;;  %v2927_v44 = vadd.f32 %v2926_v48, %v8815_v63  ;;  %v3015_v22 = vpop.f32.mrf.mxu1 }
 0x2f6   : > { %v9158_v49 = vadd.f32 %v2750_v27, %v2662_v54 }
 0x2f7   : > { %v9161_v1 = vadd.f32 %v3015_v22, %v2927_v44  ;;  %2965 = vmatmul.bf16.gmra.mxu0 %v11884_v17  ;;  %3123 = vmatmul.bf16.gmra.mxu2 %v11885_v34 }
 0x2f8   : > { %3054 = vmatmul.bf16.gmra.mxu1 %v8241_v9 }
 0x2fa   : > { %3405 = vmatmul.bf16.gmra.mxu3 %v11880_v43  ;;  %v2664_v19 = vpop.f32.mrf.mxu2 }
 0x2fb   : > { %v2665_v41 = vadd.f32 %v2664_v19, %v9076_v36  ;;  %v11886_v19 = vld [vmem:[#allocation86_spill] sm:$0xff] }
 0x2fc   : > { %v2928_v35 = vpop.f32.mrf.mxu0 }
 0x2fd   : > { %v2753_v21 = vpop.f32.mrf.mxu3  ;;  %v2929_v63 = vadd.f32 %v2928_v35, %v8837_v39  ;;  %v3017_v30 = vpop.f32.mrf.mxu1 }
 0x2fe   : > { %v9168_v56 = vadd.f32 %v2753_v21, %v2665_v41  ;;  %v11887_v41 = vld [vmem:[#allocation87_spill] sm:$0xff] }
 0x2ff   : > { %v9171_v22 = vadd.f32 %v3017_v30, %v2929_v63 }
 0x302   : > { %v2666_v13 = vpop.f32.mrf.mxu2 }
 0x303   : > { %v2667_v54 = vadd.f32 %v2666_v13, %v9091_v26 }
 0x304   : > { %v2931_v48 = vpop.f32.mrf.mxu0 }
 0x305   : > { %v2755_v27 = vpop.f32.mrf.mxu3  ;;  %v2932_v43 = vadd.f32 %v2931_v48, %v8860_v60  ;;  %v3020_v9 = vpop.f32.mrf.mxu1 }
 0x306   : > { %v9174_v44 = vadd.f32 %v2755_v27, %v2667_v54 }
 0x307   : > { %v9177_v36 = vadd.f32 %v3020_v9, %v2932_v43  ;;  %2970 = vmatmul.bf16.gmra.mxu0 %v11886_v19  ;;  %3128 = vmatmul.bf16.gmra.mxu2 %v11887_v41 }
 0x308   : > { %3059 = vmatmul.bf16.gmra.mxu1 %v8291_v15 }
 0x30a   : > { %3410 = vmatmul.bf16.gmra.mxu3 %v11882_v32  ;;  %v2669_v39 = vpop.f32.mrf.mxu2 }
 0x30b   : > { %v2670_v26 = vadd.f32 %v2669_v39, %v9104_v6  ;;  %v6905_v39 = vld [vmem:[#allocation5 + $0x238] sm:$0xff] }
 0x30c   : > { %v2933_v35 = vpop.f32.mrf.mxu0  ;;  %3545 = vmatpush.bf16.msrb.mxu1 %v6905_v39 }
 0x30d   : > { %v2758_v21 = vpop.f32.mrf.mxu3  ;;  %v2934_v60 = vadd.f32 %v2933_v35, %v8877_v51  ;;  %v3022_v30 = vpop.f32.mrf.mxu1  ;;  %v6897_v51 = vld [vmem:[#allocation5 + $0x1f8] sm:$0xff] }
 0x30e   : > { %v9184_v63 = vadd.f32 %v2758_v21, %v2670_v26  ;;  %3456 = vmatpush.bf16.msrb.mxu0 %v6897_v51  ;;  %v6904_v21 = vld [vmem:[#allocation5 + $0x230] sm:$0xff] }
 0x30f   : > { %v9187_v9 = vadd.f32 %v3022_v30, %v2934_v60 }
 0x310   : > { %3546 = vmatpush.bf16.msrb.mxu1 %v6904_v21  ;;  %v6893_v21 = vld [vmem:[#allocation5 + $0x1d8] sm:$0xff] }
 0x312   : > { %v2671_v13 = vpop.f32.mrf.mxu2 }
 0x313   : > { %v2672_v54 = vadd.f32 %v2671_v13, %v9119_v57  ;;  %v6895_v13 = vld [vmem:[#allocation5 + $0x1e8] sm:$0xff] }
 0x314   : > { %v2936_v48 = vpop.f32.mrf.mxu0 }
 0x315   : > { %v2760_v27 = vpop.f32.mrf.mxu3  ;;  %v2937_v32 = vadd.f32 %v2936_v48, %v8896_v16  ;;  %v3025_v15 = vpop.f32.mrf.mxu1  ;;  %v6896_v16 = vld [vmem:[#allocation5 + $0x1f0] sm:$0xff]  ;;  %v6902_v48 = vld [vmem:[#allocation5 + $0x220] sm:$0xff] }
 0x316   : > { %v9190_v43 = vadd.f32 %v2760_v27, %v2672_v54  ;;  %3457 = vmatpush.bf16.msrb.mxu0 %v6896_v16  ;;  %v6903_v54 = vld [vmem:[#allocation5 + $0x228] sm:$0xff] }
 0x317   : > { %v9193_v6 = vadd.f32 %v3025_v15, %v2937_v32  ;;  %2975 = vmatmul.bf16.gmra.mxu0 %v8650_v23  ;;  %3133 = vmatmul.bf16.gmra.mxu2 %v8655_v31  ;;  %v11890_v16 = vld [vmem:[#allocation97_spill] sm:$0xff] }
 0x318   : > { %3064 = vmatmul.bf16.gmra.mxu1 %v8351_v59 }
 0x319   : > { %3547 = vmatpush.bf16.msrb.mxu1 %v6903_v54 }
 0x31a   : > { %3415 = vmatmul.bf16.gmra.mxu3 %v11884_v17  ;;  %v3094_v57 = vpop.f32.mrf.mxu2  ;;  %3458 = vmatpush.bf16.msrb.mxu0 %v6895_v13  ;;  %v6900_v13 = vld [vmem:[#allocation5 + $0x210] sm:$0xff] }
 0x31b   : > { %v9200_v26 = vadd.f32 %v3094_v57, %v9129_v0  ;;  %v6894_v0 = vld [vmem:[#allocation5 + $0x1e0] sm:$0xff] }
 0x31c   : > { %v2938_v15 = vpop.f32.mrf.mxu0  ;;  %v11889_v57 = vld [vmem:[#allocation96_spill] sm:$0xff] }
 0x31d   : > { %v2939_v35 = vadd.f32 %v2938_v15, %v8913_v4  ;;  %v3027_v60 = vpop.f32.mrf.mxu1  ;;  %3548 = vmatpush.bf16.msrb.mxu1 %v6902_v48  ;;  %v6901_v15 = vld [vmem:[#allocation5 + $0x218] sm:$0xff] }
 0x31e   : > { %3459 = vmatpush.bf16.msrb.mxu0 %v6894_v0 }
 0x31f   : > { %v9203_v30 = vadd.f32 %v3027_v60, %v2939_v35  ;;  %v11891_v35 = vld [vmem:[#allocation66_spill] sm:$0xff] }
 0x320   : > { %v6892_v60 = vld [vmem:[#allocation5 + $0x1d0] sm:$0xff] }
 0x321   : > { %3549 = vmatpush.bf16.msrb.mxu1 %v6901_v15 }
 0x322   : > { %v3096_v17 = vpop.f32.mrf.mxu2  ;;  %3460 = vmatpush.bf16.msrb.mxu0 %v6893_v21  ;;  %v6898_v21 = vld [vmem:[#allocation5 + $0x200] sm:$0xff] }
 0x323   : > { %v9206_v27 = vadd.f32 %v3096_v17, %v9139_v5 }
 0x324   : > { %v2941_v32 = vpop.f32.mrf.mxu0 }
 0x325   : > { %v2942_v51 = vadd.f32 %v2941_v32, %v8932_v25  ;;  %v3030_v39 = vpop.f32.mrf.mxu1  ;;  %3550 = vmatpush.bf16.msrb.mxu1 %v6900_v13  ;;  %v6891_v32 = vld [vmem:[#allocation5 + $0x1c8] sm:$0xff] }
 0x326   : > { %3461 = vmatpush.bf16.msrb.mxu0 %v6892_v60  ;;  %v11894_v60 = vld [vmem:[#allocation100_spill] sm:$0xff]  ;;  %v11895_v13 = vld [vmem:[#allocation101_spill] sm:$0xff] }
 0x327   : > { %v9209_v4 = vadd.f32 %v3030_v39, %v2942_v51  ;;  %2980 = vmatmul.bf16.gmra.mxu0 %v11889_v57  ;;  %3138 = vmatmul.bf16.gmra.mxu2 %v11890_v16  ;;  %v6899_v51 = vld [vmem:[#allocation5 + $0x208] sm:$0xff] }
 0x328   : > { %3069 = vmatmul.bf16.gmra.mxu1 %v11891_v35 }
 0x329   : > { %11888 = vst [vmem:[#allocation62_spill] sm:$0xff] %v9209_v4  ;;  %3551 = vmatpush.bf16.msrb.mxu1 %v6899_v51 }
 0x32a   : > { %3420 = vmatmul.bf16.gmra.mxu3 %v11886_v19  ;;  %v3099_v5 = vpop.f32.mrf.mxu2  ;;  %3462 = vmatpush.bf16.msrb.mxu0 %v6891_v32 }
 0x32b   : > { %v9216_v25 = vadd.f32 %v3099_v5, %v9145_v62  ;;  %v6890_v62 = vld [vmem:[#allocation5 + $0x1c0] sm:$0xff] }
 0x32c   : > { %v2943_v54 = vpop.f32.mrf.mxu0 }
 0x32d   : > { %v2944_v17 = vadd.f32 %v2943_v54, %v8949_v45  ;;  %v3032_v0 = vpop.f32.mrf.mxu1  ;;  %3552 = vmatpush.bf16.msrb.mxu1 %v6898_v21  ;;  %v11896_v54 = vld [vmem:[#allocation73_spill] sm:$0xff] }
 0x32e   : > { %3463 = vmatpush.bf16.msrb.mxu0 %v6890_v62 }
 0x32f   : > { %v9219_v48 = vadd.f32 %v3032_v0, %v2944_v17 }
 0x331   : > { %11892 = vst [vmem:[#allocation68_spill] sm:$0xff] %v9219_v48  ;;  %v11904_v48 = vld [vmem:[#allocation22_spill] sm:$0xff] }
 0x332   : > { %v3101_v19 = vpop.f32.mrf.mxu2 }
 0x333   : > { %v9222_v39 = vadd.f32 %v3101_v19, %v9155_v12 }
 0x334   : > { %v2946_v15 = vpop.f32.mrf.mxu0 }
 0x335   : > { %v2947_v5 = vadd.f32 %v2946_v15, %v8968_v3  ;;  %v3035_v4 = vpop.f32.mrf.mxu1 }
 0x337   : > { %v9225_v45 = vadd.f32 %v3035_v4, %v2947_v5  ;;  %2985 = vmatmul.bf16.gmra.mxu0 %v11894_v60  ;;  %3143 = vmatmul.bf16.gmra.mxu2 %v11895_v13  ;;  %v9237_v4 = vpop.f32.mrf.mxu3 }
 0x338   : > { %3074 = vmatmul.bf16.gmra.mxu1 %v11896_v54 }
 0x339   : > { %11893 = vst [vmem:[#allocation69_spill] sm:$0xff] %v9225_v45 }
 0x33a   : > { %3425 = vmatmul.bf16.gmra.mxu3 %v8650_v23  ;;  %v3104_v12 = vpop.f32.mrf.mxu2 }
 0x33b   : > { %v9232_v17 = vadd.f32 %v3104_v12, %v9161_v1  ;;  %v11899_v1 = vld [vmem:[#allocation104_spill] sm:$0xff]  ;;  %v11900_v12 = vld [vmem:[#allocation105_spill] sm:$0xff] }
 0x33c   : > { %v2948_v0 = vpop.f32.mrf.mxu0 }
 0x33d   : > { %v2949_v3 = vadd.f32 %v2948_v0, %v8985_v24  ;;  %v3037_v32 = vpop.f32.mrf.mxu1  ;;  %v11901_v24 = vld [vmem:[#allocation21_spill] sm:$0xff] }
 0x33f   : > { %v9235_v51 = vadd.f32 %v3037_v32, %v2949_v3 }
 0x341   : > { %11897 = vst [vmem:[#allocation75_spill] sm:$0xff] %v9235_v51 }
 0x342   : > { %v3106_v19 = vpop.f32.mrf.mxu2 }
 0x343   : > { %v9240_v62 = vadd.f32 %v3106_v19, %v9171_v22  ;;  %v9252_v22 = vpop.f32.mrf.mxu3 }
 0x344   : > { %v2951_v21 = vpop.f32.mrf.mxu0 }
 0x345   : > { %v2952_v15 = vadd.f32 %v2951_v21, %v9004_v61  ;;  %v3040_v23 = vpop.f32.mrf.mxu1 }
 0x347   : > { %v9243_v5 = vadd.f32 %v3040_v23, %v2952_v15  ;;  %2990 = vmatmul.bf16.gmra.mxu0 %v11899_v1  ;;  %3148 = vmatmul.bf16.gmra.mxu2 %v11900_v12 }
 0x348   : > { %3079 = vmatmul.bf16.gmra.mxu1 %v11901_v24 }
 0x349   : > { %11898 = vst [vmem:[#allocation72_spill] sm:$0xff] %v9243_v5 }
 0x34a   : > { %3430 = vmatmul.bf16.gmra.mxu3 %v11889_v57  ;;  %v3109_v0 = vpop.f32.mrf.mxu2 }
 0x34b   : > { %v9250_v3 = vadd.f32 %v3109_v0, %v9177_v36  ;;  %v9261_v45 = vpop.f32.mrf.mxu3  ;;  %v11903_v0 = vld [vmem:[#allocation109_spill] sm:$0xff] }
 0x34c   : > { %v2953_v32 = vpop.f32.mrf.mxu0 }
 0x34d   : > { %v2954_v61 = vadd.f32 %v2953_v32, %v9017_v42  ;;  %v3042_v19 = vpop.f32.mrf.mxu1 }
 0x34f   : > { %v9255_v21 = vadd.f32 %v3042_v19, %v2954_v61 }
 0x351   : > { %11902 = vst [vmem:[#allocation80_spill] sm:$0xff] %v9255_v21 }
 0x352   : > { %v3111_v15 = vpop.f32.mrf.mxu2 }
 0x353   : > { %v9258_v23 = vadd.f32 %v3111_v15, %v9187_v9 }
 0x354   : > { %v2956_v5 = vpop.f32.mrf.mxu0 }
 0x355   : > { %v2957_v51 = vadd.f32 %v2956_v5, %v9032_v40  ;;  %v3045_v57 = vpop.f32.mrf.mxu1 }
 0x357   : > { %v9263_v36 = vadd.f32 %v3045_v57, %v2957_v51  ;;  %3153 = vmatmul.bf16.gmra.mxu2 %v11903_v0  ;;  %3464 = vmatmul.bf16.vlgmr.msrb.gmra.mxu0 %v11904_v48  ;;  %v9275_v51 = vpop.f32.mrf.mxu3 }
 0x358   : > { %3553 = vmatmul.bf16.vlgmr.msrb.gmra.mxu1 %v11873_v53  ;;  %v11906_v53 = vld [vmem:[#allocation111_spill] sm:$0xff] }
 0x35a   : > { %3435 = vmatmul.bf16.gmra.mxu3 %v11894_v60  ;;  %v3114_v42 = vpop.f32.mrf.mxu2 }
 0x35b   : > { %v9270_v9 = vadd.f32 %v3114_v42, %v9193_v6 }
 0x35c   : > { %v2958_v32 = vpop.f32.mrf.mxu0 }
 0x35d   : > { %v2959_v40 = vadd.f32 %v2958_v32, %v9045_v37  ;;  %v3047_v5 = vpop.f32.mrf.mxu1 }
 0x35f   : > { %v9273_v61 = vadd.f32 %v3047_v5, %v2959_v40  ;;  %v9286_v37 = vpop.f32.mrf.mxu3 }
 0x361   : > { %11905 = vst [vmem:[#allocation81_spill] sm:$0xff] %v9273_v61  ;;  %v11909_v61 = vld [vmem:[#allocation108_spill] sm:$0xff] }
 0x362   : > { %v9277_v19 = vpop.f32.mrf.mxu2 }
 0x364   : > { %v2961_v15 = vpop.f32.mrf.mxu0 }
 0x365   : > { %v2962_v48 = vadd.f32 %v2961_v15, %v9060_v58  ;;  %v3050_v60 = vpop.f32.mrf.mxu1 }
 0x367   : > { %v9280_v57 = vadd.f32 %v3050_v60, %v2962_v48  ;;  %3158 = vmatmul.bf16.gmra.mxu2 %v11906_v53  ;;  %3469 = vmatmul.bf16.gmra.mxu0 %v11860_v8  ;;  %v9295_v15 = vpop.f32.mrf.mxu3 }
 0x368   : > { %3558 = vmatmul.bf16.gmra.mxu1 %v11877_v29  ;;  %v11908_v29 = vld [vmem:[#allocation57_spill] sm:$0xff] }
 0x36a   : > { %3440 = vmatmul.bf16.gmra.mxu3 %v11899_v1  ;;  %v9288_v6 = vpop.f32.mrf.mxu2 }
 0x36c   : > { %v2963_v42 = vpop.f32.mrf.mxu0 }
 0x36d   : > { %v2964_v32 = vadd.f32 %v2963_v42, %v9073_v38  ;;  %v3052_v40 = vpop.f32.mrf.mxu1 }
 0x36f   : > { %v9291_v58 = vadd.f32 %v3052_v40, %v2964_v32 }
 0x371   : > { %11907 = vst [vmem:[#allocation86_spill] sm:$0xff] %v9291_v58  ;;  %v9305_v58 = vpop.f32.mrf.mxu3 }
 0x372   : > { %v9293_v5 = vpop.f32.mrf.mxu2 }
 0x374   : > { %v2966_v48 = vpop.f32.mrf.mxu0 }
 0x375   : > { %v2967_v8 = vadd.f32 %v2966_v48, %v9088_v7  ;;  %v3055_v1 = vpop.f32.mrf.mxu1 }
 0x377   : > { %v3056_v60 = vadd.f32 %v3055_v1, %v2967_v8  ;;  %3163 = vmatmul.bf16.gmra.mxu2 %v11908_v29  ;;  %3474 = vmatmul.bf16.gmra.mxu0 %v11865_v2 }
 0x378   : > { %3563 = vmatmul.bf16.gmra.mxu1 %v11881_v47 }
 0x379   : > { %v9314_v47 = vpop.f32.mrf.mxu3 }
 0x37a   : > { %3445 = vmatmul.bf16.gmra.mxu3 %v11909_v61  ;;  %v9302_v38 = vpop.f32.mrf.mxu2  ;;  %v11913_v61 = vld [vmem:[#allocation59_spill] sm:$0xff] }
 0x37b   : > { %11910 = vst [vmem:[#allocation87_spill] sm:$0xff] %v9302_v38  ;;  %v11917_v38 = vld [vmem:[#allocation33_spill] sm:$0xff] }
 0x37c   : > { %v2968_v42 = vpop.f32.mrf.mxu0 }
 0x37d   : > { %v2969_v32 = vadd.f32 %v2968_v42, %v9101_v18  ;;  %v3057_v40 = vpop.f32.mrf.mxu1  ;;  %v11914_v18 = vmov 0  }
 0x37f   : > { %v9307_v21 = vadd.f32 %v3057_v40, %v2969_v32 }
 0x381   : > { %11911 = vst [vmem:[#allocation96_spill] sm:$0xff] %v9307_v21 }
 0x382   : > { %v9309_v7 = vpop.f32.mrf.mxu2 }
 0x383   : > { %11912 = vst [vmem:[#allocation97_spill] sm:$0xff] %v9309_v7 }
 0x384   : > { %v2971_v48 = vpop.f32.mrf.mxu0 }
 0x385   : > { %v2972_v8 = vadd.f32 %v2971_v48, %v9116_v55  ;;  %v3060_v2 = vpop.f32.mrf.mxu1 }
 0x387   : > { %v3061_v1 = vadd.f32 %v3060_v2, %v2972_v8  ;;  %3168 = vmatmul.bf16.gmra.mxu2 %v11913_v61  ;;  %3479 = vmatmul.bf16.gmra.mxu0 %v8022_v33 }
 0x388   : > { %3568 = vmatmul.bf16.gmra.mxu1 %v11883_v10 }
 0x38a   : > { %3450 = vmatmul.bf16.gmra.mxu3 %v11914_v18  ;;  %v9318_v42 = vpop.f32.mrf.mxu2 }
 0x38b   : > { %11915 = vst [vmem:[#allocation66_spill] sm:$0xff] %v9318_v42 }
 0x38c   : > { %v2973_v32 = vpop.f32.mrf.mxu0 }
 0x38d   : > { %v2974_v40 = vadd.f32 %v2973_v32, %v9126_v28  ;;  %v3062_v21 = vpop.f32.mrf.mxu1 }
 0x38f   : > { %v9321_v7 = vadd.f32 %v3062_v21, %v2974_v40 }
 0x391   : > { %11916 = vst [vmem:[#allocation100_spill] sm:$0xff] %v9321_v7 }
 0x392   : > { %v9323_v55 = vpop.f32.mrf.mxu2 }
 0x394   : > { %v2976_v48 = vpop.f32.mrf.mxu0 }
 0x395   : > { %v2977_v8 = vadd.f32 %v2976_v48, %v9136_v46  ;;  %v3065_v33 = vpop.f32.mrf.mxu1 }
 0x397   : > { %v3066_v2 = vadd.f32 %v3065_v33, %v2977_v8  ;;  %3484 = vmatmul.bf16.gmra.mxu0 %v11917_v38 }
 0x398   : > { %3573 = vmatmul.bf16.gmra.mxu1 %v11885_v34 }
 0x39a   : > { %v3134_v10 = vpop.f32.mrf.mxu2 }
 0x39b   : > { %v9329_v42 = vadd.f32 %v3134_v10, %v9263_v36 }
 0x39c   : > { %v2978_v18 = vpop.f32.mrf.mxu0 }
 0x39d   : > { %v2979_v28 = vadd.f32 %v2978_v18, %v9142_v20  ;;  %v3067_v21 = vpop.f32.mrf.mxu1 }
 0x39f   : > { %v9332_v32 = vadd.f32 %v3067_v21, %v2979_v28 }
 0x3a2   : > { %v9334_v40 = vpop.f32.mrf.mxu2 }
 0x3a4   : > { %v2981_v7 = vpop.f32.mrf.mxu0 }
 0x3a5   : > { %v2982_v46 = vadd.f32 %v2981_v7, %v9152_v11  ;;  %v3070_v48 = vpop.f32.mrf.mxu1 }
 0x3a7   : > { %v9337_v8 = vadd.f32 %v3070_v48, %v2982_v46  ;;  %3489 = vmatmul.bf16.gmra.mxu0 %v8107_v52 }
 0x3a8   : > { %3578 = vmatmul.bf16.gmra.mxu1 %v11887_v41 }
 0x3aa   : > { %v3139_v34 = vpop.f32.mrf.mxu2 }
 0x3ab   : > { %v9342_v36 = vadd.f32 %v3139_v34, %v9280_v57 }
 0x3ac   : > { %v2983_v20 = vpop.f32.mrf.mxu0 }
 0x3ad   : > { %v2984_v38 = vadd.f32 %v2983_v20, %v9158_v49  ;;  %v3072_v18 = vpop.f32.mrf.mxu1 }
 0x3af   : > { %v9345_v33 = vadd.f32 %v3072_v18, %v2984_v38 }
 0x3b2   : > { %v9347_v10 = vpop.f32.mrf.mxu2 }
 0x3b4   : > { %v2986_v11 = vpop.f32.mrf.mxu0 }
 0x3b5   : > { %v2987_v7 = vadd.f32 %v2986_v11, %v9168_v56  ;;  %v3075_v28 = vpop.f32.mrf.mxu1 }
 0x3b7   : > { %v9350_v21 = vadd.f32 %v3075_v28, %v2987_v7  ;;  %3494 = vmatmul.bf16.gmra.mxu0 %v8149_v14 }
 0x3b8   : > { %3583 = vmatmul.bf16.gmra.mxu1 %v8655_v31 }
 0x3ba   : > { %v3144_v52 = vpop.f32.mrf.mxu2 }
 0x3bb   : > { %v9354_v41 = vadd.f32 %v3144_v52, %v3056_v60 }
 0x3bc   : > { %v2988_v57 = vpop.f32.mrf.mxu0 }
 0x3bd   : > { %v2989_v49 = vadd.f32 %v2988_v57, %v9174_v44  ;;  %v3077_v46 = vpop.f32.mrf.mxu1 }
 0x3bf   : > { %v9357_v48 = vadd.f32 %v3077_v46, %v2989_v49  ;;  %v11918_v46 = vld [vmem:[#allocation46_spill] sm:$0xff] }
 0x3c2   : > { %v9359_v34 = vpop.f32.mrf.mxu2 }
 0x3c4   : > { %v2991_v20 = vpop.f32.mrf.mxu0 }
 0x3c5   : > { %v2992_v56 = vadd.f32 %v2991_v20, %v9184_v63  ;;  %v3080_v38 = vpop.f32.mrf.mxu1 }
 0x3c7   : > { %v9362_v18 = vadd.f32 %v3080_v38, %v2992_v56  ;;  %3499 = vmatmul.bf16.gmra.mxu0 %v8191_v50 }
 0x3c8   : > { %3588 = vmatmul.bf16.gmra.mxu1 %v11890_v16 }
 0x3ca   : > { %v3149_v14 = vpop.f32.mrf.mxu2 }
 0x3cb   : > { %v9366_v31 = vadd.f32 %v3149_v14, %v3061_v1 }
 0x3cc   : > { %v2993_v60 = vpop.f32.mrf.mxu0 }
 0x3cd   : > { %v2994_v44 = vadd.f32 %v2993_v60, %v9190_v43  ;;  %v3082_v11 = vpop.f32.mrf.mxu1  ;;  %v9380_v43 = vld [vmem:[%s11431_s5] ss:$0 sm:$0xff] }
 0x3cf   : > { %v9369_v7 = vadd.f32 %v3082_v11, %v2994_v44 }
 0x3d2   : > { %v9371_v28 = vpop.f32.mrf.mxu2 }
 0x3d4   : > { %v3465_v52 = vpop.f32.mrf.mxu0 }
 0x3d5   : > { %v3466_v63 = vadd.f32 %v3465_v52, %v9237_v4  ;;  %v3554_v57 = vpop.f32.mrf.mxu1 }
 0x3d7   : > { %v3555_v49 = vadd.f32 %v3554_v57, %v3466_v63  ;;  %3504 = vmatmul.bf16.gmra.mxu0 %v11918_v46  ;;  %v11919_v46 = vld [vmem:[#allocation53_spill] sm:$0xff] }
 0x3d8   : > { %3593 = vmatmul.bf16.gmra.mxu1 %v11895_v13  ;;  %v9389_v13 = vld [vmem:[%s11432_s6] ss:$0 sm:$0xff] }
 0x3d9   : > { %v3634_v50 = vadd.f32 %v3555_v49, %v9200_v26 }
 0x3da   : > { %v3154_v16 = vpop.f32.mrf.mxu2 }
 0x3db   : > { %v9382_v1 = vadd.f32 %v3154_v16, %v3066_v2  ;;  %v3670_v38 = vmul.f32 %v9380_v43, %v3634_v50  ;;  %v3396_v50 = vpop.f32.mrf.mxu3 }
 0x3dc   : > { %v3467_v20 = vpop.f32.mrf.mxu0 }
 0x3dd   : > { %v3468_v56 = vadd.f32 %v3467_v20, %v9252_v22  ;;  %v3556_v4 = vpop.f32.mrf.mxu1  ;;  %v3706_v60 = vadd.f32 %v9389_v13, %v3670_v38 }
 0x3df   : > { %v3557_v26 = vadd.f32 %v3556_v4, %v3468_v56  ;;  %v3738_v63 = vmax.f32 %v3706_v60, 0.0 }
 0x3e1   : > { %v3635_v14 = vadd.f32 %v3557_v26, %v9206_v27 }
 0x3e3   : > { %v3671_v44 = vmul.f32 %v9380_v43, %v3635_v14  ;;  %v9404_v14 = vpop.f32.mrf.mxu3 }
 0x3e4   : > { %v3470_v2 = vpop.f32.mrf.mxu0 }
 0x3e5   : > { %v3707_v11 = vadd.f32 %v9389_v13, %v3671_v44  ;;  %v3471_v22 = vadd.f32 %v3470_v2, %v9261_v45  ;;  %v3559_v52 = vpop.f32.mrf.mxu1 }
 0x3e7   : > { %v3739_v57 = vmax.f32 %v3707_v11, 0.0  ;;  %v3560_v49 = vadd.f32 %v3559_v52, %v3471_v22  ;;  %3509 = vmatmul.bf16.gmra.mxu0 %v11919_v46 }
 0x3e8   : > { %3598 = vmatmul.bf16.gmra.mxu1 %v11900_v12 }
 0x3e9   : > { %v9398_v16 = vpack.c.bf16 %v3739_v57, %v3738_v63  ;;  %v3636_v27 = vadd.f32 %v3560_v49, %v9216_v25 }
 0x3eb   : > { %v3672_v38 = vmul.f32 %v9380_v43, %v3636_v27  ;;  %v9415_v57 = vpop.f32.mrf.mxu3 }
 0x3ec   : > { %v3472_v20 = vpop.f32.mrf.mxu0 }
 0x3ed   : > { %v3473_v56 = vadd.f32 %v3472_v20, %v9275_v51  ;;  %v3561_v4 = vpop.f32.mrf.mxu1  ;;  %v3708_v60 = vadd.f32 %v9389_v13, %v3672_v38 }
 0x3ef   : > { %v3562_v45 = vadd.f32 %v3561_v4, %v3473_v56  ;;  %v3740_v22 = vmax.f32 %v3708_v60, 0.0 }
 0x3f1   : > { %v3637_v26 = vadd.f32 %v3562_v45, %v9222_v39 }
 0x3f3   : > { %v3673_v44 = vmul.f32 %v9380_v43, %v3637_v26  ;;  %v9424_v26 = vpop.f32.mrf.mxu3 }
 0x3f4   : > { %v3475_v12 = vpop.f32.mrf.mxu0 }
 0x3f5   : > { %v3709_v2 = vadd.f32 %v9389_v13, %v3673_v44  ;;  %v3476_v25 = vadd.f32 %v3475_v12, %v9286_v37  ;;  %v3564_v11 = vpop.f32.mrf.mxu1 }
 0x3f7   : > { %v3741_v51 = vmax.f32 %v3709_v2, 0.0  ;;  %v3565_v52 = vadd.f32 %v3564_v11, %v3476_v25  ;;  %3514 = vmatmul.bf16.gmra.mxu0 %v8351_v59 }
 0x3f8   : > { %3603 = vmatmul.bf16.gmra.mxu1 %v11903_v0 }
 0x3f9   : > { %v9412_v39 = vpack.c.bf16 %v3741_v51, %v3740_v22  ;;  %v3638_v63 = vadd.f32 %v3565_v52, %v9232_v17 }
 0x3fb   : > { %v3674_v37 = vmul.f32 %v9380_v43, %v3638_v63  ;;  %v9433_v51 = vpop.f32.mrf.mxu3 }
 0x3fc   : > { %v3477_v49 = vpop.f32.mrf.mxu0 }
 0x3fd   : > { %v3478_v46 = vadd.f32 %v3477_v49, %v9295_v15  ;;  %v3566_v27 = vpop.f32.mrf.mxu1  ;;  %v3710_v4 = vadd.f32 %v9389_v13, %v3674_v37  ;;  %v6937_v37 = vld [vmem:[#allocation7 + $0xf4] sm:$0xf0] }
 0x3ff   : > { %v3567_v20 = vadd.f32 %v3566_v27, %v3478_v46  ;;  %v3742_v60 = vmax.f32 %v3710_v4, 0.0  ;;  %v6570_v27 = vld [vmem:[#allocation7 + $0xe8] sm:$0xf] }
 0x401   : > { %v3639_v56 = vadd.f32 %v3567_v20, %v9240_v62 }
 0x403   : > { %v3675_v59 = vmul.f32 %v9380_v43, %v3639_v56 }
 0x404   : > { %v3480_v0 = vpop.f32.mrf.mxu0 }
 0x405   : > { %v3711_v38 = vadd.f32 %v9389_v13, %v3675_v59  ;;  %v3481_v17 = vadd.f32 %v3480_v0, %v9305_v58  ;;  %v3569_v45 = vpop.f32.mrf.mxu1  ;;  %v9440_v59 = vor.u32 %v6937_v37, %v6570_v27  ;;  %v6923_v27 = vld [vmem:[#allocation7 + $0x8c] sm:$0xf] }
 0x407   : > { %v3743_v15 = vmax.f32 %v3711_v38, 0.0  ;;  %v3570_v44 = vadd.f32 %v3569_v45, %v3481_v17  ;;  %3519 = vmatmul.bf16.gmra.mxu0 %v11891_v35  ;;  %v9449_v17 = vpop.f32.mrf.mxu3  ;;  %v6554_v45 = vld [vmem:[#allocation7 + $0xc8] sm:$0xf] }
 0x408   : > { %3608 = vmatmul.bf16.gmra.mxu1 %v11906_v53  ;;  %4824 = vmatpush.bf16.msra.mxu0 %v9440_v59 }
 0x409   : > { %v9428_v62 = vpack.c.bf16 %v3743_v15, %v3742_v60  ;;  %v3640_v12 = vadd.f32 %v3570_v44, %v9250_v3  ;;  %v6933_v60 = vld [vmem:[#allocation7 + $0xd4] sm:$0xf0]  ;;  %v6556_v44 = vld [vmem:[#allocation7 + $0xd8] sm:$0xf0] }
 0x40a   : > { %v9452_v15 = vor.u32 %v6933_v60, %v6554_v45  ;;  %v6506_v60 = vld [vmem:[#allocation7 + $0x68] sm:$0xf] }
 0x40b   : > { %v3676_v58 = vmul.f32 %v9380_v43, %v3640_v12 }
 0x40c   : > { %v3482_v2 = vpop.f32.mrf.mxu0  ;;  %4825 = vmatpush.bf16.msra.mxu0 %v9452_v15 }
 0x40d   : > { %v3483_v25 = vadd.f32 %v3482_v2, %v9314_v47  ;;  %v3571_v11 = vpop.f32.mrf.mxu1  ;;  %v3712_v63 = vadd.f32 %v9389_v13, %v3676_v58  ;;  %v6935_v47 = vld [vmem:[#allocation7 + $0xec] sm:$0xf] }
 0x40e   : > { %v6927_v58 = vld [vmem:[#allocation7 + $0xac] sm:$0xf] }
 0x40f   : > { %v3572_v22 = vadd.f32 %v3571_v11, %v3483_v25  ;;  %v3744_v20 = vmax.f32 %v3712_v63, 0.0  ;;  %v6929_v11 = vld [vmem:[#allocation7 + $0xb4] sm:$0xf0] }
 0x411   : > { %v3641_v52 = vadd.f32 %v3572_v22, %v9258_v23  ;;  %v6572_v23 = vld [vmem:[#allocation7 + $0xf8] sm:$0xf0]  ;;  %v3117_v22 = vadd.f32 %v9277_v19, %v9203_v30 }
 0x412   : > { %v9443_v0 = vor.u32 %v6935_v47, %v6572_v23  ;;  %v6524_v47 = vld [vmem:[#allocation7 + $0x98] sm:$0xf0] }
 0x413   : > { %v3677_v35 = vmul.f32 %v9380_v43, %v3641_v52 }
 0x414   : > { %v3485_v53 = vpop.f32.mrf.mxu0  ;;  %4913 = vmatpush.bf16.msra.mxu1 %v9443_v0 }
 0x415   : > { %v3713_v49 = vadd.f32 %v9389_v13, %v3677_v35  ;;  %v3486_v46 = vadd.f32 %v3485_v53, %v3396_v50  ;;  %v3574_v3 = vpop.f32.mrf.mxu1  ;;  %v6540_v53 = vld [vmem:[#allocation7 + $0xb8] sm:$0xf0] }
 0x417   : > { %v3745_v56 = vmax.f32 %v3713_v49, 0.0  ;;  %v3575_v4 = vadd.f32 %v3574_v3, %v3486_v46  ;;  %3524 = vmatmul.bf16.gmra.mxu0 %v11896_v54  ;;  %v6931_v54 = vld [vmem:[#allocation7 + $0xcc] sm:$0xf]  ;;  %v9464_v49 = vor.u32 %v6927_v58, %v6540_v53  ;;  %v6522_v46 = vld [vmem:[#allocation7 + $0x88] sm:$0xf] }
 0x418   : > { %3613 = vmatmul.bf16.gmra.mxu1 %v11908_v29  ;;  %v9454_v29 = vor.u32 %v6931_v54, %v6556_v44  ;;  %v6925_v3 = vld [vmem:[#allocation7 + $0x94] sm:$0xf0]  ;;  %v6919_v44 = vld [vmem:[#allocation7 + $0x6c] sm:$0xf] }
 0x419   : > { %v9445_v38 = vpack.c.bf16 %v3745_v56, %v3744_v20  ;;  %v3642_v50 = vadd.f32 %v3575_v4, %v9270_v9  ;;  %v6538_v9 = vld [vmem:[#allocation7 + $0xa8] sm:$0xf]  ;;  %v9470_v19 = vor.u32 %v6925_v3, %v6522_v46  ;;  %v9472_v20 = vpop.f32.mrf.mxu3  ;;  %v9474_v4 = vor.u32 %v6923_v27, %v6524_v47  ;;  %v6921_v54 = vld [vmem:[#allocation7 + $0x74] sm:$0xf0]  ;;  %v6492_v3 = vld [vmem:[#allocation7 + $0x58] sm:$0xf0] }
 0x41a   : > { %4914 = vmatpush.bf16.msra.mxu1 %v9454_v29  ;;  %v9462_v35 = vor.u32 %v6929_v11, %v6538_v9  ;;  %v9481_v9 = vor.u32 %v6921_v54, %v6506_v60  ;;  %v6508_v11 = vld [vmem:[#allocation7 + $0x78] sm:$0xf0]  ;;  %v6917_v53 = vld [vmem:[#allocation7 + $0x54] sm:$0xf0]  ;;  %v6474_v47 = vld [vmem:[#allocation7 + $0x28] sm:$0xf] }
 0x41b   : > { %v3678_v52 = vmul.f32 %v9380_v43, %v3642_v50  ;;  %v9484_v58 = vor.u32 %v6919_v44, %v6508_v11  ;;  %v6909_v11 = vld [vmem:[#allocation7 + $0x14] sm:$0xf0] }
 0x41c   : > { %v3487_v12 = vpop.f32.mrf.mxu0  ;;  %4826 = vmatpush.bf16.msra.mxu0 %v9462_v35 }
 0x41d   : > { %v3488_v2 = vadd.f32 %v3487_v12, %v9404_v14  ;;  %v3576_v25 = vpop.f32.mrf.mxu1  ;;  %v3714_v37 = vadd.f32 %v9389_v13, %v3678_v52 }
 0x41e   : > { %4915 = vmatpush.bf16.msra.mxu1 %v9464_v49 }
 0x41f   : > { %v3577_v63 = vadd.f32 %v3576_v25, %v3488_v2  ;;  %v3746_v12 = vmax.f32 %v3714_v37, 0.0 }
 0x420   : > { %4827 = vmatpush.bf16.msra.mxu0 %v9470_v19 }
 0x421   : > { %v3643_v14 = vadd.f32 %v3577_v63, %v3117_v22  ;;  %v6490_v63 = vld [vmem:[#allocation7 + $0x48] sm:$0xf] }
 0x422   : > { %4916 = vmatpush.bf16.msra.mxu1 %v9474_v4  ;;  %v9492_v46 = vor.u32 %v6917_v53, %v6490_v63  ;;  %v6460_v53 = vld [vmem:[#allocation7 + $0x18] sm:$0xf0] }
 0x423   : > { %v3679_v30 = vmul.f32 %v9380_v43, %v3643_v14  ;;  %v6915_v14 = vld [vmem:[#allocation7 + $0x4c] sm:$0xf] }
 0x424   : > { %v3490_v56 = vpop.f32.mrf.mxu0  ;;  %4828 = vmatpush.bf16.msra.mxu0 %v9481_v9 }
 0x425   : > { %v3715_v23 = vadd.f32 %v9389_v13, %v3679_v30  ;;  %v3491_v50 = vadd.f32 %v3490_v56, %v9415_v57  ;;  %v3579_v45 = vpop.f32.mrf.mxu1  ;;  %v11920_v57 = vld [vmem:[#allocation62_spill] sm:$0xff]  ;;  %v6913_v56 = vld [vmem:[#allocation7 + $0x34] sm:$0xf0] }
 0x426   : > { %v3120_v22 = vadd.f32 %v9288_v6, %v11920_v57  ;;  %4917 = vmatpush.bf16.msra.mxu1 %v9484_v58  ;;  %v3413_v6 = vpop.f32.mrf.mxu3  ;;  %v9502_v44 = vor.u32 %v6913_v56, %v6474_v47  ;;  %v6907_v57 = vld [vmem:[#allocation7 + $0xc] sm:$0xf] }
 0x427   : > { %v3747_v2 = vmax.f32 %v3715_v23, 0.0  ;;  %v3580_v25 = vadd.f32 %v3579_v45, %v3491_v50  ;;  %3529 = vmatmul.bf16.gmra.mxu0 %v11901_v24  ;;  %v6911_v23 = vld [vmem:[#allocation7 + $0x2c] sm:$0xf]  ;;  %v11921_v50 = vld [vmem:[#allocation68_spill] sm:$0xff] }
 0x428   : > { %3618 = vmatmul.bf16.gmra.mxu1 %v11913_v61  ;;  %v9494_v61 = vor.u32 %v6915_v14, %v6492_v3  ;;  %4829 = vmatpush.bf16.msra.mxu0 %v9492_v46  ;;  %v3122_v45 = vadd.f32 %v9293_v5, %v11921_v50 }
 0x429   : > { %v9488_v52 = vpack.c.bf16 %v3747_v2, %v3746_v12  ;;  %v3644_v24 = vadd.f32 %v3580_v25, %v3120_v22  ;;  %v6476_v12 = vld [vmem:[#allocation7 + $0x38] sm:$0xf0]  ;;  %v6458_v25 = vld [vmem:[#allocation7 + $0x8] sm:$0xf] }
 0x42a   : > { %4918 = vmatpush.bf16.msra.mxu1 %v9494_v61  ;;  %v9504_v2 = vor.u32 %v6911_v23, %v6476_v12  ;;  %v9510_v63 = vor.u32 %v6909_v11, %v6458_v25  ;;  %v11922_v23 = vld [vmem:[#allocation23_spill] sm:$0xff] }
 0x42b   : > { %v3680_v60 = vmul.f32 %v9380_v43, %v3644_v24  ;;  %v9512_v24 = vor.u32 %v6907_v57, %v6460_v53  ;;  %v11927_v53 = vld [vmem:[#allocation97_spill] sm:$0xff] }
 0x42c   : > { %v3492_v27 = vpop.f32.mrf.mxu0  ;;  %4830 = vmatpush.bf16.msra.mxu0 %v9502_v44 }
 0x42d   : > { %v3493_v37 = vadd.f32 %v3492_v27, %v9424_v26  ;;  %v3581_v30 = vpop.f32.mrf.mxu1  ;;  %v3716_v22 = vadd.f32 %v9389_v13, %v3680_v60  ;;  %v11924_v60 = vld [vmem:[#allocation69_spill] sm:$0xff] }
 0x42e   : > { %4919 = vmatpush.bf16.msra.mxu1 %v9504_v2  ;;  %v3416_v50 = vpop.f32.mrf.mxu3 }
 0x42f   : > { %v3582_v54 = vadd.f32 %v3581_v30, %v3493_v37  ;;  %v3748_v30 = vmax.f32 %v3716_v22, 0.0 }
 0x430   : > { %4831 = vmatpush.bf16.msra.mxu0 %v9510_v63 }
 0x431   : > { %v3645_v26 = vadd.f32 %v3582_v54, %v3122_v45  ;;  %v11923_v45 = vld [vmem:[#allocation65_spill] sm:$0xff]  ;;  %v11925_v54 = vld [vmem:[#allocation87_spill] sm:$0xff] }
 0x432   : > { %4920 = vmatpush.bf16.msra.mxu1 %v9512_v24  ;;  %v3125_v12 = vadd.f32 %v11925_v54, %v11924_v60 }
 0x433   : > { %v3681_v5 = vmul.f32 %v9380_v43, %v3645_v26 }
 0x434   : > { %v3495_v14 = vpop.f32.mrf.mxu0 }
 0x435   : > { %v3717_v3 = vadd.f32 %v9389_v13, %v3681_v5  ;;  %v3496_v27 = vadd.f32 %v3495_v14, %v9433_v51  ;;  %v3584_v37 = vpop.f32.mrf.mxu1  ;;  %v11926_v5 = vld [vmem:[#allocation75_spill] sm:$0xff] }
 0x436   : > { %v3127_v22 = vadd.f32 %v11927_v53, %v11926_v5 }
 0x437   : > { %v3749_v47 = vmax.f32 %v3717_v3, 0.0  ;;  %v3585_v56 = vadd.f32 %v3584_v37, %v3496_v27  ;;  %3534 = vmatmul.bf16.gmra.mxu0 %v11922_v23  ;;  %v3418_v37 = vpop.f32.mrf.mxu3 }
 0x438   : > { %3623 = vmatmul.bf16.gmra.mxu1 %v11923_v45 }
 0x439   : > { %v9522_v26 = vpack.c.bf16 %v3749_v47, %v3748_v30  ;;  %v3646_v25 = vadd.f32 %v3585_v56, %v3125_v12 }
 0x43b   : > { %v3682_v14 = vmul.f32 %v9380_v43, %v3646_v25  ;;  %v11929_v25 = vld [vmem:[#allocation72_spill] sm:$0xff] }
 0x43c   : > { %v3497_v51 = vpop.f32.mrf.mxu0 }
 0x43d   : > { %v3498_v11 = vadd.f32 %v3497_v51, %v9449_v17  ;;  %v3586_v57 = vpop.f32.mrf.mxu1  ;;  %v3718_v23 = vadd.f32 %v9389_v13, %v3682_v14  ;;  %v11928_v51 = vmov 0  }
 0x43f   : > { %v3587_v3 = vadd.f32 %v3586_v57, %v3498_v11  ;;  %v3750_v17 = vmax.f32 %v3718_v23, 0.0  ;;  %v11930_v11 = vld [vmem:[#allocation66_spill] sm:$0xff] }
 0x440   : > { %v3130_v57 = vadd.f32 %v11930_v11, %v11929_v25 }
 0x441   : > { %v3647_v27 = vadd.f32 %v3587_v3, %v3127_v22  ;;  %v3421_v22 = vpop.f32.mrf.mxu3 }
 0x443   : > { %v3683_v45 = vmul.f32 %v9380_v43, %v3647_v27 }
 0x444   : > { %v3500_v60 = vpop.f32.mrf.mxu0 }
 0x445   : > { %v3719_v30 = vadd.f32 %v9389_v13, %v3683_v45  ;;  %v3501_v47 = vadd.f32 %v3500_v60, %v9472_v20  ;;  %v3589_v56 = vpop.f32.mrf.mxu1  ;;  %v11931_v45 = vld [vmem:[#allocation80_spill] sm:$0xff] }
 0x446   : > { %v3132_v20 = vadd.f32 %v9323_v55, %v11931_v45  ;;  %v11932_v45 = vld [vmem:[#allocation81_spill] sm:$0xff] }
 0x447   : > { %v3751_v54 = vmax.f32 %v3719_v30, 0.0  ;;  %v3590_v12 = vadd.f32 %v3589_v56, %v3501_v47  ;;  %3539 = vmatmul.bf16.gmra.mxu0 %v11928_v51 }
 0x448   : > { %3628 = vmatmul.bf16.gmra.mxu1 %v11928_v51 }
 0x449   : > { %v9536_v5 = vpack.c.bf16 %v3751_v54, %v3750_v17  ;;  %v3648_v53 = vadd.f32 %v3590_v12, %v3130_v57  ;;  %v3423_v25 = vpop.f32.mrf.mxu3 }
 0x44b   : > { %v3684_v23 = vmul.f32 %v9380_v43, %v3648_v53 }
 0x44c   : > { %v3502_v14 = vpop.f32.mrf.mxu0 }
 0x44d   : > { %v3503_v3 = vadd.f32 %v3502_v14, %v3413_v6  ;;  %v3591_v27 = vpop.f32.mrf.mxu1  ;;  %v3720_v47 = vadd.f32 %v9389_v13, %v3684_v23 }
 0x44f   : > { %v3592_v60 = vadd.f32 %v3591_v27, %v3503_v3  ;;  %v3752_v11 = vmax.f32 %v3720_v47, 0.0 }
 0x451   : > { %v3649_v30 = vadd.f32 %v3592_v60, %v3132_v20  ;;  %v3426_v60 = vpop.f32.mrf.mxu3 }
 0x453   : > { %v3685_v56 = vmul.f32 %v9380_v43, %v3649_v30 }
 0x454   : > { %v3505_v51 = vpop.f32.mrf.mxu0 }
 0x455   : > { %v3721_v17 = vadd.f32 %v9389_v13, %v3685_v56  ;;  %v3506_v54 = vadd.f32 %v3505_v51, %v3416_v50  ;;  %v3594_v12 = vpop.f32.mrf.mxu1  ;;  %v3137_v50 = vadd.f32 %v9334_v40, %v11932_v45 }
 0x457   : > { %v3753_v6 = vmax.f32 %v3721_v17, 0.0  ;;  %v3595_v57 = vadd.f32 %v3594_v12, %v3506_v54  ;;  %4832 = vmatmul.bf16.vlgmr.msra.gmra.mxu0 %v9398_v16 }
 0x458   : > { %4921 = vmatmul.bf16.vlgmr.msra.gmra.mxu1 %v9398_v16 }
 0x459   : > { %v9546_v55 = vpack.c.bf16 %v3753_v6, %v3752_v11  ;;  %v3650_v53 = vadd.f32 %v3595_v57, %v9329_v42  ;;  %v3428_v57 = vpop.f32.mrf.mxu3 }
 0x45b   : > { %3792 = vmatpush.bf16.msra.mxu2 %v9546_v55  ;;  %v3686_v20 = vmul.f32 %v9380_v43, %v3650_v53 }
 0x45c   : > { %v3507_v14 = vpop.f32.mrf.mxu0 }
 0x45d   : > { %v3508_v3 = vadd.f32 %v3507_v14, %v3418_v37  ;;  %v3596_v27 = vpop.f32.mrf.mxu1  ;;  %v3722_v47 = vadd.f32 %v9389_v13, %v3686_v20 }
 0x45f   : > { %v3597_v23 = vadd.f32 %v3596_v27, %v3508_v3  ;;  %3793 = vmatpush.bf16.msra.mxu2 %v9536_v5  ;;  %v3754_v54 = vmax.f32 %v3722_v47, 0.0  ;;  %v11933_v3 = vld [vmem:[#allocation86_spill] sm:$0xff] }
 0x460   : > { %v3142_v27 = vadd.f32 %v9347_v10, %v11933_v3 }
 0x461   : > { %v3651_v30 = vadd.f32 %v3597_v23, %v3137_v50 }
 0x463   : > { %v3687_v56 = vmul.f32 %v9380_v43, %v3651_v30  ;;  %3794 = vmatpush.bf16.msra.mxu2 %v9522_v26 }
 0x464   : > { %v3510_v42 = vpop.f32.mrf.mxu0 }
 0x465   : > { %v3723_v37 = vadd.f32 %v9389_v13, %v3687_v56  ;;  %v3511_v51 = vadd.f32 %v3510_v42, %v3421_v22  ;;  %v3599_v17 = vpop.f32.mrf.mxu1 }
 0x467   : > { %v3755_v40 = vmax.f32 %v3723_v37, 0.0  ;;  %v3600_v12 = vadd.f32 %v3599_v17, %v3511_v51  ;;  %3795 = vmatpush.bf16.msra.mxu2 %v9488_v52  ;;  %4837 = vmatmul.bf16.gmra.mxu0 %v9412_v39 }
 0x468   : > { %4926 = vmatmul.bf16.gmra.mxu1 %v9412_v39 }
 0x469   : > { %v9561_v11 = vpack.c.bf16 %v3755_v40, %v3754_v54  ;;  %v3652_v6 = vadd.f32 %v3600_v12, %v9342_v36  ;;  %v3431_v36 = vpop.f32.mrf.mxu3 }
 0x46b   : > { %3796 = vmatpush.bf16.msra.mxu2 %v9445_v38  ;;  %v3688_v45 = vmul.f32 %v9380_v43, %v3652_v6 }
 0x46c   : > { %v3512_v53 = vpop.f32.mrf.mxu0 }
 0x46d   : > { %v3513_v14 = vadd.f32 %v3512_v53, %v3423_v25  ;;  %v3601_v22 = vpop.f32.mrf.mxu1  ;;  %v3724_v23 = vadd.f32 %v9389_v13, %v3688_v45 }
 0x46f   : > { %v3602_v50 = vadd.f32 %v3601_v22, %v3513_v14  ;;  %3797 = vmatpush.bf16.msra.mxu2 %v9428_v62  ;;  %v3756_v37 = vmax.f32 %v3724_v23, 0.0  ;;  %v11934_v14 = vld [vmem:[#allocation96_spill] sm:$0xff] }
 0x471   : > { %v3653_v20 = vadd.f32 %v3602_v50, %v3142_v27  ;;  %v3433_v53 = vpop.f32.mrf.mxu3 }
 0x473   : > { %v3689_v30 = vmul.f32 %v9380_v43, %v3653_v20  ;;  %3798 = vmatpush.bf16.msra.mxu2 %v9412_v39 }
 0x474   : > { %v3515_v47 = vpop.f32.mrf.mxu0 }
 0x475   : > { %v3725_v25 = vadd.f32 %v9389_v13, %v3689_v30  ;;  %v3516_v56 = vadd.f32 %v3515_v47, %v3426_v60  ;;  %v3604_v42 = vpop.f32.mrf.mxu1  ;;  %v3147_v60 = vadd.f32 %v9359_v34, %v11934_v14 }
 0x477   : > { %v3757_v10 = vmax.f32 %v3725_v25, 0.0  ;;  %v3605_v51 = vadd.f32 %v3604_v42, %v3516_v56  ;;  %3799 = vmatpush.bf16.msra.mxu2 %v9398_v16  ;;  %4842 = vmatmul.bf16.gmra.mxu0 %v9428_v62 }
 0x478   : > { %4931 = vmatmul.bf16.gmra.mxu1 %v9428_v62 }
 0x479   : > { %v9576_v17 = vpack.c.bf16 %v3757_v10, %v3756_v37  ;;  %v3654_v54 = vadd.f32 %v3605_v51, %v9354_v41  ;;  %v3436_v56 = vpop.f32.mrf.mxu3 }
 0x47b   : > { %v3690_v22 = vmul.f32 %v9380_v43, %v3654_v54  ;;  %v11935_v54 = vld [vmem:[#allocation100_spill] sm:$0xff] }
 0x47c   : > { %v3517_v40 = vpop.f32.mrf.mxu0 }
 0x47d   : > { %v3518_v12 = vadd.f32 %v3517_v40, %v3428_v57  ;;  %v3606_v6 = vpop.f32.mrf.mxu1  ;;  %v3726_v45 = vadd.f32 %v9389_v13, %v3690_v22  ;;  %v3152_v40 = vadd.f32 %v9371_v28, %v11935_v54 }
 0x47f   : > { %v3607_v3 = vadd.f32 %v3606_v6, %v3518_v12  ;;  %v3758_v47 = vmax.f32 %v3726_v45, 0.0 }
 0x481   : > { %v3655_v27 = vadd.f32 %v3607_v3, %v3147_v60  ;;  %v3438_v60 = vpop.f32.mrf.mxu3 }
 0x483   : > { %v3691_v50 = vmul.f32 %v9380_v43, %v3655_v27 }
 0x484   : > { %v3520_v20 = vpop.f32.mrf.mxu0 }
 0x485   : > { %v3727_v23 = vadd.f32 %v9389_v13, %v3691_v50  ;;  %v3521_v30 = vadd.f32 %v3520_v20, %v3431_v36  ;;  %v3609_v41 = vpop.f32.mrf.mxu1  ;;  %v3156_v36 = vpop.f32.mrf.mxu2 }
 0x487   : > { %v3759_v57 = vmax.f32 %v3727_v23, 0.0  ;;  %v3610_v25 = vadd.f32 %v3609_v41, %v3521_v30  ;;  %4847 = vmatmul.bf16.gmra.mxu0 %v9445_v38 }
 0x488   : > { %4936 = vmatmul.bf16.gmra.mxu1 %v9445_v38 }
 0x489   : > { %v9587_v34 = vpack.c.bf16 %v3759_v57, %v3758_v47  ;;  %v3656_v42 = vadd.f32 %v3610_v25, %v9366_v31  ;;  %v3441_v47 = vpop.f32.mrf.mxu3 }
 0x48b   : > { %v3692_v12 = vmul.f32 %v9380_v43, %v3656_v42 }
 0x48c   : > { %v3522_v37 = vpop.f32.mrf.mxu0 }
 0x48d   : > { %v3523_v10 = vadd.f32 %v3522_v37, %v3433_v53  ;;  %v3611_v51 = vpop.f32.mrf.mxu1  ;;  %v3728_v22 = vadd.f32 %v9389_v13, %v3692_v12  ;;  %v3159_v28 = vpop.f32.mrf.mxu2  ;;  %v3157_v37 = vadd.f32 %v3156_v36, %v9332_v32 }
 0x48e   : > { %v3160_v32 = vadd.f32 %v3159_v28, %v9337_v8 }
 0x48f   : > { %v3612_v6 = vadd.f32 %v3611_v51, %v3523_v10  ;;  %v3760_v53 = vmax.f32 %v3728_v22, 0.0 }
 0x491   : > { %v3657_v14 = vadd.f32 %v3612_v6, %v3152_v40 }
 0x493   : > { %v3693_v3 = vmul.f32 %v9380_v43, %v3657_v14 }
 0x494   : > { %v3525_v27 = vpop.f32.mrf.mxu0 }
 0x495   : > { %v3729_v45 = vadd.f32 %v9389_v13, %v3693_v3  ;;  %v3526_v31 = vadd.f32 %v3525_v27, %v3436_v56  ;;  %v3614_v50 = vpop.f32.mrf.mxu1  ;;  %v3161_v54 = vpop.f32.mrf.mxu2 }
 0x496   : > { %v3443_v3 = vpop.f32.mrf.mxu3 }
 0x497   : > { %v3761_v20 = vmax.f32 %v3729_v45, 0.0  ;;  %v3615_v23 = vadd.f32 %v3614_v50, %v3526_v31  ;;  %4852 = vmatmul.bf16.gmra.mxu0 %v9488_v52 }
 0x498   : > { %4941 = vmatmul.bf16.gmra.mxu1 %v9488_v52 }
 0x499   : > { %v9598_v30 = vpack.c.bf16 %v3761_v20, %v3760_v53  ;;  %v3658_v41 = vadd.f32 %v3615_v23, %v9382_v1 }
 0x49b   : > { %11936 = vst [vmem:[#allocation101_spill] sm:$0xff] %v9598_v30  ;;  %v3694_v56 = vmul.f32 %v9380_v43, %v3658_v41  ;;  %v3162_v41 = vadd.f32 %v3161_v54, %v9345_v33 }
 0x49c   : > { %v3527_v57 = vpop.f32.mrf.mxu0 }
 0x49d   : > { %v3528_v25 = vadd.f32 %v3527_v57, %v3438_v60  ;;  %v3616_v42 = vpop.f32.mrf.mxu1  ;;  %v3730_v40 = vadd.f32 %v9389_v13, %v3694_v56  ;;  %v3164_v53 = vpop.f32.mrf.mxu2 }
 0x49e   : > { %v3165_v33 = vadd.f32 %v3164_v53, %v9350_v21 }
 0x49f   : > { %v3617_v10 = vadd.f32 %v3616_v42, %v3528_v25  ;;  %v3762_v27 = vmax.f32 %v3730_v40, 0.0  ;;  %v3446_v25 = vpop.f32.mrf.mxu3 }
 0x4a1   : > { %v3659_v51 = vadd.f32 %v3617_v10, %v3157_v37 }
 0x4a3   : > { %v3695_v12 = vmul.f32 %v9380_v43, %v3659_v51 }
 0x4a4   : > { %v3530_v6 = vpop.f32.mrf.mxu0 }
 0x4a5   : > { %v3731_v14 = vadd.f32 %v9389_v13, %v3695_v12  ;;  %v3531_v22 = vadd.f32 %v3530_v6, %v3441_v47  ;;  %v3619_v1 = vpop.f32.mrf.mxu1  ;;  %v3166_v40 = vpop.f32.mrf.mxu2 }
 0x4a7   : > { %v3763_v60 = vmax.f32 %v3731_v14, 0.0  ;;  %v3620_v45 = vadd.f32 %v3619_v1, %v3531_v22  ;;  %4857 = vmatmul.bf16.gmra.mxu0 %v9522_v26  ;;  %v3448_v22 = vpop.f32.mrf.mxu3 }
 0x4a8   : > { %4946 = vmatmul.bf16.gmra.mxu1 %v9522_v26 }
 0x4a9   : > { %v9609_v36 = vpack.c.bf16 %v3763_v60, %v3762_v27  ;;  %v3660_v31 = vadd.f32 %v3620_v45, %v3160_v32  ;;  %v3167_v45 = vadd.f32 %v3166_v40, %v9357_v48 }
 0x4ab   : > { %11937 = vst [vmem:[#allocation73_spill] sm:$0xff] %v9609_v36  ;;  %v3696_v47 = vmul.f32 %v9380_v43, %v3660_v31 }
 0x4ac   : > { %v3532_v50 = vpop.f32.mrf.mxu0 }
 0x4ad   : > { %v3533_v20 = vadd.f32 %v3532_v50, %v3443_v3  ;;  %v3621_v23 = vpop.f32.mrf.mxu1  ;;  %v3732_v37 = vadd.f32 %v9389_v13, %v3696_v47  ;;  %v3169_v50 = vpop.f32.mrf.mxu2 }
 0x4ae   : > { %v3170_v48 = vadd.f32 %v3169_v50, %v9362_v18 }
 0x4af   : > { %v3622_v57 = vadd.f32 %v3621_v23, %v3533_v20  ;;  %v3764_v12 = vmax.f32 %v3732_v37, 0.0  ;;  %v3451_v23 = vpop.f32.mrf.mxu3 }
 0x4b1   : > { %v3661_v42 = vadd.f32 %v3622_v57, %v3162_v41 }
 0x4b3   : > { %v3697_v56 = vmul.f32 %v9380_v43, %v3661_v42 }
 0x4b4   : > { %v3535_v10 = vpop.f32.mrf.mxu0 }
 0x4b5   : > { %v3733_v8 = vadd.f32 %v9389_v13, %v3697_v56  ;;  %v3536_v28 = vadd.f32 %v3535_v10, %v3446_v25  ;;  %v3624_v51 = vpop.f32.mrf.mxu1 }
 0x4b7   : > { %v3765_v6 = vmax.f32 %v3733_v8, 0.0  ;;  %v3625_v14 = vadd.f32 %v3624_v51, %v3536_v28  ;;  %4862 = vmatmul.bf16.gmra.mxu0 %v9536_v5  ;;  %v620_v8 = vld [vmem:[%s11438_s12] sm:$0x3]  ;;  %v3171_v28 = vpop.f32.mrf.mxu2  ;;  %v3453_v40 = vpop.f32.mrf.mxu3 }
 0x4b8   : > { %4951 = vmatmul.bf16.gmra.mxu1 %v9536_v5  ;;  %3787 = vst [vmem:[#allocation1] ss:$9 sm:$0xff] %v620_v8 }
 0x4b9   : > { %v9619_v54 = vpack.c.bf16 %v3765_v6, %v3764_v12  ;;  %v3662_v1 = vadd.f32 %v3625_v14, %v3165_v33  ;;  %v3172_v33 = vadd.f32 %v3171_v28, %v9369_v7 }
 0x4bb   : > { %11938 = vst [vmem:[#allocation104_spill] sm:$0xff] %v9619_v54  ;;  %v3698_v32 = vmul.f32 %v9380_v43, %v3662_v1 }
 0x4bc   : > { %v3537_v3 = vpop.f32.mrf.mxu0 }
 0x4bd   : > { %v3538_v27 = vadd.f32 %v3537_v3, %v3448_v22  ;;  %v3626_v60 = vpop.f32.mrf.mxu1  ;;  %v3734_v41 = vadd.f32 %v9389_v13, %v3698_v32 }
 0x4bf   : > { %v3627_v31 = vadd.f32 %v3626_v60, %v3538_v27  ;;  %v3766_v42 = vmax.f32 %v3734_v41, 0.0  ;;  %v3788_v18 = vld [vmem:[#allocation1] sm:$0xff]  ;;  %v3789_v7 = vld [vmem:[#allocation1 + $0x9] sm:$0xff] }
 0x4c0   : > { %3800 = vmatmul.bf16.vlgmr.msra.gmra.mxu2 %v3788_v18 }
 0x4c1   : > { %v3663_v20 = vadd.f32 %v3627_v31, %v3167_v45 }
 0x4c3   : > { %v3699_v47 = vmul.f32 %v9380_v43, %v3663_v20 }
 0x4c4   : > { %v3540_v21 = vpop.f32.mrf.mxu0 }
 0x4c5   : > { %v3735_v53 = vadd.f32 %v9389_v13, %v3699_v47  ;;  %v3541_v57 = vadd.f32 %v3540_v21, %v3451_v23  ;;  %v3629_v25 = vpop.f32.mrf.mxu1 }
 0x4c7   : > { %v3767_v37 = vmax.f32 %v3735_v53, 0.0  ;;  %v3630_v56 = vadd.f32 %v3629_v25, %v3541_v57  ;;  %4867 = vmatmul.bf16.gmra.mxu0 %v9546_v55  ;;  %v621_v57 = vunpack.c.l.bf16 %v620_v8  ;;  %v6562_v8 = vld [vmem:[#allocation7 + $0xe0] sm:$0xf] }
 0x4c8   : > { %4956 = vmatmul.bf16.gmra.mxu1 %v9546_v55 }
 0x4c9   : > { %v9629_v10 = vpack.c.bf16 %v3767_v37, %v3766_v42  ;;  %v3664_v51 = vadd.f32 %v3630_v56, %v3170_v48  ;;  %v623_v25 = vperm.slane %v621_v57, 0  ;;  %v624_v42 = vperm.slane %v621_v57, 2  ;;  %v6926_v57 = vld [vmem:[#allocation7 + $0xa4] sm:$0xf] }
 0x4cb   : > { %11939 = vst [vmem:[#allocation105_spill] sm:$0xff] %v9629_v10  ;;  %v3700_v22 = vmul.f32 %v9380_v43, %v3664_v51  ;;  %v628_v56 = vsel %vm627_vm0, %v623_v25, 0.0  ;;  %v629_v48 = vsel %vm627_vm0, %v624_v42, 0.0 }
 0x4cc   : > { %v3542_v12 = vpop.f32.mrf.mxu0  ;;  %v630_v51 = vadd.f32 %v629_v48, %v628_v56  ;;  %v6532_v56 = vld [vmem:[#allocation7 + $0xb0] sm:$0xf0]  ;;  %v6514_v48 = vld [vmem:[#allocation7 + $0x80] sm:$0xf] }
 0x4cd   : > { %v3543_v6 = vadd.f32 %v3542_v12, %v3453_v40  ;;  %v3631_v14 = vpop.f32.mrf.mxu1  ;;  %v3736_v27 = vadd.f32 %v9389_v13, %v3700_v22  ;;  %v6564_v22 = vld [vmem:[#allocation7 + $0xf0] sm:$0xf0] }
 0x4ce   : > { %631 = vadd.xlane.f32.xlu0 %v630_v51  ;;  %v6924_v51 = vld [vmem:[#allocation7 + $0x8c] sm:$0xf0] }
 0x4cf   : > { %v3632_v1 = vadd.f32 %v3631_v14, %v3543_v6  ;;  %v3768_v32 = vmax.f32 %v3736_v27, 0.0  ;;  %v6936_v6 = vld [vmem:[#allocation7 + $0xec] sm:$0xf0]  ;;  %v6934_v14 = vld [vmem:[#allocation7 + $0xe4] sm:$0xf] }
 0x4d0   : > { %v9689_v18 = vor.u32 %v6934_v14, %v6564_v22  ;;  %v6930_v27 = vld [vmem:[#allocation7 + $0xc4] sm:$0xf]  ;;  %v6516_v22 = vld [vmem:[#allocation7 + $0x90] sm:$0xf0] }
 0x4d1   : > { %v3665_v3 = vadd.f32 %v3632_v1, %v3172_v33  ;;  %v9687_v33 = vor.u32 %v6936_v6, %v6562_v8  ;;  %v6546_v1 = vld [vmem:[#allocation7 + $0xc0] sm:$0xf]  ;;  %v9707_v6 = vor.u32 %v6926_v57, %v6532_v56  ;;  %v6922_v14 = vld [vmem:[#allocation7 + $0x84] sm:$0xf]  ;;  %v6500_v57 = vld [vmem:[#allocation7 + $0x70] sm:$0xf0] }
 0x4d2   : > { %v6482_v56 = vld [vmem:[#allocation7 + $0x40] sm:$0xf] }
 0x4d3   : > { %v3701_v60 = vmul.f32 %v9380_v43, %v3665_v3  ;;  %v6932_v3 = vld [vmem:[#allocation7 + $0xcc] sm:$0xf0]  ;;  %4011 = vmatpush.bf16.msrb.mxu2 %v9687_v33 }
 0x4d4   : > { %v9655_v43 = vpop.f32.mrf.mxu0 }
 0x4d5   : > { %v3737_v45 = vadd.f32 %v9389_v13, %v3701_v60  ;;  %v9657_v13 = vpop.f32.mrf.mxu1  ;;  %v6548_v60 = vld [vmem:[#allocation7 + $0xd0] sm:$0xf0] }
 0x4d7   : > { %v3769_v31 = vmax.f32 %v3737_v45, 0.0  ;;  %4872 = vmatmul.bf16.gmra.mxu0 %v9561_v11  ;;  %v9693_v45 = vor.u32 %v6932_v3, %v6546_v1  ;;  %v9710_v1 = vor.u32 %v6924_v51, %v6514_v48  ;;  %v9713_v3 = vor.u32 %v6922_v14, %v6516_v22  ;;  %v6914_v48 = vld [vmem:[#allocation7 + $0x44] sm:$0xf]  ;;  %v6484_v51 = vld [vmem:[#allocation7 + $0x50] sm:$0xf0] }
 0x4d8   : > { %4961 = vmatmul.bf16.gmra.mxu1 %v9561_v11 }
 0x4d9   : > { %v9641_v50 = vpack.c.bf16 %v3769_v31, %v3768_v32  ;;  %v9697_v32 = vor.u32 %v6930_v27, %v6548_v60  ;;  %4012 = vmatpush.bf16.msrb.mxu2 %v9693_v45  ;;  %v6530_v31 = vld [vmem:[#allocation7 + $0xa0] sm:$0xf]  ;;  %v6920_v60 = vld [vmem:[#allocation7 + $0x6c] sm:$0xf0] }
 0x4da   : > { %v6498_v27 = vld [vmem:[#allocation7 + $0x60] sm:$0xf] }
 0x4db   : > { %11940 = vst [vmem:[#allocation21_spill] sm:$0xff] %v9641_v50  ;;  %3805 = vmatpush.bf16.msra.mxu3 %v9641_v50 }
 0x4dc   : > { %v9661_v20 = vpop.f32.mrf.mxu0 }
 0x4dd   : > { %v9663_v23 = vpop.f32.mrf.mxu1 }
 0x4df   : > { %3806 = vmatpush.bf16.msra.mxu3 %v9629_v10 }
 0x4e3   : > { %3807 = vmatpush.bf16.msra.mxu3 %v9619_v54 }
 0x4e4   : > { %v9665_v41 = vpop.f32.mrf.mxu0 }
 0x4e5   : > { %v9667_v47 = vpop.f32.mrf.mxu1 }
 0x4e7   : > { %3808 = vmatpush.bf16.msra.mxu3 %v9609_v36  ;;  %4877 = vmatmul.bf16.gmra.mxu0 %v9576_v17 }
 0x4e8   : > { %4966 = vmatmul.bf16.gmra.mxu1 %v9576_v17 }
 0x4eb   : > { %3809 = vmatpush.bf16.msra.mxu3 %v9598_v30 }
 0x4ec   : > { %v9671_v21 = vpop.f32.mrf.mxu0 }
 0x4ed   : > { %v9673_v53 = vpop.f32.mrf.mxu1 }
 0x4ef   : > { %3810 = vmatpush.bf16.msra.mxu3 %v9587_v34 }
 0x4f3   : > { %3811 = vmatpush.bf16.msra.mxu3 %v9576_v17 }
 0x4f4   : > { %v9677_v37 = vpop.f32.mrf.mxu0 }
 0x4f5   : > { %v9681_v28 = vpop.f32.mrf.mxu1 }
 0x4f7   : > { %3812 = vmatpush.bf16.msra.mxu3 %v9561_v11  ;;  %4882 = vmatmul.bf16.gmra.mxu0 %v9587_v34 }
 0x4f8   : > { %4971 = vmatmul.bf16.gmra.mxu1 %v9587_v34 }
 0x4fa   : > { %3813 = vmatmul.bf16.vlgmr.msra.gmra.mxu3 %v3789_v7  ;;  %v6928_v7 = vld [vmem:[#allocation7 + $0xac] sm:$0xf0] }
 0x4fb   : > { %4024 = vmatpush.bf16.msrb.mxu3 %v9689_v18  ;;  %v9703_v42 = vor.u32 %v6928_v7, %v6530_v31  ;;  %v6918_v31 = vld [vmem:[#allocation7 + $0x64] sm:$0xf]  ;;  %v9717_v7 = vor.u32 %v6920_v60, %v6498_v27  ;;  %v9731_v27 = vor.u32 %v6914_v48, %v6484_v51  ;;  %v6466_v60 = vld [vmem:[#allocation7 + $0x20] sm:$0xf] }
 0x4fc   : > { %v9683_v40 = vpop.f32.mrf.mxu0 }
 0x4fd   : > { %v9685_v12 = vpop.f32.mrf.mxu1  ;;  %4013 = vmatpush.bf16.msrb.mxu2 %v9703_v42 }
 0x4ff   : > { %4025 = vmatpush.bf16.msrb.mxu3 %v9697_v32 }
 0x501   : > { %4014 = vmatpush.bf16.msrb.mxu2 %v9710_v1 }
 0x503   : > { %4026 = vmatpush.bf16.msrb.mxu3 %v9707_v6 }
 0x504   : > { %v9701_v25 = vpop.f32.mrf.mxu0 }
 0x505   : > { %v9705_v8 = vpop.f32.mrf.mxu1  ;;  %4015 = vmatpush.bf16.msrb.mxu2 %v9717_v7 }
 0x506   : > { %11941 = vst [vmem:[#allocation109_spill] sm:$0xff] %v9705_v8 }
 0x507   : > { %4887 = vmatmul.bf16.gmra.mxu0 %v9598_v30  ;;  %4027 = vmatpush.bf16.msrb.mxu3 %v9713_v3 }
 0x508   : > { %4976 = vmatmul.bf16.gmra.mxu1 %v9598_v30 }
 0x50d   : > { %v9727_v22 = vpop.f32.mrf.mxu1 }
 0x50e   : > { %11943 = vst [vmem:[#allocation111_spill] sm:$0xff] %v9727_v22  ;;  %v6906_v22 = vld [vmem:[#allocation7 + $0x4] sm:$0xf] }
 0x517   : > { %4892 = vmatmul.bf16.gmra.mxu0 %v9609_v36 }
 0x518   : > { %4981 = vmatmul.bf16.gmra.mxu1 %v9609_v36  ;;  %v9721_v36 = vpop.f32.mrf.mxu0 }
 0x519   : > { %11942 = vst [vmem:[#allocation22_spill] sm:$0xff] %v9721_v36  ;;  %v6468_v36 = vld [vmem:[#allocation7 + $0x30] sm:$0xf0] }
 0x527   : > { %4897 = vmatmul.bf16.gmra.mxu0 %v9619_v54 }
 0x528   : > { %4986 = vmatmul.bf16.gmra.mxu1 %v9619_v54  ;;  %v9719_v54 = vor.u32 %v6918_v31, %v6500_v57  ;;  %v6912_v31 = vld [vmem:[#allocation7 + $0x2c] sm:$0xf0]  ;;  %v6910_v57 = vld [vmem:[#allocation7 + $0x24] sm:$0xf] }
 0x529   : > { %v9735_v30 = vor.u32 %v6912_v31, %v6466_v60  ;;  %v9737_v8 = vor.u32 %v6910_v57, %v6468_v36  ;;  %v6950_v31 = vld [vmem:[%s11439_s13 + $0x60] sm:$0xff]  ;;  %v6941_v57 = vld [vmem:[%s11439_s13 + $0x18] sm:$0xff] }
 0x52a   : > { %4028 = vmatpush.bf16.msrb.mxu3 %v9719_v54 }
 0x52e   : > { %4029 = vmatpush.bf16.msrb.mxu3 %v9731_v27 }
 0x532   : > { %4030 = vmatpush.bf16.msrb.mxu3 %v9737_v8 }
 0x537   : > { %4902 = vmatmul.bf16.gmra.mxu0 %v9629_v10 }
 0x538   : > { %4991 = vmatmul.bf16.gmra.mxu1 %v9629_v10  ;;  %v6916_v10 = vld [vmem:[#allocation7 + $0x4c] sm:$0xf0] }
 0x539   : > { %v9725_v14 = vor.u32 %v6916_v10, %v6482_v56  ;;  %v6450_v10 = vld [vmem:[#allocation7] sm:$0xf]  ;;  %v6908_v56 = vld [vmem:[#allocation7 + $0xc] sm:$0xf0] }
 0x53a   : > { %v9740_v48 = vor.u32 %v6908_v56, %v6450_v10  ;;  %v6949_v10 = vld [vmem:[%s11439_s13 + $0x58] sm:$0xff]  ;;  %v6940_v56 = vld [vmem:[%s11439_s13 + $0x10] sm:$0xff] }
 0x53b   : > { %4016 = vmatpush.bf16.msrb.mxu2 %v9725_v14 }
 0x53f   : > { %4017 = vmatpush.bf16.msrb.mxu2 %v9735_v30 }
 0x543   : > { %4018 = vmatpush.bf16.msrb.mxu2 %v9740_v48  ;;  %v3801_v36 = vpop.f32.mrf.mxu2 }
 0x547   : > { %4907 = vmatmul.bf16.gmra.mxu0 %v9641_v50  ;;  %4037 = vmatpush.bf16.msra.mxu2 %v9440_v59 }
 0x548   : > { %4996 = vmatmul.bf16.gmra.mxu1 %v9641_v50  ;;  %v6452_v50 = vld [vmem:[#allocation7 + $0x10] sm:$0xf0] }
 0x549   : > { %v9743_v51 = vor.u32 %v6906_v22, %v6452_v50  ;;  %v6951_v50 = vld [vmem:[%s11439_s13 + $0x68] sm:$0xff]  ;;  %v6942_v22 = vld [vmem:[%s11439_s13 + $0x20] sm:$0xff] }
 0x54b   : > { %4031 = vmatpush.bf16.msrb.mxu3 %v9743_v51  ;;  %4038 = vmatpush.bf16.msra.mxu2 %v9452_v15  ;;  %v3803_v60 = vpop.f32.mrf.mxu2 }
 0x54c   : > { %v6939_v60 = vld [vmem:[%s11439_s13 + $0x8] sm:$0xff] }
 0x54f   : > { %4050 = vmatpush.bf16.msra.mxu3 %v9443_v0  ;;  %4039 = vmatpush.bf16.msra.mxu2 %v9462_v35  ;;  %v632_v35 = vpop.xlane.xlu0 %631 }
 0x553   : > { %4051 = vmatpush.bf16.msra.mxu3 %v9454_v29  ;;  %4040 = vmatpush.bf16.msra.mxu2 %v9470_v19 }
 0x557   : > { %4052 = vmatpush.bf16.msra.mxu3 %v9464_v49  ;;  %4041 = vmatpush.bf16.msra.mxu2 %v9481_v9  ;;  %v633_v49 = vrot.slane %v632_v35, 4 }
 0x559   : > { %v634_v19 = vadd.f32 %v633_v49, %v632_v35  ;;  %v6969_v35 = vld [vmem:[%s11439_s13 + $0xf8] sm:$0xff]  ;;  %v6960_v49 = vld [vmem:[%s11439_s13 + $0xb0] sm:$0xff] }
 0x55b   : > { %4053 = vmatpush.bf16.msra.mxu3 %v9474_v4  ;;  %4042 = vmatpush.bf16.msra.mxu2 %v9492_v46  ;;  %v635_v4 = vrot.slane %v634_v19, 2 }
 0x55d   : > { %v636_v9 = vadd.f32 %v635_v4, %v634_v19  ;;  %v6968_v19 = vld [vmem:[%s11439_s13 + $0xf0] sm:$0xff]  ;;  %v6959_v4 = vld [vmem:[%s11439_s13 + $0xa8] sm:$0xff] }
 0x55f   : > { %4054 = vmatpush.bf16.msra.mxu3 %v9484_v58  ;;  %4043 = vmatpush.bf16.msra.mxu2 %v9502_v44  ;;  %v637_v58 = vrot.slane %v636_v9, 1  ;;  %v6953_v44 = vld [vmem:[%s11439_s13 + $0x78] sm:$0xff] }
 0x561   : > { %v638_v46 = vadd.f32 %v637_v58, %v636_v9  ;;  %v6967_v9 = vld [vmem:[%s11439_s13 + $0xe8] sm:$0xff]  ;;  %v6958_v58 = vld [vmem:[%s11439_s13 + $0xa0] sm:$0xff] }
 0x563   : > { %4055 = vmatpush.bf16.msra.mxu3 %v9494_v61  ;;  %4044 = vmatpush.bf16.msra.mxu2 %v9510_v63  ;;  %7003 = vpush %v638_v46  ;;  %v6945_v61 = vld [vmem:[%s11439_s13 + $0x38] sm:$0xff]  ;;  %v6952_v63 = vld [vmem:[%s11439_s13 + $0x70] sm:$0xff]  ;;  %v6966_v46 = vld [vmem:[%s11439_s13 + $0xe0] sm:$0xff] }
 0x567   : > { %4056 = vmatpush.bf16.msra.mxu3 %v9504_v2  ;;  %v6944_v2 = vld [vmem:[%s11439_s13 + $0x30] sm:$0xff] }
 0x56b   : > { %4057 = vmatpush.bf16.msra.mxu3 %v9512_v24  ;;  %v6943_v24 = vld [vmem:[%s11439_s13 + $0x28] sm:$0xff] }
 0x57d   : > { %v3814_v59 = vpop.f32.mrf.mxu3 }
 0x57e   : > { %v3815_v0 = vadd.f32 %v3814_v59, %v3801_v36  ;;  %v6948_v36 = vld [vmem:[%s11439_s13 + $0x50] sm:$0xff]  ;;  %v6947_v59 = vld [vmem:[%s11439_s13 + $0x48] sm:$0xff] }
 0x580   : > { %v3818_v15 = vpack.c.bf16 %v3815_v0, %v3815_v0  ;;  %v6938_v0 = vld [vmem:[%s11439_s13] sm:$0xff] }
 0x582   : > { %4019 = vmatmul.bf16.vlgmr.msrb.gmra.mxu2 %v3818_v15  ;;  %4032 = vmatmul.bf16.vlgmr.msrb.gmra.mxu3 %v3818_v15 }
 0x583   : > { %4354 = vmatpush.bf16.msrb.mxu2 %v6945_v61  ;;  %4367 = vmatpush.bf16.msrb.mxu3 %v6953_v44  ;;  %v6957_v61 = vld [vmem:[%s11439_s13 + $0x98] sm:$0xff] }
 0x584   : > { %v6965_v44 = vld [vmem:[%s11439_s13 + $0xd8] sm:$0xff] }
 0x585   : > { %v3816_v29 = vpop.f32.mrf.mxu3 }
 0x586   : > { %v6961_v29 = vld [vmem:[%s11439_s13 + $0xb8] sm:$0xff] }
 0x587   : > { %4355 = vmatpush.bf16.msrb.mxu2 %v6944_v2  ;;  %4368 = vmatpush.bf16.msrb.mxu3 %v6952_v63  ;;  %v6956_v2 = vld [vmem:[%s11439_s13 + $0x90] sm:$0xff] }
 0x588   : > { %v6964_v63 = vld [vmem:[%s11439_s13 + $0xd0] sm:$0xff] }
 0x58b   : > { %4356 = vmatpush.bf16.msrb.mxu2 %v6943_v24  ;;  %4369 = vmatpush.bf16.msrb.mxu3 %v6951_v50  ;;  %v6955_v24 = vld [vmem:[%s11439_s13 + $0x88] sm:$0xff] }
 0x58c   : > { %v6963_v50 = vld [vmem:[%s11439_s13 + $0xc8] sm:$0xff] }
 0x58f   : > { %4357 = vmatpush.bf16.msrb.mxu2 %v6942_v22  ;;  %4370 = vmatpush.bf16.msrb.mxu3 %v6950_v31  ;;  %v6954_v22 = vld [vmem:[%s11439_s13 + $0x80] sm:$0xff] }
 0x590   : > { %v6962_v31 = vld [vmem:[%s11439_s13 + $0xc0] sm:$0xff] }
 0x592   : > { %4045 = vmatmul.bf16.vlgmr.msra.gmra.mxu2 %v3818_v15  ;;  %4058 = vmatmul.bf16.vlgmr.msra.gmra.mxu3 %v3818_v15  ;;  %v6946_v15 = vld [vmem:[%s11439_s13 + $0x40] sm:$0xff] }
 0x593   : > { %4358 = vmatpush.bf16.msrb.mxu2 %v6941_v57  ;;  %4371 = vmatpush.bf16.msrb.mxu3 %v6949_v10  ;;  %v9862_v57 = vld [vmem:[%s11435_s9] sm:$0xf] }
 0x594   : > { %s7004_s20 = spop %7003 }
 0x595   : > { %v4078_v10 = vstv %s7004_s20 }
 0x597   : > { %4359 = vmatpush.bf16.msrb.mxu2 %v6940_v56  ;;  %4372 = vmatpush.bf16.msrb.mxu3 %v6948_v36  ;;  %v9867_v56 = vld [vmem:[%s11434_s8] sm:$0xf]  ;;  %v4079_v36 = vmul.f32 %v4078_v10, %v9862_v57 }
 0x59b   : > { %4360 = vmatpush.bf16.msrb.mxu2 %v6939_v60  ;;  %4373 = vmatpush.bf16.msrb.mxu3 %v6947_v59  ;;  %v4065_v60 = vperm.slane %v9867_v56, 0  ;;  %v4066_v59 = vperm.slane %v9867_v56, 1 }
 0x59f   : > { %4361 = vmatpush.bf16.msrb.mxu2 %v6938_v0  ;;  %4374 = vmatpush.bf16.msrb.mxu3 %v6946_v15 }
 0x5a3   : > { %4380 = vmatpush.bf16.msra.mxu2 %v6961_v29  ;;  %4393 = vmatpush.bf16.msra.mxu3 %v6969_v35  ;;  %v4081_v35 = vperm.slane %v4079_v36, 0 }
 0x5a7   : > { %4381 = vmatpush.bf16.msra.mxu2 %v6960_v49  ;;  %4394 = vmatpush.bf16.msra.mxu3 %v6968_v19  ;;  %v4082_v19 = vperm.slane %v4079_v36, 1 }
 0x5ab   : > { %4382 = vmatpush.bf16.msra.mxu2 %v6959_v4  ;;  %4395 = vmatpush.bf16.msra.mxu3 %v6967_v9 }
 0x5af   : > { %4383 = vmatpush.bf16.msra.mxu2 %v6958_v58  ;;  %4396 = vmatpush.bf16.msra.mxu3 %v6966_v46 }
 0x5b3   : > { %4384 = vmatpush.bf16.msra.mxu2 %v6957_v61  ;;  %4397 = vmatpush.bf16.msra.mxu3 %v6965_v44 }
 0x5b7   : > { %4385 = vmatpush.bf16.msra.mxu2 %v6956_v2  ;;  %4398 = vmatpush.bf16.msra.mxu3 %v6964_v63  ;;  %v4067_v2 = vperm.slane %v9867_v56, 2  ;;  %v4068_v63 = vperm.slane %v9867_v56, 3 }
 0x5bb   : > { %4386 = vmatpush.bf16.msra.mxu2 %v6955_v24  ;;  %4399 = vmatpush.bf16.msra.mxu3 %v6963_v50 }
 0x5bf   : > { %4387 = vmatpush.bf16.msra.mxu2 %v6954_v22  ;;  %4400 = vmatpush.bf16.msra.mxu3 %v6962_v31  ;;  %v4083_v31 = vperm.slane %v4079_v36, 2 }
 0x605   : > { %v4020_v0 = vpop.f32.mrf.mxu2  ;;  %v4033_v15 = vpop.f32.mrf.mxu3 }
 0x606   : > { %v4073_v29 = vmul.f32 %v4065_v60, %v4020_v0  ;;  %v4074_v49 = vmul.f32 %v4066_v59, %v4033_v15  ;;  %v4084_v60 = vperm.slane %v4079_v36, 3 }
 0x608   : > { %v4089_v4 = vadd.f32 %v4081_v35, %v4073_v29  ;;  %v4090_v9 = vadd.f32 %v4082_v19, %v4074_v49  ;;  %v6754_v19 = vld [vmem:[#allocation8 + $0x60] sm:$0xf] }
 0x60a   : > { %v4093_v58 = vpack.c.bf16 %v4089_v4, %v4089_v4  ;;  %v4094_v46 = vpack.c.bf16 %v4090_v9, %v4090_v9  ;;  %v6984_v4 = vld [vmem:[#allocation8 + $0x6c] sm:$0xf0]  ;;  %v6982_v9 = vld [vmem:[#allocation8 + $0x64] sm:$0xf] }
 0x60c   : > { %4362 = vmatmul.bf16.vlgmr.msrb.gmra.mxu2 %v4093_v58  ;;  %4375 = vmatmul.bf16.vlgmr.msrb.gmra.mxu3 %v4094_v46  ;;  %v6755_v58 = vor.u32 %v6984_v4, %v6754_v19  ;;  %v6756_v46 = vld [vmem:[#allocation8 + $0x70] sm:$0xf0]  ;;  %v6762_v4 = vld [vmem:[#allocation8 + $0x68] sm:$0xf] }
 0x60d   : > { %v4022_v61 = vpop.f32.mrf.mxu2  ;;  %v4035_v44 = vpop.f32.mrf.mxu3  ;;  %v6708_v19 = vld [vmem:[#allocation8 + $0x10] sm:$0xf0] }
 0x60e   : > { %v6759_v61 = vor.u32 %v6982_v9, %v6756_v46  ;;  %4522 = vmatpush.bf16.msrb.mxu2 %v6755_v58  ;;  %v6738_v44 = vld [vmem:[#allocation8 + $0x40] sm:$0xf]  ;;  %v6985_v9 = vld [vmem:[#allocation8 + $0x74] sm:$0xf0] }
 0x60f   : > { %v6763_v46 = vor.u32 %v6985_v9, %v6762_v4  ;;  %v6971_v4 = vld [vmem:[#allocation8 + $0xc] sm:$0xf]  ;;  %v6716_v9 = vld [vmem:[#allocation8 + $0x18] sm:$0xf0] }
 0x610   : > { %4535 = vmatpush.bf16.msrb.mxu3 %v6759_v61  ;;  %v6983_v61 = vld [vmem:[#allocation8 + $0x6c] sm:$0xf] }
 0x615   : > { %v4046_v24 = vpop.f32.mrf.mxu2  ;;  %v4059_v50 = vpop.f32.mrf.mxu3 }
 0x616   : > { %v4075_v22 = vmul.f32 %v4067_v2, %v4046_v24  ;;  %v4076_v10 = vmul.f32 %v4068_v63, %v4059_v50  ;;  %v6980_v2 = vld [vmem:[#allocation8 + $0x4c] sm:$0xf0]  ;;  %v6978_v63 = vld [vmem:[#allocation8 + $0x44] sm:$0xf]  ;;  %v6740_v24 = vld [vmem:[#allocation8 + $0x50] sm:$0xf0] }
 0x617   : > { %v6739_v36 = vor.u32 %v6980_v2, %v6738_v44  ;;  %v6743_v50 = vor.u32 %v6978_v63, %v6740_v24  ;;  %v6764_v44 = vld [vmem:[#allocation8 + $0x78] sm:$0xf0]  ;;  %v6746_v63 = vld [vmem:[#allocation8 + $0x48] sm:$0xf]  ;;  %v6979_v24 = vld [vmem:[#allocation8 + $0x4c] sm:$0xf] }
 0x618   : > { %v4091_v59 = vadd.f32 %v4083_v31, %v4075_v22  ;;  %v4092_v0 = vadd.f32 %v4084_v60, %v4076_v10  ;;  %v6722_v22 = vld [vmem:[#allocation8 + $0x20] sm:$0xf]  ;;  %v6976_v31 = vld [vmem:[#allocation8 + $0x2c] sm:$0xf0]  ;;  %v6974_v10 = vld [vmem:[#allocation8 + $0x24] sm:$0xf]  ;;  %v6767_v2 = vor.u32 %v6983_v61, %v6764_v44  ;;  %v9876_v61 = vpop.f32.mrf.mxu1 }
 0x619   : > { %4523 = vmatpush.bf16.msrb.mxu2 %v6739_v36  ;;  %4536 = vmatpush.bf16.msrb.mxu3 %v6743_v50  ;;  %v6723_v60 = vor.u32 %v6976_v31, %v6722_v22  ;;  %v6981_v36 = vld [vmem:[#allocation8 + $0x54] sm:$0xf0]  ;;  %v6748_v22 = vld [vmem:[#allocation8 + $0x58] sm:$0xf0] }
 0x61a   : > { %v4095_v15 = vpack.c.bf16 %v4091_v59, %v4091_v59  ;;  %v4096_v29 = vpack.c.bf16 %v4092_v0, %v4092_v0  ;;  %v6724_v59 = vld [vmem:[#allocation8 + $0x30] sm:$0xf0]  ;;  %v6747_v50 = vor.u32 %v6981_v36, %v6746_v63  ;;  %v6751_v31 = vor.u32 %v6979_v24, %v6748_v22  ;;  %v4161_v63 = vld [vmem:[%s11440_s14] sm:$0x1] }
 0x61b   : > { %v6727_v0 = vor.u32 %v6974_v10, %v6724_v59  ;;  %v6730_v10 = vld [vmem:[#allocation8 + $0x28] sm:$0xf]  ;;  %v6975_v59 = vld [vmem:[#allocation8 + $0x2c] sm:$0xf] }
 0x61c   : > { %4388 = vmatmul.bf16.vlgmr.msra.gmra.mxu2 %v4095_v15  ;;  %4401 = vmatmul.bf16.vlgmr.msra.gmra.mxu3 %v4096_v29  ;;  %v6706_v15 = vld [vmem:[#allocation8] sm:$0xf]  ;;  %v6972_v29 = vld [vmem:[#allocation8 + $0xc] sm:$0xf0] }
 0x61d   : > { %v4048_v35 = vpop.f32.mrf.mxu2  ;;  %v4061_v49 = vpop.f32.mrf.mxu3  ;;  %4524 = vmatpush.bf16.msrb.mxu2 %v6723_v60  ;;  %4537 = vmatpush.bf16.msrb.mxu3 %v6727_v0  ;;  %v6977_v60 = vld [vmem:[#allocation8 + $0x34] sm:$0xf0] }
 0x61e   : > { %v6970_v35 = vld [vmem:[#allocation8 + $0x4] sm:$0xf]  ;;  %v6707_v49 = vor.u32 %v6972_v29, %v6706_v15  ;;  %v6731_v0 = vor.u32 %v6977_v60, %v6730_v10  ;;  %v6732_v15 = vld [vmem:[#allocation8 + $0x38] sm:$0xf0] }
 0x61f   : > { %v6711_v58 = vor.u32 %v6970_v35, %v6708_v19  ;;  %v6735_v29 = vor.u32 %v6975_v59, %v6732_v15  ;;  %v6714_v35 = vld [vmem:[#allocation8 + $0x8] sm:$0xf] }
 0x620   : > { %v9883_v22 = vpop.f32.mrf.mxu1 }
 0x621   : > { %4525 = vmatpush.bf16.msrb.mxu2 %v6707_v49  ;;  %4538 = vmatpush.bf16.msrb.mxu3 %v6711_v58  ;;  %v6973_v49 = vld [vmem:[#allocation8 + $0x14] sm:$0xf0]  ;;  %v6719_v58 = vor.u32 %v6971_v4, %v6716_v9 }
 0x622   : > { %v6715_v19 = vor.u32 %v6973_v49, %v6714_v35 }
 0x625   : > { %4548 = vmatpush.bf16.msra.mxu2 %v6763_v46  ;;  %4561 = vmatpush.bf16.msra.mxu3 %v6767_v2  ;;  %v9874_v46 = vpop.f32.mrf.mxu0 }
 0x629   : > { %4549 = vmatpush.bf16.msra.mxu2 %v6747_v50  ;;  %4562 = vmatpush.bf16.msra.mxu3 %v6751_v31 }
 0x62d   : > { %4550 = vmatpush.bf16.msra.mxu2 %v6731_v0  ;;  %4563 = vmatpush.bf16.msra.mxu3 %v6735_v29  ;;  %v9881_v50 = vpop.f32.mrf.mxu0  ;;  %v9887_v29 = vpop.f32.mrf.mxu1 }
 0x631   : > { %4551 = vmatpush.bf16.msra.mxu2 %v6715_v19  ;;  %4564 = vmatpush.bf16.msra.mxu3 %v6719_v58 }
 0x635   : > { %v9885_v15 = vpop.f32.mrf.mxu0 }
 0x63d   : > { %v9893_v58 = vpop.f32.mrf.mxu0 }
 0x68f   : > { %v4363_v44 = vpop.f32.mrf.mxu2  ;;  %v4376_v2 = vpop.f32.mrf.mxu3 }
 0x690   : > { %v4364_v31 = vadd.f32 %v4363_v44, %v4161_v63  ;;  %v9895_v44 = vpop.f32.mrf.mxu1 }
 0x692   : > { %v4377_v10 = vadd.f32 %v4376_v2, %v4364_v31  ;;  %v9903_v2 = vpop.f32.mrf.mxu0 }
 0x697   : > { %v4365_v36 = vpop.f32.mrf.mxu2  ;;  %v4378_v24 = vpop.f32.mrf.mxu3 }
 0x69f   : > { %v4389_v60 = vpop.f32.mrf.mxu2  ;;  %v4402_v59 = vpop.f32.mrf.mxu3 }
 0x6a0   : > { %v4390_v0 = vadd.f32 %v4389_v60, %v4377_v10 }
 0x6a2   : > { %v4403_v35 = vadd.f32 %v4402_v59, %v4390_v0 }
 0x6a4   : > { %v4406_v49 = vmax.f32 %v4403_v35, 0.0 }
 0x6a6   : > { %v4407_v19 = vpack.c.bf16 %v4406_v49, %v4406_v49 }
 0x6a7   : > { %v4391_v4 = vpop.f32.mrf.mxu2  ;;  %v4404_v9 = vpop.f32.mrf.mxu3 }
 0x6a8   : > { %6768 = vmatmul.msk.bf16.vlgmr.msrb.gmra.mxu2 %vm4514_vm6, %v4407_v19  ;;  %6769 = vmatmul.msk.bf16.vlgmr.msrb.gmra.mxu3 %vm4514_vm6, %v4407_v19 }
 0x6a9   : > { %4646 = vmatpush.bf16.msrb.mxu2 %v9687_v33  ;;  %4735 = vmatpush.bf16.msrb.mxu3 %v9689_v18  ;;  %v9905_v33 = vpop.f32.mrf.mxu1  ;;  %v9913_v18 = vpop.f32.mrf.mxu0 }
 0x6ad   : > { %4647 = vmatpush.bf16.msrb.mxu2 %v9693_v45  ;;  %4736 = vmatpush.bf16.msrb.mxu3 %v9697_v32 }
 0x6b1   : > { %4648 = vmatpush.bf16.msrb.mxu2 %v9703_v42  ;;  %4737 = vmatpush.bf16.msrb.mxu3 %v9707_v6  ;;  %v9915_v45 = vpop.f32.mrf.mxu1 }
 0x6b5   : > { %4649 = vmatpush.bf16.msrb.mxu2 %v9710_v1  ;;  %4738 = vmatpush.bf16.msrb.mxu3 %v9713_v3 }
 0x6b8   : > { %6770 = vmatmul.msk.bf16.vlgmr.msra.gmra.mxu2 %vm4514_vm6, %v4407_v19  ;;  %6771 = vmatmul.msk.bf16.vlgmr.msra.gmra.mxu3 %vm4514_vm6, %v4407_v19 }
 0x6b9   : > { %4650 = vmatpush.bf16.msrb.mxu2 %v9717_v7  ;;  %4739 = vmatpush.bf16.msrb.mxu3 %v9719_v54  ;;  %v9923_v54 = vpop.f32.mrf.mxu0  ;;  %v9925_v32 = vpop.f32.mrf.mxu1 }
 0x6bd   : > { %4651 = vmatpush.bf16.msrb.mxu2 %v9725_v14  ;;  %4740 = vmatpush.bf16.msrb.mxu3 %v9731_v27 }
 0x6c1   : > { %4652 = vmatpush.bf16.msrb.mxu2 %v9735_v30  ;;  %4741 = vmatpush.bf16.msrb.mxu3 %v9737_v8  ;;  %v9927_v42 = vpop.f32.mrf.mxu0  ;;  %v9929_v6 = vpop.f32.mrf.mxu1 }
 0x6c5   : > { %4653 = vmatpush.bf16.msrb.mxu2 %v9740_v48  ;;  %4742 = vmatpush.bf16.msrb.mxu3 %v9743_v51 }
 0x6c8   : > { %4654 = vmatmul.bf16.vlgmr.msrb.gmra.mxu2 %v9398_v16  ;;  %4743 = vmatmul.bf16.vlgmr.msrb.gmra.mxu3 %v9398_v16 }
 0x6c9   : > { %v9933_v30 = vpop.f32.mrf.mxu0  ;;  %v9935_v8 = vpop.f32.mrf.mxu1 }
 0x6d1   : > { %v9937_v1 = vpop.f32.mrf.mxu0  ;;  %v9939_v3 = vpop.f32.mrf.mxu1 }
 0x6d8   : > { %4659 = vmatmul.bf16.gmra.mxu2 %v9412_v39  ;;  %4748 = vmatmul.bf16.gmra.mxu3 %v9412_v39 }
 0x6d9   : > { %v9943_v16 = vpop.f32.mrf.mxu0  ;;  %v9945_v7 = vpop.f32.mrf.mxu1 }
 0x6e1   : > { %v9949_v39 = vpop.f32.mrf.mxu0  ;;  %v9951_v14 = vpop.f32.mrf.mxu1 }
 0x6e8   : > { %4664 = vmatmul.bf16.gmra.mxu2 %v9428_v62  ;;  %4753 = vmatmul.bf16.gmra.mxu3 %v9428_v62 }
 0x6e9   : > { %v9953_v27 = vpop.f32.mrf.mxu0  ;;  %v9955_v48 = vpop.f32.mrf.mxu1 }
 0x6ea   : > { %11944 = vst [vmem:[#allocation57_spill] sm:$0xff] %v9953_v27 }
 0x6eb   : > { %11945 = vst [vmem:[#allocation108_spill] sm:$0xff] %v9955_v48 }
 0x6f1   : > { %v9959_v62 = vpop.f32.mrf.mxu0  ;;  %v9961_v51 = vpop.f32.mrf.mxu1 }
 0x6f2   : > { %11946 = vst [vmem:[#allocation59_spill] sm:$0xff] %v9959_v62 }
 0x6f3   : > { %11947 = vst [vmem:[#allocation33_spill] sm:$0xff] %v9961_v51 }
 0x6f8   : > { %4669 = vmatmul.bf16.gmra.mxu2 %v9445_v38  ;;  %4758 = vmatmul.bf16.gmra.mxu3 %v9445_v38 }
 0x6f9   : > { %v9965_v38 = vpop.f32.mrf.mxu0  ;;  %v9967_v63 = vpop.f32.mrf.mxu1 }
 0x6fa   : > { %11948 = vst [vmem:[#allocation46_spill] sm:$0xff] %v9965_v38 }
 0x6fb   : > { %11949 = vst [vmem:[#allocation53_spill] sm:$0xff] %v9967_v63 }
 0x701   : > { %v9969_v36 = vpop.f32.mrf.mxu0  ;;  %v9971_v24 = vpop.f32.mrf.mxu1 }
 0x702   : > { %11950 = vst [vmem:[#allocation62_spill] sm:$0xff] %v9969_v36 }
 0x703   : > { %11951 = vst [vmem:[#allocation68_spill] sm:$0xff] %v9971_v24 }
 0x708   : > { %4674 = vmatmul.bf16.gmra.mxu2 %v9488_v52  ;;  %4763 = vmatmul.bf16.gmra.mxu3 %v9488_v52  ;;  %v4424_v52 = vld [vmem:[%s11952_s4] sm:$0xf] }
 0x709   : > { %v4506_v31 = vperm.slane %v4424_v52, 0  ;;  %v4507_v10 = vperm.slane %v4424_v52, 1  ;;  %v9978_v35 = vpop.f32.mrf.mxu0  ;;  %v9980_v49 = vpop.f32.mrf.mxu1 }
 0x70a   : > { %11953 = vst [vmem:[#allocation23_spill] sm:$0xff] %v9978_v35 }
 0x70b   : > { %11954 = vst [vmem:[#allocation65_spill] sm:$0xff] %v9980_v49 }
 0x711   : > { %v9984_v51 = vpop.f32.mrf.mxu1 }
 0x712   : > { %11956 = vst [vmem:[#allocation87_spill] sm:$0xff] %v9984_v51 }
 0x718   : > { %4679 = vmatmul.bf16.gmra.mxu2 %v9522_v26  ;;  %4768 = vmatmul.bf16.gmra.mxu3 %v9522_v26 }
 0x728   : > { %4684 = vmatmul.bf16.gmra.mxu2 %v9536_v5  ;;  %4773 = vmatmul.bf16.gmra.mxu3 %v9536_v5  ;;  %v9982_v5 = vpop.f32.mrf.mxu0 }
 0x729   : > { %11955 = vst [vmem:[#allocation69_spill] sm:$0xff] %v9982_v5 }
 0x72b   : > { %v4527_v60 = vpop.f32.mrf.mxu2  ;;  %v4540_v26 = vpop.f32.mrf.mxu3 }
 0x72c   : > { %v4528_v59 = vadd.f32 %v4527_v60, %v4506_v31  ;;  %v4541_v0 = vadd.f32 %v4540_v26, %v4507_v10  ;;  %v4508_v60 = vperm.slane %v4424_v52, 2  ;;  %v4509_v26 = vperm.slane %v4424_v52, 3 }
 0x72e   : > { %v4570_v19 = vsub.f32 0.0, %v4528_v59  ;;  %v4571_v4 = vsub.f32 0.0, %v4541_v0 }
 0x730   : > { %v4574_v9 = vmul.f32 1.442695, %v4570_v19  ;;  %v4576_v24 = vmul.f32 1.442695, %v4571_v4  ;;  %v9988_v35 = vpop.f32.mrf.mxu0 }
 0x731   : > { %11957 = vst [vmem:[#allocation75_spill] sm:$0xff] %v9988_v35 }
 0x732   : > { %7093 = vpow2.f32 %v4574_v9 }
 0x733   : > { %7095 = vpow2.f32 %v4576_v24  ;;  %v4529_v36 = vpop.f32.mrf.mxu2  ;;  %v4542_v63 = vpop.f32.mrf.mxu3 }
 0x738   : > { %v7094_v38 = vpop.eup %7093  ;;  %4689 = vmatmul.bf16.gmra.mxu2 %v9546_v55  ;;  %4778 = vmatmul.bf16.gmra.mxu3 %v9546_v55  ;;  %v9990_v55 = vpop.f32.mrf.mxu1 }
 0x739   : > { %v7096_v31 = vpop.eup %7095  ;;  %v4582_v10 = vadd.f32 1.0, %v7094_v38  ;;  %11958 = vst [vmem:[#allocation97_spill] sm:$0xff] %v9990_v55 }
 0x73a   : > { %v4583_v59 = vadd.f32 1.0, %v7096_v31 }
 0x73b   : > { %7097 = vrcp.f32 %v4582_v10  ;;  %v4553_v0 = vpop.f32.mrf.mxu2  ;;  %v4566_v19 = vpop.f32.mrf.mxu3  ;;  %vm4591_vm9 = vweird.f32 %v4582_v10 }
 0x73c   : > { %7099 = vrcp.f32 %v4583_v59  ;;  %v4554_v36 = vadd.f32 %v4553_v0, %v4508_v60  ;;  %v4567_v63 = vadd.f32 %v4566_v19, %v4509_v26  ;;  %v4612_v26 = vand.u32 2147483648, %v4583_v59 }
 0x73d   : > { %v4610_v19 = vand.u32 2147483647, %v4583_v59  ;;  %vm4606_vm11 = vweird.f32 %v4583_v59 }
 0x73e   : > { %v4572_v24 = vsub.f32 0.0, %v4554_v36  ;;  %v4573_v4 = vsub.f32 0.0, %v4567_v63  ;;  %v4613_v63 = vor.u32 1.1754944e-38, %v4612_v26 }
 0x73f   : > { %vm4611_vm13 = vcmp.eq.f32.partialorder %v4610_v19, 8.507059e+37 }
 0x740   : > { %v4578_v5 = vmul.f32 1.442695, %v4572_v24  ;;  %v4580_v51 = vmul.f32 1.442695, %v4573_v4  ;;  %v4597_v4 = vand.u32 2147483648, %v4582_v10  ;;  %v10012_v35 = vpop.f32.mrf.mxu1 }
 0x741   : > { %v7098_v9 = vpop.eup %7097  ;;  %11964 = vst [vmem:[#allocation72_spill] sm:$0xff] %v10012_v35 }
 0x742   : > { %v7100_v49 = vpop.eup %7099  ;;  %v4587_v38 = vmul.f32 %v7098_v9, %v4582_v10  ;;  %7101 = vpow2.f32 %v4578_v5  ;;  %vm4592_vm7 = vweird.f32 %v7098_v9 }
 0x743   : > { %v4602_v62 = vmul.f32 %v7100_v49, %v4583_v59  ;;  %v4555_v52 = vpop.f32.mrf.mxu2  ;;  %v4568_v31 = vpop.f32.mrf.mxu3  ;;  %7103 = vpow2.f32 %v4580_v51  ;;  %vm4607_vm8 = vweird.f32 %v7100_v49  ;;  %vm9996_vm10 = vmor %vm4591_vm9, %vm4592_vm7  ;;  %vm5138_vm7 = vcmask 1042434  }
 0x744   : > { %v4588_v48 = vsub.f32 1.0, %v4587_v38  ;;  %vm4608_vm12 = vmor %vm4606_vm11, %vm4607_vm8  ;;  %v10010_v59 = vpop.f32.mrf.mxu0  ;;  %v4598_v31 = vor.u32 1.1754944e-38, %v4597_v4  ;;  %vm5140_vm8 = vcmask 1041408  }
 0x745   : > { %v4603_v27 = vsub.f32 1.0, %v4602_v62 }
 0x746   : > { %v4589_v60 = vmul.f32 %v7098_v9, %v4588_v48  ;;  %v4595_v48 = vand.u32 2147483647, %v4582_v10 }
 0x747   : > { %v4604_v0 = vmul.f32 %v7100_v49, %v4603_v27 }
 0x748   : > { %v4590_v24 = vadd.f32 %v7098_v9, %v4589_v60  ;;  %4694 = vmatmul.bf16.gmra.mxu2 %v9561_v11  ;;  %4783 = vmatmul.bf16.gmra.mxu3 %v9561_v11  ;;  %v7102_v5 = vpop.eup %7101  ;;  %vm4596_vm14 = vcmp.eq.f32.partialorder %v4595_v48, 8.507059e+37  ;;  %v10053_v4 = vpop.f32.mrf.mxu1 }
 0x749   : > { %v4605_v27 = vadd.f32 %v7100_v49, %v4604_v0  ;;  %v7104_v51 = vpop.eup %7103  ;;  %v10003_v55 = vadd.f32 1.0, %v7102_v5  ;;  %11981 = vst [vmem:[#allocation80_spill] sm:$0xff] %v10053_v4 }
 0x74a   : > { %v4594_v11 = vsel %vm9996_vm10, %v7098_v9, %v4590_v24  ;;  %v10007_v36 = vadd.f32 1.0, %v7104_v51  ;;  %v12015_v24 = vld [vmem:[#allocation65_spill] sm:$0xff] }
 0x74b   : > { %v4609_v38 = vsel %vm4608_vm12, %v7100_v49, %v4605_v27  ;;  %7105 = vrcp.f32 %v10003_v55  ;;  %v4599_v27 = vsel %vm4596_vm14, %v4598_v31, %v4594_v11  ;;  %v4627_v49 = vand.u32 2147483648, %v10003_v55 }
 0x74c   : > { %v4614_v60 = vsel %vm4611_vm13, %v4613_v63, %v4609_v38  ;;  %7107 = vrcp.f32 %v10007_v36  ;;  %v10051_v35 = vpop.f32.mrf.mxu0  ;;  %v4625_v0 = vand.u32 2147483647, %v10003_v55  ;;  %v4642_v26 = vand.u32 2147483648, %v10007_v36 }
 0x74d   : > { %v5134_v5 = vrot.slane %v4614_v60, 7  ;;  %11980 = vst [vmem:[#allocation66_spill] sm:$0xff] %v10051_v35  ;;  %v4640_v62 = vand.u32 2147483647, %v10007_v36  ;;  %vm4621_vm1 = vweird.f32 %v10003_v55  ;;  %v4628_v4 = vor.u32 1.1754944e-38, %v4627_v49  ;;  %v12011_v49 = vld [vmem:[#allocation68_spill] sm:$0xff] }
 0x74e   : > { %vm4636_vm3 = vweird.f32 %v10007_v36  ;;  %vm4626_vm4 = vcmp.eq.f32.partialorder %v4625_v0, 8.507059e+37  ;;  %v12009_v0 = vld [vmem:[#allocation62_spill] sm:$0xff]  ;;  %v12013_v60 = vld [vmem:[#allocation23_spill] sm:$0xff] }
 0x74f   : > { %v10024_v38 = vsel %vm627_vm0, %v4599_v27, %v5134_v5  ;;  %vm4641_vm6 = vcmp.eq.f32.partialorder %v4640_v62, 8.507059e+37 }
 0x751   : > { %v7106_v63 = vpop.eup %7105 }
 0x752   : > { %v7108_v9 = vpop.eup %7107  ;;  %v4617_v51 = vmul.f32 %v7106_v63, %v10003_v55  ;;  %vm4622_vm15 = vweird.f32 %v7106_v63 }
 0x753   : > { %v4632_v27 = vmul.f32 %v7108_v9, %v10007_v36  ;;  %vm4637_vm0 = vweird.f32 %v7108_v9  ;;  %vm4623_vm2 = vmor %vm4621_vm1, %vm4622_vm15  ;;  %v12002_v36 = vld [vmem:[#allocation108_spill] sm:$0xff] }
 0x754   : > { %v4618_v52 = vsub.f32 1.0, %v4617_v51  ;;  %vm4638_vm5 = vmor %vm4636_vm3, %vm4637_vm0 }
 0x755   : > { %v4633_v5 = vsub.f32 1.0, %v4632_v27 }
 0x756   : > { %v4619_v11 = vmul.f32 %v7106_v63, %v4618_v52 }
 0x757   : > { %v4634_v51 = vmul.f32 %v7108_v9, %v4633_v5 }
 0x758   : > { %4699 = vmatmul.bf16.gmra.mxu2 %v9576_v17  ;;  %4788 = vmatmul.bf16.gmra.mxu3 %v9576_v17  ;;  %v4620_v52 = vadd.f32 %v7106_v63, %v4619_v11  ;;  %v4643_v17 = vor.u32 1.1754944e-38, %v4642_v26 }
 0x759   : > { %v4635_v19 = vadd.f32 %v7108_v9, %v4634_v51 }
 0x75a   : > { %v4624_v31 = vsel %vm4623_vm2, %v7106_v63, %v4620_v52  ;;  %v12001_v63 = vld [vmem:[#allocation57_spill] sm:$0xff] }
 0x75b   : > { %v4629_v27 = vsel %vm4626_vm4, %v4628_v4, %v4624_v31  ;;  %v4639_v11 = vsel %vm4638_vm5, %v7108_v9, %v4635_v19  ;;  %v12003_v19 = vld [vmem:[#allocation59_spill] sm:$0xff]  ;;  %v12004_v9 = vld [vmem:[#allocation33_spill] sm:$0xff]  ;;  %v12005_v31 = vld [vmem:[#allocation46_spill] sm:$0xff] }
 0x75c   : > { %v5135_v10 = vrot.slane %v4629_v27, 6  ;;  %v4644_v48 = vsel %vm4641_vm6, %v4643_v17, %v4639_v11  ;;  %v10080_v17 = vpop.f32.mrf.mxu0  ;;  %v10082_v11 = vpop.f32.mrf.mxu1  ;;  %v12007_v52 = vld [vmem:[#allocation53_spill] sm:$0xff] }
 0x75d   : > { %v5136_v5 = vrot.slane %v4644_v48, 5 }
 0x75f   : > { %v5139_v48 = vsel %vm5138_vm7, %v5135_v10, %v5136_v5 }
 0x760   : > { %v5141_v35 = vsel %vm5140_vm8, %v10024_v38, %v5139_v48 }
 0x761   : > { %v10091_v4 = vmul.f32 %v5141_v35, %v9867_v56  ;;  %v10094_v27 = vmul.f32 %v5141_v35, %v9862_v57 }
 0x763   : > { %11992 = vst [vmem:[#allocation81_spill] sm:$0xff] %v10091_v4  ;;  %v10103_v62 = vperm.slane %v10091_v4, 2  ;;  %v10106_v56 = vperm.slane %v10091_v4, 3  ;;  %v10111_v5 = vperm.slane %v10094_v27, 2  ;;  %v10114_v51 = vperm.slane %v10094_v27, 3 }
 0x764   : > { %11993 = vst [vmem:[#allocation86_spill] sm:$0xff] %v10094_v27  ;;  %v4997_v57 = vpop.f32.mrf.mxu1 }
 0x765   : > { %v10118_v38 = vmul.f32 %v10103_v62, %v9655_v43  ;;  %v10122_v48 = vmul.f32 %v10106_v56, %v9657_v13  ;;  %v10126_v26 = vmul.f32 %v10103_v62, %v9661_v20  ;;  %v10130_v10 = vmul.f32 %v10106_v56, %v9663_v23 }
 0x766   : > { %v10134_v35 = vmul.f32 %v10103_v62, %v9665_v41  ;;  %v10138_v43 = vmul.f32 %v10106_v56, %v9667_v47  ;;  %v10142_v13 = vmul.f32 %v10103_v62, %v9671_v21  ;;  %v10146_v20 = vmul.f32 %v10106_v56, %v9673_v53 }
 0x767   : > { %v10150_v23 = vmul.f32 %v10103_v62, %v9677_v37  ;;  %v10154_v41 = vmul.f32 %v10106_v56, %v9681_v28  ;;  %v10158_v47 = vmul.f32 %v10103_v62, %v9683_v40  ;;  %v10162_v21 = vmul.f32 %v10106_v56, %v9685_v12  ;;  %v11998_v37 = vld [vmem:[#allocation109_spill] sm:$0xff]  ;;  %v11999_v28 = vld [vmem:[#allocation22_spill] sm:$0xff]  ;;  %v12000_v40 = vld [vmem:[#allocation111_spill] sm:$0xff]  ;;  %v4908_v12 = vpop.f32.mrf.mxu0 }
 0x768   : > { %4704 = vmatmul.bf16.gmra.mxu2 %v9587_v34  ;;  %v10167_v53 = vmul.f32 %v10103_v62, %v9701_v25  ;;  %v10171_v55 = vmul.f32 %v10106_v56, %v11998_v37  ;;  %v10175_v27 = vmul.f32 %v10103_v62, %v11999_v28  ;;  %v10179_v4 = vmul.f32 %v10106_v56, %v12000_v40 }
 0x769   : > { %4793 = vmatmul.bf16.gmra.mxu3 %v9587_v34  ;;  %v10184_v25 = vmul.f32 %v10103_v62, %v9874_v46  ;;  %v10188_v37 = vmul.f32 %v10106_v56, %v9876_v61  ;;  %v10192_v28 = vmul.f32 %v10103_v62, %v9881_v50  ;;  %v10196_v40 = vmul.f32 %v10106_v56, %v9883_v22 }
 0x76a   : > { %v10200_v34 = vmul.f32 %v10103_v62, %v9885_v15  ;;  %v10204_v46 = vmul.f32 %v10106_v56, %v9887_v29  ;;  %v10208_v61 = vmul.f32 %v10103_v62, %v9893_v58  ;;  %v10212_v50 = vmul.f32 %v10106_v56, %v9895_v44 }
 0x76b   : > { %v10216_v22 = vmul.f32 %v10103_v62, %v9903_v2  ;;  %v10220_v15 = vmul.f32 %v10106_v56, %v9905_v33  ;;  %v10224_v29 = vmul.f32 %v10103_v62, %v9913_v18  ;;  %v10228_v58 = vmul.f32 %v10106_v56, %v9915_v45 }
 0x76c   : > { %v10232_v44 = vmul.f32 %v10103_v62, %v9923_v54  ;;  %v10236_v2 = vmul.f32 %v10106_v56, %v9925_v32  ;;  %v10240_v33 = vmul.f32 %v10103_v62, %v9927_v42  ;;  %v10244_v18 = vmul.f32 %v10106_v56, %v9929_v6 }
 0x76d   : > { %v10248_v45 = vmul.f32 %v10103_v62, %v9933_v30  ;;  %v10252_v54 = vmul.f32 %v10106_v56, %v9935_v8  ;;  %v10256_v32 = vmul.f32 %v10103_v62, %v9937_v1  ;;  %v10260_v42 = vmul.f32 %v10106_v56, %v9939_v3 }
 0x76e   : > { %v10264_v6 = vmul.f32 %v10103_v62, %v9943_v16  ;;  %v10268_v30 = vmul.f32 %v10106_v56, %v9945_v7  ;;  %v10272_v8 = vmul.f32 %v10103_v62, %v9949_v39  ;;  %v10276_v1 = vmul.f32 %v10106_v56, %v9951_v14 }
 0x76f   : > { %v10280_v3 = vmul.f32 %v10103_v62, %v12001_v63  ;;  %v10284_v16 = vmul.f32 %v10106_v56, %v12002_v36  ;;  %v10288_v7 = vmul.f32 %v10103_v62, %v12003_v19  ;;  %v10292_v39 = vmul.f32 %v10106_v56, %v12004_v9 }
 0x770   : > { %v10296_v14 = vmul.f32 %v10103_v62, %v12005_v31  ;;  %v10300_v63 = vmul.f32 %v10106_v56, %v12007_v52  ;;  %v10304_v36 = vmul.f32 %v10103_v62, %v12009_v0  ;;  %v10308_v19 = vmul.f32 %v10106_v56, %v12011_v49 }
 0x771   : > { %v10312_v9 = vmul.f32 %v10103_v62, %v12013_v60  ;;  %v10316_v31 = vmul.f32 %v10106_v56, %v12015_v24  ;;  %v10336_v24 = vmul.f32 %v10103_v62, %v10010_v59  ;;  %v10356_v59 = vmul.f32 %v10106_v56, %v10082_v11 }
 0x772   : > { %12006 = vst [vmem:[#allocation96_spill] sm:$0xff] %v10296_v14  ;;  %v12017_v14 = vld [vmem:[#allocation69_spill] sm:$0xff]  ;;  %v10376_v11 = vadd.f32 %v10114_v51, %v10122_v48  ;;  %v10396_v48 = vadd.f32 %v10111_v5, %v10142_v13 }
 0x773   : > { %12008 = vst [vmem:[#allocation100_spill] sm:$0xff] %v10300_v63  ;;  %v10320_v52 = vmul.f32 %v10103_v62, %v12017_v14  ;;  %v12019_v63 = vld [vmem:[#allocation87_spill] sm:$0xff]  ;;  %v12028_v13 = vld [vmem:[#allocation101_spill] sm:$0xff] }
 0x774   : > { %12010 = vst [vmem:[#allocation109_spill] sm:$0xff] %v10304_v36  ;;  %v10324_v0 = vmul.f32 %v10106_v56, %v12019_v63  ;;  %v12021_v36 = vld [vmem:[#allocation75_spill] sm:$0xff]  ;;  %v12026_v63 = vld [vmem:[#allocation66_spill] sm:$0xff] }
 0x775   : > { %12012 = vst [vmem:[#allocation22_spill] sm:$0xff] %v10308_v19  ;;  %v10328_v49 = vmul.f32 %v10103_v62, %v12021_v36  ;;  %v12023_v19 = vld [vmem:[#allocation97_spill] sm:$0xff]  ;;  %v12027_v36 = vld [vmem:[#allocation80_spill] sm:$0xff] }
 0x776   : > { %12014 = vst [vmem:[#allocation111_spill] sm:$0xff] %v10312_v9  ;;  %v10332_v60 = vmul.f32 %v10106_v56, %v12023_v19  ;;  %v4999_v9 = vpop.f32.mrf.mxu1  ;;  %v10352_v19 = vmul.f32 %v10103_v62, %v10080_v17  ;;  %v10372_v17 = vadd.f32 %v10111_v5, %v10118_v38  ;;  %v10392_v38 = vadd.f32 %v10114_v51, %v10138_v43 }
 0x777   : > { %12016 = vst [vmem:[#allocation57_spill] sm:$0xff] %v10316_v31  ;;  %v12024_v31 = vld [vmem:[#allocation72_spill] sm:$0xff]  ;;  %v10416_v43 = vadd.f32 %v10114_v51, %v10162_v21  ;;  %v10438_v21 = vadd.f32 %v10111_v5, %v10184_v25  ;;  %v10458_v25 = vadd.f32 %v10114_v51, %v10204_v46  ;;  %v10478_v46 = vadd.f32 %v10111_v5, %v10224_v29 }
 0x778   : > { %12018 = vst [vmem:[#allocation108_spill] sm:$0xff] %v10320_v52  ;;  %v10340_v14 = vmul.f32 %v10106_v56, %v12024_v31  ;;  %v4910_v52 = vpop.f32.mrf.mxu0  ;;  %v10359_v31 = vmul.f32 %v10103_v62, %v4908_v12  ;;  %v10380_v12 = vadd.f32 %v10111_v5, %v10126_v26  ;;  %v10400_v26 = vadd.f32 %v10114_v51, %v10146_v20 }
 0x779   : > { %12020 = vst [vmem:[#allocation59_spill] sm:$0xff] %v10324_v0  ;;  %v10344_v0 = vmul.f32 %v10103_v62, %v12026_v63  ;;  %v10365_v63 = vmul.f32 %v10103_v62, %v4910_v52  ;;  %v10388_v62 = vadd.f32 %v10111_v5, %v10134_v35  ;;  %v10412_v35 = vadd.f32 %v10111_v5, %v10158_v47 }
 0x77a   : > { %12022 = vst [vmem:[#allocation33_spill] sm:$0xff] %v10328_v49  ;;  %v10348_v49 = vmul.f32 %v10106_v56, %v12027_v36  ;;  %v10368_v36 = vmul.f32 %v10106_v56, %v4999_v9  ;;  %4709 = vmatmul.bf16.gmra.mxu2 %v12028_v13  ;;  %v10421_v20 = vadd.f32 %v10111_v5, %v10167_v53  ;;  %v12032_v9 = vld [vmem:[#allocation96_spill] sm:$0xff] }
 0x77b   : > { %12025 = vst [vmem:[#allocation46_spill] sm:$0xff] %v10340_v14  ;;  %v10362_v14 = vmul.f32 %v10106_v56, %v4997_v57  ;;  %v10384_v57 = vadd.f32 %v10114_v51, %v10130_v10  ;;  %v10404_v10 = vadd.f32 %v10111_v5, %v10150_v23  ;;  %v10408_v56 = vadd.f32 %v10114_v51, %v10154_v41  ;;  %v12034_v52 = vld [vmem:[#allocation100_spill] sm:$0xff] }
 0x77c   : > { %v10425_v23 = vadd.f32 %v10114_v51, %v10171_v55  ;;  %v10429_v41 = vadd.f32 %v10111_v5, %v10175_v27  ;;  %v10433_v47 = vadd.f32 %v10114_v51, %v10179_v4  ;;  %4798 = vmatmul.bf16.gmra.mxu3 %v12028_v13  ;;  %v10442_v53 = vadd.f32 %v10114_v51, %v10188_v37  ;;  %v12036_v13 = vld [vmem:[#allocation109_spill] sm:$0xff] }
 0x77d   : > { %v10446_v55 = vadd.f32 %v10111_v5, %v10192_v28  ;;  %v10450_v27 = vadd.f32 %v10114_v51, %v10196_v40  ;;  %v10454_v4 = vadd.f32 %v10111_v5, %v10200_v34  ;;  %v10462_v37 = vadd.f32 %v10111_v5, %v10208_v61 }
 0x77e   : > { %v10466_v28 = vadd.f32 %v10114_v51, %v10212_v50  ;;  %v10470_v40 = vadd.f32 %v10111_v5, %v10216_v22  ;;  %v10474_v34 = vadd.f32 %v10114_v51, %v10220_v15  ;;  %v10482_v61 = vadd.f32 %v10114_v51, %v10228_v58 }
 0x77f   : > { %v10486_v50 = vadd.f32 %v10111_v5, %v10232_v44  ;;  %v10490_v22 = vadd.f32 %v10114_v51, %v10236_v2  ;;  %v10494_v15 = vadd.f32 %v10111_v5, %v10240_v33  ;;  %v10498_v29 = vadd.f32 %v10114_v51, %v10244_v18 }
 0x780   : > { %v10502_v58 = vadd.f32 %v10111_v5, %v10248_v45  ;;  %v10506_v44 = vadd.f32 %v10114_v51, %v10252_v54  ;;  %v10510_v2 = vadd.f32 %v10111_v5, %v10256_v32  ;;  %v10514_v33 = vadd.f32 %v10114_v51, %v10260_v42 }
 0x781   : > { %v10518_v18 = vadd.f32 %v10111_v5, %v10264_v6  ;;  %v10522_v45 = vadd.f32 %v10114_v51, %v10268_v30  ;;  %v10526_v54 = vadd.f32 %v10111_v5, %v10272_v8  ;;  %v10530_v32 = vadd.f32 %v10114_v51, %v10276_v1 }
 0x782   : > { %v10534_v42 = vadd.f32 %v10111_v5, %v10280_v3  ;;  %v10538_v6 = vadd.f32 %v10114_v51, %v10284_v16  ;;  %v10542_v30 = vadd.f32 %v10111_v5, %v10288_v7  ;;  %v10546_v8 = vadd.f32 %v10114_v51, %v10292_v39 }
 0x783   : > { %v10550_v1 = vadd.f32 %v10111_v5, %v12032_v9  ;;  %v10554_v3 = vadd.f32 %v10114_v51, %v12034_v52  ;;  %v10558_v16 = vadd.f32 %v10111_v5, %v12036_v13 }
 0x784   : > { %12029 = vst [vmem:[#allocation53_spill] sm:$0xff] %v10538_v6  ;;  %v12038_v6 = vld [vmem:[#allocation22_spill] sm:$0xff] }
 0x785   : > { %12030 = vst [vmem:[#allocation62_spill] sm:$0xff] %v10542_v30  ;;  %v10562_v7 = vadd.f32 %v10114_v51, %v12038_v6  ;;  %v12039_v30 = vld [vmem:[#allocation111_spill] sm:$0xff] }
 0x786   : > { %12031 = vst [vmem:[#allocation68_spill] sm:$0xff] %v10546_v8  ;;  %v10566_v39 = vadd.f32 %v10111_v5, %v12039_v30  ;;  %v12040_v8 = vld [vmem:[#allocation57_spill] sm:$0xff]  ;;  %v10586_v30 = vadd.f32 %v10114_v51, %v10332_v60  ;;  %v10608_v60 = vadd.f32 %v10111_v5, %v10352_v19  ;;  %v10630_v19 = vadd.f32 %v10114_v51, %v10368_v36 }
 0x787   : > { %12033 = vst [vmem:[#allocation23_spill] sm:$0xff] %v10550_v1  ;;  %v10570_v9 = vadd.f32 %v10114_v51, %v12040_v8  ;;  %v12042_v1 = vld [vmem:[#allocation108_spill] sm:$0xff]  ;;  %v10590_v8 = vadd.f32 %v10111_v5, %v10336_v24  ;;  %v10612_v24 = vadd.f32 %v10114_v51, %v10356_v59 }
 0x788   : > { %12035 = vst [vmem:[#allocation65_spill] sm:$0xff] %v10554_v3  ;;  %v10574_v52 = vadd.f32 %v10111_v5, %v12042_v1  ;;  %v12044_v3 = vld [vmem:[#allocation59_spill] sm:$0xff]  ;;  %v12053_v59 = vld [vmem:[#allocation76_spill] sm:$0xff] }
 0x789   : > { %12037 = vst [vmem:[#allocation69_spill] sm:$0xff] %v10558_v16  ;;  %v10578_v13 = vadd.f32 %v10114_v51, %v12044_v3  ;;  %v12045_v16 = vld [vmem:[#allocation33_spill] sm:$0xff]  ;;  %v10600_v3 = vadd.f32 %v10111_v5, %v10344_v0  ;;  %v10622_v0 = vadd.f32 %v10114_v51, %v10362_v14  ;;  %v12056_v14 = vld [vmem:[#allocation78_spill] sm:$0xff] }
 0x78a   : > { %12041 = vst [vmem:[#allocation87_spill] sm:$0xff] %v10570_v9  ;;  %v10582_v6 = vadd.f32 %v10111_v5, %v12045_v16  ;;  %v12046_v9 = vld [vmem:[#allocation46_spill] sm:$0xff]  ;;  %v10604_v16 = vadd.f32 %v10114_v51, %v10348_v49  ;;  %v10626_v49 = vadd.f32 %v10111_v5, %v10365_v63 }
 0x78b   : > { %12043 = vst [vmem:[#allocation75_spill] sm:$0xff] %v10574_v52  ;;  %v10594_v1 = vadd.f32 %v10114_v51, %v12046_v9  ;;  %v10596_v52 = vpop.f32.mrf.mxu2  ;;  %v10614_v9 = vpop.f32.mrf.mxu3  ;;  %v12061_v63 = vld [vmem:[#allocation82_spill] sm:$0xff] }
 0x78c   : > { %12047 = vst [vmem:[#allocation97_spill] sm:$0xff] %v10596_v52  ;;  %v10618_v52 = vadd.f32 %v10111_v5, %v10359_v31  ;;  %v12055_v31 = vunpack.c.h.bf16 %v12053_v59  ;;  %v12059_v5 = vunpack.c.h.bf16 %v12056_v14  ;;  %v12062_v36 = vunpack.c.l.bf16 %v12061_v63 }
 0x78d   : > { %12048 = vst [vmem:[#allocation72_spill] sm:$0xff] %v10608_v60 }
 0x78e   : > { %12049 = vst [vmem:[#allocation66_spill] sm:$0xff] %v10612_v24  ;;  %v12054_v24 = vunpack.c.l.bf16 %v12053_v59  ;;  %v10650_v51 = vadd.f32 %v10384_v57, %v12059_v5  ;;  %v12066_v59 = vld [vmem:[#allocation84_spill] sm:$0xff] }
 0x78f   : > { %12050 = vst [vmem:[#allocation80_spill] sm:$0xff] %v10614_v9 }
 0x790   : > { %12051 = vst [vmem:[#allocation101_spill] sm:$0xff] %v10618_v52  ;;  %v10635_v9 = vadd.f32 %v10372_v17, %v12054_v24  ;;  %v10640_v52 = vadd.f32 %v10376_v11, %v12055_v31  ;;  %v10655_v17 = vadd.f32 %v10388_v62, %v12062_v36  ;;  %v12064_v24 = vunpack.c.h.bf16 %v12061_v63  ;;  %v12076_v36 = vld [vmem:[#allocation90_spill] sm:$0xff] }
 0x791   : > { %12052 = vst [vmem:[#allocation96_spill] sm:$0xff] %v10622_v0  ;;  %v12057_v0 = vunpack.c.l.bf16 %v12056_v14  ;;  %v12067_v31 = vunpack.c.l.bf16 %v12066_v59  ;;  %v12071_v14 = vld [vmem:[#allocation88_spill] sm:$0xff] }
 0x792   : > { %12060 = vst [vmem:[#allocation109_spill] sm:$0xff] %v10650_v51  ;;  %v10660_v11 = vadd.f32 %v10392_v38, %v12064_v24  ;;  %v12072_v5 = vunpack.c.l.bf16 %v12071_v14  ;;  %v12074_v63 = vunpack.c.h.bf16 %v12071_v14  ;;  %v12077_v24 = vunpack.c.l.bf16 %v12076_v36 }
 0x793   : > { %v10645_v60 = vadd.f32 %v10380_v12, %v12057_v0  ;;  %12063 = vst [vmem:[#allocation22_spill] sm:$0xff] %v10655_v17  ;;  %v10665_v12 = vadd.f32 %v10396_v48, %v12067_v31  ;;  %v12069_v0 = vunpack.c.h.bf16 %v12066_v59  ;;  %v12079_v59 = vunpack.c.h.bf16 %v12076_v36  ;;  %v12081_v31 = vld [vmem:[#allocation92_spill] sm:$0xff] }
 0x794   : > { %12065 = vst [vmem:[#allocation111_spill] sm:$0xff] %v10660_v11  ;;  %v10675_v62 = vadd.f32 %v10404_v10, %v12072_v5  ;;  %v10680_v38 = vadd.f32 %v10408_v56, %v12074_v63  ;;  %v10685_v48 = vadd.f32 %v10412_v35, %v12077_v24  ;;  %v12084_v14 = vunpack.c.h.bf16 %v12081_v31  ;;  %v12085_v5 = vld [vmem:[#allocation94_spill] sm:$0xff] }
 0x795   : > { %12058 = vst [vmem:[#allocation100_spill] sm:$0xff] %v10645_v60  ;;  %v10670_v57 = vadd.f32 %v10400_v26, %v12069_v0  ;;  %v10690_v26 = vadd.f32 %v10416_v43, %v12079_v59  ;;  %v12082_v0 = vunpack.c.l.bf16 %v12081_v31  ;;  %v12086_v63 = vunpack.c.l.bf16 %v12085_v5  ;;  %v12088_v24 = vld [vmem:[#allocation98_spill] sm:$0xff] }
 0x796   : > { %12068 = vst [vmem:[#allocation57_spill] sm:$0xff] %v10665_v12  ;;  %v10700_v56 = vadd.f32 %v10425_v23, %v12084_v14  ;;  %v12087_v36 = vunpack.c.h.bf16 %v12085_v5  ;;  %v12089_v59 = vunpack.c.l.bf16 %v12088_v24  ;;  %v12090_v31 = vunpack.c.h.bf16 %v12088_v24 }
 0x797   : > { %12070 = vst [vmem:[#allocation108_spill] sm:$0xff] %v10670_v57  ;;  %v10695_v10 = vadd.f32 %v10421_v20, %v12082_v0  ;;  %v10705_v35 = vadd.f32 %v10429_v41, %v12086_v63  ;;  %v12091_v0 = vld [vmem:[#allocation99_spill] sm:$0xff]  ;;  %v12094_v63 = vld [vmem:[#allocation102_spill] sm:$0xff] }
 0x798   : > { %12073 = vst [vmem:[#allocation59_spill] sm:$0xff] %v10675_v62  ;;  %v10710_v43 = vadd.f32 %v10433_v47, %v12087_v36  ;;  %v10715_v20 = vadd.f32 %v10438_v21, %v12089_v59  ;;  %v10720_v23 = vadd.f32 %v10442_v53, %v12090_v31  ;;  %v12092_v14 = vunpack.c.l.bf16 %v12091_v0  ;;  %v12097_v59 = vld [vmem:[#allocation103_spill] sm:$0xff] }
 0x799   : > { %12075 = vst [vmem:[#allocation33_spill] sm:$0xff] %v10680_v38  ;;  %v12093_v5 = vunpack.c.h.bf16 %v12091_v0  ;;  %v12095_v36 = vunpack.c.l.bf16 %v12094_v63  ;;  %v12096_v24 = vunpack.c.h.bf16 %v12094_v63  ;;  %v12098_v31 = vunpack.c.l.bf16 %v12097_v59 }
 0x79a   : > { %12078 = vst [vmem:[#allocation46_spill] sm:$0xff] %v10685_v48  ;;  %v10725_v41 = vadd.f32 %v10446_v55, %v12092_v14  ;;  %v12099_v0 = vunpack.c.h.bf16 %v12097_v59  ;;  %v12100_v14 = vld [vmem:[#allocation106_spill] sm:$0xff] }
 0x79b   : > { %12080 = vst [vmem:[#allocation76_spill] sm:$0xff] %v10690_v26  ;;  %v10730_v47 = vadd.f32 %v10450_v27, %v12093_v5  ;;  %v10735_v21 = vadd.f32 %v10454_v4, %v12095_v36  ;;  %v10740_v53 = vadd.f32 %v10458_v25, %v12096_v24  ;;  %v10745_v55 = vadd.f32 %v10462_v37, %v12098_v31  ;;  %v12103_v36 = vld [vmem:[#allocation107_spill] sm:$0xff]  ;;  %v12106_v31 = vld [vmem:[#allocation110_spill] sm:$0xff] }
 0x79c   : > { %12083 = vst [vmem:[#allocation78_spill] sm:$0xff] %v10695_v10  ;;  %v10750_v27 = vadd.f32 %v10466_v28, %v12099_v0  ;;  %v12101_v5 = vunpack.c.l.bf16 %v12100_v14  ;;  %v12102_v63 = vunpack.c.h.bf16 %v12100_v14  ;;  %v12104_v24 = vunpack.c.l.bf16 %v12103_v36 }
 0x79d   : > { %v12105_v59 = vunpack.c.h.bf16 %v12103_v36  ;;  %v12107_v0 = vunpack.c.l.bf16 %v12106_v31  ;;  %v12108_v14 = vunpack.c.h.bf16 %v12106_v31  ;;  %v12115_v31 = vld [vmem:[#allocation112_spill] sm:$0xff] }
 0x79e   : > { %v10755_v4 = vadd.f32 %v10470_v40, %v12101_v5  ;;  %v10760_v25 = vadd.f32 %v10474_v34, %v12102_v63  ;;  %v10765_v37 = vadd.f32 %v10478_v46, %v12104_v24  ;;  %v12109_v5 = vld [vmem:[#allocation50_spill] sm:$0xff]  ;;  %v10792_v24 = vpop.f32.mrf.mxu2 }
 0x79f   : > { %v10770_v28 = vadd.f32 %v10482_v61, %v12105_v59  ;;  %v10775_v40 = vadd.f32 %v10486_v50, %v12107_v0  ;;  %v10780_v34 = vadd.f32 %v10490_v22, %v12108_v14  ;;  %v12110_v63 = vunpack.c.l.bf16 %v12109_v5  ;;  %12112 = vst [vmem:[#allocation82_spill] sm:$0xff] %v10792_v24  ;;  %v10794_v59 = vpop.f32.mrf.mxu3  ;;  %v12114_v50 = vld [vmem:[#allocation73_spill] sm:$0xff]  ;;  %v12121_v24 = vld [vmem:[#allocation35_spill] sm:$0xff] }
 0x7a0   : > { %v12111_v36 = vunpack.c.h.bf16 %v12109_v5  ;;  %12113 = vst [vmem:[#allocation84_spill] sm:$0xff] %v10794_v59  ;;  %4714 = vmatmul.bf16.gmra.mxu2 %v12114_v50  ;;  %v12116_v0 = vunpack.c.l.bf16 %v12115_v31  ;;  %v12117_v14 = vunpack.c.h.bf16 %v12115_v31  ;;  %v12118_v5 = vld [vmem:[#allocation52_spill] sm:$0xff]  ;;  %4803 = vmatmul.bf16.gmra.mxu3 %v12114_v50  ;;  %v12131_v50 = vld [vmem:[#allocation63_spill] sm:$0xff] }
 0x7a1   : > { %v10785_v46 = vadd.f32 %v10494_v15, %v12110_v63  ;;  %v12119_v63 = vunpack.c.l.bf16 %v12118_v5 }
 0x7a2   : > { %v10790_v61 = vadd.f32 %v10498_v29, %v12111_v36  ;;  %v10800_v22 = vadd.f32 %v10502_v58, %v12116_v0  ;;  %v10805_v15 = vadd.f32 %v10506_v44, %v12117_v14  ;;  %v12120_v36 = vunpack.c.h.bf16 %v12118_v5  ;;  %v12126_v14 = vld [vmem:[#allocation20_spill] sm:$0xff] }
 0x7a3   : > { %v10810_v29 = vadd.f32 %v10510_v2, %v12119_v63  ;;  %v12122_v58 = vunpack.c.l.bf16 %v12121_v24  ;;  %v12124_v44 = vunpack.c.h.bf16 %v12121_v24  ;;  %v12127_v2 = vunpack.c.l.bf16 %v12126_v14 }
 0x7a4   : > { %v10815_v59 = vadd.f32 %v10514_v33, %v12120_v36  ;;  %v12129_v33 = vunpack.c.h.bf16 %v12126_v14  ;;  %v12132_v36 = vunpack.c.l.bf16 %v12131_v50  ;;  %v12134_v24 = vunpack.c.h.bf16 %v12131_v50 }
 0x7a5   : > { %v10821_v0 = vadd.f32 %v10518_v18, %v12122_v58  ;;  %v10826_v31 = vadd.f32 %v10522_v45, %v12124_v44  ;;  %v10831_v63 = vadd.f32 %v10526_v54, %v12127_v2  ;;  %v12135_v58 = vld [vmem:[#allocation53_spill] sm:$0xff]  ;;  %v12137_v44 = vld [vmem:[#allocation38_spill] sm:$0xff]  ;;  %v12141_v2 = vld [vmem:[#allocation68_spill] sm:$0xff] }
 0x7a6   : > { %v10836_v5 = vadd.f32 %v10530_v32, %v12129_v33  ;;  %v10841_v18 = vadd.f32 %v10534_v42, %v12132_v36  ;;  %v10846_v45 = vadd.f32 %v12135_v58, %v12134_v24  ;;  %v12140_v14 = vunpack.c.h.bf16 %v12137_v44  ;;  %v12142_v33 = vld [vmem:[#allocation70_spill] sm:$0xff]  ;;  %v12147_v36 = vld [vmem:[#allocation65_spill] sm:$0xff] }
 0x7a7   : > { %12123 = vst [vmem:[#allocation88_spill] sm:$0xff] %v10821_v0  ;;  %v12139_v0 = vld [vmem:[#allocation62_spill] sm:$0xff]  ;;  %v12146_v50 = vunpack.c.h.bf16 %v12142_v33  ;;  %v12149_v58 = vld [vmem:[#allocation41_spill] sm:$0xff] }
 0x7a8   : > { %12125 = vst [vmem:[#allocation90_spill] sm:$0xff] %v10826_v31  ;;  %v12138_v31 = vunpack.c.l.bf16 %v12137_v44  ;;  %v10856_v32 = vadd.f32 %v12141_v2, %v12140_v14  ;;  %v12153_v14 = vld [vmem:[#allocation25_spill] sm:$0xff] }
 0x7a9   : > { %12128 = vst [vmem:[#allocation92_spill] sm:$0xff] %v10831_v63  ;;  %v12144_v63 = vld [vmem:[#allocation23_spill] sm:$0xff]  ;;  %v10866_v24 = vadd.f32 %v12147_v36, %v12146_v50  ;;  %v12154_v2 = vunpack.c.l.bf16 %v12153_v14  ;;  %v12157_v36 = vld [vmem:[#allocation44_spill] sm:$0xff] }
 0x7aa   : > { %12130 = vst [vmem:[#allocation94_spill] sm:$0xff] %v10836_v5  ;;  %v10851_v54 = vadd.f32 %v12139_v0, %v12138_v31  ;;  %v12143_v5 = vunpack.c.l.bf16 %v12142_v33  ;;  %v12152_v31 = vunpack.c.h.bf16 %v12149_v58  ;;  %v12156_v33 = vld [vmem:[#allocation87_spill] sm:$0xff] }
 0x7ab   : > { %12133 = vst [vmem:[#allocation98_spill] sm:$0xff] %v10841_v18  ;;  %v12151_v18 = vld [vmem:[#allocation69_spill] sm:$0xff] }
 0x7ac   : > { %12136 = vst [vmem:[#allocation99_spill] sm:$0xff] %v10846_v45  ;;  %v10861_v42 = vadd.f32 %v12144_v63, %v12143_v5  ;;  %v12150_v45 = vunpack.c.l.bf16 %v12149_v58  ;;  %v10876_v44 = vadd.f32 %v10562_v7, %v12152_v31  ;;  %v10881_v63 = vadd.f32 %v10566_v39, %v12154_v2  ;;  %v12161_v58 = vld [vmem:[#allocation28_spill] sm:$0xff] }
 0x7ad   : > { %12148 = vst [vmem:[#allocation103_spill] sm:$0xff] %v10866_v24  ;;  %v12155_v5 = vunpack.c.h.bf16 %v12153_v14  ;;  %v12158_v24 = vunpack.c.l.bf16 %v12157_v36  ;;  %v12162_v31 = vunpack.c.l.bf16 %v12161_v58  ;;  %v12163_v14 = vunpack.c.h.bf16 %v12161_v58 }
 0x7ae   : > { %12145 = vst [vmem:[#allocation102_spill] sm:$0xff] %v10861_v42  ;;  %v10871_v0 = vadd.f32 %v12151_v18, %v12150_v45  ;;  %v12159_v42 = vld [vmem:[#allocation75_spill] sm:$0xff]  ;;  %v12160_v45 = vunpack.c.h.bf16 %v12157_v36  ;;  %v12170_v36 = vld [vmem:[#allocation49_spill] sm:$0xff]  ;;  %v5645_v57 = vmax.f32 %v10881_v63, 0.0 }
 0x7af   : > { %v10886_v50 = vadd.f32 %v12156_v33, %v12155_v5  ;;  %v10891_v18 = vadd.f32 %v12159_v42, %v12158_v24  ;;  %v10901_v39 = vadd.f32 %v10582_v6, %v12162_v31  ;;  %v10906_v2 = vadd.f32 %v10586_v30, %v12163_v14  ;;  %v12165_v5 = vld [vmem:[#allocation48_spill] sm:$0xff]  ;;  %v12174_v31 = vld [vmem:[#allocation55_spill] sm:$0xff] }
 0x7b0   : > { %v10896_v7 = vadd.f32 %v10578_v13, %v12160_v45  ;;  %v12166_v33 = vunpack.c.l.bf16 %v12165_v5  ;;  %v12168_v24 = vunpack.c.h.bf16 %v12165_v5  ;;  %v12171_v45 = vunpack.c.l.bf16 %v12170_v36 }
 0x7b1   : > { %12164 = vst [vmem:[#allocation106_spill] sm:$0xff] %v10906_v2  ;;  %v12172_v58 = vunpack.c.h.bf16 %v12170_v36  ;;  %v12175_v14 = vunpack.c.l.bf16 %v12174_v31  ;;  %v12176_v2 = vld [vmem:[#allocation72_spill] sm:$0xff]  ;;  %v12177_v5 = vunpack.c.h.bf16 %v12174_v31 }
 0x7b2   : > { %v10911_v42 = vadd.f32 %v10590_v8, %v12166_v33  ;;  %v10916_v13 = vadd.f32 %v10594_v1, %v12168_v24  ;;  %v10921_v6 = vadd.f32 %v10600_v3, %v12171_v45  ;;  %v12178_v33 = vld [vmem:[#allocation66_spill] sm:$0xff]  ;;  %v12179_v24 = vld [vmem:[#allocation56_spill] sm:$0xff] }
 0x7b3   : > { %v10926_v30 = vadd.f32 %v10604_v16, %v12172_v58  ;;  %v10931_v8 = vadd.f32 %v12176_v2, %v12175_v14  ;;  %v10936_v1 = vadd.f32 %v12178_v33, %v12177_v5  ;;  %v12182_v36 = vunpack.c.h.bf16 %v12179_v24  ;;  %v12183_v45 = vld [vmem:[#allocation96_spill] sm:$0xff]  ;;  %v12184_v58 = vld [vmem:[#allocation61_spill] sm:$0xff] }
 0x7b4   : > { %12167 = vst [vmem:[#allocation107_spill] sm:$0xff] %v10911_v42  ;;  %v12181_v42 = vld [vmem:[#allocation101_spill] sm:$0xff]  ;;  %v12186_v31 = vunpack.c.h.bf16 %v12184_v58  ;;  %v5574_v5 = vmax.f32 %v10700_v56, 0.0  ;;  %v5590_v33 = vmax.f32 %v10740_v53, 0.0  ;;  %v5594_v56 = vmax.f32 %v10750_v27, 0.0  ;;  %v12199_v62 = vld [vmem:[#allocation103_spill] sm:$0xff] }
 0x7b5   : > { %12169 = vst [vmem:[#allocation110_spill] sm:$0xff] %v10916_v13  ;;  %v12180_v13 = vunpack.c.l.bf16 %v12179_v24  ;;  %v10946_v16 = vadd.f32 %v12183_v45, %v12182_v36  ;;  %v10962_v24 = vpop.f32.mrf.mxu2  ;;  %v10964_v36 = vpop.f32.mrf.mxu3  ;;  %v5581_v45 = vmax.f32 %v10715_v20, 0.0  ;;  %v5601_v20 = vmax.f32 %v10765_v37, 0.0  ;;  %v12198_v38 = vld [vmem:[#allocation102_spill] sm:$0xff] }
 0x7b6   : > { %12173 = vst [vmem:[#allocation50_spill] sm:$0xff] %v10926_v30  ;;  %v12185_v30 = vunpack.c.l.bf16 %v12184_v58  ;;  %v10956_v14 = vadd.f32 %v10630_v19, %v12186_v31  ;;  %v5582_v19 = vmax.f32 %v10720_v23, 0.0  ;;  %v5585_v58 = vmax.f32 %v10725_v41, 0.0 }
 0x7b7   : > { %v10941_v3 = vadd.f32 %v12181_v42, %v12180_v13  ;;  %12187 = vst [vmem:[#allocation73_spill] sm:$0xff] %v10962_v24  ;;  %v5586_v31 = vmax.f32 %v10730_v47, 0.0  ;;  %v5589_v13 = vmax.f32 %v10735_v21, 0.0  ;;  %v5593_v42 = vmax.f32 %v10745_v55, 0.0  ;;  %v12190_v24 = vld [vmem:[#allocation90_spill] sm:$0xff] }
 0x7b8   : > { %v10951_v2 = vadd.f32 %v10626_v49, %v12185_v30  ;;  %12188 = vst [vmem:[#allocation112_spill] sm:$0xff] %v10964_v36  ;;  %v5577_v49 = vmax.f32 %v10705_v35, 0.0  ;;  %v5578_v30 = vmax.f32 %v10710_v43, 0.0  ;;  %v5597_v35 = vmax.f32 %v10755_v4, 0.0  ;;  %v12189_v36 = vld [vmem:[#allocation88_spill] sm:$0xff] }
 0x7b9   : > { %v5598_v43 = vmax.f32 %v10760_v25, 0.0  ;;  %v5602_v23 = vmax.f32 %v10770_v28, 0.0  ;;  %v5605_v41 = vmax.f32 %v10775_v40, 0.0  ;;  %v5606_v47 = vmax.f32 %v10780_v34, 0.0  ;;  %v12191_v40 = vld [vmem:[#allocation92_spill] sm:$0xff]  ;;  %v12192_v34 = vld [vmem:[#allocation94_spill] sm:$0xff] }
 0x7ba   : > { %v5609_v21 = vmax.f32 %v10785_v46, 0.0  ;;  %v5610_v53 = vmax.f32 %v10790_v61, 0.0  ;;  %v5613_v55 = vmax.f32 %v10800_v22, 0.0  ;;  %v5614_v27 = vmax.f32 %v10805_v15, 0.0  ;;  %v12195_v22 = vld [vmem:[#allocation104_spill] sm:$0xff]  ;;  %v12196_v15 = vld [vmem:[#allocation98_spill] sm:$0xff] }
 0x7bb   : > { %v5617_v4 = vmax.f32 %v10810_v29, 0.0  ;;  %v5618_v25 = vmax.f32 %v10815_v59, 0.0  ;;  %v5621_v37 = vmax.f32 %v12189_v36, 0.0  ;;  %v5622_v28 = vmax.f32 %v12190_v24, 0.0  ;;  %v12197_v59 = vld [vmem:[#allocation99_spill] sm:$0xff] }
 0x7bc   : > { %v5625_v10 = vmax.f32 %v12191_v40, 0.0  ;;  %v5626_v26 = vmax.f32 %v12192_v34, 0.0  ;;  %v5629_v29 = vmax.f32 %v12196_v15, 0.0  ;;  %v5630_v48 = vmax.f32 %v12197_v59, 0.0 }
 0x7bd   : > { %v11002_v46 = vpop.f32.mrf.mxu2  ;;  %v11004_v61 = vpop.f32.mrf.mxu3  ;;  %4719 = vmatmul.bf16.gmra.mxu2 %v12195_v22  ;;  %4808 = vmatmul.bf16.gmra.mxu3 %v12195_v22  ;;  %v5633_v36 = vmax.f32 %v10851_v54, 0.0  ;;  %v5634_v24 = vmax.f32 %v10856_v32, 0.0  ;;  %v5637_v40 = vmax.f32 %v12198_v38, 0.0  ;;  %v5638_v34 = vmax.f32 %v12199_v62, 0.0  ;;  %v12200_v32 = vld [vmem:[#allocation106_spill] sm:$0xff]  ;;  %v12201_v38 = vld [vmem:[#allocation107_spill] sm:$0xff] }
 0x7be   : > { %12193 = vst [vmem:[#allocation52_spill] sm:$0xff] %v11002_v46  ;;  %v5641_v46 = vmax.f32 %v10871_v0, 0.0  ;;  %v5646_v22 = vmax.f32 %v10886_v50, 0.0  ;;  %v5649_v15 = vmax.f32 %v10891_v18, 0.0  ;;  %v5650_v59 = vmax.f32 %v10896_v7, 0.0  ;;  %v12202_v62 = vld [vmem:[#allocation110_spill] sm:$0xff] }
 0x7bf   : > { %12194 = vst [vmem:[#allocation35_spill] sm:$0xff] %v11004_v61  ;;  %v5642_v61 = vmax.f32 %v10876_v44, 0.0  ;;  %v5653_v54 = vmax.f32 %v10901_v39, 0.0  ;;  %v5654_v12 = vmax.f32 %v12200_v32, 0.0  ;;  %v5657_v11 = vmax.f32 %v12201_v38, 0.0  ;;  %v12203_v44 = vld [vmem:[#allocation50_spill] sm:$0xff] }
 0x7c0   : > { %v5658_v17 = vmax.f32 %v12202_v62, 0.0  ;;  %v5661_v0 = vmax.f32 %v10921_v6, 0.0  ;;  %v5662_v51 = vmax.f32 %v12203_v44, 0.0  ;;  %v5665_v63 = vmax.f32 %v10931_v8, 0.0  ;;  %v12206_v6 = vld [vmem:[#allocation100_spill] sm:$0xff]  ;;  %v12208_v8 = vld [vmem:[#allocation109_spill] sm:$0xff] }
 0x7c1   : > { %v5666_v50 = vmax.f32 %v10936_v1, 0.0  ;;  %v5669_v18 = vmax.f32 %v10941_v3, 0.0  ;;  %v5670_v7 = vmax.f32 %v10946_v16, 0.0  ;;  %v5673_v39 = vmax.f32 %v10951_v2, 0.0  ;;  %v12210_v16 = vld [vmem:[#allocation22_spill] sm:$0xff] }
 0x7c2   : > { %v5674_v32 = vmax.f32 %v10956_v14, 0.0  ;;  %v12204_v38 = vmax.f32 %v10635_v9, 0.0  ;;  %v12205_v62 = vmax.f32 %v10640_v52, 0.0  ;;  %v12207_v44 = vmax.f32 %v12206_v6, 0.0  ;;  %v12212_v14 = vld [vmem:[#allocation111_spill] sm:$0xff]  ;;  %v12216_v6 = vld [vmem:[#allocation108_spill] sm:$0xff] }
 0x7c3   : > { %v12209_v1 = vmax.f32 %v12208_v8, 0.0  ;;  %v12211_v2 = vmax.f32 %v12210_v16, 0.0  ;;  %v12213_v9 = vmax.f32 %v12212_v14, 0.0  ;;  %v12217_v8 = vmax.f32 %v12216_v6, 0.0  ;;  %v12220_v14 = vld [vmem:[#allocation33_spill] sm:$0xff] }
 0x7c4   : > { %v5676_v60 = vpack.c.bf16 %v12205_v62, %v12204_v38  ;;  %v12214_v38 = vld [vmem:[#allocation57_spill] sm:$0xff] }
 0x7c5   : > { %v5678_v3 = vpack.c.bf16 %v12209_v1, %v12207_v44  ;;  %v5680_v52 = vpack.c.bf16 %v12213_v9, %v12211_v2  ;;  %v12215_v62 = vmax.f32 %v12214_v38, 0.0  ;;  %v12218_v44 = vld [vmem:[#allocation59_spill] sm:$0xff]  ;;  %v12221_v2 = vmax.f32 %v12220_v14, 0.0  ;;  %v12222_v38 = vld [vmem:[#allocation46_spill] sm:$0xff] }
 0x7c6   : > { %v12219_v16 = vmax.f32 %v12218_v44, 0.0  ;;  %v12223_v6 = vmax.f32 %v12222_v38, 0.0  ;;  %v12226_v14 = vld [vmem:[#allocation78_spill] sm:$0xff]  ;;  %v5690_v38 = vpack.c.bf16 %v5578_v30, %v5577_v49  ;;  %5740 = vst [vmem:[%s11059_s26 + $0x8] sm:$0xff] %v5676_v60  ;;  %v5700_v30 = vpack.c.bf16 %v5598_v43, %v5597_v35 }
 0x7c7   : > { %v5682_v1 = vpack.c.bf16 %v12217_v8, %v12215_v62  ;;  %v12224_v8 = vld [vmem:[#allocation76_spill] sm:$0xff]  ;;  %v5702_v49 = vpack.c.bf16 %v5602_v23, %v5601_v20  ;;  %5742 = vst [vmem:[%s11059_s26 + $0x18] sm:$0xff] %v5678_v3  ;;  %v11074_v60 = vpack.c.bf16 %v5630_v48, %v5629_v29  ;;  %v11080_v35 = vpack.c.bf16 %v5642_v61, %v5641_v46  ;;  %v12233_v29 = vld [vmem:[#allocation27_spill] sm:$0xff] }
 0x7c8   : > { %v5684_v9 = vpack.c.bf16 %v12221_v2, %v12219_v16  ;;  %v12225_v62 = vmax.f32 %v12224_v8, 0.0  ;;  %v12227_v2 = vmax.f32 %v12226_v14, 0.0  ;;  %v5692_v8 = vpack.c.bf16 %v5582_v19, %v5581_v45  ;;  %5744 = vst [vmem:[%s11059_s26 + $0x28] sm:$0xff] %v5680_v52  ;;  %v12232_v46 = vld [vmem:[#allocation80_spill] sm:$0xff]  ;;  %v12240_v52 = vld [vmem:[#allocation73_spill] sm:$0xff] }
 0x7c9   : > { %v5698_v14 = vpack.c.bf16 %v5594_v56, %v5593_v42  ;;  %v5704_v19 = vpack.c.bf16 %v5606_v47, %v5605_v41  ;;  %v5706_v45 = vpack.c.bf16 %v5610_v53, %v5609_v21  ;;  %v11069_v42 = vpack.c.bf16 %v5622_v28, %v5621_v37  ;;  %5746 = vst [vmem:[%s11059_s26 + $0x38] sm:$0xff] %v5682_v1  ;;  %v12231_v37 = vld [vmem:[#allocation97_spill] sm:$0xff] }
 0x7ca   : > { %v5686_v44 = vpack.c.bf16 %v12225_v62, %v12223_v6  ;;  %v5688_v16 = vpack.c.bf16 %v5574_v5, %v12227_v2  ;;  %v5694_v6 = vpack.c.bf16 %v5586_v31, %v5585_v58  ;;  %v5696_v62 = vpack.c.bf16 %v5590_v33, %v5589_v13  ;;  %v11062_v2 = vpop.f32.mrf.mxu2  ;;  %v11064_v5 = vpop.f32.mrf.mxu3  ;;  %5748 = vst [vmem:[%s11059_s26 + $0x48] sm:$0xff] %v5684_v9  ;;  %v12241_v9 = vld [vmem:[#allocation112_spill] sm:$0xff] }
 0x7cb   : > { %v5708_v58 = vpack.c.bf16 %v5614_v27, %v5613_v55  ;;  %v11067_v13 = vpack.c.bf16 %v5618_v25, %v5617_v4  ;;  %v11071_v33 = vpack.c.bf16 %v5626_v26, %v5625_v10  ;;  %v11076_v31 = vpack.c.bf16 %v5634_v24, %v5633_v36  ;;  %5754 = vst [vmem:[%s11059_s26 + $0x78] sm:$0xff] %v5690_v38  ;;  %v12230_v27 = vld [vmem:[#allocation26_spill] sm:$0xff] }
 0x7cc   : > { %v11078_v56 = vpack.c.bf16 %v5638_v34, %v5637_v40  ;;  %v11083_v43 = vpack.c.bf16 %v5646_v22, %v5645_v57  ;;  %v11085_v20 = vpack.c.bf16 %v5650_v59, %v5649_v15  ;;  %v11087_v26 = vpack.c.bf16 %v5654_v12, %v5653_v54  ;;  %5750 = vst [vmem:[%s11059_s26 + $0x58] sm:$0xff] %v5686_v44  ;;  %v12228_v57 = vld [vmem:[#allocation81_spill] sm:$0xff]  ;;  %v12234_v40 = vld [vmem:[#allocation82_spill] sm:$0xff]  ;;  %v12235_v22 = vld [vmem:[#allocation84_spill] sm:$0xff] }
 0x7cd   : > { %v11089_v10 = vpack.c.bf16 %v5658_v17, %v5657_v11  ;;  %v11092_v48 = vpack.c.bf16 %v5662_v51, %v5661_v0  ;;  %v11094_v23 = vpack.c.bf16 %v5666_v50, %v5665_v63  ;;  %v11096_v41 = vpack.c.bf16 %v5670_v7, %v5669_v18  ;;  %5752 = vst [vmem:[%s11059_s26 + $0x68] sm:$0xff] %v5688_v16  ;;  %v12229_v11 = vld [vmem:[#allocation24_spill] sm:$0xff]  ;;  %v12236_v59 = vld [vmem:[#allocation29_spill] sm:$0xff]  ;;  %v12238_v50 = vld [vmem:[#allocation86_spill] sm:$0xff] }
 0x7ce   : > { %v11098_v47 = vpack.c.bf16 %v5674_v32, %v5673_v39  ;;  %v11103_v21 = vperm.slane %v12228_v57, 0  ;;  %v11106_v12 = vperm.slane %v12228_v57, 1  ;;  %5756 = vst [vmem:[%s11059_s26 + $0x88] sm:$0xff] %v5692_v8  ;;  %v5002_v53 = vunpack.c.l.bf16 %v12229_v11  ;;  %v12237_v63 = vld [vmem:[#allocation105_spill] sm:$0xff]  ;;  %v12239_v39 = vld [vmem:[#allocation30_spill] sm:$0xff]  ;;  %v12242_v16 = vld [vmem:[#allocation31_spill] sm:$0xff] }
 0x7cf   : > { %5758 = vst [vmem:[%s11059_s26 + $0x98] sm:$0xff] %v5694_v6  ;;  %v5003_v55 = vunpack.c.h.bf16 %v12229_v11  ;;  %v5006_v4 = vunpack.c.l.bf16 %v12230_v27  ;;  %v5007_v25 = vunpack.c.h.bf16 %v12230_v27  ;;  %v5010_v36 = vunpack.c.l.bf16 %v12233_v29 }
 0x7d0   : > { %5760 = vst [vmem:[%s11059_s26 + $0xa8] sm:$0xff] %v5696_v62  ;;  %v5153_v28 = vmul.f32 %v11103_v21, %v12231_v37  ;;  %v5154_v61 = vmul.f32 %v11106_v12, %v12232_v46  ;;  %v5011_v24 = vunpack.c.h.bf16 %v12233_v29  ;;  %v5157_v34 = vmul.f32 %v11103_v21, %v12234_v40 }
 0x7d1   : > { %5762 = vst [vmem:[%s11059_s26 + $0xb8] sm:$0xff] %v5698_v14  ;;  %v5158_v15 = vmul.f32 %v11106_v12, %v12235_v22  ;;  %v5014_v54 = vunpack.c.l.bf16 %v12236_v59  ;;  %v5015_v0 = vunpack.c.h.bf16 %v12236_v59  ;;  %v11133_v18 = vperm.slane %v12238_v50, 0  ;;  %v12243_v14 = vld [vmem:[#allocation52_spill] sm:$0xff] }
 0x7d2   : > { %v4667_v51 = vpop.f32.mrf.mxu2  ;;  %v4756_v17 = vpop.f32.mrf.mxu3  ;;  %5764 = vst [vmem:[%s11059_s26 + $0xc8] sm:$0xff] %v5700_v30  ;;  %4724 = vmatmul.bf16.gmra.mxu2 %v12237_v63  ;;  %4813 = vmatmul.bf16.gmra.mxu3 %v12237_v63  ;;  %v11136_v7 = vperm.slane %v12238_v50, 1  ;;  %v5018_v32 = vunpack.c.l.bf16 %v12239_v39  ;;  %v5019_v3 = vunpack.c.h.bf16 %v12239_v39  ;;  %v5161_v1 = vmul.f32 %v11103_v21, %v12240_v52 }
 0x7d3   : > { %5766 = vst [vmem:[%s11059_s26 + $0xd8] sm:$0xff] %v5702_v49  ;;  %v5162_v44 = vmul.f32 %v11106_v12, %v12241_v9  ;;  %v5022_v38 = vunpack.c.l.bf16 %v12242_v16  ;;  %v5023_v8 = vunpack.c.h.bf16 %v12242_v16  ;;  %v5291_v6 = vadd.f32 %v11133_v18, %v5153_v28  ;;  %v12244_v49 = vld [vmem:[#allocation35_spill] sm:$0xff] }
 0x7d4   : > { %5768 = vst [vmem:[%s11059_s26 + $0xe8] sm:$0xff] %v5704_v19  ;;  %v5292_v62 = vadd.f32 %v11136_v7, %v5154_v61  ;;  %v5165_v30 = vmul.f32 %v11103_v21, %v12243_v14  ;;  %v5166_v19 = vmul.f32 %v11106_v12, %v12244_v49  ;;  %v5295_v57 = vadd.f32 %v11133_v18, %v5157_v34  ;;  %v12245_v61 = vld [vmem:[#allocation32_spill] sm:$0xff] }
 0x7d5   : > { %5770 = vst [vmem:[%s11059_s26 + $0xf8] sm:$0xff] %v5706_v45  ;;  %v5296_v11 = vadd.f32 %v11136_v7, %v5158_v15  ;;  %v5169_v27 = vmul.f32 %v11103_v21, %v11062_v2  ;;  %v5170_v45 = vmul.f32 %v11106_v12, %v11064_v5  ;;  %v5173_v46 = vmul.f32 %v11103_v21, %v4667_v51 }
 0x7d6   : > { %5772 = vst [vmem:[%s11059_s26 + $0x108] sm:$0xff] %v5708_v58  ;;  %v5174_v58 = vmul.f32 %v11106_v12, %v4756_v17  ;;  %v5026_v29 = vunpack.c.l.bf16 %v12245_v61  ;;  %v5027_v40 = vunpack.c.h.bf16 %v12245_v61  ;;  %v5299_v2 = vadd.f32 %v11133_v18, %v5161_v1 }
 0x7d7   : > { %5774 = vst [vmem:[%s11059_s26 + $0x118] sm:$0xff] %v11067_v13  ;;  %v5300_v5 = vadd.f32 %v11136_v7, %v5162_v44  ;;  %v5419_v13 = vadd.f32 %v5291_v6, %v5002_v53  ;;  %v5420_v51 = vadd.f32 %v5292_v62, %v5003_v55  ;;  %v5303_v17 = vadd.f32 %v11133_v18, %v5165_v30  ;;  %v12246_v55 = vld [vmem:[#allocation34_spill] sm:$0xff] }
 0x7d8   : > { %5776 = vst [vmem:[%s11059_s26 + $0x128] sm:$0xff] %v11069_v42  ;;  %v5304_v15 = vadd.f32 %v11136_v7, %v5166_v19  ;;  %v5423_v42 = vadd.f32 %v5295_v57, %v5006_v4  ;;  %v5424_v59 = vadd.f32 %v5296_v11, %v5007_v25  ;;  %v5307_v63 = vadd.f32 %v11133_v18, %v5169_v27 }
 0x7d9   : > { %5778 = vst [vmem:[%s11059_s26 + $0x138] sm:$0xff] %v11071_v33  ;;  %v5308_v50 = vadd.f32 %v11136_v7, %v5170_v45  ;;  %v5311_v53 = vadd.f32 %v11133_v18, %v5173_v46  ;;  %v5312_v33 = vadd.f32 %v11136_v7, %v5174_v58  ;;  %v5030_v39 = vunpack.c.l.bf16 %v12246_v55  ;;  %v12247_v45 = vld [vmem:[#allocation21_spill] sm:$0xff] }
 0x7da   : > { %v4670_v37 = vpop.f32.mrf.mxu2  ;;  %v4759_v28 = vpop.f32.mrf.mxu3  ;;  %5780 = vst [vmem:[%s11059_s26 + $0x148] sm:$0xff] %v11074_v60  ;;  %v5031_v52 = vunpack.c.h.bf16 %v12246_v55  ;;  %v5427_v60 = vadd.f32 %v5299_v2, %v5010_v36  ;;  %v5428_v4 = vadd.f32 %v5300_v5, %v5011_v24  ;;  %v5547_v9 = vmax.f32 %v5419_v13, 0.0 }
 0x7db   : > { %v5177_v34 = vmul.f32 %v11103_v21, %v4670_v37  ;;  %v5178_v22 = vmul.f32 %v11106_v12, %v4759_v28  ;;  %5782 = vst [vmem:[%s11059_s26 + $0x158] sm:$0xff] %v11076_v31  ;;  %v5548_v31 = vmax.f32 %v5420_v51, 0.0  ;;  %v5431_v44 = vadd.f32 %v5303_v17, %v5014_v54 }
 0x7dc   : > { %5784 = vst [vmem:[%s11059_s26 + $0x168] sm:$0xff] %v11078_v56  ;;  %v5432_v16 = vadd.f32 %v5304_v15, %v5015_v0  ;;  %v5551_v6 = vmax.f32 %v5423_v42, 0.0  ;;  %v5552_v62 = vmax.f32 %v5424_v59, 0.0  ;;  %v5435_v56 = vadd.f32 %v5307_v63, %v5018_v32 }
 0x7dd   : > { %v5315_v25 = vadd.f32 %v11133_v18, %v5177_v34  ;;  %v5316_v1 = vadd.f32 %v11136_v7, %v5178_v22  ;;  %5786 = vst [vmem:[%s11059_s26 + $0x178] sm:$0xff] %v11080_v35  ;;  %v5436_v36 = vadd.f32 %v5308_v50, %v5019_v3  ;;  %v5439_v30 = vadd.f32 %v5311_v53, %v5022_v38 }
 0x7de   : > { %5788 = vst [vmem:[%s11059_s26 + $0x188] sm:$0xff] %v11083_v43  ;;  %v5440_v49 = vadd.f32 %v5312_v33, %v5023_v8  ;;  %v5555_v54 = vmax.f32 %v5427_v60, 0.0  ;;  %v5556_v43 = vmax.f32 %v5428_v4, 0.0  ;;  %v5559_v32 = vmax.f32 %v5431_v44, 0.0 }
 0x7df   : > { %5790 = vst [vmem:[%s11059_s26 + $0x198] sm:$0xff] %v11085_v20  ;;  %v5443_v0 = vadd.f32 %v5315_v25, %v5026_v29  ;;  %v5444_v57 = vadd.f32 %v5316_v1, %v5027_v40  ;;  %v5560_v3 = vmax.f32 %v5432_v16, 0.0  ;;  %v5675_v8 = vpack.c.bf16 %v5548_v31, %v5547_v9  ;;  %v12249_v1 = vld [vmem:[#allocation37_spill] sm:$0xff] }
 0x7e0   : > { %5792 = vst [vmem:[%s11059_s26 + $0x1a8] sm:$0xff] %v11087_v26  ;;  %v5677_v11 = vpack.c.bf16 %v5552_v62, %v5551_v6  ;;  %v5563_v26 = vmax.f32 %v5435_v56, 0.0  ;;  %v5564_v27 = vmax.f32 %v5436_v36, 0.0  ;;  %v5568_v37 = vmax.f32 %v5440_v49, 0.0 }
 0x7e1   : > { %5794 = vst [vmem:[%s11059_s26 + $0x1b8] sm:$0xff] %v11089_v10  ;;  %v5567_v10 = vmax.f32 %v5439_v30, 0.0  ;;  %v5571_v58 = vmax.f32 %v5443_v0, 0.0  ;;  %v5572_v61 = vmax.f32 %v5444_v57, 0.0  ;;  %v5681_v29 = vpack.c.bf16 %v5560_v3, %v5559_v32 }
 0x7e2   : > { %v4672_v14 = vpop.f32.mrf.mxu2  ;;  %v4761_v24 = vpop.f32.mrf.mxu3  ;;  %5796 = vst [vmem:[%s11059_s26 + $0x1c8] sm:$0xff] %v11092_v48  ;;  %4729 = vmatmul.bf16.gmra.mxu2 %v12247_v45  ;;  %4818 = vmatmul.bf16.gmra.mxu3 %v12247_v45  ;;  %v5679_v48 = vpack.c.bf16 %v5556_v43, %v5555_v54  ;;  %v5038_v9 = vunpack.c.l.bf16 %v12249_v1  ;;  %v5039_v44 = vunpack.c.h.bf16 %v12249_v1 }
 0x7e3   : > { %v5181_v35 = vmul.f32 %v11103_v21, %v4672_v14  ;;  %v5182_v19 = vmul.f32 %v11106_v12, %v4761_v24  ;;  %5798 = vst [vmem:[%s11059_s26 + $0x1d8] sm:$0xff] %v11094_v23  ;;  %v5683_v23 = vpack.c.bf16 %v5564_v27, %v5563_v26  ;;  %v5685_v22 = vpack.c.bf16 %v5568_v37, %v5567_v10  ;;  %v12251_v10 = vld [vmem:[#allocation40_spill] sm:$0xff] }
 0x7e4   : > { %5800 = vst [vmem:[%s11059_s26 + $0x1e8] sm:$0xff] %v11096_v41  ;;  %v5687_v51 = vpack.c.bf16 %v5572_v61, %v5571_v58  ;;  %v5046_v37 = vunpack.c.l.bf16 %v12251_v10 }
 0x7e5   : > { %v5319_v20 = vadd.f32 %v11133_v18, %v5181_v35  ;;  %v5320_v38 = vadd.f32 %v11136_v7, %v5182_v19  ;;  %5802 = vst [vmem:[%s11059_s26 + $0x1f8] sm:$0xff] %v11098_v47  ;;  %v12248_v47 = vld [vmem:[#allocation36_spill] sm:$0xff]  ;;  %v12250_v19 = vld [vmem:[#allocation39_spill] sm:$0xff] }
 0x7e6   : > { %5739 = vst [vmem:[%s11059_s26] sm:$0xff] %v5675_v8  ;;  %v5034_v17 = vunpack.c.l.bf16 %v12248_v47  ;;  %v5035_v59 = vunpack.c.h.bf16 %v12248_v47  ;;  %v5042_v54 = vunpack.c.l.bf16 %v12250_v19  ;;  %v5043_v0 = vunpack.c.h.bf16 %v12250_v19 }
 0x7e7   : > { %v5447_v28 = vadd.f32 %v5319_v20, %v5030_v39  ;;  %v5448_v46 = vadd.f32 %v5320_v38, %v5031_v52  ;;  %5741 = vst [vmem:[%s11059_s26 + $0x10] sm:$0xff] %v5677_v11 }
 0x7e8   : > { %5743 = vst [vmem:[%s11059_s26 + $0x20] sm:$0xff] %v5679_v48 }
 0x7e9   : > { %v5575_v40 = vmax.f32 %v5447_v28, 0.0  ;;  %v5576_v2 = vmax.f32 %v5448_v46, 0.0  ;;  %5745 = vst [vmem:[%s11059_s26 + $0x30] sm:$0xff] %v5681_v29  ;;  %v5047_v46 = vunpack.c.h.bf16 %v12251_v10 }
 0x7ea   : > { %v4675_v5 = vpop.f32.mrf.mxu2  ;;  %v4764_v34 = vpop.f32.mrf.mxu3  ;;  %5747 = vst [vmem:[%s11059_s26 + $0x40] sm:$0xff] %v5683_v23 }
 0x7eb   : > { %v5185_v41 = vmul.f32 %v11103_v21, %v4675_v5  ;;  %v5186_v13 = vmul.f32 %v11106_v12, %v4764_v34  ;;  %v5689_v15 = vpack.c.bf16 %v5576_v2, %v5575_v40  ;;  %5749 = vst [vmem:[%s11059_s26 + $0x50] sm:$0xff] %v5685_v22 }
 0x7ec   : > { %5751 = vst [vmem:[%s11059_s26 + $0x60] sm:$0xff] %v5687_v51 }
 0x7ed   : > { %v5323_v42 = vadd.f32 %v11133_v18, %v5185_v41  ;;  %v5324_v63 = vadd.f32 %v11136_v7, %v5186_v13  ;;  %5753 = vst [vmem:[%s11059_s26 + $0x70] sm:$0xff] %v5689_v15  ;;  %v12252_v41 = vld [vmem:[#allocation42_spill] sm:$0xff] }
 0x7ee   : > { %v5050_v13 = vunpack.c.l.bf16 %v12252_v41  ;;  %v5051_v47 = vunpack.c.h.bf16 %v12252_v41 }
 0x7ef   : > { %v5451_v50 = vadd.f32 %v5323_v42, %v5034_v17  ;;  %v5452_v53 = vadd.f32 %v5324_v63, %v5035_v59 }
 0x7f1   : > { %v5579_v33 = vmax.f32 %v5451_v50, 0.0  ;;  %v5580_v55 = vmax.f32 %v5452_v53, 0.0 }
 0x7f2   : > { %v4677_v39 = vpop.f32.mrf.mxu2  ;;  %v4766_v52 = vpop.f32.mrf.mxu3 }
 0x7f3   : > { %v5691_v60 = vpack.c.bf16 %v5580_v55, %v5579_v33  ;;  %v5189_v4 = vmul.f32 %v11103_v21, %v4677_v39  ;;  %v5190_v25 = vmul.f32 %v11106_v12, %v4766_v52  ;;  %v12253_v52 = vld [vmem:[#allocation43_spill] sm:$0xff] }
 0x7f5   : > { %5755 = vst [vmem:[%s11059_s26 + $0x80] sm:$0xff] %v5691_v60  ;;  %v5327_v31 = vadd.f32 %v11133_v18, %v5189_v4  ;;  %v5328_v16 = vadd.f32 %v11136_v7, %v5190_v25  ;;  %v5054_v60 = vunpack.c.l.bf16 %v12253_v52  ;;  %v5055_v25 = vunpack.c.h.bf16 %v12253_v52 }
 0x7f7   : > { %v5455_v6 = vadd.f32 %v5327_v31, %v5038_v9  ;;  %v5456_v62 = vadd.f32 %v5328_v16, %v5039_v44 }
 0x7f9   : > { %v5583_v56 = vmax.f32 %v5455_v6, 0.0  ;;  %v5584_v36 = vmax.f32 %v5456_v62, 0.0 }
 0x7fa   : > { %v4680_v14 = vpop.f32.mrf.mxu2  ;;  %v4769_v24 = vpop.f32.mrf.mxu3 }
 0x7fb   : > { %v5693_v30 = vpack.c.bf16 %v5584_v36, %v5583_v56  ;;  %v5193_v49 = vmul.f32 %v11103_v21, %v4680_v14  ;;  %v5194_v35 = vmul.f32 %v11106_v12, %v4769_v24  ;;  %v12254_v24 = vld [vmem:[#allocation45_spill] sm:$0xff] }
 0x7fd   : > { %5757 = vst [vmem:[%s11059_s26 + $0x90] sm:$0xff] %v5693_v30  ;;  %v5331_v43 = vadd.f32 %v11133_v18, %v5193_v49  ;;  %v5332_v57 = vadd.f32 %v11136_v7, %v5194_v35  ;;  %v5058_v30 = vunpack.c.l.bf16 %v12254_v24  ;;  %v5059_v35 = vunpack.c.h.bf16 %v12254_v24 }
 0x7ff   : > { %v5459_v32 = vadd.f32 %v5331_v43, %v5042_v54  ;;  %v5460_v3 = vadd.f32 %v5332_v57, %v5043_v0 }
 0x801   : > { %v5587_v20 = vmax.f32 %v5459_v32, 0.0  ;;  %v5588_v38 = vmax.f32 %v5460_v3, 0.0 }
 0x802   : > { %v4682_v8 = vpop.f32.mrf.mxu2  ;;  %v4771_v11 = vpop.f32.mrf.mxu3 }
 0x803   : > { %v5695_v26 = vpack.c.bf16 %v5588_v38, %v5587_v20  ;;  %v5197_v27 = vmul.f32 %v11103_v21, %v4682_v8  ;;  %v5198_v45 = vmul.f32 %v11106_v12, %v4771_v11  ;;  %v12255_v11 = vld [vmem:[#allocation47_spill] sm:$0xff] }
 0x805   : > { %5759 = vst [vmem:[%s11059_s26 + $0xa0] sm:$0xff] %v5695_v26  ;;  %v5335_v28 = vadd.f32 %v11133_v18, %v5197_v27  ;;  %v5336_v48 = vadd.f32 %v11136_v7, %v5198_v45  ;;  %v5062_v26 = vunpack.c.l.bf16 %v12255_v11  ;;  %v5063_v45 = vunpack.c.h.bf16 %v12255_v11 }
 0x807   : > { %v5463_v58 = vadd.f32 %v5335_v28, %v5046_v37  ;;  %v5464_v61 = vadd.f32 %v5336_v48, %v5047_v46 }
 0x809   : > { %v5591_v29 = vmax.f32 %v5463_v58, 0.0  ;;  %v5592_v40 = vmax.f32 %v5464_v61, 0.0 }
 0x80a   : > { %v4685_v2 = vpop.f32.mrf.mxu2  ;;  %v4774_v23 = vpop.f32.mrf.mxu3 }
 0x80b   : > { %v5697_v5 = vpack.c.bf16 %v5592_v40, %v5591_v29  ;;  %v5201_v34 = vmul.f32 %v11103_v21, %v4685_v2  ;;  %v5202_v22 = vmul.f32 %v11106_v12, %v4774_v23  ;;  %v12256_v23 = vld [vmem:[#allocation51_spill] sm:$0xff] }
 0x80d   : > { %5761 = vst [vmem:[%s11059_s26 + $0xb0] sm:$0xff] %v5697_v5  ;;  %v5339_v51 = vadd.f32 %v11133_v18, %v5201_v34  ;;  %v5340_v17 = vadd.f32 %v11136_v7, %v5202_v22  ;;  %v5066_v5 = vunpack.c.l.bf16 %v12256_v23  ;;  %v5067_v22 = vunpack.c.h.bf16 %v12256_v23 }
 0x80f   : > { %v5467_v15 = vadd.f32 %v5339_v51, %v5050_v13  ;;  %v5468_v42 = vadd.f32 %v5340_v17, %v5051_v47 }
 0x811   : > { %v5595_v59 = vmax.f32 %v5467_v15, 0.0  ;;  %v5596_v63 = vmax.f32 %v5468_v42, 0.0 }
 0x812   : > { %v4687_v50 = vpop.f32.mrf.mxu2  ;;  %v4776_v53 = vpop.f32.mrf.mxu3 }
 0x813   : > { %v5699_v33 = vpack.c.bf16 %v5596_v63, %v5595_v59  ;;  %v5205_v55 = vmul.f32 %v11103_v21, %v4687_v50  ;;  %v5206_v39 = vmul.f32 %v11106_v12, %v4776_v53  ;;  %v12257_v53 = vld [vmem:[#allocation54_spill] sm:$0xff] }
 0x815   : > { %5763 = vst [vmem:[%s11059_s26 + $0xc0] sm:$0xff] %v5699_v33  ;;  %v5343_v4 = vadd.f32 %v11133_v18, %v5205_v55  ;;  %v5344_v1 = vadd.f32 %v11136_v7, %v5206_v39  ;;  %v5070_v33 = vunpack.c.l.bf16 %v12257_v53  ;;  %v5071_v39 = vunpack.c.h.bf16 %v12257_v53 }
 0x817   : > { %v5471_v9 = vadd.f32 %v5343_v4, %v5054_v60  ;;  %v5472_v31 = vadd.f32 %v5344_v1, %v5055_v25 }
 0x819   : > { %v5599_v44 = vmax.f32 %v5471_v9, 0.0  ;;  %v5600_v16 = vmax.f32 %v5472_v31, 0.0 }
 0x81a   : > { %v4690_v6 = vpop.f32.mrf.mxu2  ;;  %v4779_v62 = vpop.f32.mrf.mxu3 }
 0x81b   : > { %v5701_v56 = vpack.c.bf16 %v5600_v16, %v5599_v44  ;;  %v5209_v36 = vmul.f32 %v11103_v21, %v4690_v6  ;;  %v5210_v14 = vmul.f32 %v11106_v12, %v4779_v62  ;;  %v12258_v62 = vld [vmem:[#allocation58_spill] sm:$0xff] }
 0x81d   : > { %5765 = vst [vmem:[%s11059_s26 + $0xd0] sm:$0xff] %v5701_v56  ;;  %v5347_v49 = vadd.f32 %v11133_v18, %v5209_v36  ;;  %v5348_v19 = vadd.f32 %v11136_v7, %v5210_v14  ;;  %v5074_v56 = vunpack.c.l.bf16 %v12258_v62  ;;  %v5075_v14 = vunpack.c.h.bf16 %v12258_v62 }
 0x81f   : > { %v5475_v54 = vadd.f32 %v5347_v49, %v5058_v30  ;;  %v5476_v43 = vadd.f32 %v5348_v19, %v5059_v35 }
 0x821   : > { %v5603_v0 = vmax.f32 %v5475_v54, 0.0  ;;  %v5604_v57 = vmax.f32 %v5476_v43, 0.0 }
 0x822   : > { %v4692_v32 = vpop.f32.mrf.mxu2  ;;  %v4781_v3 = vpop.f32.mrf.mxu3 }
 0x823   : > { %v5703_v20 = vpack.c.bf16 %v5604_v57, %v5603_v0  ;;  %v5213_v38 = vmul.f32 %v11103_v21, %v4692_v32  ;;  %v5214_v8 = vmul.f32 %v11106_v12, %v4781_v3  ;;  %v12259_v3 = vld [vmem:[#allocation60_spill] sm:$0xff] }
 0x825   : > { %5767 = vst [vmem:[%s11059_s26 + $0xe0] sm:$0xff] %v5703_v20  ;;  %v5351_v27 = vadd.f32 %v11133_v18, %v5213_v38  ;;  %v5352_v10 = vadd.f32 %v11136_v7, %v5214_v8  ;;  %v5078_v20 = vunpack.c.l.bf16 %v12259_v3  ;;  %v5079_v8 = vunpack.c.h.bf16 %v12259_v3 }
 0x827   : > { %v5479_v37 = vadd.f32 %v5351_v27, %v5062_v26  ;;  %v5480_v28 = vadd.f32 %v5352_v10, %v5063_v45 }
 0x829   : > { %v5607_v46 = vmax.f32 %v5479_v37, 0.0  ;;  %v5608_v48 = vmax.f32 %v5480_v28, 0.0 }
 0x82a   : > { %v4695_v58 = vpop.f32.mrf.mxu2  ;;  %v4784_v61 = vpop.f32.mrf.mxu3 }
 0x82b   : > { %v5705_v29 = vpack.c.bf16 %v5608_v48, %v5607_v46  ;;  %v5217_v40 = vmul.f32 %v11103_v21, %v4695_v58  ;;  %v5218_v2 = vmul.f32 %v11106_v12, %v4784_v61  ;;  %v12260_v61 = vld [vmem:[#allocation64_spill] sm:$0xff] }
 0x82d   : > { %5769 = vst [vmem:[%s11059_s26 + $0xf0] sm:$0xff] %v5705_v29  ;;  %v5355_v34 = vadd.f32 %v11133_v18, %v5217_v40  ;;  %v5356_v41 = vadd.f32 %v11136_v7, %v5218_v2  ;;  %v5082_v29 = vunpack.c.l.bf16 %v12260_v61  ;;  %v5083_v2 = vunpack.c.h.bf16 %v12260_v61 }
 0x82f   : > { %v5483_v13 = vadd.f32 %v5355_v34, %v5066_v5  ;;  %v5484_v51 = vadd.f32 %v5356_v41, %v5067_v22 }
 0x831   : > { %v5611_v47 = vmax.f32 %v5483_v13, 0.0  ;;  %v5612_v17 = vmax.f32 %v5484_v51, 0.0 }
 0x832   : > { %v4697_v15 = vpop.f32.mrf.mxu2  ;;  %v4786_v42 = vpop.f32.mrf.mxu3 }
 0x833   : > { %v5707_v59 = vpack.c.bf16 %v5612_v17, %v5611_v47  ;;  %v5221_v63 = vmul.f32 %v11103_v21, %v4697_v15  ;;  %v5222_v50 = vmul.f32 %v11106_v12, %v4786_v42  ;;  %v12261_v42 = vld [vmem:[#allocation67_spill] sm:$0xff] }
 0x835   : > { %5771 = vst [vmem:[%s11059_s26 + $0x100] sm:$0xff] %v5707_v59  ;;  %v5359_v55 = vadd.f32 %v11133_v18, %v5221_v63  ;;  %v5360_v52 = vadd.f32 %v11136_v7, %v5222_v50  ;;  %v5086_v59 = vunpack.c.l.bf16 %v12261_v42  ;;  %v5087_v50 = vunpack.c.h.bf16 %v12261_v42 }
 0x837   : > { %v5487_v60 = vadd.f32 %v5359_v55, %v5070_v33  ;;  %v5488_v4 = vadd.f32 %v5360_v52, %v5071_v39 }
 0x839   : > { %v5615_v25 = vmax.f32 %v5487_v60, 0.0  ;;  %v5616_v1 = vmax.f32 %v5488_v4, 0.0 }
 0x83a   : > { %v4700_v9 = vpop.f32.mrf.mxu2  ;;  %v4789_v31 = vpop.f32.mrf.mxu3 }
 0x83b   : > { %v5709_v44 = vpack.c.bf16 %v5616_v1, %v5615_v25  ;;  %v5225_v16 = vmul.f32 %v11103_v21, %v4700_v9  ;;  %v5226_v6 = vmul.f32 %v11106_v12, %v4789_v31  ;;  %v12262_v31 = vld [vmem:[#allocation71_spill] sm:$0xff] }
 0x83d   : > { %5773 = vst [vmem:[%s11059_s26 + $0x110] sm:$0xff] %v5709_v44  ;;  %v5363_v36 = vadd.f32 %v11133_v18, %v5225_v16  ;;  %v5364_v24 = vadd.f32 %v11136_v7, %v5226_v6  ;;  %v5090_v44 = vunpack.c.l.bf16 %v12262_v31  ;;  %v5091_v6 = vunpack.c.h.bf16 %v12262_v31 }
 0x83f   : > { %v5491_v30 = vadd.f32 %v5363_v36, %v5074_v56  ;;  %v5492_v49 = vadd.f32 %v5364_v24, %v5075_v14 }
 0x841   : > { %v5619_v35 = vmax.f32 %v5491_v30, 0.0  ;;  %v5620_v19 = vmax.f32 %v5492_v49, 0.0 }
 0x842   : > { %v4702_v54 = vpop.f32.mrf.mxu2  ;;  %v4791_v43 = vpop.f32.mrf.mxu3 }
 0x843   : > { %v5711_v0 = vpack.c.bf16 %v5620_v19, %v5619_v35  ;;  %v5229_v57 = vmul.f32 %v11103_v21, %v4702_v54  ;;  %v5230_v32 = vmul.f32 %v11106_v12, %v4791_v43  ;;  %v12263_v43 = vld [vmem:[#allocation74_spill] sm:$0xff] }
 0x845   : > { %5775 = vst [vmem:[%s11059_s26 + $0x120] sm:$0xff] %v5711_v0  ;;  %v5367_v38 = vadd.f32 %v11133_v18, %v5229_v57  ;;  %v5368_v11 = vadd.f32 %v11136_v7, %v5230_v32  ;;  %v5094_v0 = vunpack.c.l.bf16 %v12263_v43  ;;  %v5095_v32 = vunpack.c.h.bf16 %v12263_v43 }
 0x847   : > { %v5495_v26 = vadd.f32 %v5367_v38, %v5078_v20  ;;  %v5496_v27 = vadd.f32 %v5368_v11, %v5079_v8 }
 0x849   : > { %v5623_v45 = vmax.f32 %v5495_v26, 0.0  ;;  %v5624_v10 = vmax.f32 %v5496_v27, 0.0 }
 0x84a   : > { %v4705_v37 = vpop.f32.mrf.mxu2  ;;  %v4794_v28 = vpop.f32.mrf.mxu3 }
 0x84b   : > { %v5713_v46 = vpack.c.bf16 %v5624_v10, %v5623_v45  ;;  %v5233_v48 = vmul.f32 %v11103_v21, %v4705_v37  ;;  %v5234_v58 = vmul.f32 %v11106_v12, %v4794_v28  ;;  %v12264_v28 = vld [vmem:[#allocation77_spill] sm:$0xff] }
 0x84d   : > { %5777 = vst [vmem:[%s11059_s26 + $0x130] sm:$0xff] %v5713_v46  ;;  %v5371_v40 = vadd.f32 %v11133_v18, %v5233_v48  ;;  %v5372_v23 = vadd.f32 %v11136_v7, %v5234_v58  ;;  %v5098_v46 = vunpack.c.l.bf16 %v12264_v28  ;;  %v5099_v58 = vunpack.c.h.bf16 %v12264_v28 }
 0x84f   : > { %v5499_v5 = vadd.f32 %v5371_v40, %v5082_v29  ;;  %v5500_v34 = vadd.f32 %v5372_v23, %v5083_v2 }
 0x851   : > { %v5627_v22 = vmax.f32 %v5499_v5, 0.0  ;;  %v5628_v41 = vmax.f32 %v5500_v34, 0.0 }
 0x852   : > { %v4707_v13 = vpop.f32.mrf.mxu2  ;;  %v4796_v51 = vpop.f32.mrf.mxu3 }
 0x853   : > { %v5715_v47 = vpack.c.bf16 %v5628_v41, %v5627_v22  ;;  %v5237_v17 = vmul.f32 %v11103_v21, %v4707_v13  ;;  %v5238_v15 = vmul.f32 %v11106_v12, %v4796_v51  ;;  %v12265_v51 = vld [vmem:[#allocation79_spill] sm:$0xff] }
 0x855   : > { %5779 = vst [vmem:[%s11059_s26 + $0x140] sm:$0xff] %v5715_v47  ;;  %v5375_v63 = vadd.f32 %v11133_v18, %v5237_v17  ;;  %v5376_v53 = vadd.f32 %v11136_v7, %v5238_v15  ;;  %v5102_v47 = vunpack.c.l.bf16 %v12265_v51  ;;  %v5103_v15 = vunpack.c.h.bf16 %v12265_v51 }
 0x857   : > { %v5503_v33 = vadd.f32 %v5375_v63, %v5086_v59  ;;  %v5504_v55 = vadd.f32 %v5376_v53, %v5087_v50 }
 0x859   : > { %v5631_v39 = vmax.f32 %v5503_v33, 0.0  ;;  %v5632_v52 = vmax.f32 %v5504_v55, 0.0 }
 0x85a   : > { %v4710_v60 = vpop.f32.mrf.mxu2  ;;  %v4799_v4 = vpop.f32.mrf.mxu3 }
 0x85b   : > { %v5717_v25 = vpack.c.bf16 %v5632_v52, %v5631_v39  ;;  %v5241_v1 = vmul.f32 %v11103_v21, %v4710_v60  ;;  %v5242_v9 = vmul.f32 %v11106_v12, %v4799_v4  ;;  %v12266_v4 = vld [vmem:[#allocation83_spill] sm:$0xff] }
 0x85d   : > { %5781 = vst [vmem:[%s11059_s26 + $0x150] sm:$0xff] %v5717_v25  ;;  %v5379_v16 = vadd.f32 %v11133_v18, %v5241_v1  ;;  %v5380_v62 = vadd.f32 %v11136_v7, %v5242_v9  ;;  %v5106_v25 = vunpack.c.l.bf16 %v12266_v4  ;;  %v5107_v9 = vunpack.c.h.bf16 %v12266_v4 }
 0x85f   : > { %v5507_v56 = vadd.f32 %v5379_v16, %v5090_v44  ;;  %v5508_v36 = vadd.f32 %v5380_v62, %v5091_v6 }
 0x861   : > { %v5635_v14 = vmax.f32 %v5507_v56, 0.0  ;;  %v5636_v24 = vmax.f32 %v5508_v36, 0.0 }
 0x862   : > { %v4712_v30 = vpop.f32.mrf.mxu2  ;;  %v4801_v49 = vpop.f32.mrf.mxu3 }
 0x863   : > { %v5719_v35 = vpack.c.bf16 %v5636_v24, %v5635_v14  ;;  %v5245_v19 = vmul.f32 %v11103_v21, %v4712_v30  ;;  %v5246_v54 = vmul.f32 %v11106_v12, %v4801_v49  ;;  %v12267_v49 = vld [vmem:[#allocation85_spill] sm:$0xff] }
 0x865   : > { %5783 = vst [vmem:[%s11059_s26 + $0x160] sm:$0xff] %v5719_v35  ;;  %v5383_v57 = vadd.f32 %v11133_v18, %v5245_v19  ;;  %v5384_v3 = vadd.f32 %v11136_v7, %v5246_v54  ;;  %v5110_v35 = vunpack.c.l.bf16 %v12267_v49  ;;  %v5111_v54 = vunpack.c.h.bf16 %v12267_v49 }
 0x867   : > { %v5511_v20 = vadd.f32 %v5383_v57, %v5094_v0  ;;  %v5512_v38 = vadd.f32 %v5384_v3, %v5095_v32 }
 0x869   : > { %v5639_v8 = vmax.f32 %v5511_v20, 0.0  ;;  %v5640_v11 = vmax.f32 %v5512_v38, 0.0 }
 0x86a   : > { %v4715_v26 = vpop.f32.mrf.mxu2  ;;  %v4804_v27 = vpop.f32.mrf.mxu3 }
 0x86b   : > { %v5721_v45 = vpack.c.bf16 %v5640_v11, %v5639_v8  ;;  %v5249_v10 = vmul.f32 %v11103_v21, %v4715_v26  ;;  %v5250_v37 = vmul.f32 %v11106_v12, %v4804_v27  ;;  %v12268_v27 = vld [vmem:[#allocation89_spill] sm:$0xff] }
 0x86d   : > { %5785 = vst [vmem:[%s11059_s26 + $0x170] sm:$0xff] %v5721_v45  ;;  %v5387_v48 = vadd.f32 %v11133_v18, %v5249_v10  ;;  %v5388_v61 = vadd.f32 %v11136_v7, %v5250_v37  ;;  %v5114_v45 = vunpack.c.l.bf16 %v12268_v27  ;;  %v5115_v37 = vunpack.c.h.bf16 %v12268_v27 }
 0x86f   : > { %v5515_v29 = vadd.f32 %v5387_v48, %v5098_v46  ;;  %v5516_v40 = vadd.f32 %v5388_v61, %v5099_v58 }
 0x871   : > { %v5643_v2 = vmax.f32 %v5515_v29, 0.0  ;;  %v5644_v23 = vmax.f32 %v5516_v40, 0.0 }
 0x872   : > { %v4717_v5 = vpop.f32.mrf.mxu2  ;;  %v4806_v34 = vpop.f32.mrf.mxu3 }
 0x873   : > { %v5723_v22 = vpack.c.bf16 %v5644_v23, %v5643_v2  ;;  %v5253_v41 = vmul.f32 %v11103_v21, %v4717_v5  ;;  %v5254_v13 = vmul.f32 %v11106_v12, %v4806_v34  ;;  %v12269_v34 = vld [vmem:[#allocation91_spill] sm:$0xff] }
 0x875   : > { %5787 = vst [vmem:[%s11059_s26 + $0x180] sm:$0xff] %v5723_v22  ;;  %v5391_v17 = vadd.f32 %v11133_v18, %v5253_v41  ;;  %v5392_v42 = vadd.f32 %v11136_v7, %v5254_v13  ;;  %v5118_v22 = vunpack.c.l.bf16 %v12269_v34  ;;  %v5119_v13 = vunpack.c.h.bf16 %v12269_v34 }
 0x877   : > { %v5519_v59 = vadd.f32 %v5391_v17, %v5102_v47  ;;  %v5520_v63 = vadd.f32 %v5392_v42, %v5103_v15 }
 0x879   : > { %v5647_v50 = vmax.f32 %v5519_v59, 0.0  ;;  %v5648_v53 = vmax.f32 %v5520_v63, 0.0 }
 0x87a   : > { %v4720_v33 = vpop.f32.mrf.mxu2  ;;  %v4809_v55 = vpop.f32.mrf.mxu3 }
 0x87b   : > { %v5725_v39 = vpack.c.bf16 %v5648_v53, %v5647_v50  ;;  %v5257_v52 = vmul.f32 %v11103_v21, %v4720_v33  ;;  %v5258_v60 = vmul.f32 %v11106_v12, %v4809_v55  ;;  %v12270_v55 = vld [vmem:[#allocation93_spill] sm:$0xff] }
 0x87d   : > { %5789 = vst [vmem:[%s11059_s26 + $0x190] sm:$0xff] %v5725_v39  ;;  %v5395_v1 = vadd.f32 %v11133_v18, %v5257_v52  ;;  %v5396_v31 = vadd.f32 %v11136_v7, %v5258_v60  ;;  %v5122_v39 = vunpack.c.l.bf16 %v12270_v55  ;;  %v5123_v60 = vunpack.c.h.bf16 %v12270_v55 }
 0x87f   : > { %v5523_v44 = vadd.f32 %v5395_v1, %v5106_v25  ;;  %v5524_v16 = vadd.f32 %v5396_v31, %v5107_v9 }
 0x881   : > { %v5651_v6 = vmax.f32 %v5523_v44, 0.0  ;;  %v5652_v62 = vmax.f32 %v5524_v16, 0.0 }
 0x882   : > { %v4722_v56 = vpop.f32.mrf.mxu2  ;;  %v4811_v36 = vpop.f32.mrf.mxu3 }
 0x883   : > { %v5727_v14 = vpack.c.bf16 %v5652_v62, %v5651_v6  ;;  %v5261_v24 = vmul.f32 %v11103_v21, %v4722_v56  ;;  %v5262_v30 = vmul.f32 %v11106_v12, %v4811_v36  ;;  %v12272_v36 = vld [vmem:[#allocation95_spill] sm:$0xff] }
 0x885   : > { %5791 = vst [vmem:[%s11059_s26 + $0x1a0] sm:$0xff] %v5727_v14  ;;  %v5399_v19 = vadd.f32 %v11133_v18, %v5261_v24  ;;  %v5400_v43 = vadd.f32 %v11136_v7, %v5262_v30  ;;  %v5126_v14 = vunpack.c.l.bf16 %v12272_v36  ;;  %v5127_v30 = vunpack.c.h.bf16 %v12272_v36 }
 0x887   : > { %v5527_v0 = vadd.f32 %v5399_v19, %v5110_v35  ;;  %v5528_v57 = vadd.f32 %v5400_v43, %v5111_v54 }
 0x889   : > { %v5655_v32 = vmax.f32 %v5527_v0, 0.0  ;;  %v5656_v3 = vmax.f32 %v5528_v57, 0.0 }
 0x88a   : > { %v4725_v20 = vpop.f32.mrf.mxu2  ;;  %v4814_v38 = vpop.f32.mrf.mxu3 }
 0x88b   : > { %v5729_v8 = vpack.c.bf16 %v5656_v3, %v5655_v32  ;;  %v5265_v11 = vmul.f32 %v11103_v21, %v4725_v20  ;;  %v5266_v26 = vmul.f32 %v11106_v12, %v4814_v38 }
 0x88d   : > { %5793 = vst [vmem:[%s11059_s26 + $0x1b0] sm:$0xff] %v5729_v8  ;;  %v5403_v10 = vadd.f32 %v11133_v18, %v5265_v11  ;;  %v5404_v28 = vadd.f32 %v11136_v7, %v5266_v26 }
 0x88f   : > { %v5531_v46 = vadd.f32 %v5403_v10, %v5114_v45  ;;  %v5532_v48 = vadd.f32 %v5404_v28, %v5115_v37 }
 0x891   : > { %v5659_v58 = vmax.f32 %v5531_v46, 0.0  ;;  %v5660_v61 = vmax.f32 %v5532_v48, 0.0 }
 0x892   : > { %v4727_v29 = vpop.f32.mrf.mxu2  ;;  %v4816_v40 = vpop.f32.mrf.mxu3 }
 0x893   : > { %v5731_v2 = vpack.c.bf16 %v5660_v61, %v5659_v58  ;;  %v5269_v23 = vmul.f32 %v11103_v21, %v4727_v29  ;;  %v5270_v5 = vmul.f32 %v11106_v12, %v4816_v40 }
 0x895   : > { %5795 = vst [vmem:[%s11059_s26 + $0x1c0] sm:$0xff] %v5731_v2  ;;  %v5407_v41 = vadd.f32 %v11133_v18, %v5269_v23  ;;  %v5408_v51 = vadd.f32 %v11136_v7, %v5270_v5 }
 0x897   : > { %v5535_v47 = vadd.f32 %v5407_v41, %v5118_v22  ;;  %v5536_v17 = vadd.f32 %v5408_v51, %v5119_v13 }
 0x899   : > { %v5663_v15 = vmax.f32 %v5535_v47, 0.0  ;;  %v5664_v42 = vmax.f32 %v5536_v17, 0.0 }
 0x89a   : > { %v4730_v59 = vpop.f32.mrf.mxu2  ;;  %v4819_v63 = vpop.f32.mrf.mxu3 }
 0x89b   : > { %v5733_v50 = vpack.c.bf16 %v5664_v42, %v5663_v15  ;;  %v5273_v53 = vmul.f32 %v11103_v21, %v4730_v59  ;;  %v5274_v33 = vmul.f32 %v11106_v12, %v4819_v63 }
 0x89d   : > { %5797 = vst [vmem:[%s11059_s26 + $0x1d0] sm:$0xff] %v5733_v50  ;;  %v5411_v52 = vadd.f32 %v11133_v18, %v5273_v53  ;;  %v5412_v4 = vadd.f32 %v11136_v7, %v5274_v33 }
 0x89f   : > { %v5539_v25 = vadd.f32 %v5411_v52, %v5122_v39  ;;  %v5540_v1 = vadd.f32 %v5412_v4, %v5123_v60 }
 0x8a1   : > { %v5667_v9 = vmax.f32 %v5539_v25, 0.0  ;;  %v5668_v31 = vmax.f32 %v5540_v1, 0.0 }
 0x8a2   : > { %v4732_v44 = vpop.f32.mrf.mxu2  ;;  %v4821_v16 = vpop.f32.mrf.mxu3 }
 0x8a3   : > { %v5735_v6 = vpack.c.bf16 %v5668_v31, %v5667_v9  ;;  %v5277_v62 = vmul.f32 %v11103_v21, %v4732_v44  ;;  %v5278_v56 = vmul.f32 %v11106_v12, %v4821_v16 }
 0x8a5   : > { %5799 = vst [vmem:[%s11059_s26 + $0x1e0] sm:$0xff] %v5735_v6  ;;  %v5415_v24 = vadd.f32 %v11133_v18, %v5277_v62  ;;  %v5416_v49 = vadd.f32 %v11136_v7, %v5278_v56 }
 0x8a7   : > { %v5543_v35 = vadd.f32 %v5415_v24, %v5126_v14  ;;  %v5544_v21 = vadd.f32 %v5416_v49, %v5127_v30 }
 0x8a9   : > { %v5671_v12 = vmax.f32 %v5543_v35, 0.0  ;;  %v5672_v19 = vmax.f32 %v5544_v21, 0.0 }
 0x8ab   : > { %v5737_v54 = vpack.c.bf16 %v5672_v19, %v5671_v12 }
 0x8ad   : > { %5801 = vst [vmem:[%s11059_s26 + $0x1f0] sm:$0xff] %v5737_v54 }
 0x8ae   : > { %7271 = shalt.err (!%p7268_p10)
}
 0x8af   : > { %s7328_s19 = smov 256   ;;  %s7329_s26 = smov 16  }
 0x8b0   : > { %7019 = dma.vmem_to_hbm [thread:$0]  (%p7505_p3), %s5817_s28, 8192, %s5819_s0, %s5804_s29, %s7328_s19, %s7328_s19, %s7329_s26  }
 0x8b1 PF: > { %s12273_s24 = sld [smem:[#allocation15_spill]]  ;;  %p12275_p12 = scmp.ge.s32.totalorder %s7318_s27, 2 }
 0x8b3   : > { %p7036_p13 = pnand %p12275_p12, %p7455_p6 }
 0x8b5   : > { %p7037_p0 = pneg %p7036_p13 }
 0x8b7   : > { %s5833_s2 = sand.u32 1, %s12273_s24  }
 0x8b8   : > { %s5834_s23 = scalar_lea.sflag [#allocation4], %s5833_s2 }
 0x8b9   : > { %7301 = dma.done.wait (%p7037_p0), %s5834_s23, 8192  }
 0x8ba   : > { %7303 = vsyncadd (%p7037_p0), %s5834_s23, 4294959104  ;;  %s12276_s27 = sld [smem:[#allocation18_spill]]  ;;  %s12279_s24 = smov %s7310_s25 }
 0x8bb   : > { %s12277_s1 = sld [smem:[#allocation16_spill]] }
 0x8bc   : > { %s12278_s26 = sld [smem:[#allocation19_spill]] }
 0x8c0   : > { %p32_p5 = scmp.ge.s32.totalorder %s12276_s27, 4  }
 0x8c1   : > { %s12280_s25 = smov %s12277_s1 }
 0x8c2   :  { %34 = sbr.rel (!%p32_p5) target bundleno = 16 (0x10), region = 147 }
 0x8c7   :  { %5840 = vsyncpa [#allocation3], 1 }
 0x8c8   :  { %5842 = vsyncpa [#allocation3 + $0x1], 1 }
 0x8c9   :  { %5843 = vsyncpa [#allocation6], 1 }
 0x8ca   :  { %5844 = vsyncpa [#allocation9], 1 }
 0x8cb   :  { %5845 = vsyncpa [#allocation4], 1 }
 0x8cc   :  { %5847 = vsyncpa [#allocation4 + $0x1], 1 }

</bundles_post_ra>
